<compile_context>
chip_gen: v6e
topology: v6e:2x2x1
jax: 0.10.0
libtpu: 0.0.40
codegen_flags: <defaults>
</compile_context>

<pallas_src>
import functools

import numpy as np
import jax
import jax.numpy as jnp
from jax import lax
from jax.experimental import pallas as pl
from jax.experimental.pallas import tpu as pltpu

LN_EPS = 1e-6
KS = 7          # depthwise kernel size
PAD = KS // 2   # 3 -> "same" padding


def _round_up(x, m):
    return (x + m - 1) // m * m


def _convnext_kernel(x_hbm, dww_ref, dwb_ref, lng_ref, lnb_ref,
                     w1_ref, b1_ref, w2_ref, b2_ref, gamma_ref,
                     out_ref, xbuf, copy_sem,
                     *, c_real, gelu_tanh_approx):
    # x_hbm   : (N, R*TH + 6, Wp, Cp) padded NHWC image in HBM (manual DMA)
    # dww_ref : (7, 7, Cp)   depthwise conv weight
    # dwb/lng/lnb/b2/gamma : (1, Cp) ; b1 : (1, Fp)
    # w1 : (Cp, Fp) bf16 ; w2 : (Fp, Cp) bf16
    # out_ref : (1, TH, W, Cp)
    # xbuf    : (2, TH+6, Wp, Cp) VMEM double buffer ; copy_sem : DMA sems (2,)
    _, TH, W, Cp = out_ref.shape
    _, rows, Wp, _ = xbuf.shape          # rows = TH + 2*PAD

    n = pl.program_id(0)
    r = pl.program_id(1)
    num_r = pl.num_programs(1)
    slot = r & 1

    def win_copy(row_block, buf_slot):
        return pltpu.make_async_copy(
            x_hbm.at[n, pl.ds(row_block * TH, rows)],
            xbuf.at[buf_slot],
            copy_sem.at[buf_slot])

    # Prime the pipeline on the first row tile of this image.
    @pl.when(r == 0)
    def _():
        win_copy(0, slot).start()

    # Prefetch the next row tile (same image) into the other slot.
    @pl.when(r + 1 < num_r)
    def _():
        win_copy(r + 1, 1 - slot).start()

    # Wait for the current window.
    win_copy(r, slot).wait()

    # ---- depthwise 7x7 conv ----
    # Flatten (rows, Wp) onto the sublane axis (Wp is a multiple of 8, so the
    # reshape is layout-preserving).  Each kw tap is one XLU roll of the whole
    # window, reused by all 7 kh taps through aligned row-block slices.
    x = xbuf[slot]                                   # (rows, Wp, Cp) f32
    yf = x.reshape(rows * Wp, Cp)
    n_sub = rows * Wp

    acc = jnp.zeros((TH * Wp, Cp), jnp.float32)
    res_flat = None
    for kw in range(KS):
        z = yf if kw == 0 else pltpu.roll(yf, n_sub - kw, axis=0)  # z[i]=yf[i+kw]
        if kw == PAD:
            # original (un-padded) pixels for the residual path
            res_flat = z[PAD * Wp:PAD * Wp + TH * Wp]
        for kh in range(KS):
            acc = acc + z[kh * Wp:kh * Wp + TH * Wp] * dww_ref[kh, kw]
    acc = acc + dwb_ref[0]

    # Trim the padded W columns once, so LN / MXU / GELU only see real pixels.
    acc = acc.reshape(TH, Wp, Cp)[:, :W, :]                  # (TH, W, Cp)
    residual = res_flat.reshape(TH, Wp, Cp)[:, :W, :]        # (TH, W, Cp)

    # ---- LayerNorm over channels (biased variance, two-pass form) ----
    # Padded channels of `acc` are exactly zero; they add (Cp-C)*mean^2 to
    # sum(diff^2), which we subtract in closed form.
    inv_c = jnp.float32(1.0 / c_real)
    mean = jnp.sum(acc, axis=-1, keepdims=True) * inv_c
    diff = acc - mean
    var = (jnp.sum(diff * diff, axis=-1, keepdims=True)
           - jnp.float32(Cp - c_real) * mean * mean) * inv_c
    var = jnp.maximum(var, 0.0)
    normed = diff * lax.rsqrt(var + LN_EPS) * lng_ref[0] + lnb_ref[0]

    # ---- pointwise MLP on the MXU: bf16 operands, f32 accumulation ----
    flat = normed.reshape(TH * W, Cp).astype(jnp.bfloat16)
    h = jnp.dot(flat, w1_ref[...], preferred_element_type=jnp.float32) + b1_ref[0]
    if gelu_tanh_approx:
        # tanh runs on the EUP slot (nearly free); slight deviation from erf.
        h = 0.5 * h * (1.0 + jnp.tanh(np.float32(0.7978845608028654)
                                      * (h + np.float32(0.044715) * h * h * h)))
    else:
        # exact (erf) GELU -> matches torch.nn.GELU() default
        h = 0.5 * h * (1.0 + lax.erf(h * np.float32(0.7071067811865476)))
    y = jnp.dot(h.astype(jnp.bfloat16), w2_ref[...],
                preferred_element_type=jnp.float32) + b2_ref[0]

    # ---- layer scale + residual ----
    y = y * gamma_ref[0]
    y = y.reshape(TH, W, Cp) + residual
    out_ref[0] = y.astype(out_ref.dtype)


@functools.partial(jax.jit, static_argnames=("row_tile", "gelu_tanh_approx"))
def convnext_block(x_nchw, dw_weight, dw_bias, ln_weight, ln_bias,
                   pw1_weight, pw1_bias, pw2_weight, pw2_bias, gamma,
                   *, row_tile=16, gelu_tanh_approx=False):
    """Fused ConvNeXt block.  Parameters use PyTorch layouts:
       dw_weight (C,1,7,7), pw1_weight (4C,C), pw2_weight (C,4C).
       x_nchw: (N,C,H,W) float32 -> (N,C,H,W) float32."""
    N, C, H, W = x_nchw.shape
    F = 4 * C
    Cp = _round_up(C, 128)          # lane-dense channel dim
    Fp = _round_up(F, 128)          # lane-dense hidden dim

    # Row tiling with a 3-row halo.  Ragged last tile is handled by padding H
    # up to R*TH with zero rows (sliced off at the end) — no divisor search.
    TH = max(1, min(row_tile, H))
    R = (H + TH - 1) // TH
    Hp = R * TH
    Wp = _round_up(W + 2 * PAD, 8)  # left pad 3, right pad >= 3 up to 8-mult

    # NCHW -> NHWC, channel pad, spatial zero pad.  This padded image is the
    # ONLY per-pixel input; the kernel DMAs halo windows out of it directly.
    # TODO(synk): if the surrounding model can run NHWC end-to-end, drop this
    # transpose/pad pass and the epilogue transpose.
    x_nhwc = jnp.transpose(x_nchw, (0, 2, 3, 1))
    x_pad = jnp.pad(x_nhwc,
                    ((0, 0),
                     (PAD, PAD + (Hp - H)),
                     (PAD, Wp - W - PAD),
                     (0, Cp - C)))                 # (N, Hp+6, Wp, Cp)

    # Parameter repack / pad / cast (padded entries are zero -> they contribute
    # nothing, and padded output channels come out exactly zero).
    dww = jnp.pad(jnp.transpose(dw_weight[:, 0], (1, 2, 0)),
                  ((0, 0), (0, 0), (0, Cp - C)))                     # (7,7,Cp)
    pad_c = lambda v: jnp.pad(v, (0, Cp - C)).reshape(1, Cp)
    dwb = pad_c(dw_bias)
    lng = pad_c(ln_weight)
    lnb = pad_c(ln_bias)
    b2 = pad_c(pw2_bias)
    gam = pad_c(gamma)
    w1 = jnp.pad(pw1_weight.T, ((0, Cp - C), (0, Fp - F))).astype(jnp.bfloat16)
    b1 = jnp.pad(pw1_bias, (0, Fp - F)).reshape(1, Fp)
    w2 = jnp.pad(pw2_weight.T, ((0, Fp - F), (0, Cp - C))).astype(jnp.bfloat16)

    kernel = functools.partial(_convnext_kernel, c_real=C,
                               gelu_tanh_approx=gelu_tanh_approx)

    out = pl.pallas_call(
        kernel,
        out_shape=jax.ShapeDtypeStruct((N, Hp, W, Cp), x_nchw.dtype),
        grid_spec=pltpu.PrefetchScalarGridSpec(
            num_scalar_prefetch=0,
            grid=(N, R),
            in_specs=[
                pl.BlockSpec(memory_space=pl.ANY),                    # padded image (manual DMA)
                pl.BlockSpec((KS, KS, Cp), lambda n, r: (0, 0, 0)),   # dw weight
                pl.BlockSpec((1, Cp), lambda n, r: (0, 0)),           # dw bias
                pl.BlockSpec((1, Cp), lambda n, r: (0, 0)),           # ln gamma
                pl.BlockSpec((1, Cp), lambda n, r: (0, 0)),           # ln beta
                pl.BlockSpec((Cp, Fp), lambda n, r: (0, 0)),          # w1 (bf16)
                pl.BlockSpec((1, Fp), lambda n, r: (0, 0)),           # b1
                pl.BlockSpec((Fp, Cp), lambda n, r: (0, 0)),          # w2 (bf16)
                pl.BlockSpec((1, Cp), lambda n, r: (0, 0)),           # b2
                pl.BlockSpec((1, Cp), lambda n, r: (0, 0)),           # layer scale
            ],
            out_specs=pl.BlockSpec((1, TH, W, Cp), lambda n, r: (n, r, 0, 0)),
            scratch_shapes=[
                pltpu.VMEM((2, TH + 2 * PAD, Wp, Cp), jnp.float32),   # halo double buffer
                pltpu.SemaphoreType.DMA((2,)),
            ],
        ),
        compiler_params=pltpu.CompilerParams(
            # Row axis must stay sequential so the r==0 priming of the manual
            # double buffer is valid on every core; batch axis feeds megacore.
            dimension_semantics=("parallel", "arbitrary"),
            vmem_limit_bytes=48 * 1024 * 1024),
    )(x_pad, dww, dwb, lng, lnb, w1, b1, w2, b2, gam)

    # drop row/channel padding, back to NCHW
    return jnp.transpose(out[:, :H, :, :C], (0, 3, 1, 2))


def reference_block(x, dw_w, dw_b, ln_g, ln_b, w1, b1, w2, b2, gamma):
    """Pure-JAX (f32) reference of the PyTorch Block.forward (drop_path=Identity).
       Weights in PyTorch layouts: dw_w (C,1,7,7), w1 (4C,C), w2 (C,4C)."""
    N, C, H, W = x.shape
    y = jax.lax.conv_general_dilated(
        x, dw_w, window_strides=(1, 1), padding=[(PAD, PAD), (PAD, PAD)],
        dimension_numbers=("NCHW", "OIHW", "NCHW"), feature_group_count=C)
    y = y + dw_b.reshape(1, C, 1, 1)
    y = jnp.transpose(y, (0, 2, 3, 1))
    mean = y.mean(-1, keepdims=True)
    var = ((y - mean) ** 2).mean(-1, keepdims=True)
    y = (y - mean) / jnp.sqrt(var + LN_EPS) * ln_g + ln_b
    y = y @ w1.T + b1
    y = 0.5 * y * (1.0 + jax.lax.erf(y / np.sqrt(2.0)))
    y = y @ w2.T + b2
    y = gamma * y
    y = jnp.transpose(y, (0, 3, 1, 2))
    return y + x                                   # drop_path = identity


if __name__ == "__main__":
    # Small, module-consistent shapes: dim=8, 4*dim hidden, 16x16 spatial.
    N, C, H, W = 2, 8, 16, 16
    hidden = 4 * C

    key = jax.random.PRNGKey(0)
    ks = jax.random.split(key, 10)

    x = jax.random.normal(ks[0], (N, C, H, W), jnp.float32)
    dw_w = 0.1 * jax.random.normal(ks[1], (C, 1, KS, KS), jnp.float32)  # Conv2d groups=dim
    dw_b = 0.1 * jax.random.normal(ks[2], (C,), jnp.float32)
    ln_g = 1.0 + 0.1 * jax.random.normal(ks[3], (C,), jnp.float32)
    ln_b = 0.1 * jax.random.normal(ks[4], (C,), jnp.float32)
    w1 = 0.1 * jax.random.normal(ks[5], (hidden, C), jnp.float32)       # Linear(dim, 4*dim)
    b1 = 0.1 * jax.random.normal(ks[6], (hidden,), jnp.float32)
    w2 = 0.1 * jax.random.normal(ks[7], (C, hidden), jnp.float32)       # Linear(4*dim, dim)
    b2 = 0.1 * jax.random.normal(ks[8], (C,), jnp.float32)
    # gamma is a trainable parameter (init 1e-6); use O(1) values so the
    # computed branch actually contributes to the numerical check.
    gamma = 0.5 + 0.1 * jax.random.normal(ks[9], (C,), jnp.float32)

    ref = reference_block(x, dw_w, dw_b, ln_g, ln_b, w1, b1, w2, b2, gamma)

    # (1) row_tile=8 -> R=2: exercises the manual double-buffer prefetch path.
    out = convnext_block(x, dw_w, dw_b, ln_g, ln_b, w1, b1, w2, b2, gamma,
                         row_tile=8)
    out = jax.block_until_ready(out)
    np.testing.assert_allclose(np.asarray(out), np.asarray(ref),
                               rtol=2e-2, atol=2e-2)

    # (2) row_tile=6 -> ragged last tile (H=16 padded to 18 rows, sliced off).
    out2 = convnext_block(x, dw_w, dw_b, ln_g, ln_b, w1, b1, w2, b2, gamma,
                          row_tile=6)
    out2 = jax.block_until_ready(out2)
    np.testing.assert_allclose(np.asarray(out2), np.asarray(ref),
                               rtol=2e-2, atol=2e-2)

    print("KERNEL_OK")
</pallas_src>

<mosaic_0001>
module attributes {stable_mosaic.version = 11 : i64} {
  func.func @_convnext_kernel(%arg0: i32, %arg1: i32, %arg2: memref<2x22x24x128xf32, #tpu.memory_space<any>>, %arg3: memref<7x7x128xf32, #tpu.memory_space<vmem>>, %arg4: memref<1x128xf32, #tpu.memory_space<vmem>>, %arg5: memref<1x128xf32, #tpu.memory_space<vmem>>, %arg6: memref<1x128xf32, #tpu.memory_space<vmem>>, %arg7: memref<128x128xbf16, #tpu.memory_space<vmem>>, %arg8: memref<1x128xf32, #tpu.memory_space<vmem>>, %arg9: memref<128x128xbf16, #tpu.memory_space<vmem>>, %arg10: memref<1x128xf32, #tpu.memory_space<vmem>>, %arg11: memref<1x128xf32, #tpu.memory_space<vmem>>, %arg12: memref<1x8x16x128xf32, #tpu.memory_space<vmem>>, %arg13: memref<2x14x24x128xf32, #tpu.memory_space<vmem>>, %arg14: memref<2x!tpu.dma_semaphore, #tpu.memory_space<semaphore_mem>>) attributes {dimension_semantics = [#tpu.dimension_semantics<parallel>, #tpu.dimension_semantics<arbitrary>], iteration_bounds = array<i64: 2, 2>, scalar_prefetch = 0 : i64, scratch_operands = 2 : i64, tpu.core_type = #tpu.core_type<tc>, window_params = [{}, {pipeline_mode = #tpu.pipeline_mode<synchronous>, transform_indices = @transform_1, window_bounds = array<i64: 7, 7, 128>}, {pipeline_mode = #tpu.pipeline_mode<synchronous>, transform_indices = @transform_2, window_bounds = array<i64: 1, 128>}, {pipeline_mode = #tpu.pipeline_mode<synchronous>, transform_indices = @transform_3, window_bounds = array<i64: 1, 128>}, {pipeline_mode = #tpu.pipeline_mode<synchronous>, transform_indices = @transform_4, window_bounds = array<i64: 1, 128>}, {pipeline_mode = #tpu.pipeline_mode<synchronous>, transform_indices = @transform_5, window_bounds = array<i64: 128, 128>}, {pipeline_mode = #tpu.pipeline_mode<synchronous>, transform_indices = @transform_6, window_bounds = array<i64: 1, 128>}, {pipeline_mode = #tpu.pipeline_mode<synchronous>, transform_indices = @transform_7, window_bounds = array<i64: 128, 128>}, {pipeline_mode = #tpu.pipeline_mode<synchronous>, transform_indices = @transform_8, window_bounds = array<i64: 1, 128>}, {pipeline_mode = #tpu.pipeline_mode<synchronous>, transform_indices = @transform_9, window_bounds = array<i64: 1, 128>}, {transform_indices = @transform_10, window_bounds = array<i64: 1, 8, 16, 128>}]} {
    %c1_i32 = arith.constant 1 : i32
    %0 = arith.andi %arg1, %c1_i32 : i32
    %c0_i32 = arith.constant 0 : i32
    %1 = arith.cmpi eq, %arg1, %c0_i32 : i32
    %2 = arith.extui %1 : i1 to i32
    %c0_i32_0 = arith.constant 0 : i32
    %3 = arith.cmpi ne, %2, %c0_i32_0 : i32
    scf.if %3 {
      %c0_i32_183 = arith.constant 0 : i32
      %c0_i32_184 = arith.constant 0 : i32
      %c0_i32_185 = arith.constant 0 : i32
      %446 = tpu.memref_slice %arg2[%arg0, %c0_i32_183, %c0_i32_184, %c0_i32_185] : memref<2x22x24x128xf32, #tpu.memory_space<any>> -> memref<1x14x24x128xf32, #tpu.memory_space<any>>
      %447 = tpu.memref_squeeze %446 : memref<1x14x24x128xf32, #tpu.memory_space<any>> -> memref<14x24x128xf32, #tpu.memory_space<any>>
      %c0_i32_186 = arith.constant 0 : i32
      %c0_i32_187 = arith.constant 0 : i32
      %c0_i32_188 = arith.constant 0 : i32
      %448 = tpu.memref_slice %arg13[%0, %c0_i32_186, %c0_i32_187, %c0_i32_188] : memref<2x14x24x128xf32, #tpu.memory_space<vmem>> -> memref<1x14x24x128xf32, #tpu.memory_space<vmem>>
      %449 = tpu.memref_squeeze %448 : memref<1x14x24x128xf32, #tpu.memory_space<vmem>> -> memref<14x24x128xf32, #tpu.memory_space<vmem>>
      %450 = tpu.memref_slice %arg14[%0] : memref<2x!tpu.dma_semaphore, #tpu.memory_space<semaphore_mem>> -> memref<1x!tpu.dma_semaphore, #tpu.memory_space<semaphore_mem>>
      %451 = tpu.memref_squeeze %450 : memref<1x!tpu.dma_semaphore, #tpu.memory_space<semaphore_mem>> -> memref<!tpu.dma_semaphore, #tpu.memory_space<semaphore_mem>>
      tpu.enqueue_dma source(%447 : memref<14x24x128xf32, #tpu.memory_space<any>>) target(%449 : memref<14x24x128xf32, #tpu.memory_space<vmem>>) target_semaphore(%451 : memref<!tpu.dma_semaphore, #tpu.memory_space<semaphore_mem>>)
    } else {
    }
    %c1_i32_1 = arith.constant 1 : i32
    %4 = arith.addi %arg1, %c1_i32_1 : i32
    %c2_i32 = arith.constant 2 : i32
    %5 = arith.cmpi slt, %4, %c2_i32 : i32
    %6 = arith.extui %5 : i1 to i32
    %c0_i32_2 = arith.constant 0 : i32
    %7 = arith.cmpi ne, %6, %c0_i32_2 : i32
    scf.if %7 {
      %c1_i32_183 = arith.constant 1 : i32
      %446 = arith.addi %arg1, %c1_i32_183 : i32
      %c1_i32_184 = arith.constant 1 : i32
      %447 = arith.subi %c1_i32_184, %0 : i32
      %c8_i32_185 = arith.constant 8 : i32
      %448 = arith.muli %446, %c8_i32_185 : i32
      %c0_i32_186 = arith.constant 0 : i32
      %c0_i32_187 = arith.constant 0 : i32
      %449 = tpu.memref_slice %arg2[%arg0, %448, %c0_i32_186, %c0_i32_187] : memref<2x22x24x128xf32, #tpu.memory_space<any>> -> memref<1x14x24x128xf32, #tpu.memory_space<any>>
      %450 = tpu.memref_squeeze %449 : memref<1x14x24x128xf32, #tpu.memory_space<any>> -> memref<14x24x128xf32, #tpu.memory_space<any>>
      %c0_i32_188 = arith.constant 0 : i32
      %c0_i32_189 = arith.constant 0 : i32
      %c0_i32_190 = arith.constant 0 : i32
      %451 = tpu.memref_slice %arg13[%447, %c0_i32_188, %c0_i32_189, %c0_i32_190] : memref<2x14x24x128xf32, #tpu.memory_space<vmem>> -> memref<1x14x24x128xf32, #tpu.memory_space<vmem>>
      %452 = tpu.memref_squeeze %451 : memref<1x14x24x128xf32, #tpu.memory_space<vmem>> -> memref<14x24x128xf32, #tpu.memory_space<vmem>>
      %453 = tpu.memref_slice %arg14[%447] : memref<2x!tpu.dma_semaphore, #tpu.memory_space<semaphore_mem>> -> memref<1x!tpu.dma_semaphore, #tpu.memory_space<semaphore_mem>>
      %454 = tpu.memref_squeeze %453 : memref<1x!tpu.dma_semaphore, #tpu.memory_space<semaphore_mem>> -> memref<!tpu.dma_semaphore, #tpu.memory_space<semaphore_mem>>
      tpu.enqueue_dma source(%450 : memref<14x24x128xf32, #tpu.memory_space<any>>) target(%452 : memref<14x24x128xf32, #tpu.memory_space<vmem>>) target_semaphore(%454 : memref<!tpu.dma_semaphore, #tpu.memory_space<semaphore_mem>>)
    } else {
    }
    %c8_i32 = arith.constant 8 : i32
    %8 = arith.muli %arg1, %c8_i32 : i32
    %c0_i32_3 = arith.constant 0 : i32
    %c0_i32_4 = arith.constant 0 : i32
    %9 = tpu.memref_slice %arg2[%arg0, %8, %c0_i32_3, %c0_i32_4] : memref<2x22x24x128xf32, #tpu.memory_space<any>> -> memref<1x14x24x128xf32, #tpu.memory_space<any>>
    %10 = tpu.memref_squeeze %9 : memref<1x14x24x128xf32, #tpu.memory_space<any>> -> memref<14x24x128xf32, #tpu.memory_space<any>>
    %c0_i32_5 = arith.constant 0 : i32
    %c0_i32_6 = arith.constant 0 : i32
    %c0_i32_7 = arith.constant 0 : i32
    %11 = tpu.memref_slice %arg13[%0, %c0_i32_5, %c0_i32_6, %c0_i32_7] : memref<2x14x24x128xf32, #tpu.memory_space<vmem>> -> memref<1x14x24x128xf32, #tpu.memory_space<vmem>>
    %12 = tpu.memref_squeeze %11 : memref<1x14x24x128xf32, #tpu.memory_space<vmem>> -> memref<14x24x128xf32, #tpu.memory_space<vmem>>
    %13 = tpu.memref_slice %arg14[%0] : memref<2x!tpu.dma_semaphore, #tpu.memory_space<semaphore_mem>> -> memref<1x!tpu.dma_semaphore, #tpu.memory_space<semaphore_mem>>
    %14 = tpu.memref_squeeze %13 : memref<1x!tpu.dma_semaphore, #tpu.memory_space<semaphore_mem>> -> memref<!tpu.dma_semaphore, #tpu.memory_space<semaphore_mem>>
    tpu.wait_dma2 semaphore(%14 : memref<!tpu.dma_semaphore, #tpu.memory_space<semaphore_mem>>) src(%10 : memref<14x24x128xf32, #tpu.memory_space<any>>) dst(%12 : memref<14x24x128xf32, #tpu.memory_space<vmem>>)
    %15 = arith.index_cast %0 : i32 to index
    %c0 = arith.constant 0 : index
    %c0_8 = arith.constant 0 : index
    %c0_9 = arith.constant 0 : index
    %16 = vector.load %arg13[%15, %c0, %c0_8, %c0_9] : memref<2x14x24x128xf32, #tpu.memory_space<vmem>>, vector<1x14x24x128xf32>
    %17 = vector.shape_cast %16 : vector<1x14x24x128xf32> to vector<14x24x128xf32>
    %18 = vector.shape_cast %17 : vector<14x24x128xf32> to vector<336x128xf32>
    %cst = arith.constant 0.000000e+00 : f32
    %19 = vector.broadcast %cst : f32 to vector<192x128xf32>
    %20 = vector.extract_strided_slice %18 {offsets = [0, 0], sizes = [192, 128], strides = [1, 1]} : vector<336x128xf32> to vector<192x128xf32>
    %c0_10 = arith.constant 0 : index
    %c0_11 = arith.constant 0 : index
    %c0_12 = arith.constant 0 : index
    %21 = vector.load %arg3[%c0_10, %c0_11, %c0_12] : memref<7x7x128xf32, #tpu.memory_space<vmem>>, vector<1x1x128xf32>
    %22 = vector.shape_cast %21 : vector<1x1x128xf32> to vector<128xf32>
    %23 = vector.shape_cast %22 : vector<128xf32> to vector<1x128xf32>
    %24 = vector.broadcast %23 : vector<1x128xf32> to vector<192x128xf32>
    %25 = arith.mulf %20, %24 : vector<192x128xf32>
    %26 = arith.addf %19, %25 : vector<192x128xf32>
    %27 = vector.extract_strided_slice %18 {offsets = [24, 0], sizes = [192, 128], strides = [1, 1]} : vector<336x128xf32> to vector<192x128xf32>
    %c1 = arith.constant 1 : index
    %c0_13 = arith.constant 0 : index
    %c0_14 = arith.constant 0 : index
    %28 = vector.load %arg3[%c1, %c0_13, %c0_14] : memref<7x7x128xf32, #tpu.memory_space<vmem>>, vector<1x1x128xf32>
    %29 = vector.shape_cast %28 : vector<1x1x128xf32> to vector<128xf32>
    %30 = vector.shape_cast %29 : vector<128xf32> to vector<1x128xf32>
    %31 = vector.broadcast %30 : vector<1x128xf32> to vector<192x128xf32>
    %32 = arith.mulf %27, %31 : vector<192x128xf32>
    %33 = arith.addf %26, %32 : vector<192x128xf32>
    %34 = vector.extract_strided_slice %18 {offsets = [48, 0], sizes = [192, 128], strides = [1, 1]} : vector<336x128xf32> to vector<192x128xf32>
    %c2 = arith.constant 2 : index
    %c0_15 = arith.constant 0 : index
    %c0_16 = arith.constant 0 : index
    %35 = vector.load %arg3[%c2, %c0_15, %c0_16] : memref<7x7x128xf32, #tpu.memory_space<vmem>>, vector<1x1x128xf32>
    %36 = vector.shape_cast %35 : vector<1x1x128xf32> to vector<128xf32>
    %37 = vector.shape_cast %36 : vector<128xf32> to vector<1x128xf32>
    %38 = vector.broadcast %37 : vector<1x128xf32> to vector<192x128xf32>
    %39 = arith.mulf %34, %38 : vector<192x128xf32>
    %40 = arith.addf %33, %39 : vector<192x128xf32>
    %41 = vector.extract_strided_slice %18 {offsets = [72, 0], sizes = [192, 128], strides = [1, 1]} : vector<336x128xf32> to vector<192x128xf32>
    %c3 = arith.constant 3 : index
    %c0_17 = arith.constant 0 : index
    %c0_18 = arith.constant 0 : index
    %42 = vector.load %arg3[%c3, %c0_17, %c0_18] : memref<7x7x128xf32, #tpu.memory_space<vmem>>, vector<1x1x128xf32>
    %43 = vector.shape_cast %42 : vector<1x1x128xf32> to vector<128xf32>
    %44 = vector.shape_cast %43 : vector<128xf32> to vector<1x128xf32>
    %45 = vector.broadcast %44 : vector<1x128xf32> to vector<192x128xf32>
    %46 = arith.mulf %41, %45 : vector<192x128xf32>
    %47 = arith.addf %40, %46 : vector<192x128xf32>
    %48 = vector.extract_strided_slice %18 {offsets = [96, 0], sizes = [192, 128], strides = [1, 1]} : vector<336x128xf32> to vector<192x128xf32>
    %c4 = arith.constant 4 : index
    %c0_19 = arith.constant 0 : index
    %c0_20 = arith.constant 0 : index
    %49 = vector.load %arg3[%c4, %c0_19, %c0_20] : memref<7x7x128xf32, #tpu.memory_space<vmem>>, vector<1x1x128xf32>
    %50 = vector.shape_cast %49 : vector<1x1x128xf32> to vector<128xf32>
    %51 = vector.shape_cast %50 : vector<128xf32> to vector<1x128xf32>
    %52 = vector.broadcast %51 : vector<1x128xf32> to vector<192x128xf32>
    %53 = arith.mulf %48, %52 : vector<192x128xf32>
    %54 = arith.addf %47, %53 : vector<192x128xf32>
    %55 = vector.extract_strided_slice %18 {offsets = [120, 0], sizes = [192, 128], strides = [1, 1]} : vector<336x128xf32> to vector<192x128xf32>
    %c5 = arith.constant 5 : index
    %c0_21 = arith.constant 0 : index
    %c0_22 = arith.constant 0 : index
    %56 = vector.load %arg3[%c5, %c0_21, %c0_22] : memref<7x7x128xf32, #tpu.memory_space<vmem>>, vector<1x1x128xf32>
    %57 = vector.shape_cast %56 : vector<1x1x128xf32> to vector<128xf32>
    %58 = vector.shape_cast %57 : vector<128xf32> to vector<1x128xf32>
    %59 = vector.broadcast %58 : vector<1x128xf32> to vector<192x128xf32>
    %60 = arith.mulf %55, %59 : vector<192x128xf32>
    %61 = arith.addf %54, %60 : vector<192x128xf32>
    %62 = vector.extract_strided_slice %18 {offsets = [144, 0], sizes = [192, 128], strides = [1, 1]} : vector<336x128xf32> to vector<192x128xf32>
    %c6 = arith.constant 6 : index
    %c0_23 = arith.constant 0 : index
    %c0_24 = arith.constant 0 : index
    %63 = vector.load %arg3[%c6, %c0_23, %c0_24] : memref<7x7x128xf32, #tpu.memory_space<vmem>>, vector<1x1x128xf32>
    %64 = vector.shape_cast %63 : vector<1x1x128xf32> to vector<128xf32>
    %65 = vector.shape_cast %64 : vector<128xf32> to vector<1x128xf32>
    %66 = vector.broadcast %65 : vector<1x128xf32> to vector<192x128xf32>
    %67 = arith.mulf %62, %66 : vector<192x128xf32>
    %68 = arith.addf %61, %67 : vector<192x128xf32>
    %c335_i32 = arith.constant 335 : i32
    %69 = tpu.dynamic_rotate %18 by %c335_i32 dim 0 : vector<336x128xf32>, i32 -> vector<336x128xf32>
    %70 = vector.extract_strided_slice %69 {offsets = [0, 0], sizes = [192, 128], strides = [1, 1]} : vector<336x128xf32> to vector<192x128xf32>
    %c0_25 = arith.constant 0 : index
    %c1_26 = arith.constant 1 : index
    %c0_27 = arith.constant 0 : index
    %71 = vector.load %arg3[%c0_25, %c1_26, %c0_27] : memref<7x7x128xf32, #tpu.memory_space<vmem>>, vector<1x1x128xf32>
    %72 = vector.shape_cast %71 : vector<1x1x128xf32> to vector<128xf32>
    %73 = vector.shape_cast %72 : vector<128xf32> to vector<1x128xf32>
    %74 = vector.broadcast %73 : vector<1x128xf32> to vector<192x128xf32>
    %75 = arith.mulf %70, %74 : vector<192x128xf32>
    %76 = arith.addf %68, %75 : vector<192x128xf32>
    %77 = vector.extract_strided_slice %69 {offsets = [24, 0], sizes = [192, 128], strides = [1, 1]} : vector<336x128xf32> to vector<192x128xf32>
    %c1_28 = arith.constant 1 : index
    %c1_29 = arith.constant 1 : index
    %c0_30 = arith.constant 0 : index
    %78 = vector.load %arg3[%c1_28, %c1_29, %c0_30] : memref<7x7x128xf32, #tpu.memory_space<vmem>>, vector<1x1x128xf32>
    %79 = vector.shape_cast %78 : vector<1x1x128xf32> to vector<128xf32>
    %80 = vector.shape_cast %79 : vector<128xf32> to vector<1x128xf32>
    %81 = vector.broadcast %80 : vector<1x128xf32> to vector<192x128xf32>
    %82 = arith.mulf %77, %81 : vector<192x128xf32>
    %83 = arith.addf %76, %82 : vector<192x128xf32>
    %84 = vector.extract_strided_slice %69 {offsets = [48, 0], sizes = [192, 128], strides = [1, 1]} : vector<336x128xf32> to vector<192x128xf32>
    %c2_31 = arith.constant 2 : index
    %c1_32 = arith.constant 1 : index
    %c0_33 = arith.constant 0 : index
    %85 = vector.load %arg3[%c2_31, %c1_32, %c0_33] : memref<7x7x128xf32, #tpu.memory_space<vmem>>, vector<1x1x128xf32>
    %86 = vector.shape_cast %85 : vector<1x1x128xf32> to vector<128xf32>
    %87 = vector.shape_cast %86 : vector<128xf32> to vector<1x128xf32>
    %88 = vector.broadcast %87 : vector<1x128xf32> to vector<192x128xf32>
    %89 = arith.mulf %84, %88 : vector<192x128xf32>
    %90 = arith.addf %83, %89 : vector<192x128xf32>
    %91 = vector.extract_strided_slice %69 {offsets = [72, 0], sizes = [192, 128], strides = [1, 1]} : vector<336x128xf32> to vector<192x128xf32>
    %c3_34 = arith.constant 3 : index
    %c1_35 = arith.constant 1 : index
    %c0_36 = arith.constant 0 : index
    %92 = vector.load %arg3[%c3_34, %c1_35, %c0_36] : memref<7x7x128xf32, #tpu.memory_space<vmem>>, vector<1x1x128xf32>
    %93 = vector.shape_cast %92 : vector<1x1x128xf32> to vector<128xf32>
    %94 = vector.shape_cast %93 : vector<128xf32> to vector<1x128xf32>
    %95 = vector.broadcast %94 : vector<1x128xf32> to vector<192x128xf32>
    %96 = arith.mulf %91, %95 : vector<192x128xf32>
    %97 = arith.addf %90, %96 : vector<192x128xf32>
    %98 = vector.extract_strided_slice %69 {offsets = [96, 0], sizes = [192, 128], strides = [1, 1]} : vector<336x128xf32> to vector<192x128xf32>
    %c4_37 = arith.constant 4 : index
    %c1_38 = arith.constant 1 : index
    %c0_39 = arith.constant 0 : index
    %99 = vector.load %arg3[%c4_37, %c1_38, %c0_39] : memref<7x7x128xf32, #tpu.memory_space<vmem>>, vector<1x1x128xf32>
    %100 = vector.shape_cast %99 : vector<1x1x128xf32> to vector<128xf32>
    %101 = vector.shape_cast %100 : vector<128xf32> to vector<1x128xf32>
    %102 = vector.broadcast %101 : vector<1x128xf32> to vector<192x128xf32>
    %103 = arith.mulf %98, %102 : vector<192x128xf32>
    %104 = arith.addf %97, %103 : vector<192x128xf32>
    %105 = vector.extract_strided_slice %69 {offsets = [120, 0], sizes = [192, 128], strides = [1, 1]} : vector<336x128xf32> to vector<192x128xf32>
    %c5_40 = arith.constant 5 : index
    %c1_41 = arith.constant 1 : index
    %c0_42 = arith.constant 0 : index
    %106 = vector.load %arg3[%c5_40, %c1_41, %c0_42] : memref<7x7x128xf32, #tpu.memory_space<vmem>>, vector<1x1x128xf32>
    %107 = vector.shape_cast %106 : vector<1x1x128xf32> to vector<128xf32>
    %108 = vector.shape_cast %107 : vector<128xf32> to vector<1x128xf32>
    %109 = vector.broadcast %108 : vector<1x128xf32> to vector<192x128xf32>
    %110 = arith.mulf %105, %109 : vector<192x128xf32>
    %111 = arith.addf %104, %110 : vector<192x128xf32>
    %112 = vector.extract_strided_slice %69 {offsets = [144, 0], sizes = [192, 128], strides = [1, 1]} : vector<336x128xf32> to vector<192x128xf32>
    %c6_43 = arith.constant 6 : index
    %c1_44 = arith.constant 1 : index
    %c0_45 = arith.constant 0 : index
    %113 = vector.load %arg3[%c6_43, %c1_44, %c0_45] : memref<7x7x128xf32, #tpu.memory_space<vmem>>, vector<1x1x128xf32>
    %114 = vector.shape_cast %113 : vector<1x1x128xf32> to vector<128xf32>
    %115 = vector.shape_cast %114 : vector<128xf32> to vector<1x128xf32>
    %116 = vector.broadcast %115 : vector<1x128xf32> to vector<192x128xf32>
    %117 = arith.mulf %112, %116 : vector<192x128xf32>
    %118 = arith.addf %111, %117 : vector<192x128xf32>
    %c334_i32 = arith.constant 334 : i32
    %119 = tpu.dynamic_rotate %18 by %c334_i32 dim 0 : vector<336x128xf32>, i32 -> vector<336x128xf32>
    %120 = vector.extract_strided_slice %119 {offsets = [0, 0], sizes = [192, 128], strides = [1, 1]} : vector<336x128xf32> to vector<192x128xf32>
    %c0_46 = arith.constant 0 : index
    %c2_47 = arith.constant 2 : index
    %c0_48 = arith.constant 0 : index
    %121 = vector.load %arg3[%c0_46, %c2_47, %c0_48] : memref<7x7x128xf32, #tpu.memory_space<vmem>>, vector<1x1x128xf32>
    %122 = vector.shape_cast %121 : vector<1x1x128xf32> to vector<128xf32>
    %123 = vector.shape_cast %122 : vector<128xf32> to vector<1x128xf32>
    %124 = vector.broadcast %123 : vector<1x128xf32> to vector<192x128xf32>
    %125 = arith.mulf %120, %124 : vector<192x128xf32>
    %126 = arith.addf %118, %125 : vector<192x128xf32>
    %127 = vector.extract_strided_slice %119 {offsets = [24, 0], sizes = [192, 128], strides = [1, 1]} : vector<336x128xf32> to vector<192x128xf32>
    %c1_49 = arith.constant 1 : index
    %c2_50 = arith.constant 2 : index
    %c0_51 = arith.constant 0 : index
    %128 = vector.load %arg3[%c1_49, %c2_50, %c0_51] : memref<7x7x128xf32, #tpu.memory_space<vmem>>, vector<1x1x128xf32>
    %129 = vector.shape_cast %128 : vector<1x1x128xf32> to vector<128xf32>
    %130 = vector.shape_cast %129 : vector<128xf32> to vector<1x128xf32>
    %131 = vector.broadcast %130 : vector<1x128xf32> to vector<192x128xf32>
    %132 = arith.mulf %127, %131 : vector<192x128xf32>
    %133 = arith.addf %126, %132 : vector<192x128xf32>
    %134 = vector.extract_strided_slice %119 {offsets = [48, 0], sizes = [192, 128], strides = [1, 1]} : vector<336x128xf32> to vector<192x128xf32>
    %c2_52 = arith.constant 2 : index
    %c2_53 = arith.constant 2 : index
    %c0_54 = arith.constant 0 : index
    %135 = vector.load %arg3[%c2_52, %c2_53, %c0_54] : memref<7x7x128xf32, #tpu.memory_space<vmem>>, vector<1x1x128xf32>
    %136 = vector.shape_cast %135 : vector<1x1x128xf32> to vector<128xf32>
    %137 = vector.shape_cast %136 : vector<128xf32> to vector<1x128xf32>
    %138 = vector.broadcast %137 : vector<1x128xf32> to vector<192x128xf32>
    %139 = arith.mulf %134, %138 : vector<192x128xf32>
    %140 = arith.addf %133, %139 : vector<192x128xf32>
    %141 = vector.extract_strided_slice %119 {offsets = [72, 0], sizes = [192, 128], strides = [1, 1]} : vector<336x128xf32> to vector<192x128xf32>
    %c3_55 = arith.constant 3 : index
    %c2_56 = arith.constant 2 : index
    %c0_57 = arith.constant 0 : index
    %142 = vector.load %arg3[%c3_55, %c2_56, %c0_57] : memref<7x7x128xf32, #tpu.memory_space<vmem>>, vector<1x1x128xf32>
    %143 = vector.shape_cast %142 : vector<1x1x128xf32> to vector<128xf32>
    %144 = vector.shape_cast %143 : vector<128xf32> to vector<1x128xf32>
    %145 = vector.broadcast %144 : vector<1x128xf32> to vector<192x128xf32>
    %146 = arith.mulf %141, %145 : vector<192x128xf32>
    %147 = arith.addf %140, %146 : vector<192x128xf32>
    %148 = vector.extract_strided_slice %119 {offsets = [96, 0], sizes = [192, 128], strides = [1, 1]} : vector<336x128xf32> to vector<192x128xf32>
    %c4_58 = arith.constant 4 : index
    %c2_59 = arith.constant 2 : index
    %c0_60 = arith.constant 0 : index
    %149 = vector.load %arg3[%c4_58, %c2_59, %c0_60] : memref<7x7x128xf32, #tpu.memory_space<vmem>>, vector<1x1x128xf32>
    %150 = vector.shape_cast %149 : vector<1x1x128xf32> to vector<128xf32>
    %151 = vector.shape_cast %150 : vector<128xf32> to vector<1x128xf32>
    %152 = vector.broadcast %151 : vector<1x128xf32> to vector<192x128xf32>
    %153 = arith.mulf %148, %152 : vector<192x128xf32>
    %154 = arith.addf %147, %153 : vector<192x128xf32>
    %155 = vector.extract_strided_slice %119 {offsets = [120, 0], sizes = [192, 128], strides = [1, 1]} : vector<336x128xf32> to vector<192x128xf32>
    %c5_61 = arith.constant 5 : index
    %c2_62 = arith.constant 2 : index
    %c0_63 = arith.constant 0 : index
    %156 = vector.load %arg3[%c5_61, %c2_62, %c0_63] : memref<7x7x128xf32, #tpu.memory_space<vmem>>, vector<1x1x128xf32>
    %157 = vector.shape_cast %156 : vector<1x1x128xf32> to vector<128xf32>
    %158 = vector.shape_cast %157 : vector<128xf32> to vector<1x128xf32>
    %159 = vector.broadcast %158 : vector<1x128xf32> to vector<192x128xf32>
    %160 = arith.mulf %155, %159 : vector<192x128xf32>
    %161 = arith.addf %154, %160 : vector<192x128xf32>
    %162 = vector.extract_strided_slice %119 {offsets = [144, 0], sizes = [192, 128], strides = [1, 1]} : vector<336x128xf32> to vector<192x128xf32>
    %c6_64 = arith.constant 6 : index
    %c2_65 = arith.constant 2 : index
    %c0_66 = arith.constant 0 : index
    %163 = vector.load %arg3[%c6_64, %c2_65, %c0_66] : memref<7x7x128xf32, #tpu.memory_space<vmem>>, vector<1x1x128xf32>
    %164 = vector.shape_cast %163 : vector<1x1x128xf32> to vector<128xf32>
    %165 = vector.shape_cast %164 : vector<128xf32> to vector<1x128xf32>
    %166 = vector.broadcast %165 : vector<1x128xf32> to vector<192x128xf32>
    %167 = arith.mulf %162, %166 : vector<192x128xf32>
    %168 = arith.addf %161, %167 : vector<192x128xf32>
    %c333_i32 = arith.constant 333 : i32
    %169 = tpu.dynamic_rotate %18 by %c333_i32 dim 0 : vector<336x128xf32>, i32 -> vector<336x128xf32>
    %170 = vector.extract_strided_slice %169 {offsets = [72, 0], sizes = [192, 128], strides = [1, 1]} : vector<336x128xf32> to vector<192x128xf32>
    %171 = vector.extract_strided_slice %169 {offsets = [0, 0], sizes = [192, 128], strides = [1, 1]} : vector<336x128xf32> to vector<192x128xf32>
    %c0_67 = arith.constant 0 : index
    %c3_68 = arith.constant 3 : index
    %c0_69 = arith.constant 0 : index
    %172 = vector.load %arg3[%c0_67, %c3_68, %c0_69] : memref<7x7x128xf32, #tpu.memory_space<vmem>>, vector<1x1x128xf32>
    %173 = vector.shape_cast %172 : vector<1x1x128xf32> to vector<128xf32>
    %174 = vector.shape_cast %173 : vector<128xf32> to vector<1x128xf32>
    %175 = vector.broadcast %174 : vector<1x128xf32> to vector<192x128xf32>
    %176 = arith.mulf %171, %175 : vector<192x128xf32>
    %177 = arith.addf %168, %176 : vector<192x128xf32>
    %178 = vector.extract_strided_slice %169 {offsets = [24, 0], sizes = [192, 128], strides = [1, 1]} : vector<336x128xf32> to vector<192x128xf32>
    %c1_70 = arith.constant 1 : index
    %c3_71 = arith.constant 3 : index
    %c0_72 = arith.constant 0 : index
    %179 = vector.load %arg3[%c1_70, %c3_71, %c0_72] : memref<7x7x128xf32, #tpu.memory_space<vmem>>, vector<1x1x128xf32>
    %180 = vector.shape_cast %179 : vector<1x1x128xf32> to vector<128xf32>
    %181 = vector.shape_cast %180 : vector<128xf32> to vector<1x128xf32>
    %182 = vector.broadcast %181 : vector<1x128xf32> to vector<192x128xf32>
    %183 = arith.mulf %178, %182 : vector<192x128xf32>
    %184 = arith.addf %177, %183 : vector<192x128xf32>
    %185 = vector.extract_strided_slice %169 {offsets = [48, 0], sizes = [192, 128], strides = [1, 1]} : vector<336x128xf32> to vector<192x128xf32>
    %c2_73 = arith.constant 2 : index
    %c3_74 = arith.constant 3 : index
    %c0_75 = arith.constant 0 : index
    %186 = vector.load %arg3[%c2_73, %c3_74, %c0_75] : memref<7x7x128xf32, #tpu.memory_space<vmem>>, vector<1x1x128xf32>
    %187 = vector.shape_cast %186 : vector<1x1x128xf32> to vector<128xf32>
    %188 = vector.shape_cast %187 : vector<128xf32> to vector<1x128xf32>
    %189 = vector.broadcast %188 : vector<1x128xf32> to vector<192x128xf32>
    %190 = arith.mulf %185, %189 : vector<192x128xf32>
    %191 = arith.addf %184, %190 : vector<192x128xf32>
    %192 = vector.extract_strided_slice %169 {offsets = [72, 0], sizes = [192, 128], strides = [1, 1]} : vector<336x128xf32> to vector<192x128xf32>
    %c3_76 = arith.constant 3 : index
    %c3_77 = arith.constant 3 : index
    %c0_78 = arith.constant 0 : index
    %193 = vector.load %arg3[%c3_76, %c3_77, %c0_78] : memref<7x7x128xf32, #tpu.memory_space<vmem>>, vector<1x1x128xf32>
    %194 = vector.shape_cast %193 : vector<1x1x128xf32> to vector<128xf32>
    %195 = vector.shape_cast %194 : vector<128xf32> to vector<1x128xf32>
    %196 = vector.broadcast %195 : vector<1x128xf32> to vector<192x128xf32>
    %197 = arith.mulf %192, %196 : vector<192x128xf32>
    %198 = arith.addf %191, %197 : vector<192x128xf32>
    %199 = vector.extract_strided_slice %169 {offsets = [96, 0], sizes = [192, 128], strides = [1, 1]} : vector<336x128xf32> to vector<192x128xf32>
    %c4_79 = arith.constant 4 : index
    %c3_80 = arith.constant 3 : index
    %c0_81 = arith.constant 0 : index
    %200 = vector.load %arg3[%c4_79, %c3_80, %c0_81] : memref<7x7x128xf32, #tpu.memory_space<vmem>>, vector<1x1x128xf32>
    %201 = vector.shape_cast %200 : vector<1x1x128xf32> to vector<128xf32>
    %202 = vector.shape_cast %201 : vector<128xf32> to vector<1x128xf32>
    %203 = vector.broadcast %202 : vector<1x128xf32> to vector<192x128xf32>
    %204 = arith.mulf %199, %203 : vector<192x128xf32>
    %205 = arith.addf %198, %204 : vector<192x128xf32>
    %206 = vector.extract_strided_slice %169 {offsets = [120, 0], sizes = [192, 128], strides = [1, 1]} : vector<336x128xf32> to vector<192x128xf32>
    %c5_82 = arith.constant 5 : index
    %c3_83 = arith.constant 3 : index
    %c0_84 = arith.constant 0 : index
    %207 = vector.load %arg3[%c5_82, %c3_83, %c0_84] : memref<7x7x128xf32, #tpu.memory_space<vmem>>, vector<1x1x128xf32>
    %208 = vector.shape_cast %207 : vector<1x1x128xf32> to vector<128xf32>
    %209 = vector.shape_cast %208 : vector<128xf32> to vector<1x128xf32>
    %210 = vector.broadcast %209 : vector<1x128xf32> to vector<192x128xf32>
    %211 = arith.mulf %206, %210 : vector<192x128xf32>
    %212 = arith.addf %205, %211 : vector<192x128xf32>
    %213 = vector.extract_strided_slice %169 {offsets = [144, 0], sizes = [192, 128], strides = [1, 1]} : vector<336x128xf32> to vector<192x128xf32>
    %c6_85 = arith.constant 6 : index
    %c3_86 = arith.constant 3 : index
    %c0_87 = arith.constant 0 : index
    %214 = vector.load %arg3[%c6_85, %c3_86, %c0_87] : memref<7x7x128xf32, #tpu.memory_space<vmem>>, vector<1x1x128xf32>
    %215 = vector.shape_cast %214 : vector<1x1x128xf32> to vector<128xf32>
    %216 = vector.shape_cast %215 : vector<128xf32> to vector<1x128xf32>
    %217 = vector.broadcast %216 : vector<1x128xf32> to vector<192x128xf32>
    %218 = arith.mulf %213, %217 : vector<192x128xf32>
    %219 = arith.addf %212, %218 : vector<192x128xf32>
    %c332_i32 = arith.constant 332 : i32
    %220 = tpu.dynamic_rotate %18 by %c332_i32 dim 0 : vector<336x128xf32>, i32 -> vector<336x128xf32>
    %221 = vector.extract_strided_slice %220 {offsets = [0, 0], sizes = [192, 128], strides = [1, 1]} : vector<336x128xf32> to vector<192x128xf32>
    %c0_88 = arith.constant 0 : index
    %c4_89 = arith.constant 4 : index
    %c0_90 = arith.constant 0 : index
    %222 = vector.load %arg3[%c0_88, %c4_89, %c0_90] : memref<7x7x128xf32, #tpu.memory_space<vmem>>, vector<1x1x128xf32>
    %223 = vector.shape_cast %222 : vector<1x1x128xf32> to vector<128xf32>
    %224 = vector.shape_cast %223 : vector<128xf32> to vector<1x128xf32>
    %225 = vector.broadcast %224 : vector<1x128xf32> to vector<192x128xf32>
    %226 = arith.mulf %221, %225 : vector<192x128xf32>
    %227 = arith.addf %219, %226 : vector<192x128xf32>
    %228 = vector.extract_strided_slice %220 {offsets = [24, 0], sizes = [192, 128], strides = [1, 1]} : vector<336x128xf32> to vector<192x128xf32>
    %c1_91 = arith.constant 1 : index
    %c4_92 = arith.constant 4 : index
    %c0_93 = arith.constant 0 : index
    %229 = vector.load %arg3[%c1_91, %c4_92, %c0_93] : memref<7x7x128xf32, #tpu.memory_space<vmem>>, vector<1x1x128xf32>
    %230 = vector.shape_cast %229 : vector<1x1x128xf32> to vector<128xf32>
    %231 = vector.shape_cast %230 : vector<128xf32> to vector<1x128xf32>
    %232 = vector.broadcast %231 : vector<1x128xf32> to vector<192x128xf32>
    %233 = arith.mulf %228, %232 : vector<192x128xf32>
    %234 = arith.addf %227, %233 : vector<192x128xf32>
    %235 = vector.extract_strided_slice %220 {offsets = [48, 0], sizes = [192, 128], strides = [1, 1]} : vector<336x128xf32> to vector<192x128xf32>
    %c2_94 = arith.constant 2 : index
    %c4_95 = arith.constant 4 : index
    %c0_96 = arith.constant 0 : index
    %236 = vector.load %arg3[%c2_94, %c4_95, %c0_96] : memref<7x7x128xf32, #tpu.memory_space<vmem>>, vector<1x1x128xf32>
    %237 = vector.shape_cast %236 : vector<1x1x128xf32> to vector<128xf32>
    %238 = vector.shape_cast %237 : vector<128xf32> to vector<1x128xf32>
    %239 = vector.broadcast %238 : vector<1x128xf32> to vector<192x128xf32>
    %240 = arith.mulf %235, %239 : vector<192x128xf32>
    %241 = arith.addf %234, %240 : vector<192x128xf32>
    %242 = vector.extract_strided_slice %220 {offsets = [72, 0], sizes = [192, 128], strides = [1, 1]} : vector<336x128xf32> to vector<192x128xf32>
    %c3_97 = arith.constant 3 : index
    %c4_98 = arith.constant 4 : index
    %c0_99 = arith.constant 0 : index
    %243 = vector.load %arg3[%c3_97, %c4_98, %c0_99] : memref<7x7x128xf32, #tpu.memory_space<vmem>>, vector<1x1x128xf32>
    %244 = vector.shape_cast %243 : vector<1x1x128xf32> to vector<128xf32>
    %245 = vector.shape_cast %244 : vector<128xf32> to vector<1x128xf32>
    %246 = vector.broadcast %245 : vector<1x128xf32> to vector<192x128xf32>
    %247 = arith.mulf %242, %246 : vector<192x128xf32>
    %248 = arith.addf %241, %247 : vector<192x128xf32>
    %249 = vector.extract_strided_slice %220 {offsets = [96, 0], sizes = [192, 128], strides = [1, 1]} : vector<336x128xf32> to vector<192x128xf32>
    %c4_100 = arith.constant 4 : index
    %c4_101 = arith.constant 4 : index
    %c0_102 = arith.constant 0 : index
    %250 = vector.load %arg3[%c4_100, %c4_101, %c0_102] : memref<7x7x128xf32, #tpu.memory_space<vmem>>, vector<1x1x128xf32>
    %251 = vector.shape_cast %250 : vector<1x1x128xf32> to vector<128xf32>
    %252 = vector.shape_cast %251 : vector<128xf32> to vector<1x128xf32>
    %253 = vector.broadcast %252 : vector<1x128xf32> to vector<192x128xf32>
    %254 = arith.mulf %249, %253 : vector<192x128xf32>
    %255 = arith.addf %248, %254 : vector<192x128xf32>
    %256 = vector.extract_strided_slice %220 {offsets = [120, 0], sizes = [192, 128], strides = [1, 1]} : vector<336x128xf32> to vector<192x128xf32>
    %c5_103 = arith.constant 5 : index
    %c4_104 = arith.constant 4 : index
    %c0_105 = arith.constant 0 : index
    %257 = vector.load %arg3[%c5_103, %c4_104, %c0_105] : memref<7x7x128xf32, #tpu.memory_space<vmem>>, vector<1x1x128xf32>
    %258 = vector.shape_cast %257 : vector<1x1x128xf32> to vector<128xf32>
    %259 = vector.shape_cast %258 : vector<128xf32> to vector<1x128xf32>
    %260 = vector.broadcast %259 : vector<1x128xf32> to vector<192x128xf32>
    %261 = arith.mulf %256, %260 : vector<192x128xf32>
    %262 = arith.addf %255, %261 : vector<192x128xf32>
    %263 = vector.extract_strided_slice %220 {offsets = [144, 0], sizes = [192, 128], strides = [1, 1]} : vector<336x128xf32> to vector<192x128xf32>
    %c6_106 = arith.constant 6 : index
    %c4_107 = arith.constant 4 : index
    %c0_108 = arith.constant 0 : index
    %264 = vector.load %arg3[%c6_106, %c4_107, %c0_108] : memref<7x7x128xf32, #tpu.memory_space<vmem>>, vector<1x1x128xf32>
    %265 = vector.shape_cast %264 : vector<1x1x128xf32> to vector<128xf32>
    %266 = vector.shape_cast %265 : vector<128xf32> to vector<1x128xf32>
    %267 = vector.broadcast %266 : vector<1x128xf32> to vector<192x128xf32>
    %268 = arith.mulf %263, %267 : vector<192x128xf32>
    %269 = arith.addf %262, %268 : vector<192x128xf32>
    %c331_i32 = arith.constant 331 : i32
    %270 = tpu.dynamic_rotate %18 by %c331_i32 dim 0 : vector<336x128xf32>, i32 -> vector<336x128xf32>
    %271 = vector.extract_strided_slice %270 {offsets = [0, 0], sizes = [192, 128], strides = [1, 1]} : vector<336x128xf32> to vector<192x128xf32>
    %c0_109 = arith.constant 0 : index
    %c5_110 = arith.constant 5 : index
    %c0_111 = arith.constant 0 : index
    %272 = vector.load %arg3[%c0_109, %c5_110, %c0_111] : memref<7x7x128xf32, #tpu.memory_space<vmem>>, vector<1x1x128xf32>
    %273 = vector.shape_cast %272 : vector<1x1x128xf32> to vector<128xf32>
    %274 = vector.shape_cast %273 : vector<128xf32> to vector<1x128xf32>
    %275 = vector.broadcast %274 : vector<1x128xf32> to vector<192x128xf32>
    %276 = arith.mulf %271, %275 : vector<192x128xf32>
    %277 = arith.addf %269, %276 : vector<192x128xf32>
    %278 = vector.extract_strided_slice %270 {offsets = [24, 0], sizes = [192, 128], strides = [1, 1]} : vector<336x128xf32> to vector<192x128xf32>
    %c1_112 = arith.constant 1 : index
    %c5_113 = arith.constant 5 : index
    %c0_114 = arith.constant 0 : index
    %279 = vector.load %arg3[%c1_112, %c5_113, %c0_114] : memref<7x7x128xf32, #tpu.memory_space<vmem>>, vector<1x1x128xf32>
    %280 = vector.shape_cast %279 : vector<1x1x128xf32> to vector<128xf32>
    %281 = vector.shape_cast %280 : vector<128xf32> to vector<1x128xf32>
    %282 = vector.broadcast %281 : vector<1x128xf32> to vector<192x128xf32>
    %283 = arith.mulf %278, %282 : vector<192x128xf32>
    %284 = arith.addf %277, %283 : vector<192x128xf32>
    %285 = vector.extract_strided_slice %270 {offsets = [48, 0], sizes = [192, 128], strides = [1, 1]} : vector<336x128xf32> to vector<192x128xf32>
    %c2_115 = arith.constant 2 : index
    %c5_116 = arith.constant 5 : index
    %c0_117 = arith.constant 0 : index
    %286 = vector.load %arg3[%c2_115, %c5_116, %c0_117] : memref<7x7x128xf32, #tpu.memory_space<vmem>>, vector<1x1x128xf32>
    %287 = vector.shape_cast %286 : vector<1x1x128xf32> to vector<128xf32>
    %288 = vector.shape_cast %287 : vector<128xf32> to vector<1x128xf32>
    %289 = vector.broadcast %288 : vector<1x128xf32> to vector<192x128xf32>
    %290 = arith.mulf %285, %289 : vector<192x128xf32>
    %291 = arith.addf %284, %290 : vector<192x128xf32>
    %292 = vector.extract_strided_slice %270 {offsets = [72, 0], sizes = [192, 128], strides = [1, 1]} : vector<336x128xf32> to vector<192x128xf32>
    %c3_118 = arith.constant 3 : index
    %c5_119 = arith.constant 5 : index
    %c0_120 = arith.constant 0 : index
    %293 = vector.load %arg3[%c3_118, %c5_119, %c0_120] : memref<7x7x128xf32, #tpu.memory_space<vmem>>, vector<1x1x128xf32>
    %294 = vector.shape_cast %293 : vector<1x1x128xf32> to vector<128xf32>
    %295 = vector.shape_cast %294 : vector<128xf32> to vector<1x128xf32>
    %296 = vector.broadcast %295 : vector<1x128xf32> to vector<192x128xf32>
    %297 = arith.mulf %292, %296 : vector<192x128xf32>
    %298 = arith.addf %291, %297 : vector<192x128xf32>
    %299 = vector.extract_strided_slice %270 {offsets = [96, 0], sizes = [192, 128], strides = [1, 1]} : vector<336x128xf32> to vector<192x128xf32>
    %c4_121 = arith.constant 4 : index
    %c5_122 = arith.constant 5 : index
    %c0_123 = arith.constant 0 : index
    %300 = vector.load %arg3[%c4_121, %c5_122, %c0_123] : memref<7x7x128xf32, #tpu.memory_space<vmem>>, vector<1x1x128xf32>
    %301 = vector.shape_cast %300 : vector<1x1x128xf32> to vector<128xf32>
    %302 = vector.shape_cast %301 : vector<128xf32> to vector<1x128xf32>
    %303 = vector.broadcast %302 : vector<1x128xf32> to vector<192x128xf32>
    %304 = arith.mulf %299, %303 : vector<192x128xf32>
    %305 = arith.addf %298, %304 : vector<192x128xf32>
    %306 = vector.extract_strided_slice %270 {offsets = [120, 0], sizes = [192, 128], strides = [1, 1]} : vector<336x128xf32> to vector<192x128xf32>
    %c5_124 = arith.constant 5 : index
    %c5_125 = arith.constant 5 : index
    %c0_126 = arith.constant 0 : index
    %307 = vector.load %arg3[%c5_124, %c5_125, %c0_126] : memref<7x7x128xf32, #tpu.memory_space<vmem>>, vector<1x1x128xf32>
    %308 = vector.shape_cast %307 : vector<1x1x128xf32> to vector<128xf32>
    %309 = vector.shape_cast %308 : vector<128xf32> to vector<1x128xf32>
    %310 = vector.broadcast %309 : vector<1x128xf32> to vector<192x128xf32>
    %311 = arith.mulf %306, %310 : vector<192x128xf32>
    %312 = arith.addf %305, %311 : vector<192x128xf32>
    %313 = vector.extract_strided_slice %270 {offsets = [144, 0], sizes = [192, 128], strides = [1, 1]} : vector<336x128xf32> to vector<192x128xf32>
    %c6_127 = arith.constant 6 : index
    %c5_128 = arith.constant 5 : index
    %c0_129 = arith.constant 0 : index
    %314 = vector.load %arg3[%c6_127, %c5_128, %c0_129] : memref<7x7x128xf32, #tpu.memory_space<vmem>>, vector<1x1x128xf32>
    %315 = vector.shape_cast %314 : vector<1x1x128xf32> to vector<128xf32>
    %316 = vector.shape_cast %315 : vector<128xf32> to vector<1x128xf32>
    %317 = vector.broadcast %316 : vector<1x128xf32> to vector<192x128xf32>
    %318 = arith.mulf %313, %317 : vector<192x128xf32>
    %319 = arith.addf %312, %318 : vector<192x128xf32>
    %c330_i32 = arith.constant 330 : i32
    %320 = tpu.dynamic_rotate %18 by %c330_i32 dim 0 : vector<336x128xf32>, i32 -> vector<336x128xf32>
    %321 = vector.extract_strided_slice %320 {offsets = [0, 0], sizes = [192, 128], strides = [1, 1]} : vector<336x128xf32> to vector<192x128xf32>
    %c0_130 = arith.constant 0 : index
    %c6_131 = arith.constant 6 : index
    %c0_132 = arith.constant 0 : index
    %322 = vector.load %arg3[%c0_130, %c6_131, %c0_132] : memref<7x7x128xf32, #tpu.memory_space<vmem>>, vector<1x1x128xf32>
    %323 = vector.shape_cast %322 : vector<1x1x128xf32> to vector<128xf32>
    %324 = vector.shape_cast %323 : vector<128xf32> to vector<1x128xf32>
    %325 = vector.broadcast %324 : vector<1x128xf32> to vector<192x128xf32>
    %326 = arith.mulf %321, %325 : vector<192x128xf32>
    %327 = arith.addf %319, %326 : vector<192x128xf32>
    %328 = vector.extract_strided_slice %320 {offsets = [24, 0], sizes = [192, 128], strides = [1, 1]} : vector<336x128xf32> to vector<192x128xf32>
    %c1_133 = arith.constant 1 : index
    %c6_134 = arith.constant 6 : index
    %c0_135 = arith.constant 0 : index
    %329 = vector.load %arg3[%c1_133, %c6_134, %c0_135] : memref<7x7x128xf32, #tpu.memory_space<vmem>>, vector<1x1x128xf32>
    %330 = vector.shape_cast %329 : vector<1x1x128xf32> to vector<128xf32>
    %331 = vector.shape_cast %330 : vector<128xf32> to vector<1x128xf32>
    %332 = vector.broadcast %331 : vector<1x128xf32> to vector<192x128xf32>
    %333 = arith.mulf %328, %332 : vector<192x128xf32>
    %334 = arith.addf %327, %333 : vector<192x128xf32>
    %335 = vector.extract_strided_slice %320 {offsets = [48, 0], sizes = [192, 128], strides = [1, 1]} : vector<336x128xf32> to vector<192x128xf32>
    %c2_136 = arith.constant 2 : index
    %c6_137 = arith.constant 6 : index
    %c0_138 = arith.constant 0 : index
    %336 = vector.load %arg3[%c2_136, %c6_137, %c0_138] : memref<7x7x128xf32, #tpu.memory_space<vmem>>, vector<1x1x128xf32>
    %337 = vector.shape_cast %336 : vector<1x1x128xf32> to vector<128xf32>
    %338 = vector.shape_cast %337 : vector<128xf32> to vector<1x128xf32>
    %339 = vector.broadcast %338 : vector<1x128xf32> to vector<192x128xf32>
    %340 = arith.mulf %335, %339 : vector<192x128xf32>
    %341 = arith.addf %334, %340 : vector<192x128xf32>
    %342 = vector.extract_strided_slice %320 {offsets = [72, 0], sizes = [192, 128], strides = [1, 1]} : vector<336x128xf32> to vector<192x128xf32>
    %c3_139 = arith.constant 3 : index
    %c6_140 = arith.constant 6 : index
    %c0_141 = arith.constant 0 : index
    %343 = vector.load %arg3[%c3_139, %c6_140, %c0_141] : memref<7x7x128xf32, #tpu.memory_space<vmem>>, vector<1x1x128xf32>
    %344 = vector.shape_cast %343 : vector<1x1x128xf32> to vector<128xf32>
    %345 = vector.shape_cast %344 : vector<128xf32> to vector<1x128xf32>
    %346 = vector.broadcast %345 : vector<1x128xf32> to vector<192x128xf32>
    %347 = arith.mulf %342, %346 : vector<192x128xf32>
    %348 = arith.addf %341, %347 : vector<192x128xf32>
    %349 = vector.extract_strided_slice %320 {offsets = [96, 0], sizes = [192, 128], strides = [1, 1]} : vector<336x128xf32> to vector<192x128xf32>
    %c4_142 = arith.constant 4 : index
    %c6_143 = arith.constant 6 : index
    %c0_144 = arith.constant 0 : index
    %350 = vector.load %arg3[%c4_142, %c6_143, %c0_144] : memref<7x7x128xf32, #tpu.memory_space<vmem>>, vector<1x1x128xf32>
    %351 = vector.shape_cast %350 : vector<1x1x128xf32> to vector<128xf32>
    %352 = vector.shape_cast %351 : vector<128xf32> to vector<1x128xf32>
    %353 = vector.broadcast %352 : vector<1x128xf32> to vector<192x128xf32>
    %354 = arith.mulf %349, %353 : vector<192x128xf32>
    %355 = arith.addf %348, %354 : vector<192x128xf32>
    %356 = vector.extract_strided_slice %320 {offsets = [120, 0], sizes = [192, 128], strides = [1, 1]} : vector<336x128xf32> to vector<192x128xf32>
    %c5_145 = arith.constant 5 : index
    %c6_146 = arith.constant 6 : index
    %c0_147 = arith.constant 0 : index
    %357 = vector.load %arg3[%c5_145, %c6_146, %c0_147] : memref<7x7x128xf32, #tpu.memory_space<vmem>>, vector<1x1x128xf32>
    %358 = vector.shape_cast %357 : vector<1x1x128xf32> to vector<128xf32>
    %359 = vector.shape_cast %358 : vector<128xf32> to vector<1x128xf32>
    %360 = vector.broadcast %359 : vector<1x128xf32> to vector<192x128xf32>
    %361 = arith.mulf %356, %360 : vector<192x128xf32>
    %362 = arith.addf %355, %361 : vector<192x128xf32>
    %363 = vector.extract_strided_slice %320 {offsets = [144, 0], sizes = [192, 128], strides = [1, 1]} : vector<336x128xf32> to vector<192x128xf32>
    %c6_148 = arith.constant 6 : index
    %c6_149 = arith.constant 6 : index
    %c0_150 = arith.constant 0 : index
    %364 = vector.load %arg3[%c6_148, %c6_149, %c0_150] : memref<7x7x128xf32, #tpu.memory_space<vmem>>, vector<1x1x128xf32>
    %365 = vector.shape_cast %364 : vector<1x1x128xf32> to vector<128xf32>
    %366 = vector.shape_cast %365 : vector<128xf32> to vector<1x128xf32>
    %367 = vector.broadcast %366 : vector<1x128xf32> to vector<192x128xf32>
    %368 = arith.mulf %363, %367 : vector<192x128xf32>
    %369 = arith.addf %362, %368 : vector<192x128xf32>
    %c0_151 = arith.constant 0 : index
    %c0_152 = arith.constant 0 : index
    %370 = vector.load %arg4[%c0_151, %c0_152] : memref<1x128xf32, #tpu.memory_space<vmem>>, vector<1x128xf32>
    %371 = vector.shape_cast %370 : vector<1x128xf32> to vector<128xf32>
    %372 = vector.shape_cast %371 : vector<128xf32> to vector<1x128xf32>
    %373 = vector.broadcast %372 : vector<1x128xf32> to vector<192x128xf32>
    %374 = arith.addf %369, %373 : vector<192x128xf32>
    %375 = vector.shape_cast %374 : vector<192x128xf32> to vector<8x24x128xf32>
    %376 = vector.extract_strided_slice %375 {offsets = [0, 0, 0], sizes = [8, 16, 128], strides = [1, 1, 1]} : vector<8x24x128xf32> to vector<8x16x128xf32>
    %377 = vector.shape_cast %170 : vector<192x128xf32> to vector<8x24x128xf32>
    %378 = vector.extract_strided_slice %377 {offsets = [0, 0, 0], sizes = [8, 16, 128], strides = [1, 1, 1]} : vector<8x24x128xf32> to vector<8x16x128xf32>
    %cst_153 = arith.constant dense<0.000000e+00> : vector<8x16xf32>
    %379 = vector.multi_reduction <add>, %376, %cst_153 [2] : vector<8x16x128xf32> to vector<8x16xf32>
    %380 = vector.shape_cast %379 : vector<8x16xf32> to vector<8x16x1xf32>
    %cst_154 = arith.constant 1.250000e-01 : f32
    %381 = vector.broadcast %cst_154 : f32 to vector<8x16x1xf32>
    %382 = arith.mulf %380, %381 : vector<8x16x1xf32>
    %383 = vector.broadcast %382 : vector<8x16x1xf32> to vector<8x16x128xf32>
    %384 = arith.subf %376, %383 : vector<8x16x128xf32>
    %385 = arith.mulf %384, %384 : vector<8x16x128xf32>
    %cst_155 = arith.constant dense<0.000000e+00> : vector<8x16xf32>
    %386 = vector.multi_reduction <add>, %385, %cst_155 [2] : vector<8x16x128xf32> to vector<8x16xf32>
    %387 = vector.shape_cast %386 : vector<8x16xf32> to vector<8x16x1xf32>
    %cst_156 = arith.constant 1.200000e+02 : f32
    %388 = vector.broadcast %cst_156 : f32 to vector<8x16x1xf32>
    %389 = arith.mulf %388, %382 : vector<8x16x1xf32>
    %390 = arith.mulf %389, %382 : vector<8x16x1xf32>
    %391 = arith.subf %387, %390 : vector<8x16x1xf32>
    %cst_157 = arith.constant 1.250000e-01 : f32
    %392 = vector.broadcast %cst_157 : f32 to vector<8x16x1xf32>
    %393 = arith.mulf %391, %392 : vector<8x16x1xf32>
    %cst_158 = arith.constant 0.000000e+00 : f32
    %394 = vector.broadcast %cst_158 : f32 to vector<8x16x1xf32>
    %395 = arith.maximumf %393, %394 : vector<8x16x1xf32>
    %cst_159 = arith.constant 9.99999997E-7 : f32
    %396 = vector.broadcast %cst_159 : f32 to vector<8x16x1xf32>
    %397 = arith.addf %395, %396 : vector<8x16x1xf32>
    %398 = math.rsqrt %397 : vector<8x16x1xf32>
    %399 = vector.broadcast %398 : vector<8x16x1xf32> to vector<8x16x128xf32>
    %400 = arith.mulf %384, %399 : vector<8x16x128xf32>
    %c0_160 = arith.constant 0 : index
    %c0_161 = arith.constant 0 : index
    %401 = vector.load %arg5[%c0_160, %c0_161] : memref<1x128xf32, #tpu.memory_space<vmem>>, vector<1x128xf32>
    %402 = vector.shape_cast %401 : vector<1x128xf32> to vector<128xf32>
    %403 = vector.shape_cast %402 : vector<128xf32> to vector<1x1x128xf32>
    %404 = vector.broadcast %403 : vector<1x1x128xf32> to vector<8x16x128xf32>
    %405 = arith.mulf %400, %404 : vector<8x16x128xf32>
    %c0_162 = arith.constant 0 : index
    %c0_163 = arith.constant 0 : index
    %406 = vector.load %arg6[%c0_162, %c0_163] : memref<1x128xf32, #tpu.memory_space<vmem>>, vector<1x128xf32>
    %407 = vector.shape_cast %406 : vector<1x128xf32> to vector<128xf32>
    %408 = vector.shape_cast %407 : vector<128xf32> to vector<1x1x128xf32>
    %409 = vector.broadcast %408 : vector<1x1x128xf32> to vector<8x16x128xf32>
    %410 = arith.addf %405, %409 : vector<8x16x128xf32>
    %411 = vector.shape_cast %410 : vector<8x16x128xf32> to vector<128x128xf32>
    %412 = arith.truncf %411 : vector<128x128xf32> to vector<128x128xbf16>
    %c0_164 = arith.constant 0 : index
    %c0_165 = arith.constant 0 : index
    %413 = vector.load %arg7[%c0_164, %c0_165] : memref<128x128xbf16, #tpu.memory_space<vmem>>, vector<128x128xbf16>
    %cst_166 = arith.constant dense<0.000000e+00> : vector<128x128xf32>
    %414 = tpu.matmul %412, %413, %cst_166 {dimension_numbers = #tpu.dot_dimension_numbers<[1], [0], [0], [1], [0, 0, 1, 1], [], []>} : vector<128x128xbf16>, vector<128x128xbf16>, vector<128x128xf32> -> vector<128x128xf32>
    %c0_167 = arith.constant 0 : index
    %c0_168 = arith.constant 0 : index
    %415 = vector.load %arg8[%c0_167, %c0_168] : memref<1x128xf32, #tpu.memory_space<vmem>>, vector<1x128xf32>
    %416 = vector.shape_cast %415 : vector<1x128xf32> to vector<128xf32>
    %417 = vector.shape_cast %416 : vector<128xf32> to vector<1x128xf32>
    %418 = vector.broadcast %417 : vector<1x128xf32> to vector<128x128xf32>
    %419 = arith.addf %414, %418 : vector<128x128xf32>
    %cst_169 = arith.constant 5.000000e-01 : f32
    %420 = vector.broadcast %cst_169 : f32 to vector<128x128xf32>
    %421 = arith.mulf %420, %419 : vector<128x128xf32>
    %cst_170 = arith.constant 0.707106769 : f32
    %422 = vector.broadcast %cst_170 : f32 to vector<128x128xf32>
    %423 = arith.mulf %419, %422 : vector<128x128xf32>
    %424 = math.erf %423 : vector<128x128xf32>
    %cst_171 = arith.constant 1.000000e+00 : f32
    %425 = vector.broadcast %cst_171 : f32 to vector<128x128xf32>
    %426 = arith.addf %425, %424 : vector<128x128xf32>
    %427 = arith.mulf %421, %426 : vector<128x128xf32>
    %428 = arith.truncf %427 : vector<128x128xf32> to vector<128x128xbf16>
    %c0_172 = arith.constant 0 : index
    %c0_173 = arith.constant 0 : index
    %429 = vector.load %arg9[%c0_172, %c0_173] : memref<128x128xbf16, #tpu.memory_space<vmem>>, vector<128x128xbf16>
    %cst_174 = arith.constant dense<0.000000e+00> : vector<128x128xf32>
    %430 = tpu.matmul %428, %429, %cst_174 {dimension_numbers = #tpu.dot_dimension_numbers<[1], [0], [0], [1], [0, 0, 1, 1], [], []>} : vector<128x128xbf16>, vector<128x128xbf16>, vector<128x128xf32> -> vector<128x128xf32>
    %c0_175 = arith.constant 0 : index
    %c0_176 = arith.constant 0 : index
    %431 = vector.load %arg10[%c0_175, %c0_176] : memref<1x128xf32, #tpu.memory_space<vmem>>, vector<1x128xf32>
    %432 = vector.shape_cast %431 : vector<1x128xf32> to vector<128xf32>
    %433 = vector.shape_cast %432 : vector<128xf32> to vector<1x128xf32>
    %434 = vector.broadcast %433 : vector<1x128xf32> to vector<128x128xf32>
    %435 = arith.addf %430, %434 : vector<128x128xf32>
    %c0_177 = arith.constant 0 : index
    %c0_178 = arith.constant 0 : index
    %436 = vector.load %arg11[%c0_177, %c0_178] : memref<1x128xf32, #tpu.memory_space<vmem>>, vector<1x128xf32>
    %437 = vector.shape_cast %436 : vector<1x128xf32> to vector<128xf32>
    %438 = vector.shape_cast %437 : vector<128xf32> to vector<1x128xf32>
    %439 = vector.broadcast %438 : vector<1x128xf32> to vector<128x128xf32>
    %440 = arith.mulf %435, %439 : vector<128x128xf32>
    %441 = vector.shape_cast %440 : vector<128x128xf32> to vector<8x16x128xf32>
    %442 = arith.addf %441, %378 : vector<8x16x128xf32>
    %c0_179 = arith.constant 0 : index
    %c0_180 = arith.constant 0 : index
    %c0_181 = arith.constant 0 : index
    %c0_182 = arith.constant 0 : index
    %443 = vector.load %arg12[%c0_179, %c0_180, %c0_181, %c0_182] : memref<1x8x16x128xf32, #tpu.memory_space<vmem>>, vector<1x8x16x128xf32>
    %444 = vector.shape_cast %443 : vector<1x8x16x128xf32> to vector<8x16x128xf32>
    %445 = vector.shape_cast %442 : vector<8x16x128xf32> to vector<1x8x16x128xf32>
    tpu.vector_store %arg12[%c0_179, %c0_180, %c0_181, %c0_182], %445 {strides = array<i32>} : memref<1x8x16x128xf32, #tpu.memory_space<vmem>>, vector<1x8x16x128xf32>,
    return
  }
  func.func @transform_1(%arg0: i32, %arg1: i32) -> (i32, i32, i32) {
    %c0_i32 = arith.constant 0 : i32
    %c0_i32_0 = arith.constant 0 : i32
    %c0_i32_1 = arith.constant 0 : i32
    %c0_i32_2 = arith.constant 0 : i32
    return %c0_i32, %c0_i32_0, %c0_i32_1 : i32, i32, i32
  }
  func.func @transform_2(%arg0: i32, %arg1: i32) -> (i32, i32) {
    %c0_i32 = arith.constant 0 : i32
    %c0_i32_0 = arith.constant 0 : i32
    %c0_i32_1 = arith.constant 0 : i32
    return %c0_i32, %c0_i32_0 : i32, i32
  }
  func.func @transform_3(%arg0: i32, %arg1: i32) -> (i32, i32) {
    %c0_i32 = arith.constant 0 : i32
    %c0_i32_0 = arith.constant 0 : i32
    %c0_i32_1 = arith.constant 0 : i32
    return %c0_i32, %c0_i32_0 : i32, i32
  }
  func.func @transform_4(%arg0: i32, %arg1: i32) -> (i32, i32) {
    %c0_i32 = arith.constant 0 : i32
    %c0_i32_0 = arith.constant 0 : i32
    %c0_i32_1 = arith.constant 0 : i32
    return %c0_i32, %c0_i32_0 : i32, i32
  }
  func.func @transform_5(%arg0: i32, %arg1: i32) -> (i32, i32) {
    %c0_i32 = arith.constant 0 : i32
    %c0_i32_0 = arith.constant 0 : i32
    %c0_i32_1 = arith.constant 0 : i32
    return %c0_i32, %c0_i32_0 : i32, i32
  }
  func.func @transform_6(%arg0: i32, %arg1: i32) -> (i32, i32) {
    %c0_i32 = arith.constant 0 : i32
    %c0_i32_0 = arith.constant 0 : i32
    %c0_i32_1 = arith.constant 0 : i32
    return %c0_i32, %c0_i32_0 : i32, i32
  }
  func.func @transform_7(%arg0: i32, %arg1: i32) -> (i32, i32) {
    %c0_i32 = arith.constant 0 : i32
    %c0_i32_0 = arith.constant 0 : i32
    %c0_i32_1 = arith.constant 0 : i32
    return %c0_i32, %c0_i32_0 : i32, i32
  }
  func.func @transform_8(%arg0: i32, %arg1: i32) -> (i32, i32) {
    %c0_i32 = arith.constant 0 : i32
    %c0_i32_0 = arith.constant 0 : i32
    %c0_i32_1 = arith.constant 0 : i32
    return %c0_i32, %c0_i32_0 : i32, i32
  }
  func.func @transform_9(%arg0: i32, %arg1: i32) -> (i32, i32) {
    %c0_i32 = arith.constant 0 : i32
    %c0_i32_0 = arith.constant 0 : i32
    %c0_i32_1 = arith.constant 0 : i32
    return %c0_i32, %c0_i32_0 : i32, i32
  }
  func.func @transform_10(%arg0: i32, %arg1: i32) -> (i32, i32, i32, i32) {
    %c0_i32 = arith.constant 0 : i32
    %c0_i32_0 = arith.constant 0 : i32
    %c0_i32_1 = arith.constant 0 : i32
    return %arg0, %arg1, %c0_i32, %c0_i32_0 : i32, i32, i32, i32
  }
}

</mosaic_0001>

<bundles_post_ra>
// kernel: convnext_block.1
= control target key start
LH: loop header
LB: loop body
LE: loop exit
PB: predicated region body
PF: predicated region fallthrough
CT: control target
= control target key end

     0   :  { %s4478_s13 = smov 0   ;;  %s4480_s14 = smov 0   ;;  %s9487_s0 = inlined_call_operand.vmem [shape: f32[2,22,24,128], index: 0, kind: input, shape index: {}]   ;;  %s9488_s1 = inlined_call_operand.vmem [shape: f32[7,7,128], index: 1, kind: input, shape index: {}]   ;;  %s9489_s2 = inlined_call_operand.vmem [shape: f32[1,128], index: 2, kind: input, shape index: {}]   ;;  %s9490_s3 = inlined_call_operand.vmem [shape: f32[1,128], index: 3, kind: input, shape index: {}]   ;;  %s9491_s4 = inlined_call_operand.vmem [shape: f32[1,128], index: 4, kind: input, shape index: {}]   ;;  %s9492_s5 = inlined_call_operand.vmem [shape: bf16[128,128], index: 5, kind: input, shape index: {}]   ;;  %s9493_s6 = inlined_call_operand.vmem [shape: f32[1,128], index: 6, kind: input, shape index: {}]   ;;  %s9494_s7 = inlined_call_operand.vmem [shape: bf16[128,128], index: 7, kind: input, shape index: {}]   ;;  %s9495_s8 = inlined_call_operand.vmem [shape: f32[1,128], index: 8, kind: input, shape index: {}]   ;;  %s9496_s9 = inlined_call_operand.vmem [shape: f32[1,128], index: 9, kind: input, shape index: {}]   ;;  %s9497_s10 = inlined_call_operand.vmem [shape: f32[2,16,16,128], index: 10, kind: output, shape index: {}]  }
   0x1   :  { %s4482_s15 = smov 0   ;;  %s4484_s16 = smov 0  }
   0x2   :  { %s4486_s17 = smov 0  }
   0x3 LB: > { %s29_s18 = sadd.s32 1, %s4413_s15  ;;  %s32_s19 = sadd.s32 1, %s4417_s16  ;;  %s4421_s17 = sphi %s4486_s17, %s20_s17   ;;  %s4417_s16 = sphi %s4484_s16, %s11233_s16   ;;  %s4413_s15 = sphi %s4482_s15, %s11232_s15   ;;  %s4409_s14 = sphi %s4480_s14, %s11231_s14   ;;  %s4405_s13 = sphi %s4478_s13, %s11230_s13  }
   0x4   : > { %p30_p0 = scmp.ge.s32.totalorder %s29_s18, 2  ;;  %p3832_p1 = scmp.ge.s32.totalorder %s4421_s17, 1 }
   0x5   : > { %p292_p2 = scmp.lt.s32.totalorder %s4421_s17, 5 }
   0x6   : > { %s11235_s18 = smov (%p30_p0, %s29_s18), 0  ;;  %s11237_s19 = smov (!%p30_p0, %s32_s19), %s4417_s16 }
   0x7   : > { %10046 = sst [smem:[#allocation7_spill]] %s11235_s18  ;;  %p293_p3 = pnand %p3832_p1, %p292_p2 }
   0x8   : > { %p34_p4 = scmp.ge.s32.totalorder %s11237_s19, 2 }
   0x9   : > { %296 = sbr.rel (%p293_p3) target bundleno = 1396 (0x574), region = 56 }
   0xa   : > { %s11239_s19 = smov (%p34_p4, %s11237_s19), 0 }
   0xb   : > { %10047 = sst [smem:[#allocation8_spill]] %s11239_s19 }
   0xe   : > { %s3833_s20 = sshll.u32 %s4405_s13, 3  ;;  %p329_p5 = scmp.lt.s32.totalorder %s4409_s14, 1 }
   0xf   : > { %p331_p6 = scmp.lt.s32.totalorder %s3833_s20, 15  ;;  %s4515_s21 = sand.u32 1, %s4405_s13 }
  0x10   : > { %s330_s22 = scalar_select %p329_p5, %s4409_s14, 1 }
  0x11   : > { %s11241_s20 = smov (!%p331_p6, %s3833_s20), 15  ;;  %p3837_p7 = scmp.ne.s32.totalorder %s4405_s13, 0 }
  0x12   : > { %s3835_s23 = sshll.u32 %s330_s22, 5  ;;  %s3834_s24 = sshll.u32 %s11241_s20, 1 }
  0x13   : > { %s335_s25 = sadd.s32 %s3835_s23, %s3834_s24  ;;  %344 = sbr.rel (%p3837_p7) target bundleno = 47 (0x2f), region = 60 }
  0x14   : > { %s3836_s26 = sshll.u32 %s335_s25, 3  ;;  %s345_s30 = smul.u32 (!%p3837_p7), 528, %s4409_s14 }
  0x15   : > { %s4521_s29 = scalar_lea.vmem %s9497_s10, %s3836_s26  ;;  %s347_s11 = smul.u32 (!%p3837_p7), 336, %s4515_s21 }
  0x16   : > { %s4529_s18 = scalar_lea.vmem (!%p3837_p7), %s9487_s0, %s345_s30  ;;  %s349_s19 = scalar_lea.sflag (!%p3837_p7), [#allocation3], %s4515_s21 }
  0x17   : > { %s4534_s20 = scalar_lea.vmem (!%p3837_p7), [#allocation2], %s347_s11 }
  0x18   : > { %v383_v0 = vld [vmem:[%s4529_s18] sm:$0xff]  ;;  %v385_v1 = vld [vmem:[%s4529_s18 + $0x8] sm:$0xff]  ;;  %v387_v2 = vld [vmem:[%s4529_s18 + $0x10] sm:$0xff] }
  0x19   : > { %384 = vst [vmem:[%s4534_s20] sm:$0xff] %v383_v0  ;;  %386 = vst [vmem:[%s4534_s20 + $0x8] sm:$0xff] %v385_v1  ;;  %v389_v3 = vld [vmem:[%s4529_s18 + $0x18] sm:$0xff]  ;;  %v391_v4 = vld [vmem:[%s4529_s18 + $0x20] sm:$0xff] }
  0x1a   : > { %388 = vst [vmem:[%s4534_s20 + $0x10] sm:$0xff] %v387_v2  ;;  %v393_v5 = vld [vmem:[%s4529_s18 + $0x28] sm:$0xff]  ;;  %390 = vst [vmem:[%s4534_s20 + $0x18] sm:$0xff] %v389_v3  ;;  %v395_v6 = vld [vmem:[%s4529_s18 + $0x30] sm:$0xff] }
  0x1b   : > { %392 = vst [vmem:[%s4534_s20 + $0x20] sm:$0xff] %v391_v4  ;;  %394 = vst [vmem:[%s4534_s20 + $0x28] sm:$0xff] %v393_v5  ;;  %v397_v7 = vld [vmem:[%s4529_s18 + $0x38] sm:$0xff]  ;;  %v399_v8 = vld [vmem:[%s4529_s18 + $0x40] sm:$0xff] }
  0x1c   : > { %396 = vst [vmem:[%s4534_s20 + $0x30] sm:$0xff] %v395_v6  ;;  %398 = vst [vmem:[%s4534_s20 + $0x38] sm:$0xff] %v397_v7  ;;  %v401_v9 = vld [vmem:[%s4529_s18 + $0x48] sm:$0xff]  ;;  %v403_v10 = vld [vmem:[%s4529_s18 + $0x50] sm:$0xff] }
  0x1d   : > { %400 = vst [vmem:[%s4534_s20 + $0x40] sm:$0xff] %v399_v8  ;;  %v405_v11 = vld [vmem:[%s4529_s18 + $0x58] sm:$0xff]  ;;  %402 = vst [vmem:[%s4534_s20 + $0x48] sm:$0xff] %v401_v9  ;;  %v407_v12 = vld [vmem:[%s4529_s18 + $0x60] sm:$0xff] }
  0x1e   : > { %404 = vst [vmem:[%s4534_s20 + $0x50] sm:$0xff] %v403_v10  ;;  %406 = vst [vmem:[%s4534_s20 + $0x58] sm:$0xff] %v405_v11  ;;  %v409_v13 = vld [vmem:[%s4529_s18 + $0x68] sm:$0xff]  ;;  %v411_v14 = vld [vmem:[%s4529_s18 + $0x70] sm:$0xff] }
  0x1f   : > { %408 = vst [vmem:[%s4534_s20 + $0x60] sm:$0xff] %v407_v12  ;;  %410 = vst [vmem:[%s4534_s20 + $0x68] sm:$0xff] %v409_v13  ;;  %v413_v15 = vld [vmem:[%s4529_s18 + $0x78] sm:$0xff]  ;;  %v415_v16 = vld [vmem:[%s4529_s18 + $0x80] sm:$0xff] }
  0x20   : > { %412 = vst [vmem:[%s4534_s20 + $0x70] sm:$0xff] %v411_v14  ;;  %v417_v17 = vld [vmem:[%s4529_s18 + $0x88] sm:$0xff]  ;;  %414 = vst [vmem:[%s4534_s20 + $0x78] sm:$0xff] %v413_v15  ;;  %v419_v18 = vld [vmem:[%s4529_s18 + $0x90] sm:$0xff] }
  0x21   : > { %416 = vst [vmem:[%s4534_s20 + $0x80] sm:$0xff] %v415_v16  ;;  %418 = vst [vmem:[%s4534_s20 + $0x88] sm:$0xff] %v417_v17  ;;  %v421_v19 = vld [vmem:[%s4529_s18 + $0x98] sm:$0xff]  ;;  %v423_v20 = vld [vmem:[%s4529_s18 + $0xa0] sm:$0xff] }
  0x22   : > { %420 = vst [vmem:[%s4534_s20 + $0x90] sm:$0xff] %v419_v18  ;;  %422 = vst [vmem:[%s4534_s20 + $0x98] sm:$0xff] %v421_v19  ;;  %v425_v21 = vld [vmem:[%s4529_s18 + $0xa8] sm:$0xff]  ;;  %v427_v22 = vld [vmem:[%s4529_s18 + $0xb0] sm:$0xff] }
  0x23   : > { %424 = vst [vmem:[%s4534_s20 + $0xa0] sm:$0xff] %v423_v20  ;;  %v429_v23 = vld [vmem:[%s4529_s18 + $0xb8] sm:$0xff]  ;;  %426 = vst [vmem:[%s4534_s20 + $0xa8] sm:$0xff] %v425_v21  ;;  %v431_v24 = vld [vmem:[%s4529_s18 + $0xc0] sm:$0xff] }
  0x24   : > { %428 = vst [vmem:[%s4534_s20 + $0xb0] sm:$0xff] %v427_v22  ;;  %430 = vst [vmem:[%s4534_s20 + $0xb8] sm:$0xff] %v429_v23  ;;  %v433_v25 = vld [vmem:[%s4529_s18 + $0xc8] sm:$0xff]  ;;  %v435_v26 = vld [vmem:[%s4529_s18 + $0xd0] sm:$0xff] }
  0x25   : > { %432 = vst [vmem:[%s4534_s20 + $0xc0] sm:$0xff] %v431_v24  ;;  %434 = vst [vmem:[%s4534_s20 + $0xc8] sm:$0xff] %v433_v25  ;;  %v437_v27 = vld [vmem:[%s4529_s18 + $0xd8] sm:$0xff]  ;;  %v439_v28 = vld [vmem:[%s4529_s18 + $0xe0] sm:$0xff] }
  0x26   : > { %436 = vst [vmem:[%s4534_s20 + $0xd0] sm:$0xff] %v435_v26  ;;  %v441_v29 = vld [vmem:[%s4529_s18 + $0xe8] sm:$0xff]  ;;  %438 = vst [vmem:[%s4534_s20 + $0xd8] sm:$0xff] %v437_v27  ;;  %v443_v30 = vld [vmem:[%s4529_s18 + $0xf0] sm:$0xff] }
  0x27   : > { %440 = vst [vmem:[%s4534_s20 + $0xe0] sm:$0xff] %v439_v28  ;;  %442 = vst [vmem:[%s4534_s20 + $0xe8] sm:$0xff] %v441_v29  ;;  %v445_v31 = vld [vmem:[%s4529_s18 + $0xf8] sm:$0xff]  ;;  %v447_v32 = vld [vmem:[%s4529_s18 + $0x100] sm:$0xff] }
  0x28   : > { %444 = vst [vmem:[%s4534_s20 + $0xf0] sm:$0xff] %v443_v30  ;;  %446 = vst [vmem:[%s4534_s20 + $0xf8] sm:$0xff] %v445_v31  ;;  %v449_v33 = vld [vmem:[%s4529_s18 + $0x108] sm:$0xff]  ;;  %v451_v34 = vld [vmem:[%s4529_s18 + $0x110] sm:$0xff] }
  0x29   : > { %448 = vst [vmem:[%s4534_s20 + $0x100] sm:$0xff] %v447_v32  ;;  %v453_v35 = vld [vmem:[%s4529_s18 + $0x118] sm:$0xff]  ;;  %450 = vst [vmem:[%s4534_s20 + $0x108] sm:$0xff] %v449_v33  ;;  %v455_v36 = vld [vmem:[%s4529_s18 + $0x120] sm:$0xff] }
  0x2a   : > { %452 = vst [vmem:[%s4534_s20 + $0x110] sm:$0xff] %v451_v34  ;;  %454 = vst [vmem:[%s4534_s20 + $0x118] sm:$0xff] %v453_v35  ;;  %v457_v37 = vld [vmem:[%s4529_s18 + $0x128] sm:$0xff]  ;;  %v459_v38 = vld [vmem:[%s4529_s18 + $0x130] sm:$0xff] }
  0x2b   : > { %456 = vst [vmem:[%s4534_s20 + $0x120] sm:$0xff] %v455_v36  ;;  %458 = vst [vmem:[%s4534_s20 + $0x128] sm:$0xff] %v457_v37  ;;  %v461_v39 = vld [vmem:[%s4529_s18 + $0x138] sm:$0xff]  ;;  %v463_v40 = vld [vmem:[%s4529_s18 + $0x140] sm:$0xff] }
  0x2c   : > { %460 = vst [vmem:[%s4534_s20 + $0x130] sm:$0xff] %v459_v38  ;;  %v465_v41 = vld [vmem:[%s4529_s18 + $0x148] sm:$0xff]  ;;  %462 = vst [vmem:[%s4534_s20 + $0x138] sm:$0xff] %v461_v39 }
  0x2d   : > { %464 = vst [vmem:[%s4534_s20 + $0x140] sm:$0xff] %v463_v40  ;;  %466 = vst [vmem:[%s4534_s20 + $0x148] sm:$0xff] %v465_v41 }
  0x2e   : > { %474 = vsyncadd %s349_s19, 5376 }
  0x2f PF: > { %s475_s22 = sadd.s32 1, %s4405_s13 }
  0x30   : > { %p3838_p8 = scmp.ge.s32.totalorder %s475_s22, 2 }
  0x31   : > { %s480_s23 = ssub.s32 (!%p3838_p8), 1, %s4515_s21  ;;  %s3766_s24 = smul.u32 (!%p3838_p8), 192, %s4405_s13 }
  0x32   : > { %479 = sbr.rel (%p3838_p8) target bundleno = 78 (0x4e), region = 98 }
  0x33   : > { %s3767_s25 = smul.u32 (!%p3838_p8), 528, %s4409_s14  ;;  %s488_s14 = scalar_lea.sflag (!%p3838_p8), [#allocation3], %s480_s23 }
  0x34   : > { %s486_s26 = smul.u32 (!%p3838_p8), 336, %s480_s23 }
  0x35   : > { %s3768_s18 = sadd.s32 (!%p3838_p8), %s3767_s25, %s3766_s24 }
  0x36   : > { %s4627_s30 = scalar_lea.vmem (!%p3838_p8), %s9487_s0, %s3768_s18  ;;  %s4632_s13 = scalar_lea.vmem (!%p3838_p8), [#allocation2], %s486_s26 }
  0x37   : > { %v3839_v42 = vld [vmem:[%s4627_s30 + $0xc0] sm:$0xff]  ;;  %v3840_v43 = vld [vmem:[%s4627_s30 + $0xc8] sm:$0xff]  ;;  %v3841_v44 = vld [vmem:[%s4627_s30 + $0xd0] sm:$0xff] }
  0x38   : > { %523 = vst [vmem:[%s4632_s13] sm:$0xff] %v3839_v42  ;;  %525 = vst [vmem:[%s4632_s13 + $0x8] sm:$0xff] %v3840_v43  ;;  %v3842_v45 = vld [vmem:[%s4627_s30 + $0xd8] sm:$0xff]  ;;  %v3843_v46 = vld [vmem:[%s4627_s30 + $0xe0] sm:$0xff] }
  0x39   : > { %527 = vst [vmem:[%s4632_s13 + $0x10] sm:$0xff] %v3841_v44  ;;  %v3844_v47 = vld [vmem:[%s4627_s30 + $0xe8] sm:$0xff]  ;;  %529 = vst [vmem:[%s4632_s13 + $0x18] sm:$0xff] %v3842_v45  ;;  %v3845_v48 = vld [vmem:[%s4627_s30 + $0xf0] sm:$0xff] }
  0x3a   : > { %531 = vst [vmem:[%s4632_s13 + $0x20] sm:$0xff] %v3843_v46  ;;  %533 = vst [vmem:[%s4632_s13 + $0x28] sm:$0xff] %v3844_v47  ;;  %v3846_v49 = vld [vmem:[%s4627_s30 + $0xf8] sm:$0xff]  ;;  %v3847_v50 = vld [vmem:[%s4627_s30 + $0x100] sm:$0xff] }
  0x3b   : > { %535 = vst [vmem:[%s4632_s13 + $0x30] sm:$0xff] %v3845_v48  ;;  %537 = vst [vmem:[%s4632_s13 + $0x38] sm:$0xff] %v3846_v49  ;;  %v3848_v51 = vld [vmem:[%s4627_s30 + $0x108] sm:$0xff]  ;;  %v3849_v52 = vld [vmem:[%s4627_s30 + $0x110] sm:$0xff] }
  0x3c   : > { %539 = vst [vmem:[%s4632_s13 + $0x40] sm:$0xff] %v3847_v50  ;;  %v3850_v53 = vld [vmem:[%s4627_s30 + $0x118] sm:$0xff]  ;;  %541 = vst [vmem:[%s4632_s13 + $0x48] sm:$0xff] %v3848_v51  ;;  %v3851_v54 = vld [vmem:[%s4627_s30 + $0x120] sm:$0xff] }
  0x3d   : > { %543 = vst [vmem:[%s4632_s13 + $0x50] sm:$0xff] %v3849_v52  ;;  %545 = vst [vmem:[%s4632_s13 + $0x58] sm:$0xff] %v3850_v53  ;;  %v3852_v55 = vld [vmem:[%s4627_s30 + $0x128] sm:$0xff]  ;;  %v3853_v56 = vld [vmem:[%s4627_s30 + $0x130] sm:$0xff] }
  0x3e   : > { %547 = vst [vmem:[%s4632_s13 + $0x60] sm:$0xff] %v3851_v54  ;;  %549 = vst [vmem:[%s4632_s13 + $0x68] sm:$0xff] %v3852_v55  ;;  %v3854_v57 = vld [vmem:[%s4627_s30 + $0x138] sm:$0xff]  ;;  %v3855_v58 = vld [vmem:[%s4627_s30 + $0x140] sm:$0xff] }
  0x3f   : > { %551 = vst [vmem:[%s4632_s13 + $0x70] sm:$0xff] %v3853_v56  ;;  %v3856_v59 = vld [vmem:[%s4627_s30 + $0x148] sm:$0xff]  ;;  %553 = vst [vmem:[%s4632_s13 + $0x78] sm:$0xff] %v3854_v57  ;;  %v3857_v60 = vld [vmem:[%s4627_s30 + $0x150] sm:$0xff] }
  0x40   : > { %555 = vst [vmem:[%s4632_s13 + $0x80] sm:$0xff] %v3855_v58  ;;  %557 = vst [vmem:[%s4632_s13 + $0x88] sm:$0xff] %v3856_v59  ;;  %v3858_v61 = vld [vmem:[%s4627_s30 + $0x158] sm:$0xff]  ;;  %v3859_v62 = vld [vmem:[%s4627_s30 + $0x160] sm:$0xff] }
  0x41   : > { %559 = vst [vmem:[%s4632_s13 + $0x90] sm:$0xff] %v3857_v60  ;;  %561 = vst [vmem:[%s4632_s13 + $0x98] sm:$0xff] %v3858_v61  ;;  %v3860_v63 = vld [vmem:[%s4627_s30 + $0x168] sm:$0xff]  ;;  %v3861_v0 = vld [vmem:[%s4627_s30 + $0x170] sm:$0xff] }
  0x42   : > { %563 = vst [vmem:[%s4632_s13 + $0xa0] sm:$0xff] %v3859_v62  ;;  %v3862_v1 = vld [vmem:[%s4627_s30 + $0x178] sm:$0xff]  ;;  %565 = vst [vmem:[%s4632_s13 + $0xa8] sm:$0xff] %v3860_v63  ;;  %v3863_v2 = vld [vmem:[%s4627_s30 + $0x180] sm:$0xff] }
  0x43   : > { %567 = vst [vmem:[%s4632_s13 + $0xb0] sm:$0xff] %v3861_v0  ;;  %569 = vst [vmem:[%s4632_s13 + $0xb8] sm:$0xff] %v3862_v1  ;;  %v3864_v3 = vld [vmem:[%s4627_s30 + $0x188] sm:$0xff]  ;;  %v3865_v4 = vld [vmem:[%s4627_s30 + $0x190] sm:$0xff] }
  0x44   : > { %571 = vst [vmem:[%s4632_s13 + $0xc0] sm:$0xff] %v3863_v2  ;;  %573 = vst [vmem:[%s4632_s13 + $0xc8] sm:$0xff] %v3864_v3  ;;  %v3866_v5 = vld [vmem:[%s4627_s30 + $0x198] sm:$0xff]  ;;  %v3867_v6 = vld [vmem:[%s4627_s30 + $0x1a0] sm:$0xff] }
  0x45   : > { %575 = vst [vmem:[%s4632_s13 + $0xd0] sm:$0xff] %v3865_v4  ;;  %v3868_v7 = vld [vmem:[%s4627_s30 + $0x1a8] sm:$0xff]  ;;  %577 = vst [vmem:[%s4632_s13 + $0xd8] sm:$0xff] %v3866_v5  ;;  %v3869_v8 = vld [vmem:[%s4627_s30 + $0x1b0] sm:$0xff] }
  0x46   : > { %579 = vst [vmem:[%s4632_s13 + $0xe0] sm:$0xff] %v3867_v6  ;;  %581 = vst [vmem:[%s4632_s13 + $0xe8] sm:$0xff] %v3868_v7  ;;  %v3870_v9 = vld [vmem:[%s4627_s30 + $0x1b8] sm:$0xff]  ;;  %v3871_v10 = vld [vmem:[%s4627_s30 + $0x1c0] sm:$0xff] }
  0x47   : > { %583 = vst [vmem:[%s4632_s13 + $0xf0] sm:$0xff] %v3869_v8  ;;  %585 = vst [vmem:[%s4632_s13 + $0xf8] sm:$0xff] %v3870_v9  ;;  %v3872_v11 = vld [vmem:[%s4627_s30 + $0x1c8] sm:$0xff]  ;;  %v3873_v12 = vld [vmem:[%s4627_s30 + $0x1d0] sm:$0xff] }
  0x48   : > { %587 = vst [vmem:[%s4632_s13 + $0x100] sm:$0xff] %v3871_v10  ;;  %v3874_v13 = vld [vmem:[%s4627_s30 + $0x1d8] sm:$0xff]  ;;  %589 = vst [vmem:[%s4632_s13 + $0x108] sm:$0xff] %v3872_v11  ;;  %v3875_v14 = vld [vmem:[%s4627_s30 + $0x1e0] sm:$0xff] }
  0x49   : > { %591 = vst [vmem:[%s4632_s13 + $0x110] sm:$0xff] %v3873_v12  ;;  %593 = vst [vmem:[%s4632_s13 + $0x118] sm:$0xff] %v3874_v13  ;;  %v3876_v15 = vld [vmem:[%s4627_s30 + $0x1e8] sm:$0xff]  ;;  %v3877_v16 = vld [vmem:[%s4627_s30 + $0x1f0] sm:$0xff] }
  0x4a   : > { %595 = vst [vmem:[%s4632_s13 + $0x120] sm:$0xff] %v3875_v14  ;;  %597 = vst [vmem:[%s4632_s13 + $0x128] sm:$0xff] %v3876_v15  ;;  %v3878_v17 = vld [vmem:[%s4627_s30 + $0x1f8] sm:$0xff]  ;;  %v3879_v18 = vld [vmem:[%s4627_s30 + $0x200] sm:$0xff] }
  0x4b   : > { %599 = vst [vmem:[%s4632_s13 + $0x130] sm:$0xff] %v3877_v16  ;;  %v3880_v19 = vld [vmem:[%s4627_s30 + $0x208] sm:$0xff]  ;;  %601 = vst [vmem:[%s4632_s13 + $0x138] sm:$0xff] %v3878_v17 }
  0x4c   : > { %603 = vst [vmem:[%s4632_s13 + $0x140] sm:$0xff] %v3879_v18  ;;  %605 = vst [vmem:[%s4632_s13 + $0x148] sm:$0xff] %v3880_v19 }
  0x4d   : > { %613 = vsyncadd %s488_s14, 5376 }
  0x4e PF: > { %s614_s11 = smul.u32 336, %s4515_s21  ;;  %s616_s20 = scalar_lea.sflag [#allocation3], %s4515_s21 }
  0x50   : > { %s4718_s12 = scalar_lea.vmem [#allocation2], %s614_s11 }
  0x51   : > { %4401 = dma.done.wait %s616_s20, 5376 }
  0x52   : > { %4402 = vsyncadd %s616_s20, 4294961920  ;;  %v4742_v26 = vld [vmem:[%s9488_s1] ss:$0 sm:$0xff]  ;;  %v4747_v27 = vld [vmem:[%s9488_s1 + $0x8] ss:$0 sm:$0xff]  ;;  %v970_v28 = vlaneseq }
  0x53   : > { %v4722_v20 = vld [vmem:[%s4718_s12] sm:$0xff]  ;;  %v4725_v21 = vld [vmem:[%s4718_s12 + $0x8] sm:$0xff]  ;;  %v4728_v22 = vld [vmem:[%s4718_s12 + $0x18] sm:$0xff] }
  0x54   : > { %v4731_v23 = vld [vmem:[%s4718_s12 + $0x20] sm:$0xff]  ;;  %v4734_v24 = vld [vmem:[%s4718_s12 + $0x30] sm:$0xff]  ;;  %v4737_v25 = vld [vmem:[%s4718_s12 + $0x38] sm:$0xff]  ;;  %v668_v29 = vmul.f32 %v4742_v26, %v4722_v20  ;;  %v669_v30 = vmul.f32 %v4742_v26, %v4725_v21  ;;  %v670_v31 = vmul.f32 %v4742_v26, %v4728_v22  ;;  %v706_v36 = vmul.f32 %v4747_v27, %v4728_v22 }
  0x55   : > { %v671_v32 = vmul.f32 %v4742_v26, %v4731_v23  ;;  %v4760_v33 = vld [vmem:[%s9488_s1 + $0x10] ss:$0 sm:$0xff]  ;;  %v672_v34 = vmul.f32 %v4742_v26, %v4734_v24  ;;  %v4765_v35 = vld [vmem:[%s4718_s12 + $0x48] sm:$0xff]  ;;  %v707_v37 = vmul.f32 %v4747_v27, %v4731_v23  ;;  %v708_v38 = vmul.f32 %v4747_v27, %v4734_v24  ;;  %v4798_v52 = vld [vmem:[%s4718_s12 + $0x78] sm:$0xff] }
  0x56   : > { %v709_v39 = vmul.f32 %v4747_v27, %v4737_v25  ;;  %v710_v40 = vmul.f32 %v4747_v27, %v4765_v35  ;;  %v744_v41 = vmul.f32 %v4760_v33, %v4734_v24  ;;  %v745_v42 = vmul.f32 %v4760_v33, %v4737_v25  ;;  %v4784_v43 = vld [vmem:[%s9488_s1 + $0x18] ss:$0 sm:$0xff]  ;;  %v4789_v45 = vld [vmem:[%s4718_s12 + $0x60] sm:$0xff]  ;;  %v4812_v59 = vld [vmem:[%s4718_s12 + $0x90] sm:$0xff] }
  0x57   : > { %10048 = vst [vmem:[#allocation9_spill] sm:$0xff] %v4784_v43  ;;  %v4786_v44 = vshrl.u32 %v970_v28, 7  ;;  %v722_v46 = vadd.f32 %v706_v36, %v668_v29  ;;  %v723_v47 = vadd.f32 %v707_v37, %v669_v30  ;;  %v724_v48 = vadd.f32 %v708_v38, %v670_v31  ;;  %v4807_v56 = vld [vmem:[%s9488_s1 + $0x20] ss:$0 sm:$0xff]  ;;  %v4817_v61 = vld [vmem:[%s9488_s1 + $0x28] ss:$0 sm:$0xff] }
  0x58   : > { %v4791_v49 = vadd.f32 %v709_v39, %v671_v32  ;;  %v4793_v50 = vadd.f32 %v710_v40, %v672_v34  ;;  %v746_v51 = vmul.f32 %v4760_v33, %v4765_v35  ;;  %v782_v55 = vmul.f32 %v4784_v43, %v4765_v35  ;;  %10050 = vst [vmem:[#allocation11_spill] sm:$0xff] %v4807_v56  ;;  %v4828_v2 = vld [vmem:[%s9488_s1 + $0x30] ss:$0 sm:$0xff]  ;;  %v4843_v13 = vld [vmem:[%s4718_s12 + $0xa8] sm:$0xff]  ;;  %v4859_v28 = vld [vmem:[%s9488_s1 + $0x1] ss:$0 sm:$0xff] }
  0x59   : > { %v760_v53 = vadd.f32 %v744_v41, %v722_v46  ;;  %v4800_v54 = vadd.f32 %v745_v42, %v723_v47  ;;  %v784_v58 = vmul.f32 %v4784_v43, %v4789_v45  ;;  %10051 = vst [vmem:[#allocation12_spill] sm:$0xff] %v4817_v61  ;;  %v928_v62 = vrot.slane %v4722_v20, 1  ;;  %10052 = vst [vmem:[#allocation13_spill] sm:$0xff] %v4828_v2  ;;  %v4840_v12 = vld [vmem:[%s4718_s12 + $0x50] sm:$0xff]  ;;  %v4848_v15 = vld [vmem:[%s4718_s12 + $0x68] sm:$0xff] }
  0x5a   : > { %10049 = vst [vmem:[#allocation10_spill] sm:$0xff] %v4791_v49  ;;  %v762_v57 = vadd.f32 %v746_v51, %v724_v48  ;;  %vm972_vm0 = vcmp.lt.s32.totalorder %v4786_v44, 7  ;;  %v820_v0 = vmul.f32 %v4807_v56, %v4789_v45  ;;  %v822_v1 = vmul.f32 %v4807_v56, %v4798_v52  ;;  %10053 = vst [vmem:[#allocation14_spill] sm:$0xff] %v4859_v28  ;;  %v4870_v32 = vld [vmem:[%s9488_s1 + $0x9] ss:$0 sm:$0xff]  ;;  %v4886_v40 = vld [vmem:[%s4718_s12 + $0x80] sm:$0xff] }
  0x5b   : > { %v798_v60 = vadd.f32 %v782_v55, %v760_v53  ;;  %v9503_v3 = vrot.slane %v4725_v21, 1  ;;  %v931_v4 = vrot.slane %v4728_v22, 1  ;;  %v9502_v5 = vrot.slane %v4731_v23, 1  ;;  %10054 = vst [vmem:[#allocation15_spill] sm:$0xff] %v4870_v32  ;;  %v4883_v39 = vld [vmem:[%s9488_s1 + $0x11] ss:$0 sm:$0xff] }
  0x5c   : > { %v800_v63 = vadd.f32 %v784_v58, %v762_v57  ;;  %v934_v6 = vrot.slane %v4734_v24, 1  ;;  %v9504_v7 = vrot.slane %v4737_v25, 1  ;;  %v858_v10 = vmul.f32 %v4817_v61, %v4798_v52  ;;  %10056 = vst [vmem:[#allocation17_spill] sm:$0xff] %v4883_v39  ;;  %v4890_v42 = vld [vmem:[%s4718_s12 + $0x98] sm:$0xff] }
  0x5d   : > { %v836_v8 = vadd.f32 %v820_v0, %v798_v60  ;;  %v860_v11 = vmul.f32 %v4817_v61, %v4812_v59  ;;  %v896_v14 = vmul.f32 %v4828_v2, %v4812_v59  ;;  %v937_v17 = vrot.slane %v4765_v35, 1  ;;  %v4904_v53 = vld [vmem:[%s9488_s1 + $0x19] ss:$0 sm:$0xff] }
  0x5e   : > { %v838_v9 = vadd.f32 %v822_v1, %v800_v63  ;;  %v9501_v18 = vrot.slane %v4840_v12, 1  ;;  %v1000_v19 = vsel %vm972_vm0, %v928_v62, %v9503_v3  ;;  %v940_v29 = vrot.slane %v4789_v45, 1  ;;  %10058 = vst [vmem:[#allocation19_spill] sm:$0xff] %v4904_v53  ;;  %v4921_v1 = vld [vmem:[%s9488_s1 + $0x21] ss:$0 sm:$0xff] }
  0x5f   : > { %v874_v16 = vadd.f32 %v858_v10, %v836_v8  ;;  %v9500_v30 = vrot.slane %v4848_v15, 1  ;;  %v998_v31 = vsel %vm972_vm0, %v931_v4, %v9502_v5  ;;  %v898_v36 = vmul.f32 %v4828_v2, %v4843_v13  ;;  %10060 = vst [vmem:[#allocation21_spill] sm:$0xff] %v4921_v1  ;;  %v4926_v4 = vld [vmem:[%s9488_s1 + $0x29] ss:$0 sm:$0xff] }
  0x60   : > { %v876_v34 = vadd.f32 %v860_v11, %v838_v9  ;;  %v4878_v38 = vsel %vm972_vm0, %v934_v6, %v9504_v7  ;;  %v1006_v41 = vmul.f32 %v4859_v28, %v1000_v19  ;;  %v943_v46 = vrot.slane %v4798_v52, 1  ;;  %10061 = vst [vmem:[#allocation22_spill] sm:$0xff] %v4926_v4  ;;  %v4949_v19 = vld [vmem:[%s9488_s1 + $0x31] ss:$0 sm:$0xff] }
  0x61   : > { %v912_v37 = vadd.f32 %v896_v14, %v874_v16  ;;  %10055 = vst [vmem:[#allocation16_spill] sm:$0xff] %v4878_v38  ;;  %v9499_v47 = vrot.slane %v4886_v40, 1  ;;  %v4898_v48 = vsel %vm972_vm0, %v937_v17, %v9501_v18  ;;  %v1043_v51 = vmul.f32 %v4870_v32, %v998_v31  ;;  %10064 = vst [vmem:[#allocation25_spill] sm:$0xff] %v4949_v19 }
  0x62   : > { %10057 = vst [vmem:[#allocation18_spill] sm:$0xff] %v4898_v48  ;;  %v946_v55 = vrot.slane %v4812_v59, 1  ;;  %v9498_v57 = vrot.slane %v4890_v42, 1  ;;  %v1080_v60 = vmul.f32 %v4883_v39, %v4878_v38  ;;  %vm1302_vm1 = vcmp.lt.s32.totalorder %v4786_v44, 6 }
  0x63   : > { %v1022_v58 = vadd.f32 %v1006_v41, %v912_v37  ;;  %v914_v62 = vadd.f32 %v898_v36, %v876_v34  ;;  %v4915_v63 = vsel %vm972_vm0, %v940_v29, %v9500_v30  ;;  %v1008_v0 = vmul.f32 %v4859_v28, %v998_v31 }
  0x64   : > { %10059 = vst [vmem:[#allocation20_spill] sm:$0xff] %v4915_v63  ;;  %v1117_v8 = vmul.f32 %v4904_v53, %v4898_v48  ;;  %v4934_v9 = vsel %vm972_vm0, %v943_v46, %v9499_v47  ;;  %v4940_v10 = vsel %vm972_vm0, %v946_v55, %v9498_v57  ;;  %v1154_v14 = vmul.f32 %v4921_v1, %v4915_v63 }
  0x65   : > { %v1059_v6 = vadd.f32 %v1043_v51, %v1022_v58  ;;  %10062 = vst [vmem:[#allocation23_spill] sm:$0xff] %v4934_v9  ;;  %10063 = vst [vmem:[#allocation24_spill] sm:$0xff] %v4940_v10  ;;  %v1024_v16 = vadd.f32 %v1008_v0, %v914_v62  ;;  %v1045_v17 = vmul.f32 %v4870_v32, %v4878_v38  ;;  %v1260_v29 = vrot.slane %v4722_v20, 2 }
  0x66   : > { %v9505_v31 = vrot.slane %v4725_v21, 2  ;;  %v1191_v36 = vmul.f32 %v4926_v4, %v4934_v9  ;;  %v1263_v37 = vrot.slane %v4728_v22, 2  ;;  %v9506_v41 = vrot.slane %v4731_v23, 2 }
  0x67   : > { %v1096_v11 = vadd.f32 %v1080_v60, %v1059_v6  ;;  %v1266_v46 = vrot.slane %v4734_v24, 2  ;;  %v9509_v51 = vrot.slane %v4737_v25, 2  ;;  %v1269_v55 = vrot.slane %v4765_v35, 2  ;;  %v4964_v60 = vld [vmem:[%s9488_s1 + $0x2] ss:$0 sm:$0xff] }
  0x68   : > { %v9508_v58 = vrot.slane %v4840_v12, 2  ;;  %10065 = vst [vmem:[#allocation26_spill] sm:$0xff] %v4964_v60  ;;  %v1228_v0 = vmul.f32 %v4949_v19, %v4940_v10  ;;  %v1272_v6 = vrot.slane %v4789_v45, 2  ;;  %v1275_v57 = vrot.slane %v4798_v52, 2 }
  0x69   : > { %v1133_v34 = vadd.f32 %v1117_v8, %v1096_v11  ;;  %v9507_v8 = vrot.slane %v4848_v15, 2  ;;  %v4973_v11 = vld [vmem:[%s9488_s1 + $0xa] ss:$0 sm:$0xff]  ;;  %v9516_v47 = vrot.slane %v4886_v40, 2  ;;  %v1061_v18 = vadd.f32 %v1045_v17, %v1024_v16  ;;  %v5003_v16 = vld [vmem:[%s9488_s1 + $0x1a] ss:$0 sm:$0xff] }
  0x6a   : > { %10066 = vst [vmem:[#allocation27_spill] sm:$0xff] %v4973_v11  ;;  %v4988_v5 = vsel %vm1302_vm1, %v1266_v46, %v9509_v51  ;;  %v4994_v3 = vsel %vm1302_vm1, %v1263_v37, %v9506_v41  ;;  %v1330_v7 = vsel %vm1302_vm1, %v1260_v29, %v9505_v31  ;;  %10069 = vst [vmem:[#allocation30_spill] sm:$0xff] %v5003_v16  ;;  %vm1632_vm2 = vcmp.lt.s32.totalorder %v4786_v44, 5 }
  0x6b   : > { %v1170_v62 = vadd.f32 %v1154_v14, %v1133_v34  ;;  %v4980_v14 = vld [vmem:[%s9488_s1 + $0x12] ss:$0 sm:$0xff]  ;;  %v1082_v34 = vmul.f32 %v4883_v39, %v4898_v48  ;;  %10068 = vst [vmem:[#allocation29_spill] sm:$0xff] %v4988_v5  ;;  %v5010_v46 = vsel %vm1302_vm1, %v1269_v55, %v9508_v58  ;;  %v1373_v37 = vmul.f32 %v4973_v11, %v4994_v3 }
  0x6c   : > { %10067 = vst [vmem:[#allocation28_spill] sm:$0xff] %v4980_v14  ;;  %10070 = vst [vmem:[#allocation31_spill] sm:$0xff] %v5010_v46  ;;  %v1119_v29 = vmul.f32 %v4904_v53, %v4915_v63  ;;  %v1410_v31 = vmul.f32 %v4980_v14, %v4988_v5  ;;  %v5024_v55 = vsel %vm1302_vm1, %v1272_v6, %v9507_v8  ;;  %v1590_v51 = vrot.slane %v4722_v20, 3 }
  0x6d   : > { %v1207_v30 = vadd.f32 %v1191_v36, %v1170_v62  ;;  %v1336_v36 = vmul.f32 %v4964_v60, %v1330_v7  ;;  %v1098_v41 = vadd.f32 %v1082_v34, %v1061_v18  ;;  %10071 = vst [vmem:[#allocation32_spill] sm:$0xff] %v5024_v55  ;;  %v1447_v18 = vmul.f32 %v5003_v16, %v5010_v46 }
  0x6e   : > { %v674_v34 = vmul.f32 %v4742_v26, %v4765_v35  ;;  %v1156_v6 = vmul.f32 %v4921_v1, %v4934_v9  ;;  %v5044_v8 = vsel %vm1302_vm1, %v1275_v57, %v9516_v47  ;;  %v5056_v9 = vld [vmem:[%s4718_s12 + $0xb0] sm:$0xff]  ;;  %v10076_v48 = vrot.slane %v4890_v42, 2 }
  0x6f   : > { %v1244_v17 = vadd.f32 %v1228_v0, %v1207_v30  ;;  %v1278_v30 = vrot.slane %v4812_v59, 2  ;;  %v5029_v0 = vld [vmem:[%s9488_s1 + $0x22] ss:$0 sm:$0xff]  ;;  %10073 = vst [vmem:[#allocation34_spill] sm:$0xff] %v5044_v8  ;;  %10075 = vst [vmem:[#allocation36_spill] sm:$0xff] %v5056_v9  ;;  %v1135_v63 = vadd.f32 %v1119_v29, %v1098_v41  ;;  %v949_v7 = vrot.slane %v4843_v13, 1 }
  0x70   : > { %10072 = vst [vmem:[#allocation33_spill] sm:$0xff] %v5029_v0  ;;  %v1484_v58 = vmul.f32 %v5029_v0, %v5024_v55  ;;  %v5080_v1 = vld [vmem:[%s9488_s1 + $0x3] ss:$0 sm:$0xff]  ;;  %v1193_v47 = vmul.f32 %v4926_v4, %v4940_v10  ;;  %v10081_v32 = vrot.slane %v4731_v23, 3  ;;  %v10083_v10 = vrot.slane %v5056_v9, 1 }
  0x71   : > { %v1352_v62 = vadd.f32 %v1336_v36, %v1244_v17  ;;  %v712_v36 = vmul.f32 %v4747_v27, %v4789_v45  ;;  %v5062_v57 = vsel %vm1302_vm1, %v1278_v30, %v10076_v48  ;;  %v1596_v48 = vrot.slane %v4734_v24, 3  ;;  %10079 = vst [vmem:[#allocation39_spill] sm:$0xff] %v5080_v1 }
  0x72   : > { %10077 = vst [vmem:[#allocation37_spill] sm:$0xff] %v5062_v57  ;;  %v1172_v49 = vadd.f32 %v1156_v6, %v1135_v63  ;;  %v1599_v30 = vrot.slane %v4765_v35, 3  ;;  %v5107_v63 = vsel %vm972_vm0, %v949_v7, %v10083_v10  ;;  %v10085_v39 = vrot.slane %v4737_v25, 3  ;;  %v5123_v10 = vld [vmem:[%s9488_s1 + $0x13] ss:$0 sm:$0xff] }
  0x73   : > { %v1389_v17 = vadd.f32 %v1373_v37, %v1352_v62  ;;  %v5049_v37 = vld [vmem:[%s9488_s1 + $0x2a] ss:$0 sm:$0xff]  ;;  %10084 = vst [vmem:[#allocation41_spill] sm:$0xff] %v5107_v63  ;;  %10087 = vst [vmem:[#allocation43_spill] sm:$0xff] %v5123_v10  ;;  %v1605_v7 = vrot.slane %v4798_v52, 3  ;;  %vm1962_vm3 = vcmp.lt.s32.totalorder %v4786_v44, 4 }
  0x74   : > { %10074 = vst [vmem:[#allocation35_spill] sm:$0xff] %v5049_v37  ;;  %v1521_v29 = vmul.f32 %v5049_v37, %v5044_v8  ;;  %vm2292_vm4 = vcmp.lt.s32.totalorder %v4786_v44, 3  ;;  %vm2622_vm5 = vcmp.lt.s32.totalorder %v4786_v44, 2 }
  0x75   : > { %v1426_v62 = vadd.f32 %v1410_v31, %v1389_v17  ;;  %v5067_v31 = vld [vmem:[%s9488_s1 + $0x32] ss:$0 sm:$0xff]  ;;  %v1593_v17 = vrot.slane %v4728_v22, 3 }
  0x76   : > { %10078 = vst [vmem:[#allocation38_spill] sm:$0xff] %v5067_v31  ;;  %v1558_v38 = vmul.f32 %v5067_v31, %v5062_v57 }
  0x77   : > { %v1463_v41 = vadd.f32 %v1447_v18, %v1426_v62  ;;  %v10080_v18 = vrot.slane %v4725_v21, 3  ;;  %v5096_v28 = vsel %vm1632_vm2, %v1593_v17, %v10081_v32  ;;  %v1602_v32 = vrot.slane %v4789_v45, 3 }
  0x78   : > { %v1209_v17 = vadd.f32 %v1193_v47, %v1172_v49  ;;  %v5150_v47 = vmul.f32 %v4742_v26, %v4737_v25  ;;  %v783_v26 = vmul.f32 %v4784_v43, %v4840_v12 }
  0x79   : > { %v1500_v53 = vadd.f32 %v1484_v58, %v1463_v41  ;;  %v1660_v62 = vsel %vm1632_vm2, %v1590_v51, %v10080_v18  ;;  %v5101_v58 = vld [vmem:[%s9488_s1 + $0xb] ss:$0 sm:$0xff]  ;;  %v728_v41 = vadd.f32 %v712_v36, %v674_v34  ;;  %v748_v18 = vmul.f32 %v4760_v33, %v4789_v45 }
  0x7a   : > { %10082 = vst [vmem:[#allocation40_spill] sm:$0xff] %v5101_v58  ;;  %v1666_v6 = vmul.f32 %v5080_v1, %v1660_v62  ;;  %v5118_v34 = vsel %vm1632_vm2, %v1596_v48, %v10085_v39  ;;  %v750_v62 = vmul.f32 %v4760_v33, %v4798_v52  ;;  %v1230_v39 = vmul.f32 %v4949_v19, %v5107_v63 }
  0x7b   : > { %v1537_v51 = vadd.f32 %v1521_v29, %v1500_v53  ;;  %10086 = vst [vmem:[#allocation42_spill] sm:$0xff] %v5118_v34  ;;  %v1703_v29 = vmul.f32 %v5101_v58, %v5096_v28  ;;  %v10088_v48 = vrot.slane %v4840_v12, 3  ;;  %v1740_v49 = vmul.f32 %v5123_v10, %v5118_v34  ;;  %10091 = vst [vmem:[#allocation46_spill] sm:$0xff] %v5150_v47 }
  0x7c   : > { %v1246_v36 = vadd.f32 %v1230_v39, %v1209_v17  ;;  %v1920_v19 = vrot.slane %v4722_v20, 4  ;;  %v5186_v56 = vadd.f32 %v750_v62, %v728_v41  ;;  %v1923_v41 = vrot.slane %v4728_v22, 4 }
  0x7d   : > { %v1574_v53 = vadd.f32 %v1558_v38, %v1537_v51  ;;  %v5137_v4 = vsel %vm1632_vm2, %v1599_v30, %v10088_v48  ;;  %v5142_v38 = vld [vmem:[%s9488_s1 + $0x1b] ss:$0 sm:$0xff]  ;;  %v1608_v51 = vrot.slane %v4812_v59, 3  ;;  %v5153_v30 = vadd.f32 %v748_v18, %v4793_v50 }
  0x7e   : > { %10089 = vst [vmem:[#allocation44_spill] sm:$0xff] %v5137_v4  ;;  %10090 = vst [vmem:[#allocation45_spill] sm:$0xff] %v5142_v38  ;;  %v10093_v48 = vrot.slane %v4848_v15, 3  ;;  %v1926_v39 = vrot.slane %v4734_v24, 4  ;;  %v10103_v47 = vrot.slane %v4725_v21, 4 }
  0x7f   : > { %v1682_v2 = vadd.f32 %v1666_v6, %v1574_v53  ;;  %10092 = vst [vmem:[#allocation47_spill] sm:$0xff] %v5153_v30  ;;  %v5164_v6 = vld [vmem:[%s9488_s1 + $0x23] ss:$0 sm:$0xff]  ;;  %v10096_v53 = vrot.slane %v4886_v40, 3  ;;  %v1338_v30 = vmul.f32 %v4964_v60, %v4994_v3  ;;  %10099 = vst [vmem:[#allocation52_spill] sm:$0xff] %v5186_v56  ;;  %v1375_v60 = vmul.f32 %v4973_v11, %v4988_v5 }
  0x80   : > { %v5159_v63 = vsel %vm1632_vm2, %v1602_v32, %v10093_v48  ;;  %10095 = vst [vmem:[#allocation49_spill] sm:$0xff] %v5164_v6  ;;  %v1777_v32 = vmul.f32 %v5142_v38, %v5137_v4  ;;  %v5180_v48 = vld [vmem:[%s9488_s1 + $0x2b] ss:$0 sm:$0xff]  ;;  %v5199_v3 = vld [vmem:[%s9488_s1 + $0x33] ss:$0 sm:$0xff]  ;;  %v1990_v62 = vsel %vm1962_vm3, %v1920_v19, %v10103_v47  ;;  %v1938_v5 = vrot.slane %v4812_v59, 4 }
  0x81   : > { %10094 = vst [vmem:[#allocation48_spill] sm:$0xff] %v5159_v63  ;;  %v5173_v50 = vsel %vm1632_vm2, %v1605_v7, %v10096_v53  ;;  %v1719_v18 = vadd.f32 %v1703_v29, %v1682_v2  ;;  %10098 = vst [vmem:[#allocation51_spill] sm:$0xff] %v5180_v48  ;;  %v10100_v2 = vrot.slane %v4890_v42, 3  ;;  %v1814_v53 = vmul.f32 %v5164_v6, %v5159_v63 }
  0x82   : > { %10097 = vst [vmem:[#allocation50_spill] sm:$0xff] %v5173_v50  ;;  %10102 = vst [vmem:[#allocation54_spill] sm:$0xff] %v5199_v3  ;;  %v1851_v17 = vmul.f32 %v5180_v48, %v5173_v50  ;;  %v1354_v61 = vadd.f32 %v1338_v30, %v1246_v36  ;;  %v1935_v30 = vrot.slane %v4798_v52, 4  ;;  %v10105_v47 = vrot.slane %v4731_v23, 4 }
  0x83   : > { %v5192_v7 = vsel %vm1632_vm2, %v1608_v51, %v10100_v2  ;;  %v1756_v29 = vadd.f32 %v1740_v49, %v1719_v18  ;;  %v1929_v18 = vrot.slane %v4765_v35, 4  ;;  %v1932_v49 = vrot.slane %v4789_v45, 4 }
  0x84   : > { %10101 = vst [vmem:[#allocation53_spill] sm:$0xff] %v5192_v7  ;;  %v1888_v56 = vmul.f32 %v5199_v3, %v5192_v7  ;;  %v5233_v11 = vsel %vm1962_vm3, %v1923_v41, %v10105_v47  ;;  %v10107_v36 = vrot.slane %v4840_v12, 4  ;;  %v10109_v19 = vrot.slane %v4737_v25, 4  ;;  %v5256_v47 = vld [vmem:[%s9488_s1 + $0x14] ss:$0 sm:$0xff] }
  0x85   : > { %v1793_v51 = vadd.f32 %v1777_v32, %v1756_v29  ;;  %v5220_v32 = vld [vmem:[%s9488_s1 + $0x4] ss:$0 sm:$0xff]  ;;  %10111 = vst [vmem:[#allocation59_spill] sm:$0xff] %v5256_v47 }
  0x86   : > { %10104 = vst [vmem:[#allocation55_spill] sm:$0xff] %v5220_v32  ;;  %v5244_v2 = vsel %vm1962_vm3, %v1929_v18, %v10107_v36  ;;  %v5250_v3 = vsel %vm1962_vm3, %v1926_v39, %v10109_v19  ;;  %v1996_v41 = vmul.f32 %v5220_v32, %v1990_v62  ;;  %v5265_v18 = vmul.f32 %v4784_v43, %v4798_v52 }
  0x87   : > { %v1830_v29 = vadd.f32 %v1814_v53, %v1793_v51  ;;  %v5238_v53 = vld [vmem:[%s9488_s1 + $0xc] ss:$0 sm:$0xff]  ;;  %10108 = vst [vmem:[#allocation57_spill] sm:$0xff] %v5244_v2  ;;  %10110 = vst [vmem:[#allocation58_spill] sm:$0xff] %v5250_v3  ;;  %v5269_v39 = vmul.f32 %v4784_v43, %v4812_v59  ;;  %v5272_v62 = vadd.f32 %v783_v26, %v4800_v54  ;;  %v10115_v32 = vrot.slane %v4848_v15, 4 }
  0x88   : > { %10106 = vst [vmem:[#allocation56_spill] sm:$0xff] %v5238_v53  ;;  %10113 = vst [vmem:[#allocation61_spill] sm:$0xff] %v5265_v18  ;;  %v1391_v36 = vadd.f32 %v1375_v60, %v1354_v61  ;;  %v2033_v18 = vmul.f32 %v5238_v53, %v5233_v11  ;;  %v10117_v43 = vrot.slane %v4890_v42, 4  ;;  %v10119_v26 = vrot.slane %v4886_v40, 4  ;;  %v5352_v53 = vld [vmem:[%s9488_s1 + $0x5] ss:$0 sm:$0xff] }
  0x89   : > { %v1867_v51 = vadd.f32 %v1851_v17, %v1830_v29  ;;  %v5261_v17 = vld [vmem:[%s9488_s1 + $0x1c] ss:$0 sm:$0xff]  ;;  %10114 = vst [vmem:[#allocation62_spill] sm:$0xff] %v5269_v39  ;;  %v1412_v29 = vmul.f32 %v4980_v14, %v5010_v46  ;;  %v5280_v48 = vsel %vm1962_vm3, %v1932_v49, %v10115_v32  ;;  %v2070_v61 = vmul.f32 %v5256_v47, %v5250_v3  ;;  %v5303_v32 = vld [vmem:[%s9488_s1 + $0x24] ss:$0 sm:$0xff] }
  0x8a   : > { %10112 = vst [vmem:[#allocation60_spill] sm:$0xff] %v5261_v17  ;;  %10116 = vst [vmem:[#allocation63_spill] sm:$0xff] %v5280_v48  ;;  %v5288_v54 = vsel %vm1962_vm3, %v1938_v5, %v10117_v43  ;;  %v2107_v60 = vmul.f32 %v5261_v17, %v5244_v2  ;;  %v2250_v43 = vrot.slane %v4722_v20, 5  ;;  %v5320_v5 = vld [vmem:[%s9488_s1 + $0x34] ss:$0 sm:$0xff]  ;;  %v2259_v17 = vrot.slane %v4765_v35, 5 }
  0x8b   : > { %v1904_v19 = vadd.f32 %v1888_v56, %v1867_v51  ;;  %10118 = vst [vmem:[#allocation64_spill] sm:$0xff] %v5288_v54  ;;  %v5294_v56 = vsel %vm1962_vm3, %v1935_v30, %v10119_v26  ;;  %10121 = vst [vmem:[#allocation66_spill] sm:$0xff] %v5303_v32  ;;  %v2253_v51 = vrot.slane %v4728_v22, 5  ;;  %v5311_v30 = vld [vmem:[%s9488_s1 + $0x2c] ss:$0 sm:$0xff]  ;;  %v1428_v2 = vadd.f32 %v1412_v29, %v1391_v36 }
  0x8c   : > { %10120 = vst [vmem:[#allocation65_spill] sm:$0xff] %v5294_v56  ;;  %10122 = vst [vmem:[#allocation67_spill] sm:$0xff] %v5311_v30  ;;  %v5327_v26 = vmul.f32 %v5080_v1, %v5096_v28  ;;  %v2144_v46 = vmul.f32 %v5303_v32, %v5280_v48  ;;  %v2268_v3 = vrot.slane %v4812_v59, 5  ;;  %v2181_v47 = vmul.f32 %v5311_v30, %v5294_v56 }
  0x8d   : > { %v2012_v49 = vadd.f32 %v1996_v41, %v1904_v19  ;;  %v2256_v41 = vrot.slane %v4734_v24, 5  ;;  %v2262_v19 = vrot.slane %v4789_v45, 5  ;;  %10123 = vst [vmem:[#allocation68_spill] sm:$0xff] %v5320_v5  ;;  %v2218_v29 = vmul.f32 %v5320_v5, %v5288_v54  ;;  %10127 = vst [vmem:[#allocation70_spill] sm:$0xff] %v5352_v53 }
  0x8e   : > { %v10124_v28 = vrot.slane %v4848_v15, 5  ;;  %v10128_v1 = vrot.slane %v4840_v12, 5  ;;  %v10137_v54 = vrot.slane %v4890_v42, 5  ;;  %v10139_v56 = vrot.slane %v4886_v40, 5 }
  0x8f   : > { %v2049_v14 = vadd.f32 %v2033_v18, %v2012_v49  ;;  %v2265_v18 = vrot.slane %v4798_v52, 5 }
  0x90   : > { %v5343_v36 = vsel %vm2292_vm4, %v2262_v19, %v10124_v28  ;;  %v5359_v5 = vsel %vm2292_vm4, %v2259_v17, %v10128_v1  ;;  %v10130_v19 = vrot.slane %v4737_v25, 5  ;;  %v5381_v1 = vld [vmem:[%s9488_s1 + $0x15] ss:$0 sm:$0xff]  ;;  %v5386_v17 = vld [vmem:[%s9488_s1 + $0x1d] ss:$0 sm:$0xff]  ;;  %v5403_v32 = vsel %vm2292_vm4, %v2268_v3, %v10137_v54 }
  0x91   : > { %v2086_v49 = vadd.f32 %v2070_v61, %v2049_v14  ;;  %10125 = vst [vmem:[#allocation69_spill] sm:$0xff] %v5343_v36  ;;  %v10126_v14 = vrot.slane %v4725_v21, 5  ;;  %10129 = vst [vmem:[#allocation71_spill] sm:$0xff] %v5359_v5  ;;  %v5409_v48 = vsel %vm2292_vm4, %v2265_v18, %v10139_v56  ;;  %v1523_v56 = vmul.f32 %v5049_v37, %v5062_v57 }
  0x92   : > { %v5365_v28 = vsel %vm2292_vm4, %v2256_v41, %v10130_v19  ;;  %10134 = vst [vmem:[#allocation74_spill] sm:$0xff] %v5381_v1  ;;  %10135 = vst [vmem:[#allocation75_spill] sm:$0xff] %v5386_v17  ;;  %v1281_v41 = vrot.slane %v4843_v13, 2  ;;  %v1449_v19 = vmul.f32 %v5003_v16, %v5024_v55  ;;  %v5415_v55 = vld [vmem:[%s9488_s1 + $0x2d] ss:$0 sm:$0xff]  ;;  %v9604_v57 = vrot.slane %v4731_v23, 6 }
  0x93   : > { %v2320_v61 = vsel %vm2292_vm4, %v2250_v43, %v10126_v14  ;;  %v2123_v39 = vadd.f32 %v2107_v60, %v2086_v49  ;;  %10131 = vst [vmem:[#allocation72_spill] sm:$0xff] %v5365_v28  ;;  %v10132_v43 = vrot.slane %v4731_v23, 5  ;;  %v5376_v60 = vld [vmem:[%s9488_s1 + $0xd] ss:$0 sm:$0xff]  ;;  %10138 = vst [vmem:[#allocation77_spill] sm:$0xff] %v5403_v32  ;;  %v2511_v16 = vmul.f32 %v5415_v55, %v5409_v48 }
  0x94   : > { %10133 = vst [vmem:[#allocation73_spill] sm:$0xff] %v5376_v60  ;;  %10140 = vst [vmem:[#allocation78_spill] sm:$0xff] %v5409_v48  ;;  %v2326_v49 = vmul.f32 %v5352_v53, %v2320_v61  ;;  %v1465_v54 = vadd.f32 %v1449_v19, %v1428_v2  ;;  %v2400_v61 = vmul.f32 %v5381_v1, %v5365_v28  ;;  %v2586_v37 = vrot.slane %v4734_v24, 6 }
  0x95   : > { %v5371_v14 = vsel %vm2292_vm4, %v2253_v51, %v10132_v43  ;;  %v5391_v51 = vld [vmem:[%s9488_s1 + $0x25] ss:$0 sm:$0xff]  ;;  %v1486_v43 = vmul.f32 %v5029_v0, %v5044_v8  ;;  %v2160_v30 = vadd.f32 %v2144_v46, %v2123_v39  ;;  %10141 = vst [vmem:[#allocation79_spill] sm:$0xff] %v5415_v55  ;;  %v10142_v39 = vrot.slane %v5056_v9, 2 }
  0x96   : > { %10136 = vst [vmem:[#allocation76_spill] sm:$0xff] %v5391_v51  ;;  %v2363_v46 = vmul.f32 %v5376_v60, %v5371_v14  ;;  %v2437_v8 = vmul.f32 %v5386_v17, %v5359_v5  ;;  %v2474_v0 = vmul.f32 %v5391_v51, %v5343_v36  ;;  %v9601_v51 = vrot.slane %v4737_v25, 6 }
  0x97   : > { %v5423_v3 = vsel %vm1302_vm1, %v1281_v41, %v10142_v39  ;;  %v2197_v18 = vadd.f32 %v2181_v47, %v2160_v30  ;;  %v2580_v41 = vrot.slane %v4722_v20, 6  ;;  %v1502_v39 = vadd.f32 %v1486_v43, %v1465_v54 }
  0x98   : > { %10143 = vst [vmem:[#allocation80_spill] sm:$0xff] %v5423_v3  ;;  %v1560_v2 = vmul.f32 %v5067_v31, %v5423_v3  ;;  %v9598_v47 = vrot.slane %v4725_v21, 6  ;;  %v2583_v30 = vrot.slane %v4728_v22, 6  ;;  %v2589_v17 = vrot.slane %v4765_v35, 6  ;;  %v5450_v22 = vld [vmem:[%s9488_s1 + $0x35] ss:$0 sm:$0xff] }
  0x99   : > { %v2234_v19 = vadd.f32 %v2218_v29, %v2197_v18  ;;  %v1539_v55 = vadd.f32 %v1523_v56, %v1502_v39  ;;  %v9599_v20 = vrot.slane %v4840_v12, 6  ;;  %v2592_v43 = vrot.slane %v4789_v45, 6  ;;  %10144 = vst [vmem:[#allocation81_spill] sm:$0xff] %v5450_v22 }
  0x9a   : > { %v9600_v29 = vrot.slane %v4848_v15, 6  ;;  %v2595_v54 = vrot.slane %v4798_v52, 6  ;;  %v1705_v35 = vmul.f32 %v5101_v58, %v5118_v34  ;;  %v2598_v56 = vrot.slane %v4812_v59, 6  ;;  %v5465_v52 = vld [vmem:[%s9488_s1 + $0x6] ss:$0 sm:$0xff]  ;;  %v10160_v34 = vld [vmem:[#allocation11_spill] sm:$0xff] }
  0x9b   : > { %v2342_v48 = vadd.f32 %v2326_v49, %v2234_v19  ;;  %v1576_v18 = vadd.f32 %v1560_v2, %v1539_v55  ;;  %v9603_v45 = vrot.slane %v4890_v42, 6  ;;  %v2650_v39 = vsel %vm2622_vm5, %v2580_v41, %v9598_v47  ;;  %10145 = vst [vmem:[#allocation82_spill] sm:$0xff] %v5465_v52  ;;  %v10172_v58 = vld [vmem:[#allocation59_spill] sm:$0xff] }
  0x9c   : > { %v1611_v55 = vrot.slane %v4843_v13, 3  ;;  %v9602_v2 = vrot.slane %v5056_v9, 3  ;;  %v2548_v24 = vmul.f32 %v5450_v22, %v5403_v32  ;;  %v5478_v41 = vsel %vm2622_vm5, %v2592_v43, %v9600_v29  ;;  %v5501_v43 = vld [vmem:[%s9488_s1 + $0xe] ss:$0 sm:$0xff] }
  0x9d   : > { %v2379_v49 = vadd.f32 %v2363_v46, %v2342_v48  ;;  %v1684_v48 = vadd.f32 %v5327_v26, %v1576_v18  ;;  %v1742_v46 = vmul.f32 %v5123_v10, %v5137_v4  ;;  %10146 = vst [vmem:[#allocation83_spill] sm:$0xff] %v5478_v41  ;;  %v5484_v47 = vsel %vm2622_vm5, %v2589_v17, %v9599_v20  ;;  %v5506_v17 = vld [vmem:[%s9488_s1 + $0x16] ss:$0 sm:$0xff]  ;;  %v10167_v10 = vld [vmem:[#allocation56_spill] sm:$0xff] }
  0x9e   : > { %10147 = vst [vmem:[#allocation84_spill] sm:$0xff] %v5484_v47  ;;  %v5490_v26 = vsel %vm2622_vm5, %v2586_v37, %v9601_v51  ;;  %10149 = vst [vmem:[#allocation86_spill] sm:$0xff] %v5501_v43  ;;  %v1779_v37 = vmul.f32 %v5142_v38, %v5159_v63  ;;  %v10152_v20 = vrot.slane %v4886_v40, 6  ;;  %v2656_v51 = vmul.f32 %v5465_v52, %v2650_v39 }
  0x9f   : > { %v2416_v19 = vadd.f32 %v2400_v61, %v2379_v49  ;;  %10148 = vst [vmem:[#allocation85_spill] sm:$0xff] %v5490_v26  ;;  %v5496_v61 = vsel %vm2622_vm5, %v2583_v30, %v9604_v57  ;;  %10150 = vst [vmem:[#allocation87_spill] sm:$0xff] %v5506_v17  ;;  %v1721_v18 = vadd.f32 %v1705_v35, %v1684_v48  ;;  %v1941_v4 = vrot.slane %v4843_v13, 4 }
  0xa0   : > { %v5514_v30 = vsel %vm2622_vm5, %v2598_v56, %v9603_v45  ;;  %v5520_v29 = vsel %vm2622_vm5, %v2595_v54, %v10152_v20  ;;  %v5527_v35 = vsel %vm1632_vm2, %v1611_v55, %v9602_v2  ;;  %v1816_v48 = vmul.f32 %v5164_v6, %v5173_v50  ;;  %v5542_v55 = vld [vmem:[%s9488_s1 + $0x1e] ss:$0 sm:$0xff]  ;;  %v10159_v50 = vld [vmem:[#allocation54_spill] sm:$0xff] }
  0xa1   : > { %v2453_v49 = vadd.f32 %v2437_v8, %v2416_v19  ;;  %10151 = vst [vmem:[#allocation88_spill] sm:$0xff] %v5514_v30  ;;  %10153 = vst [vmem:[#allocation89_spill] sm:$0xff] %v5520_v29  ;;  %v1758_v8 = vadd.f32 %v1742_v46, %v1721_v18  ;;  %v711_v56 = vmul.f32 %v4747_v27, %v4840_v12  ;;  %v10156_v18 = vld [vmem:[#allocation51_spill] sm:$0xff]  ;;  %v10157_v27 = vld [vmem:[#allocation46_spill] sm:$0xff] }
  0xa2   : > { %10154 = vst [vmem:[#allocation90_spill] sm:$0xff] %v5527_v35  ;;  %v2693_v20 = vmul.f32 %v5501_v43, %v5496_v61  ;;  %v2730_v54 = vmul.f32 %v5506_v17, %v5490_v26  ;;  %v749_v39 = vmul.f32 %v4760_v33, %v4848_v15  ;;  %10155 = vst [vmem:[#allocation91_spill] sm:$0xff] %v5542_v55  ;;  %v10178_v17 = vld [vmem:[#allocation64_spill] sm:$0xff] }
  0xa3   : > { %v2490_v19 = vadd.f32 %v2474_v0, %v2453_v49  ;;  %v1795_v46 = vadd.f32 %v1779_v37, %v1758_v8  ;;  %v1853_v2 = vmul.f32 %v10156_v18, %v5192_v7  ;;  %v727_v0 = vadd.f32 %v711_v56, %v10157_v27  ;;  %v10158_v49 = vld [vmem:[#allocation9_spill] sm:$0xff]  ;;  %v5562_v8 = vld [vmem:[%s9488_s1 + $0x2e] ss:$0 sm:$0xff]  ;;  %v10163_v18 = vld [vmem:[#allocation12_spill] sm:$0xff] }
  0xa4   : > { %v787_v45 = vmul.f32 %v10158_v49, %v4886_v40  ;;  %v1890_v63 = vmul.f32 %v10159_v50, %v5527_v35  ;;  %v821_v3 = vmul.f32 %v10160_v34, %v4848_v15  ;;  %v5557_v37 = vld [vmem:[%s9488_s1 + $0x26] ss:$0 sm:$0xff]  ;;  %10162 = vst [vmem:[#allocation9_spill] sm:$0xff] %v5562_v8  ;;  %v825_v27 = vmul.f32 %v10160_v34, %v4890_v42  ;;  %v5575_v56 = vld [vmem:[%s4718_s12 + $0xc8] sm:$0xff] }
  0xa5   : > { %v2527_v57 = vadd.f32 %v2511_v16, %v2490_v19  ;;  %10161 = vst [vmem:[#allocation46_spill] sm:$0xff] %v5557_v37  ;;  %v1832_v16 = vadd.f32 %v1816_v48, %v1795_v46  ;;  %v765_v19 = vadd.f32 %v749_v39, %v727_v0  ;;  %v2767_v7 = vmul.f32 %v5542_v55, %v5484_v47  ;;  %v10164_v48 = vld [vmem:[#allocation55_spill] sm:$0xff]  ;;  %v10180_v47 = vld [vmem:[#allocation68_spill] sm:$0xff] }
  0xa6   : > { %v837_v50 = vadd.f32 %v821_v3, %v5272_v62  ;;  %v859_v6 = vmul.f32 %v10163_v18, %v4886_v40  ;;  %v1998_v46 = vmul.f32 %v10164_v48, %v5233_v11  ;;  %10165 = vst [vmem:[#allocation11_spill] sm:$0xff] %v5575_v56  ;;  %v863_v0 = vmul.f32 %v10163_v18, %v5056_v9  ;;  %v10166_v3 = vld [vmem:[#allocation58_spill] sm:$0xff]  ;;  %v5589_v11 = vld [vmem:[%s4718_s12 + $0x40] sm:$0xff] }
  0xa7   : > { %v2564_v35 = vadd.f32 %v2548_v24, %v2527_v57  ;;  %v1869_v38 = vadd.f32 %v1853_v2, %v1832_v16  ;;  %v803_v39 = vadd.f32 %v787_v45, %v765_v19  ;;  %v2804_v24 = vmul.f32 %v5557_v37, %v5478_v41  ;;  %v5586_v16 = vld [vmem:[%s4718_s12 + $0x10] sm:$0xff]  ;;  %v5612_v41 = vld [vmem:[%s4718_s12 + $0x58] sm:$0xff] }
  0xa8   : > { %v2841_v62 = vmul.f32 %v5562_v8, %v5520_v29  ;;  %v2035_v2 = vmul.f32 %v10167_v10, %v10166_v3  ;;  %v5594_v45 = vld [vmem:[%s9488_s1 + $0x36] ss:$0 sm:$0xff]  ;;  %v10171_v48 = vld [vmem:[#allocation57_spill] sm:$0xff]  ;;  %v5605_v3 = vld [vmem:[%s4718_s12 + $0x28] sm:$0xff]  ;;  %v875_v37 = vadd.f32 %v859_v6, %v837_v50 }
  0xa9   : > { %v2672_v57 = vadd.f32 %v2656_v51, %v2564_v35  ;;  %10168 = vst [vmem:[#allocation12_spill] sm:$0xff] %v5594_v45  ;;  %v1906_v51 = vadd.f32 %v1890_v63, %v1869_v38  ;;  %v10169_v35 = vrot.slane %v5056_v9, 4  ;;  %v2072_v8 = vmul.f32 %v10172_v58, %v10171_v48  ;;  %v10173_v29 = vld [vmem:[#allocation13_spill] sm:$0xff]  ;;  %v10174_v6 = vld [vmem:[#allocation63_spill] sm:$0xff]  ;;  %v10175_v50 = vld [vmem:[#allocation60_spill] sm:$0xff] }
  0xaa   : > { %v841_v10 = vadd.f32 %v825_v27, %v803_v39  ;;  %v897_v55 = vmul.f32 %v10173_v29, %v4890_v42  ;;  %v901_v63 = vmul.f32 %v10173_v29, %v5575_v56  ;;  %v936_v48 = vrot.slane %v5589_v11, 1  ;;  %v10176_v56 = vld [vmem:[#allocation65_spill] sm:$0xff] }
  0xab   : > { %v5600_v19 = vsel %vm1962_vm3, %v1941_v4, %v10169_v35  ;;  %v2709_v31 = vadd.f32 %v2693_v20, %v2672_v57  ;;  %v2014_v38 = vadd.f32 %v1998_v46, %v1906_v51  ;;  %v930_v35 = vrot.slane %v5586_v16, 1  ;;  %v10177_v46 = vld [vmem:[#allocation66_spill] sm:$0xff] }
  0xac   : > { %10170 = vst [vmem:[#allocation92_spill] sm:$0xff] %v5600_v19  ;;  %v879_v4 = vadd.f32 %v863_v0, %v841_v10  ;;  %v2878_v20 = vmul.f32 %v5594_v45, %v5514_v30  ;;  %v2109_v27 = vmul.f32 %v10175_v50, %v10174_v6  ;;  %v933_v39 = vrot.slane %v5605_v3, 1  ;;  %v10179_v10 = vld [vmem:[#allocation67_spill] sm:$0xff] }
  0xad   : > { %v2746_v58 = vadd.f32 %v2730_v54, %v2709_v31  ;;  %v2051_v57 = vadd.f32 %v2035_v2, %v2014_v38  ;;  %v2146_v51 = vmul.f32 %v10177_v46, %v10176_v56  ;;  %v2183_v0 = vmul.f32 %v10179_v10, %v10178_v17  ;;  %v5628_v54 = vld [vmem:[%s4718_s12 + $0x70] sm:$0xff] }
  0xae   : > { %v2220_v43 = vmul.f32 %v10180_v47, %v5600_v19  ;;  %v913_v45 = vadd.f32 %v897_v55, %v875_v37  ;;  %v917_v30 = vadd.f32 %v901_v63, %v879_v4  ;;  %v939_v6 = vrot.slane %v5612_v41, 1  ;;  %v5643_v19 = vld [vmem:[%s4718_s12 + $0x88] sm:$0xff] }
  0xaf   : > { %v2783_v31 = vadd.f32 %v2767_v7, %v2746_v58  ;;  %v2088_v50 = vadd.f32 %v2072_v8, %v2051_v57  ;;  %v10181_v38 = vrot.slane %v4737_v25, 1  ;;  %v10182_v17 = vrot.slane %v4725_v21, 1  ;;  %v10184_v8 = vld [vmem:[#allocation14_spill] sm:$0xff] }
  0xb0   : > { %v10183_v55 = vrot.slane %v4731_v23, 1  ;;  %v2328_v57 = vmul.f32 %v5352_v53, %v5371_v14  ;;  %v5671_v14 = vld [vmem:[%s9489_s2] ss:$0 sm:$0xff] }
  0xb1   : > { %v5636_v56 = vsel %vm972_vm0, %v10181_v38, %v936_v48  ;;  %v999_v58 = vsel %vm972_vm0, %v10182_v17, %v930_v35  ;;  %v2820_v7 = vadd.f32 %v2804_v24, %v2783_v31  ;;  %v2125_v4 = vadd.f32 %v2109_v27, %v2088_v50  ;;  %v5657_v38 = vld [vmem:[%s4718_s12 + $0xa0] sm:$0xff]  ;;  %10186 = vst [vmem:[#allocation13_spill] sm:$0xff] %v5671_v14 }
  0xb2   : > { %v5649_v37 = vsel %vm972_vm0, %v10183_v55, %v933_v39  ;;  %v1007_v63 = vmul.f32 %v10184_v8, %v999_v58  ;;  %v1011_v48 = vmul.f32 %v10184_v8, %v5636_v56  ;;  %v747_v17 = vmul.f32 %v4760_v33, %v4840_v12  ;;  %v10187_v33 = vld [vmem:[#allocation15_spill] sm:$0xff] }
  0xb3   : > { %v942_v24 = vrot.slane %v5628_v54, 1  ;;  %v2857_v35 = vadd.f32 %v2841_v62, %v2820_v7  ;;  %v10185_v39 = vrot.slane %v4840_v12, 1  ;;  %v2162_v50 = vadd.f32 %v2146_v51, %v2125_v4 }
  0xb4   : > { %v1023_v58 = vadd.f32 %v1007_v63, %v913_v45  ;;  %v1027_v55 = vadd.f32 %v1011_v48, %v917_v30  ;;  %v945_v27 = vrot.slane %v5643_v19, 1  ;;  %v1044_v2 = vmul.f32 %v10187_v33, %v5649_v37  ;;  %v10188_v45 = vld [vmem:[#allocation17_spill] sm:$0xff] }
  0xb5   : > { %v5666_v31 = vsel %vm972_vm0, %v10185_v39, %v939_v6  ;;  %v2894_v7 = vadd.f32 %v2878_v20, %v2857_v35  ;;  %v2365_v6 = vmul.f32 %v5376_v60, %v5365_v28  ;;  %v948_v30 = vrot.slane %v5657_v38, 1  ;;  %v10191_v20 = vld [vmem:[#allocation10_spill] sm:$0xff] }
  0xb6   : > { %v1048_v62 = vmul.f32 %v10187_v33, %v5666_v31  ;;  %v1081_v63 = vmul.f32 %v10188_v45, %v5636_v56  ;;  %v2199_v48 = vadd.f32 %v2183_v0, %v2162_v50  ;;  %v10189_v51 = vrot.slane %v4848_v15, 1 }
  0xb7   : > { %v1060_v39 = vadd.f32 %v1044_v2, %v1023_v58  ;;  %v5690_v47 = vadd.f32 %v5671_v14, %v2894_v7  ;;  %v763_v35 = vadd.f32 %v747_v17, %v10191_v20  ;;  %v785_v28 = vmul.f32 %v10158_v49, %v4848_v15  ;;  %v10193_v58 = vld [vmem:[#allocation19_spill] sm:$0xff]  ;;  %v10196_v7 = vld [vmem:[#allocation21_spill] sm:$0xff] }
  0xb8   : > { %v5687_v4 = vsel %vm972_vm0, %v10189_v51, %v942_v24  ;;  %v1064_v53 = vadd.f32 %v1048_v62, %v1027_v55  ;;  %v2236_v0 = vadd.f32 %v2220_v43, %v2199_v48  ;;  %v10192_v50 = vrot.slane %v4886_v40, 1 }
  0xb9   : > { %10190 = vst [vmem:[#allocation66_spill] sm:$0xff] %v5690_v47  ;;  %v1085_v60 = vmul.f32 %v10188_v45, %v5687_v4  ;;  %v1097_v2 = vadd.f32 %v1081_v63, %v1060_v39  ;;  %v1118_v55 = vmul.f32 %v10193_v58, %v5666_v31  ;;  %2933 = vadd.xlane.f32.xlu0 %v5690_v47  ;;  %v10194_v17 = vrot.slane %v4890_v42, 1  ;;  %v10200_v63 = vld [vmem:[#allocation47_spill] sm:$0xff] }
  0xba   : > { %v5701_v24 = vsel %vm972_vm0, %v10192_v50, %v945_v27  ;;  %v1155_v27 = vmul.f32 %v10196_v7, %v5687_v4  ;;  %v2344_v48 = vadd.f32 %v2328_v57, %v2236_v0  ;;  %v2402_v51 = vmul.f32 %v5381_v1, %v5359_v5  ;;  %v10199_v57 = vld [vmem:[#allocation25_spill] sm:$0xff] }
  0xbb   : > { %v5710_v49 = vsel %vm972_vm0, %v10194_v17, %v948_v30  ;;  %v1101_v62 = vadd.f32 %v1085_v60, %v1064_v53  ;;  %v1122_v43 = vmul.f32 %v10193_v58, %v5701_v24  ;;  %v1134_v39 = vadd.f32 %v1118_v55, %v1097_v2  ;;  %v10197_v53 = vld [vmem:[#allocation22_spill] sm:$0xff]  ;;  %v10198_v17 = vld [vmem:[#allocation75_spill] sm:$0xff]  ;;  %v10201_v5 = vld [vmem:[#allocation61_spill] sm:$0xff] }
  0xbc   : > { %10195 = vst [vmem:[#allocation67_spill] sm:$0xff] %v5710_v49  ;;  %v801_v20 = vadd.f32 %v785_v28, %v763_v35  ;;  %v823_v50 = vmul.f32 %v10160_v34, %v4886_v40  ;;  %v1192_v60 = vmul.f32 %v10197_v53, %v5701_v24  ;;  %v2381_v58 = vadd.f32 %v2365_v6, %v2344_v48  ;;  %v10204_v48 = vld [vmem:[#allocation78_spill] sm:$0xff] }
  0xbd   : > { %v5721_v30 = vadd.f32 %v1122_v43, %v1101_v62  ;;  %v2439_v7 = vmul.f32 %v10198_v17, %v5343_v36  ;;  %v1171_v47 = vadd.f32 %v1155_v27, %v1134_v39  ;;  %v1229_v0 = vmul.f32 %v10199_v57, %v5710_v49  ;;  %v10202_v62 = vld [vmem:[#allocation52_spill] sm:$0xff]  ;;  %v10203_v43 = vld [vmem:[#allocation62_spill] sm:$0xff] }
  0xbe   : > { %v802_v2 = vadd.f32 %v10201_v5, %v10200_v63  ;;  %v1262_v28 = vrot.slane %v5586_v16, 2  ;;  %v1265_v35 = vrot.slane %v5605_v3, 2  ;;  %v1268_v55 = vrot.slane %v5589_v11, 2  ;;  %v10205_v36 = vld [vmem:[#allocation76_spill] sm:$0xff] }
  0xbf   : > { %v5736_v53 = vadd.f32 %v10203_v43, %v10202_v62  ;;  %v2418_v6 = vadd.f32 %v2402_v51, %v2381_v58  ;;  %v2476_v27 = vmul.f32 %v10205_v36, %v10204_v48  ;;  %v1208_v39 = vadd.f32 %v1192_v60, %v1171_v47  ;;  %v10209_v47 = vld [vmem:[#allocation79_spill] sm:$0xff] }
  0xc0   : > { %v10206_v57 = vrot.slane %v5056_v9, 5  ;;  %v10207_v17 = vrot.slane %v4843_v13, 5  ;;  %v839_v63 = vadd.f32 %v823_v50, %v801_v20  ;;  %v861_v1 = vmul.f32 %v10163_v18, %v4890_v42 }
  0xc1   : > { %v1271_v62 = vrot.slane %v5612_v41, 2  ;;  %v824_v51 = vmul.f32 %v10160_v34, %v4812_v59  ;;  %v2455_v58 = vadd.f32 %v2439_v7, %v2418_v6  ;;  %v2513_v60 = vmul.f32 %v10209_v47, %v5403_v32 }
  0xc2   : > { %v5746_v5 = vsel %vm2292_vm4, %v10207_v17, %v10206_v57  ;;  %v1245_v43 = vadd.f32 %v1229_v0, %v1208_v39  ;;  %v1274_v48 = vrot.slane %v5628_v54, 2  ;;  %v10210_v36 = vrot.slane %v4737_v25, 2 }
  0xc3   : > { %10208 = vst [vmem:[#allocation14_spill] sm:$0xff] %v5746_v5  ;;  %v10211_v18 = vrot.slane %v4731_v23, 2  ;;  %v10212_v59 = vrot.slane %v4725_v21, 2  ;;  %v2492_v7 = vadd.f32 %v2476_v27, %v2455_v58  ;;  %v2550_v0 = vmul.f32 %v5450_v22, %v5746_v5 }
  0xc4   : > { %v5760_v20 = vsel %vm1302_vm1, %v10210_v36, %v1268_v55  ;;  %v899_v6 = vmul.f32 %v10173_v29, %v5056_v9  ;;  %v10213_v36 = vld [vmem:[#allocation26_spill] sm:$0xff]  ;;  %v877_v39 = vadd.f32 %v861_v1, %v839_v63  ;;  %v1277_v57 = vrot.slane %v5643_v19, 2  ;;  %v10216_v29 = vld [vmem:[#allocation28_spill] sm:$0xff] }
  0xc5   : > { %v5766_v50 = vsel %vm1302_vm1, %v10211_v18, %v1265_v35  ;;  %v1329_v17 = vsel %vm1302_vm1, %v10212_v59, %v1262_v28  ;;  %v10214_v35 = vrot.slane %v4840_v12, 2  ;;  %v10215_v28 = vld [vmem:[#allocation27_spill] sm:$0xff]  ;;  %v2529_v58 = vadd.f32 %v2513_v60, %v2492_v7 }
  0xc6   : > { %v1337_v55 = vmul.f32 %v10213_v36, %v1329_v17  ;;  %v1374_v27 = vmul.f32 %v10215_v28, %v5766_v50  ;;  %v2658_v59 = vmul.f32 %v5465_v52, %v5496_v61  ;;  %v1411_v17 = vmul.f32 %v10216_v29, %v5760_v20  ;;  %v10219_v61 = vld [vmem:[#allocation86_spill] sm:$0xff] }
  0xc7   : > { %v5782_v18 = vsel %vm1302_vm1, %v10214_v35, %v1271_v62  ;;  %v826_v1 = vmul.f32 %v10160_v34, %v4843_v13  ;;  %v2601_v63 = vrot.slane %v4843_v13, 6  ;;  %v1280_v32 = vrot.slane %v5657_v38, 2 }
  0xc8   : > { %v1353_v5 = vadd.f32 %v1337_v55, %v1245_v43  ;;  %v10217_v62 = vrot.slane %v4848_v15, 2  ;;  %v2566_v60 = vadd.f32 %v2550_v0, %v2529_v58  ;;  %v2695_v43 = vmul.f32 %v10219_v61, %v5490_v26  ;;  %v10220_v55 = vld [vmem:[#allocation30_spill] sm:$0xff]  ;;  %v10223_v58 = vld [vmem:[#allocation84_spill] sm:$0xff] }
  0xc9   : > { %v1448_v29 = vmul.f32 %v10220_v55, %v5782_v18  ;;  %v915_v52 = vadd.f32 %v899_v6, %v877_v39  ;;  %v1009_v13 = vmul.f32 %v10184_v8, %v5649_v37  ;;  %v10221_v22 = vrot.slane %v4886_v40, 2 }
  0xca   : > { %v5798_v35 = vsel %vm1302_vm1, %v10217_v62, %v1274_v48  ;;  %v1390_v7 = vadd.f32 %v1374_v27, %v1353_v5  ;;  %v2674_v0 = vadd.f32 %v2658_v59, %v2566_v60  ;;  %v10224_v62 = vld [vmem:[#allocation87_spill] sm:$0xff]  ;;  %v10225_v27 = vld [vmem:[#allocation33_spill] sm:$0xff]  ;;  %v840_v61 = vadd.f32 %v824_v51, %v802_v2  ;;  %v10232_v51 = vld [vmem:[#allocation46_spill] sm:$0xff] }
  0xcb   : > { %10218 = vst [vmem:[#allocation15_spill] sm:$0xff] %v5798_v35  ;;  %v5811_v48 = vsel %vm1302_vm1, %v10221_v22, %v1277_v57  ;;  %v2732_v26 = vmul.f32 %v10224_v62, %v10223_v58  ;;  %v1485_v55 = vmul.f32 %v10225_v27, %v5798_v35  ;;  %v10226_v6 = vrot.slane %v4890_v42, 2  ;;  %v10228_v57 = vld [vmem:[#allocation83_spill] sm:$0xff]  ;;  %v10231_v2 = vld [vmem:[#allocation89_spill] sm:$0xff] }
  0xcc   : > { %10222 = vst [vmem:[#allocation17_spill] sm:$0xff] %v5811_v48  ;;  %v1427_v5 = vadd.f32 %v1411_v17, %v1390_v7  ;;  %v1592_v8 = vrot.slane %v5586_v16, 3  ;;  %v1595_v22 = vrot.slane %v5605_v3, 3  ;;  %v2711_v39 = vadd.f32 %v2695_v43, %v2674_v0  ;;  %v10229_v59 = vld [vmem:[#allocation91_spill] sm:$0xff] }
  0xcd   : > { %v5821_v37 = vsel %vm1302_vm1, %v10226_v6, %v1280_v32  ;;  %v2769_v60 = vmul.f32 %v10229_v59, %v10228_v57  ;;  %v10230_v7 = vld [vmem:[#allocation35_spill] sm:$0xff]  ;;  %v2806_v58 = vmul.f32 %v10232_v51, %v10231_v2  ;;  %v1025_v62 = vadd.f32 %v1009_v13, %v915_v52  ;;  %v5845_v52 = vld [vmem:[%s9488_s1 + $0x28] ss:$0 sm:$0xff]  ;;  %v10242_v59 = vld [vmem:[#allocation12_spill] sm:$0xff] }
  0xce   : > { %10227 = vst [vmem:[#allocation10_spill] sm:$0xff] %v5821_v37  ;;  %v1464_v17 = vadd.f32 %v1448_v29, %v1427_v5  ;;  %v1522_v34 = vmul.f32 %v10230_v7, %v5811_v48  ;;  %v1046_v32 = vmul.f32 %v10187_v33, %v5636_v56  ;;  %v1598_v6 = vrot.slane %v5589_v11, 3  ;;  %v10235_v5 = vld [vmem:[#allocation38_spill] sm:$0xff]  ;;  %10236 = vst [vmem:[#allocation21_spill] sm:$0xff] %v5845_v52 }
  0xcf   : > { %v10233_v47 = vrot.slane %v5056_v9, 6  ;;  %v2748_v0 = vadd.f32 %v2732_v26, %v2711_v39  ;;  %v1559_v57 = vmul.f32 %v10235_v5, %v5821_v37  ;;  %v4216_v13 = vld [vmem:[%s4718_s12 + $0xa8] sm:$0xff]  ;;  %v1601_v33 = vrot.slane %v5612_v41, 3 }
  0xd0   : > { %v1501_v29 = vadd.f32 %v1485_v55, %v1464_v17  ;;  %v862_v56 = vmul.f32 %v4216_v13, %v5845_v52  ;;  %v10237_v2 = vrot.slane %v4731_v23, 3  ;;  %v10239_v39 = vld [vmem:[#allocation88_spill] sm:$0xff]  ;;  %v10240_v17 = vld [vmem:[#allocation9_spill] sm:$0xff]  ;;  %v10241_v13 = vld [vmem:[#allocation39_spill] sm:$0xff]  ;;  %v1062_v7 = vadd.f32 %v1046_v32, %v1025_v62 }
  0xd1   : > { %v5838_v43 = vsel %vm2622_vm5, %v2601_v63, %v10233_v47  ;;  %v10238_v47 = vrot.slane %v4725_v21, 3  ;;  %v2785_v55 = vadd.f32 %v2769_v60, %v2748_v0  ;;  %v2843_v5 = vmul.f32 %v10240_v17, %v10239_v39  ;;  %v4217_v62 = vld [vmem:[%s9488_s1] ss:$0 sm:$0xff]  ;;  %v10255_v39 = vld [vmem:[#allocation18_spill] sm:$0xff] }
  0xd2   : > { %10234 = vst [vmem:[#allocation19_spill] sm:$0xff] %v5838_v43  ;;  %v5854_v26 = vsel %vm1632_vm2, %v10237_v2, %v1595_v22  ;;  %v1538_v51 = vadd.f32 %v1522_v34, %v1501_v29  ;;  %v2880_v9 = vmul.f32 %v10242_v59, %v5838_v43  ;;  %v1604_v37 = vrot.slane %v5628_v54, 3  ;;  %v10244_v34 = vld [vmem:[#allocation40_spill] sm:$0xff]  ;;  %v4218_v32 = vld [vmem:[%s4718_s12 + $0x50] sm:$0xff] }
  0xd3   : > { %v1659_v63 = vsel %vm1632_vm2, %v10238_v47, %v1592_v8  ;;  %v10243_v22 = vrot.slane %v4737_v25, 3  ;;  %v2822_v8 = vadd.f32 %v2806_v58, %v2785_v55  ;;  %v1083_v60 = vmul.f32 %v10188_v45, %v5666_v31  ;;  %v10249_v55 = vld [vmem:[#allocation43_spill] sm:$0xff] }
  0xd4   : > { %v1667_v52 = vmul.f32 %v10241_v13, %v1659_v63  ;;  %v1575_v0 = vadd.f32 %v1559_v57, %v1538_v51  ;;  %v1704_v29 = vmul.f32 %v10244_v34, %v5854_v26  ;;  %v5880_v47 = vmul.f32 %v4218_v32, %v4217_v62  ;;  %v5899_v62 = vld [vmem:[%s9488_s1 + $0x19] ss:$0 sm:$0xff] }
  0xd5   : > { %v5870_v2 = vsel %vm1632_vm2, %v10243_v22, %v1598_v6  ;;  %v1607_v63 = vrot.slane %v5643_v19, 3  ;;  %v10246_v6 = vrot.slane %v4840_v12, 3  ;;  %v5890_v45 = vadd.f32 %v826_v1, %v5736_v53  ;;  %10250 = vst [vmem:[#allocation61_spill] sm:$0xff] %v5899_v62 }
  0xd6   : > { %10245 = vst [vmem:[#allocation22_spill] sm:$0xff] %v5880_v47  ;;  %v2859_v57 = vadd.f32 %v2843_v5, %v2822_v8  ;;  %v1683_v51 = vadd.f32 %v1667_v52, %v1575_v0  ;;  %v1741_v22 = vmul.f32 %v10249_v55, %v5870_v2  ;;  %v5894_v43 = vadd.f32 %v862_v56, %v840_v61  ;;  %v10253_v56 = vld [vmem:[#allocation45_spill] sm:$0xff] }
  0xd7   : > { %v5887_v58 = vsel %vm1632_vm2, %v10246_v6, %v1601_v33  ;;  %10248 = vst [vmem:[#allocation47_spill] sm:$0xff] %v5890_v45  ;;  %v1120_v32 = vmul.f32 %v5899_v62, %v5687_v4  ;;  %v1610_v33 = vrot.slane %v5657_v38, 3  ;;  %v10251_v53 = vrot.slane %v4848_v15, 3  ;;  %v4220_v0 = vld [vmem:[%s9488_s1 + $0x1] ss:$0 sm:$0xff]  ;;  %v10254_v6 = vld [vmem:[#allocation16_spill] sm:$0xff] }
  0xd8   : > { %10247 = vst [vmem:[#allocation25_spill] sm:$0xff] %v5887_v58  ;;  %v2896_v52 = vadd.f32 %v2880_v9, %v2859_v57  ;;  %v1099_v5 = vadd.f32 %v1083_v60, %v1062_v7  ;;  %v1720_v61 = vadd.f32 %v1704_v29, %v1683_v51  ;;  %v1778_v8 = vmul.f32 %v10253_v56, %v5887_v58  ;;  %v4221_v7 = vld [vmem:[%s9488_s1 + $0x9] ss:$0 sm:$0xff]  ;;  %v10261_v51 = vld [vmem:[#allocation49_spill] sm:$0xff] }
  0xd9   : > { %v5908_v1 = vsel %vm1632_vm2, %v10251_v53, %v1604_v37  ;;  %v5916_v47 = vmul.f32 %v4220_v0, %v10254_v6  ;;  %v5919_v45 = vmul.f32 %v4220_v0, %v10255_v39  ;;  %v10257_v59 = vrot.slane %v4886_v40, 3  ;;  %v10262_v6 = vld [vmem:[#allocation20_spill] sm:$0xff] }
  0xda   : > { %10252 = vst [vmem:[#allocation52_spill] sm:$0xff] %v5908_v1  ;;  %v1922_v37 = vrot.slane %v5586_v16, 4  ;;  %v5932_v60 = vmul.f32 %v4221_v7, %v10255_v39  ;;  %v5935_v29 = vadd.f32 %v5671_v14, %v2896_v52  ;;  %v1757_v57 = vadd.f32 %v1741_v22, %v1720_v61  ;;  %v10268_v14 = vld [vmem:[#allocation51_spill] sm:$0xff] }
  0xdb   : > { %10256 = vst [vmem:[#allocation62_spill] sm:$0xff] %v5919_v45  ;;  %v5925_v9 = vsel %vm1632_vm2, %v10257_v59, %v1607_v63  ;;  %v1815_v53 = vmul.f32 %v10261_v51, %v5908_v1  ;;  %v5940_v45 = vmul.f32 %v4221_v7, %v10262_v6  ;;  %v4222_v59 = vld [vmem:[%s9488_s1 + $0x11] ss:$0 sm:$0xff]  ;;  %v10265_v39 = vrot.slane %v4890_v42, 3  ;;  %v5959_v51 = vld [vmem:[%s9488_s1 + $0x21] ss:$0 sm:$0xff] }
  0xdc   : > { %10258 = vst [vmem:[#allocation26_spill] sm:$0xff] %v5925_v9  ;;  %10259 = vst [vmem:[#allocation27_spill] sm:$0xff] %v5932_v60  ;;  %v5946_v63 = vmul.f32 %v4222_v59, %v10262_v6  ;;  %v1925_v22 = vrot.slane %v5605_v3, 4  ;;  %2937 = vadd.xlane.f32.xlu1 %v5935_v29  ;;  %v1136_v61 = vadd.f32 %v1120_v32, %v1099_v5  ;;  %v1928_v32 = vrot.slane %v5589_v11, 4  ;;  %v10273_v60 = vld [vmem:[#allocation29_spill] sm:$0xff] }
  0xdd   : > { %10260 = vst [vmem:[#allocation28_spill] sm:$0xff] %v5935_v29  ;;  %10263 = vst [vmem:[#allocation30_spill] sm:$0xff] %v5940_v45  ;;  %v5952_v52 = vsel %vm1632_vm2, %v10265_v39, %v1610_v33  ;;  %v1157_v6 = vmul.f32 %v5959_v51, %v5701_v24  ;;  %v1794_v45 = vadd.f32 %v1778_v8, %v1757_v57  ;;  %v10272_v5 = vrot.slane %v4725_v21, 4  ;;  %v10275_v57 = vld [vmem:[#allocation31_spill] sm:$0xff] }
  0xde   : > { %10264 = vst [vmem:[#allocation33_spill] sm:$0xff] %v5946_v63  ;;  %10266 = vst [vmem:[#allocation38_spill] sm:$0xff] %v5952_v52  ;;  %v1852_v17 = vmul.f32 %v10268_v14, %v5925_v9  ;;  %v10269_v63 = vld [vmem:[#allocation23_spill] sm:$0xff]  ;;  %v5979_v8 = vmul.f32 %v10213_v36, %v10273_v60  ;;  %v5983_v14 = vmul.f32 %v10213_v36, %v10275_v57  ;;  %v10277_v9 = vld [vmem:[#allocation54_spill] sm:$0xff]  ;;  %v10279_v60 = vrot.slane %v4731_v23, 4 }
  0xdf   : > { %10267 = vst [vmem:[#allocation39_spill] sm:$0xff] %v5959_v51  ;;  %v5966_v33 = vmul.f32 %v4222_v59, %v10269_v63  ;;  %v5970_v39 = vmul.f32 %v5899_v62, %v10269_v63  ;;  %v1989_v29 = vsel %vm1962_vm3, %v10272_v5, %v1922_v37  ;;  %v1889_v63 = vmul.f32 %v10277_v9, %v5952_v52 }
  0xe0   : > { %10274 = vst [vmem:[#allocation45_spill] sm:$0xff] %v5979_v8  ;;  %10276 = vst [vmem:[#allocation16_spill] sm:$0xff] %v5983_v14  ;;  %v5989_v62 = vmul.f32 %v10215_v28, %v10275_v57  ;;  %v1931_v37 = vrot.slane %v5612_v41, 4  ;;  %v5998_v5 = vsel %vm1962_vm3, %v10279_v60, %v1925_v22  ;;  %v1173_v36 = vadd.f32 %v1157_v6, %v1136_v61 }
  0xe1   : > { %10270 = vst [vmem:[#allocation40_spill] sm:$0xff] %v5966_v33  ;;  %10271 = vst [vmem:[#allocation43_spill] sm:$0xff] %v5970_v39  ;;  %v1831_v33 = vadd.f32 %v1815_v53, %v1794_v45  ;;  %v1159_v39 = vmul.f32 %v5959_v51, %v5710_v49  ;;  %v6003_v45 = vld [vmem:[%s9488_s1 + $0x29] ss:$0 sm:$0xff]  ;;  %v10280_v53 = vld [vmem:[#allocation55_spill] sm:$0xff]  ;;  %v6009_v14 = vmul.f32 %v4220_v0, %v5666_v31  ;;  %v1934_v22 = vrot.slane %v5628_v54, 4 }
  0xe2   : > { %10278 = vst [vmem:[#allocation18_spill] sm:$0xff] %v5989_v62  ;;  %v1194_v28 = vmul.f32 %v6003_v45, %v5710_v49  ;;  %v1997_v57 = vmul.f32 %v10280_v53, %v1989_v29  ;;  %v6012_v62 = vmul.f32 %v4220_v0, %v5687_v4  ;;  %v10283_v6 = vrot.slane %v4737_v25, 4  ;;  %v10286_v31 = vld [vmem:[#allocation56_spill] sm:$0xff] }
  0xe3   : > { %v1868_v9 = vadd.f32 %v1852_v17, %v1831_v33  ;;  %10281 = vst [vmem:[#allocation49_spill] sm:$0xff] %v6009_v14  ;;  %v6022_v60 = vmul.f32 %v4220_v0, %v5701_v24  ;;  %v6025_v17 = vmul.f32 %v4221_v7, %v5687_v4  ;;  %v2034_v33 = vmul.f32 %v10286_v31, %v5998_v5 }
  0xe4   : > { %10282 = vst [vmem:[#allocation51_spill] sm:$0xff] %v6012_v62  ;;  %v6019_v61 = vsel %vm1962_vm3, %v10283_v6, %v1928_v32  ;;  %v6030_v62 = vmul.f32 %v4221_v7, %v5701_v24  ;;  %v6033_v49 = vmul.f32 %v4222_v59, %v5701_v24  ;;  %v1937_v14 = vrot.slane %v5643_v19, 4  ;;  %v10292_v6 = vld [vmem:[#allocation59_spill] sm:$0xff]  ;;  %v4225_v24 = vld [vmem:[%s9488_s1 + $0x2] ss:$0 sm:$0xff] }
  0xe5   : > { %10284 = vst [vmem:[#allocation29_spill] sm:$0xff] %v6022_v60  ;;  %10285 = vst [vmem:[#allocation31_spill] sm:$0xff] %v6025_v17  ;;  %v1905_v29 = vadd.f32 %v1889_v63, %v1868_v9  ;;  %v10289_v32 = vrot.slane %v4840_v12, 4  ;;  %v6043_v4 = vadd.f32 %v1159_v39, %v5721_v30  ;;  %v1210_v63 = vadd.f32 %v1194_v28, %v1173_v36  ;;  %v6067_v28 = vld [vmem:[%s9488_s1 + $0xa] ss:$0 sm:$0xff] }
  0xe6   : > { %10287 = vst [vmem:[#allocation54_spill] sm:$0xff] %v6030_v62  ;;  %10288 = vst [vmem:[#allocation55_spill] sm:$0xff] %v6033_v49  ;;  %v2071_v7 = vmul.f32 %v10292_v6, %v6019_v61  ;;  %v1339_v59 = vmul.f32 %v4225_v24, %v5766_v50  ;;  %v6052_v31 = vmul.f32 %v4225_v24, %v5760_v20  ;;  %v10294_v30 = vrot.slane %v4848_v15, 4 }
  0xe7   : > { %v6040_v0 = vsel %vm1962_vm3, %v10289_v32, %v1931_v37  ;;  %10291 = vst [vmem:[#allocation93_spill] sm:$0xff] %v6043_v4  ;;  %v2013_v9 = vadd.f32 %v1997_v57, %v1905_v29  ;;  %v1940_v37 = vrot.slane %v5657_v38, 4  ;;  %v6062_v36 = vmul.f32 %v4225_v24, %v5782_v18  ;;  %10297 = vst [vmem:[#allocation96_spill] sm:$0xff] %v6067_v28  ;;  %v10298_v29 = vld [vmem:[#allocation60_spill] sm:$0xff] }
  0xe8   : > { %10290 = vst [vmem:[#allocation56_spill] sm:$0xff] %v6040_v0  ;;  %10293 = vst [vmem:[#allocation59_spill] sm:$0xff] %v6052_v31  ;;  %v6059_v39 = vsel %vm1962_vm3, %v10294_v30, %v1934_v22  ;;  %v1376_v50 = vmul.f32 %v6067_v28, %v5760_v20  ;;  %v2108_v32 = vmul.f32 %v10298_v29, %v6040_v0  ;;  %v10301_v24 = vrot.slane %v4886_v40, 4  ;;  %v10314_v4 = vld [vmem:[#allocation68_spill] sm:$0xff] }
  0xe9   : > { %10295 = vst [vmem:[#allocation94_spill] sm:$0xff] %v6059_v39  ;;  %10296 = vst [vmem:[#allocation95_spill] sm:$0xff] %v6062_v36  ;;  %v2050_v57 = vadd.f32 %v2034_v33, %v2013_v9  ;;  %v6075_v6 = vmul.f32 %v6067_v28, %v5782_v18  ;;  %v6079_v22 = vmul.f32 %v6067_v28, %v5798_v35  ;;  %v2252_v20 = vrot.slane %v5586_v16, 5  ;;  %v6089_v33 = vld [vmem:[%s4718_s12 + $0xb8] sm:$0xff]  ;;  %v6094_v9 = vld [vmem:[%s9488_s1 + $0x12] ss:$0 sm:$0xff] }
  0xea   : > { %v6085_v30 = vsel %vm1962_vm3, %v10301_v24, %v1937_v14  ;;  %10303 = vst [vmem:[#allocation99_spill] sm:$0xff] %v6094_v9  ;;  %v1413_v29 = vmul.f32 %v6094_v9, %v5782_v18  ;;  %v6100_v60 = vmul.f32 %v6094_v9, %v5798_v35  ;;  %v2145_v14 = vmul.f32 %v10177_v46, %v6059_v39 }
  0xeb   : > { %10299 = vst [vmem:[#allocation60_spill] sm:$0xff] %v6075_v6  ;;  %10300 = vst [vmem:[#allocation97_spill] sm:$0xff] %v6079_v22  ;;  %v2087_v62 = vadd.f32 %v2071_v7, %v2050_v57  ;;  %v6106_v24 = vmul.f32 %v6094_v9, %v5811_v48  ;;  %v6111_v22 = vld [vmem:[%s9488_s1 + $0x1a] ss:$0 sm:$0xff]  ;;  %v10307_v36 = vrot.slane %v4890_v42, 4  ;;  %v2255_v57 = vrot.slane %v5605_v3, 5 }
  0xec   : > { %10302 = vst [vmem:[#allocation98_spill] sm:$0xff] %v6085_v30  ;;  %10304 = vst [vmem:[#allocation100_spill] sm:$0xff] %v6100_v60  ;;  %v1450_v18 = vmul.f32 %v6111_v22, %v5798_v35  ;;  %v6124_v49 = vmul.f32 %v6111_v22, %v5811_v48  ;;  %v2182_v17 = vmul.f32 %v10179_v10, %v6085_v30  ;;  %v951_v28 = vrot.slane %v6089_v33, 1  ;;  %v10310_v60 = vld [vmem:[#allocation10_spill] sm:$0xff] }
  0xed   : > { %10305 = vst [vmem:[#allocation101_spill] sm:$0xff] %v6106_v24  ;;  %10306 = vst [vmem:[#allocation102_spill] sm:$0xff] %v6111_v22  ;;  %v6119_v7 = vsel %vm1962_vm3, %v10307_v36, %v1940_v37  ;;  %v2124_v24 = vadd.f32 %v2108_v32, %v2087_v62  ;;  %v1487_v35 = vmul.f32 %v10225_v27, %v5811_v48  ;;  %v2258_v37 = vrot.slane %v5589_v11, 5  ;;  %v10313_v62 = vld [vmem:[#allocation35_spill] sm:$0xff]  ;;  %v10315_v48 = vld [vmem:[#allocation36_spill] sm:$0xff] }
  0xee   : > { %10308 = vst [vmem:[#allocation103_spill] sm:$0xff] %v6119_v7  ;;  %10309 = vst [vmem:[#allocation104_spill] sm:$0xff] %v6124_v49  ;;  %v6133_v6 = vmul.f32 %v10225_v27, %v10310_v60  ;;  %v10312_v36 = vrot.slane %v4725_v21, 5  ;;  %v6142_v32 = vmul.f32 %v10313_v62, %v10310_v60  ;;  %v2219_v22 = vmul.f32 %v10314_v4, %v6119_v7  ;;  %v10322_v60 = vld [vmem:[#allocation70_spill] sm:$0xff] }
  0xef   : > { %v2161_v31 = vadd.f32 %v2145_v14, %v2124_v24  ;;  %v10316_v9 = vrot.slane %v10315_v48, 1  ;;  %v6166_v24 = vld [vmem:[%s9488_s1 + $0x31] ss:$0 sm:$0xff]  ;;  %v2264_v4 = vrot.slane %v5628_v54, 5 }
  0xf0   : > { %10311 = vst [vmem:[#allocation105_spill] sm:$0xff] %v6133_v6  ;;  %v2319_v49 = vsel %vm2292_vm4, %v10312_v36, %v2252_v20  ;;  %v6154_v6 = vmul.f32 %v10241_v13, %v5854_v26  ;;  %v2261_v20 = vrot.slane %v5612_v41, 5  ;;  %v10318_v36 = vrot.slane %v4731_v23, 5  ;;  %10319 = vst [vmem:[#allocation36_spill] sm:$0xff] %v6166_v24 }
  0xf1   : > { %v6150_v27 = vsel %vm972_vm0, %v10316_v9, %v951_v28  ;;  %v6172_v26 = vmul.f32 %v10241_v13, %v5870_v2  ;;  %v6176_v9 = vmul.f32 %v10241_v13, %v5887_v58  ;;  %v2198_v62 = vadd.f32 %v2182_v17, %v2161_v31 }
  0xf2   : > { %10317 = vst [vmem:[#allocation35_spill] sm:$0xff] %v6150_v27  ;;  %v6161_v14 = vsel %vm2292_vm4, %v10318_v36, %v2255_v57  ;;  %v1231_v28 = vmul.f32 %v6166_v24, %v6150_v27  ;;  %v2327_v57 = vmul.f32 %v10322_v60, %v2319_v49  ;;  %v6181_v36 = vmul.f32 %v10244_v34, %v5870_v2  ;;  %v10326_v2 = vld [vmem:[#allocation73_spill] sm:$0xff] }
  0xf3   : > { %10320 = vst [vmem:[#allocation106_spill] sm:$0xff] %v6172_v26  ;;  %10321 = vst [vmem:[#allocation107_spill] sm:$0xff] %v6176_v9  ;;  %v10323_v27 = vrot.slane %v4737_v25, 5  ;;  %v6192_v13 = vmul.f32 %v10244_v34, %v5887_v58  ;;  %v2235_v17 = vadd.f32 %v2219_v22, %v2198_v62  ;;  %v2267_v49 = vrot.slane %v5643_v19, 5  ;;  %v10330_v62 = vld [vmem:[#allocation74_spill] sm:$0xff] }
  0xf4   : > { %v1247_v26 = vadd.f32 %v1231_v28, %v1210_v63  ;;  %v2364_v31 = vmul.f32 %v10326_v2, %v6161_v14  ;;  %v6199_v9 = vmul.f32 %v10244_v34, %v5908_v1  ;;  %v2270_v60 = vrot.slane %v5657_v38, 5 }
  0xf5   : > { %v6188_v8 = vsel %vm2292_vm4, %v10323_v27, %v2258_v37  ;;  %10325 = vst [vmem:[#allocation109_spill] sm:$0xff] %v6192_v13  ;;  %v10328_v37 = vrot.slane %v4840_v12, 5  ;;  %v6210_v22 = vmul.f32 %v10249_v55, %v5887_v58  ;;  %v2343_v28 = vadd.f32 %v2327_v57, %v2235_v17 }
  0xf6   : > { %10324 = vst [vmem:[#allocation108_spill] sm:$0xff] %v6188_v8  ;;  %10327 = vst [vmem:[#allocation110_spill] sm:$0xff] %v6199_v9  ;;  %v1355_v27 = vadd.f32 %v1339_v59, %v1247_v26  ;;  %v2401_v13 = vmul.f32 %v10330_v62, %v6188_v8  ;;  %v1283_v34 = vrot.slane %v6089_v33, 2  ;;  %v6216_v9 = vld [vmem:[%s4718_s12 + $0xc0] sm:$0xff]  ;;  %v6220_v2 = vmul.f32 %v10249_v55, %v5908_v1 }
  0xf7   : > { %v6206_v63 = vsel %vm2292_vm4, %v10328_v37, %v2261_v20  ;;  %10331 = vst [vmem:[#allocation74_spill] sm:$0xff] %v6216_v9  ;;  %v6224_v20 = vmul.f32 %v10253_v56, %v5908_v1  ;;  %v10333_v59 = vrot.slane %v4848_v15, 5  ;;  %v6234_v17 = vmul.f32 %v10280_v53, %v5998_v5  ;;  %v10337_v56 = vld [vmem:[#allocation75_spill] sm:$0xff] }
  0xf8   : > { %10329 = vst [vmem:[#allocation111_spill] sm:$0xff] %v6206_v63  ;;  %10332 = vst [vmem:[#allocation112_spill] sm:$0xff] %v6220_v2  ;;  %v1392_v57 = vadd.f32 %v1376_v50, %v1355_v27  ;;  %v10335_v37 = vrot.slane %v4886_v40, 5  ;;  %v2380_v58 = vadd.f32 %v2364_v31, %v2343_v28  ;;  %v2438_v1 = vmul.f32 %v10337_v56, %v6206_v63  ;;  %v6254_v27 = vld [vmem:[%s9488_s1 + $0x30] ss:$0 sm:$0xff] }
  0xf9   : > { %v6230_v26 = vsel %vm2292_vm4, %v10333_v59, %v2264_v4  ;;  %v10338_v2 = vrot.slane %v4890_v42, 5  ;;  %v2582_v50 = vrot.slane %v5586_v16, 6  ;;  %10340 = vst [vmem:[#allocation116_spill] sm:$0xff] %v6254_v27  ;;  %v6260_v31 = vmul.f32 %v10280_v53, %v6019_v61  ;;  %v10342_v59 = vld [vmem:[#allocation76_spill] sm:$0xff] }
  0xfa   : > { %10334 = vst [vmem:[#allocation113_spill] sm:$0xff] %v6230_v26  ;;  %v6240_v55 = vsel %vm2292_vm4, %v10335_v37, %v2267_v49  ;;  %v1429_v5 = vadd.f32 %v1413_v29, %v1392_v57  ;;  %v900_v49 = vmul.f32 %v6254_v27, %v6216_v9  ;;  %v2417_v28 = vadd.f32 %v2401_v13, %v2380_v58  ;;  %v10345_v29 = vld [vmem:[#allocation79_spill] sm:$0xff]  ;;  %v10346_v58 = vld [vmem:[#allocation81_spill] sm:$0xff] }
  0xfb   : > { %10336 = vst [vmem:[#allocation114_spill] sm:$0xff] %v6240_v55  ;;  %v6248_v4 = vsel %vm2292_vm4, %v10338_v2, %v2270_v60  ;;  %10341 = vst [vmem:[#allocation117_spill] sm:$0xff] %v6260_v31  ;;  %v2475_v60 = vmul.f32 %v10342_v59, %v6230_v26  ;;  %v10343_v2 = vrot.slane %v10315_v48, 2  ;;  %v2512_v57 = vmul.f32 %v10345_v29, %v6240_v55 }
  0xfc   : > { %10339 = vst [vmem:[#allocation115_spill] sm:$0xff] %v6248_v4  ;;  %v2585_v37 = vrot.slane %v5605_v3, 6  ;;  %v1466_v27 = vadd.f32 %v1450_v18, %v1429_v5  ;;  %v916_v56 = vadd.f32 %v900_v49, %v5894_v43  ;;  %v2454_v53 = vadd.f32 %v2438_v1, %v2417_v28  ;;  %v6285_v3 = vld [vmem:[%s9488_s1 + $0x32] ss:$0 sm:$0xff] }
  0xfd   : > { %v6268_v16 = vsel %vm1302_vm1, %v10343_v2, %v1283_v34  ;;  %v2549_v13 = vmul.f32 %v10346_v58, %v6248_v4  ;;  %v2588_v31 = vrot.slane %v5589_v11, 6  ;;  %v2594_v59 = vrot.slane %v5628_v54, 6  ;;  %10348 = vst [vmem:[#allocation79_spill] sm:$0xff] %v6285_v3  ;;  %v10351_v49 = vld [vmem:[#allocation27_spill] sm:$0xff] }
  0xfe   : > { %10344 = vst [vmem:[#allocation118_spill] sm:$0xff] %v6268_v16  ;;  %v10347_v26 = vrot.slane %v4725_v21, 6  ;;  %v1503_v2 = vadd.f32 %v1487_v35, %v1466_v27  ;;  %v1561_v43 = vmul.f32 %v6285_v3, %v6268_v16  ;;  %v1026_v1 = vadd.f32 %v5916_v47, %v916_v56  ;;  %v10349_v21 = vld [vmem:[#allocation11_spill] sm:$0xff] }
  0xff   : > { %v2491_v18 = vadd.f32 %v2475_v60, %v2454_v53  ;;  %v2591_v11 = vrot.slane %v5612_v41, 6  ;;  %v952_v54 = vrot.slane %v6216_v9, 1  ;;  %v9707_v5 = vrot.slane %v10349_v21, 1 }
 0x100   : > { %v2649_v34 = vsel %vm2622_vm5, %v10347_v26, %v2582_v50  ;;  %v2597_v26 = vrot.slane %v5643_v19, 6  ;;  %v10350_v35 = vrot.slane %v4731_v23, 6  ;;  %v1540_v27 = vadd.f32 %v6142_v32, %v1503_v2  ;;  %v10354_v19 = vld [vmem:[#allocation82_spill] sm:$0xff]  ;;  %v10357_v2 = vld [vmem:[#allocation33_spill] sm:$0xff] }
 0x101   : > { %v1063_v28 = vadd.f32 %v10351_v49, %v1026_v1  ;;  %v2528_v47 = vadd.f32 %v2512_v57, %v2491_v18  ;;  %v2600_v56 = vrot.slane %v5657_v38, 6  ;;  %v10352_v41 = vrot.slane %v4737_v25, 6  ;;  %v10358_v57 = vld [vmem:[#allocation24_spill] sm:$0xff]  ;;  %v10359_v25 = vld [vmem:[#allocation86_spill] sm:$0xff]  ;;  %v10364_v49 = vld [vmem:[#allocation41_spill] sm:$0xff] }
 0x102   : > { %v6298_v50 = vsel %vm2622_vm5, %v10350_v35, %v2585_v37  ;;  %v2657_v53 = vmul.f32 %v10354_v19, %v2649_v34  ;;  %v10355_v23 = vrot.slane %v4848_v15, 6  ;;  %v1577_v32 = vadd.f32 %v1561_v43, %v1540_v27 }
 0x103   : > { %v6307_v60 = vsel %vm2622_vm5, %v10352_v41, %v2588_v31  ;;  %v1100_v1 = vadd.f32 %v10357_v2, %v1063_v28  ;;  %v1158_v38 = vmul.f32 %v5959_v51, %v10358_v57  ;;  %v2565_v18 = vadd.f32 %v2549_v13, %v2528_v47  ;;  %v10363_v13 = vld [vmem:[#allocation43_spill] sm:$0xff] }
 0x104   : > { %10353 = vst [vmem:[#allocation81_spill] sm:$0xff] %v6307_v60  ;;  %v6314_v37 = vsel %vm2622_vm5, %v10355_v23, %v2594_v59  ;;  %v2694_v35 = vmul.f32 %v10359_v25, %v6298_v50  ;;  %v1613_v31 = vrot.slane %v6089_v33, 3  ;;  %v6326_v15 = vsel %vm972_vm0, %v952_v54, %v9707_v5  ;;  %v10376_v5 = vld [vmem:[#allocation12_spill] sm:$0xff] }
 0x105   : > { %10356 = vst [vmem:[#allocation11_spill] sm:$0xff] %v6314_v37  ;;  %10360 = vst [vmem:[#allocation27_spill] sm:$0xff] %v6326_v15  ;;  %v10361_v59 = vrot.slane %v4840_v12, 6  ;;  %v1685_v43 = vadd.f32 %v6154_v6, %v1577_v32  ;;  %v1137_v27 = vadd.f32 %v10363_v13, %v1100_v1  ;;  %v1195_v28 = vmul.f32 %v6003_v45, %v10364_v49  ;;  %v10369_v6 = vld [vmem:[#allocation87_spill] sm:$0xff]  ;;  %v10371_v13 = vld [vmem:[#allocation46_spill] sm:$0xff] }
 0x106   : > { %v10365_v47 = vrot.slane %v4890_v42, 6  ;;  %v10367_v54 = vrot.slane %v4886_v40, 6  ;;  %v2731_v23 = vmul.f32 %v10369_v6, %v6307_v60  ;;  %v1943_v2 = vrot.slane %v6089_v33, 4 }
 0x107   : > { %v6332_v34 = vsel %vm2622_vm5, %v10361_v59, %v2591_v11  ;;  %v2673_v11 = vadd.f32 %v2657_v53, %v2565_v18  ;;  %v1722_v32 = vadd.f32 %v6181_v36, %v1685_v43  ;;  %v1174_v1 = vadd.f32 %v1158_v38, %v1137_v27  ;;  %v10370_v59 = vld [vmem:[#allocation91_spill] sm:$0xff]  ;;  %v10374_v36 = vld [vmem:[#allocation9_spill] sm:$0xff]  ;;  %v10375_v27 = vld [vmem:[#allocation26_spill] sm:$0xff] }
 0x108   : > { %10362 = vst [vmem:[#allocation82_spill] sm:$0xff] %v6332_v34  ;;  %v6342_v41 = vsel %vm2622_vm5, %v10365_v47, %v2600_v56  ;;  %v6348_v12 = vsel %vm2622_vm5, %v10367_v54, %v2597_v26  ;;  %v1232_v42 = vmul.f32 %v6166_v24, %v6326_v15  ;;  %v2768_v40 = vmul.f32 %v10370_v59, %v6332_v34 }
 0x109   : > { %10366 = vst [vmem:[#allocation33_spill] sm:$0xff] %v6342_v41  ;;  %10368 = vst [vmem:[#allocation86_spill] sm:$0xff] %v6348_v12  ;;  %v2710_v56 = vadd.f32 %v2694_v35, %v2673_v11  ;;  %v2805_v26 = vmul.f32 %v10371_v13, %v6314_v37  ;;  %v10372_v53 = vrot.slane %v10315_v48, 3  ;;  %v2842_v43 = vmul.f32 %v10374_v36, %v6348_v12  ;;  %v6372_v35 = vld [vmem:[%s9488_s1 + $0x23] ss:$0 sm:$0xff] }
 0x10a   : > { %v1759_v38 = vadd.f32 %v6210_v22, %v1722_v32  ;;  %v1817_v47 = vmul.f32 %v6372_v35, %v10375_v27  ;;  %v1211_v54 = vadd.f32 %v1195_v28, %v1174_v1  ;;  %v2879_v15 = vmul.f32 %v10376_v5, %v6342_v41  ;;  %v6388_v32 = vld [vmem:[%s9488_s1 + $0xc] ss:$0 sm:$0xff]  ;;  %v6396_v1 = vld [vmem:[%s9488_s1 + $0x33] ss:$0 sm:$0xff] }
 0x10b   : > { %v6364_v18 = vsel %vm1632_vm2, %v10372_v53, %v1613_v31  ;;  %v2747_v11 = vadd.f32 %v2731_v23, %v2710_v56  ;;  %v6381_v31 = vld [vmem:[%s9488_s1 + $0x2b] ss:$0 sm:$0xff]  ;;  %10377 = vst [vmem:[#allocation87_spill] sm:$0xff] %v6388_v32  ;;  %v2036_v28 = vmul.f32 %v6388_v32, %v6019_v61  ;;  %10378 = vst [vmem:[#allocation91_spill] sm:$0xff] %v6396_v1  ;;  %v10379_v53 = vrot.slane %v10315_v48, 4 }
 0x10c   : > { %10373 = vst [vmem:[#allocation43_spill] sm:$0xff] %v6364_v18  ;;  %v1854_v22 = vmul.f32 %v6381_v31, %v5952_v52  ;;  %v1796_v23 = vadd.f32 %v6224_v20, %v1759_v38  ;;  %v1891_v56 = vmul.f32 %v6396_v1, %v6364_v18  ;;  %v1248_v49 = vadd.f32 %v1232_v42, %v1211_v54  ;;  %v6409_v61 = vld [vmem:[%s9488_s1 + $0x14] ss:$0 sm:$0xff]  ;;  %v6416_v38 = vld [vmem:[%s9488_s1 + $0x1c] ss:$0 sm:$0xff] }
 0x10d   : > { %v6404_v51 = vsel %vm1962_vm3, %v10379_v53, %v1943_v2  ;;  %v2784_v57 = vadd.f32 %v2768_v40, %v2747_v11  ;;  %10381 = vst [vmem:[#allocation9_spill] sm:$0xff] %v6409_v61  ;;  %v2073_v20 = vmul.f32 %v6409_v61, %v6040_v0  ;;  %10382 = vst [vmem:[#allocation12_spill] sm:$0xff] %v6416_v38  ;;  %v10383_v11 = vld [vmem:[#allocation45_spill] sm:$0xff]  ;;  %v10384_v0 = vld [vmem:[#allocation32_spill] sm:$0xff]  ;;  %v2273_v61 = vrot.slane %v6089_v33, 5 }
 0x10e   : > { %10380 = vst [vmem:[#allocation46_spill] sm:$0xff] %v6404_v51  ;;  %v2110_v2 = vmul.f32 %v6416_v38, %v6059_v39  ;;  %v6422_v42 = vmul.f32 %v10177_v46, %v6085_v30  ;;  %v1833_v40 = vadd.f32 %v1817_v47, %v1796_v23  ;;  %v6426_v54 = vmul.f32 %v10179_v10, %v6119_v7  ;;  %v10385_v18 = vld [vmem:[#allocation99_spill] sm:$0xff]  ;;  %v10386_v47 = vld [vmem:[#allocation68_spill] sm:$0xff]  ;;  %v10387_v10 = vld [vmem:[#allocation18_spill] sm:$0xff] }
 0x10f   : > { %v1356_v53 = vadd.f32 %v10383_v11, %v1248_v49  ;;  %v1414_v52 = vmul.f32 %v10385_v18, %v10384_v0  ;;  %v2821_v27 = vadd.f32 %v2805_v26, %v2784_v57  ;;  %v1284_v32 = vrot.slane %v6216_v9, 2  ;;  %v6435_v38 = vld [vmem:[%s4718_s12 + $0xd0] sm:$0xff]  ;;  %v10388_v49 = vld [vmem:[#allocation34_spill] sm:$0xff] }
 0x110   : > { %v1870_v46 = vadd.f32 %v1854_v22, %v1833_v40  ;;  %v6439_v23 = vmul.f32 %v10386_v47, %v6404_v51  ;;  %v10389_v11 = vld [vmem:[#allocation102_spill] sm:$0xff]  ;;  %v10391_v0 = vld [vmem:[#allocation73_spill] sm:$0xff]  ;;  %v6454_v22 = vmul.f32 %v10330_v62, %v6206_v63  ;;  %v10396_v62 = vrot.slane %v10349_v21, 2 }
 0x111   : > { %v1393_v7 = vadd.f32 %v10387_v10, %v1356_v53  ;;  %v1451_v30 = vmul.f32 %v10389_v11, %v10388_v49  ;;  %v2858_v18 = vadd.f32 %v2842_v43, %v2821_v27  ;;  %v10390_v57 = vld [vmem:[#allocation70_spill] sm:$0xff]  ;;  %v6450_v39 = vmul.f32 %v10391_v0, %v6188_v8  ;;  %v6459_v53 = vld [vmem:[%s9488_s1 + $0x22] ss:$0 sm:$0xff] }
 0x112   : > { %v6446_v26 = vmul.f32 %v10390_v57, %v6161_v14  ;;  %v1907_v40 = vadd.f32 %v1891_v56, %v1870_v46  ;;  %10392 = vst [vmem:[#allocation45_spill] sm:$0xff] %v6459_v53  ;;  %v10393_v43 = vld [vmem:[#allocation37_spill] sm:$0xff]  ;;  %v954_v14 = vrot.slane %v6435_v38, 1  ;;  %v10394_v0 = vrot.slane %v10315_v48, 5 }
 0x113   : > { %v1430_v47 = vadd.f32 %v1414_v52, %v1393_v7  ;;  %v1488_v27 = vmul.f32 %v6459_v53, %v10393_v43  ;;  %v2895_v10 = vadd.f32 %v2879_v15, %v2858_v18  ;;  %v6474_v52 = vsel %vm1302_vm1, %v1284_v32, %v10396_v62  ;;  %v10398_v7 = vld [vmem:[#allocation35_spill] sm:$0xff]  ;;  %v6482_v15 = vld [vmem:[%s9488_s1 + $0x2a] ss:$0 sm:$0xff]  ;;  %v10399_v18 = vld [vmem:[#allocation80_spill] sm:$0xff] }
 0x114   : > { %v6468_v57 = vsel %vm2292_vm4, %v10394_v0, %v2273_v61  ;;  %10397 = vst [vmem:[#allocation18_spill] sm:$0xff] %v6474_v52  ;;  %v1196_v56 = vmul.f32 %v6003_v45, %v10398_v7  ;;  %v2015_v46 = vadd.f32 %v6234_v17, %v1907_v40  ;;  %v1525_v61 = vmul.f32 %v6482_v15, %v10399_v18  ;;  %v10402_v62 = vld [vmem:[#allocation13_spill] sm:$0xff]  ;;  %v10405_v17 = vld [vmem:[#allocation75_spill] sm:$0xff]  ;;  %v10407_v18 = vld [vmem:[#allocation76_spill] sm:$0xff] }
 0x115   : > { %10395 = vst [vmem:[#allocation68_spill] sm:$0xff] %v6468_v57  ;;  %v1467_v63 = vadd.f32 %v1451_v30, %v1430_v47  ;;  %v10400_v0 = vrot.slane %v10349_v21, 1  ;;  %v6493_v8 = vadd.f32 %v10402_v62, %v2895_v10  ;;  %v10404_v7 = vld [vmem:[#allocation113_spill] sm:$0xff]  ;;  %v6504_v11 = vmul.f32 %v10407_v18, %v6240_v55  ;;  %v10448_v55 = vld [vmem:[#allocation72_spill] sm:$0xff] }
 0x116   : > { %v6497_v30 = vmul.f32 %v10405_v17, %v10404_v7  ;;  %v10406_v40 = vld [vmem:[#allocation93_spill] sm:$0xff]  ;;  %v2052_v51 = vadd.f32 %v2036_v28, %v2015_v46  ;;  %v6511_v10 = vmul.f32 %v10345_v29, %v6248_v4  ;;  %v2603_v28 = vrot.slane %v6089_v33, 6  ;;  %v10409_v29 = vld [vmem:[#allocation42_spill] sm:$0xff] }
 0x117   : > { %v6490_v32 = vsel %vm972_vm0, %v10400_v0, %v954_v14  ;;  %10403 = vst [vmem:[#allocation73_spill] sm:$0xff] %v6493_v8  ;;  %v1212_v47 = vadd.f32 %v1196_v56, %v10406_v40  ;;  %v1504_v43 = vadd.f32 %v1488_v27, %v1467_v63  ;;  %v1562_v14 = vmul.f32 %v6285_v3, %v6474_v52  ;;  %v6525_v18 = vld [vmem:[%s9488_s1 + $0x3] ss:$0 sm:$0xff] }
 0x118   : > { %10401 = vst [vmem:[#allocation70_spill] sm:$0xff] %v6490_v32  ;;  %v1233_v53 = vmul.f32 %v6166_v24, %v6490_v32  ;;  %2935 = vadd.xlane.f32.xlu0 %v6493_v8  ;;  %v6515_v56 = vmul.f32 %v10346_v58, %v6468_v57  ;;  %v2089_v0 = vadd.f32 %v2073_v20, %v2052_v51  ;;  %10408 = vst [vmem:[#allocation13_spill] sm:$0xff] %v6525_v18  ;;  %v10410_v20 = vld [vmem:[#allocation59_spill] sm:$0xff]  ;;  %v10438_v57 = vld [vmem:[#allocation12_spill] sm:$0xff] }
 0x119   : > { %v6520_v63 = vmul.f32 %v10354_v19, %v6298_v50  ;;  %v1541_v27 = vadd.f32 %v1525_v61, %v1504_v43  ;;  %v1670_v62 = vmul.f32 %v6525_v18, %v10409_v29  ;;  %v6531_v58 = vmul.f32 %v10359_v25, %v6307_v60  ;;  %v6539_v43 = vld [vmem:[%s9488_s1 + $0xb] ss:$0 sm:$0xff]  ;;  %v10412_v61 = vld [vmem:[#allocation44_spill] sm:$0xff]  ;;  %v10433_v60 = vld [vmem:[#allocation57_spill] sm:$0xff] }
 0x11a   : > { %v1249_v46 = vadd.f32 %v1233_v53, %v1212_v47  ;;  %v1614_v33 = vrot.slane %v6216_v9, 3  ;;  %v9738_v51 = vrot.slane %v10349_v21, 3  ;;  %v2126_v19 = vadd.f32 %v2110_v2, %v2089_v0  ;;  %10411 = vst [vmem:[#allocation75_spill] sm:$0xff] %v6539_v43  ;;  %v10439_v4 = vld [vmem:[#allocation21_spill] sm:$0xff] }
 0x11b   : > { %v1578_v53 = vadd.f32 %v1562_v14, %v1541_v27  ;;  %v1707_v17 = vmul.f32 %v6539_v43, %v10412_v61  ;;  %v1286_v40 = vrot.slane %v6435_v38, 2  ;;  %v10413_v25 = vrot.slane %v10315_v48, 6 }
 0x11c   : > { %v1357_v50 = vadd.f32 %v10410_v20, %v1249_v46  ;;  %v6552_v2 = vmul.f32 %v10369_v6, %v6332_v34  ;;  %v6556_v14 = vmul.f32 %v10370_v59, %v6314_v37  ;;  %v10415_v46 = vld [vmem:[#allocation60_spill] sm:$0xff]  ;;  %v2163_v27 = vadd.f32 %v6422_v42, %v2126_v19  ;;  %v10420_v42 = vld [vmem:[#allocation50_spill] sm:$0xff] }
 0x11d   : > { %v6548_v47 = vsel %vm2622_vm5, %v10413_v25, %v2603_v28  ;;  %v6562_v29 = vmul.f32 %v10371_v13, %v6348_v12  ;;  %v1686_v48 = vadd.f32 %v1670_v62, %v1578_v53  ;;  %v6567_v28 = vld [vmem:[%s9488_s1 + $0x13] ss:$0 sm:$0xff]  ;;  %v10417_v6 = vld [vmem:[#allocation48_spill] sm:$0xff]  ;;  %v6575_v59 = vsel %vm1632_vm2, %v1614_v33, %v9738_v51 }
 0x11e   : > { %10414 = vst [vmem:[#allocation93_spill] sm:$0xff] %v6548_v47  ;;  %v1394_v0 = vadd.f32 %v10415_v46, %v1357_v50  ;;  %10416 = vst [vmem:[#allocation76_spill] sm:$0xff] %v6567_v28  ;;  %v1744_v20 = vmul.f32 %v6567_v28, %v10417_v6  ;;  %v6580_v13 = vld [vmem:[%s9488_s1 + $0x1b] ss:$0 sm:$0xff]  ;;  %v1944_v50 = vrot.slane %v6216_v9, 4  ;;  %v2200_v25 = vadd.f32 %v6426_v54, %v2163_v27 }
 0x11f   : > { %10418 = vst [vmem:[#allocation42_spill] sm:$0xff] %v6575_v59  ;;  %10419 = vst [vmem:[#allocation59_spill] sm:$0xff] %v6580_v13  ;;  %v1781_v62 = vmul.f32 %v6580_v13, %v10420_v42  ;;  %v10421_v19 = vld [vmem:[#allocation100_spill] sm:$0xff]  ;;  %v1723_v46 = vadd.f32 %v1707_v17, %v1686_v48  ;;  %v10422_v33 = vrot.slane %v10349_v21, 2  ;;  %v6596_v12 = vmul.f32 %v10374_v36, %v6342_v41  ;;  %v6677_v42 = vld [vmem:[%s9488_s1 + $0x5] ss:$0 sm:$0xff] }
 0x120   : > { %v1431_v53 = vadd.f32 %v10421_v19, %v1394_v0  ;;  %v6600_v37 = vmul.f32 %v10376_v5, %v6548_v47  ;;  %v10424_v0 = vld [vmem:[#allocation104_spill] sm:$0xff]  ;;  %v1526_v17 = vmul.f32 %v6482_v15, %v6268_v16  ;;  %v2237_v27 = vadd.f32 %v6439_v23, %v2200_v25  ;;  %v10425_v19 = vld [vmem:[#allocation53_spill] sm:$0xff] }
 0x121   : > { %v6592_v51 = vsel %vm1302_vm1, %v10422_v33, %v1286_v40  ;;  %v1760_v48 = vadd.f32 %v1744_v20, %v1723_v46  ;;  %v1818_v40 = vmul.f32 %v6372_v35, %v10425_v19  ;;  %v10426_v33 = vld [vmem:[#allocation90_spill] sm:$0xff]  ;;  %v1892_v36 = vmul.f32 %v6396_v1, %v6575_v59  ;;  %v6615_v5 = vld [vmem:[%s9488_s1 + $0x4] ss:$0 sm:$0xff]  ;;  %v10434_v59 = vld [vmem:[#allocation87_spill] sm:$0xff] }
 0x122   : > { %10423 = vst [vmem:[#allocation60_spill] sm:$0xff] %v6592_v51  ;;  %v1468_v54 = vadd.f32 %v10424_v0, %v1431_v53  ;;  %v1855_v8 = vmul.f32 %v6381_v31, %v10426_v33  ;;  %10427 = vst [vmem:[#allocation100_spill] sm:$0xff] %v6615_v5  ;;  %v10428_v53 = vld [vmem:[#allocation58_spill] sm:$0xff]  ;;  %v10429_v16 = vld [vmem:[#allocation105_spill] sm:$0xff]  ;;  %v1563_v20 = vmul.f32 %v6285_v3, %v6592_v51  ;;  %v10431_v41 = vrot.slane %v10349_v21, 4 }
 0x123   : > { %v2000_v0 = vmul.f32 %v6615_v5, %v10428_v53  ;;  %v6623_v25 = vld [vmem:[%s4718_s12 + $0xd8] sm:$0xff]  ;;  %v2345_v46 = vadd.f32 %v6446_v26, %v2237_v27  ;;  %v1797_v47 = vadd.f32 %v1781_v62, %v1760_v48  ;;  %v2037_v33 = vmul.f32 %v10434_v59, %v10433_v60  ;;  %v10435_v53 = vld [vmem:[#allocation63_spill] sm:$0xff]  ;;  %v10436_v5 = vld [vmem:[#allocation9_spill] sm:$0xff] }
 0x124   : > { %v1505_v23 = vadd.f32 %v10429_v16, %v1468_v54  ;;  %10430 = vst [vmem:[#allocation104_spill] sm:$0xff] %v6623_v25  ;;  %v6630_v34 = vsel %vm1962_vm3, %v1944_v50, %v10431_v41  ;;  %v2074_v16 = vmul.f32 %v10436_v5, %v10435_v53  ;;  %v10437_v54 = vld [vmem:[#allocation65_spill] sm:$0xff]  ;;  %v864_v26 = vmul.f32 %v10439_v4, %v6216_v9  ;;  %v10441_v50 = vld [vmem:[#allocation64_spill] sm:$0xff] }
 0x125   : > { %10432 = vst [vmem:[#allocation58_spill] sm:$0xff] %v6630_v34  ;;  %v2111_v51 = vmul.f32 %v10438_v57, %v10437_v54  ;;  %v2382_v62 = vadd.f32 %v6450_v39, %v2345_v46  ;;  %v1834_v27 = vadd.f32 %v1818_v40, %v1797_v47  ;;  %v6644_v41 = vld [vmem:[%s9488_s1 + $0x24] ss:$0 sm:$0xff]  ;;  %v10442_v53 = vld [vmem:[#allocation116_spill] sm:$0xff]  ;;  %v6664_v47 = vld [vmem:[%s9488_s1 + $0x34] ss:$0 sm:$0xff] }
 0x126   : > { %v1542_v19 = vadd.f32 %v1526_v17, %v1505_v23  ;;  %10440 = vst [vmem:[#allocation105_spill] sm:$0xff] %v6644_v41  ;;  %v6648_v48 = vmul.f32 %v6644_v41, %v10441_v50  ;;  %v902_v60 = vmul.f32 %v10442_v53, %v6623_v25  ;;  %v6655_v17 = vld [vmem:[%s9488_s1 + $0x2c] ss:$0 sm:$0xff]  ;;  %v10444_v23 = vld [vmem:[#allocation92_spill] sm:$0xff]  ;;  %10445 = vst [vmem:[#allocation119_spill] sm:$0xff] %v6664_v47  ;;  %v2274_v28 = vrot.slane %v6216_v9, 5 }
 0x127   : > { %10443 = vst [vmem:[#allocation87_spill] sm:$0xff] %v6655_v17  ;;  %v6659_v39 = vmul.f32 %v6655_v17, %v10444_v23  ;;  %v6668_v40 = vmul.f32 %v6664_v47, %v6630_v34  ;;  %v10446_v50 = vld [vmem:[#allocation47_spill] sm:$0xff]  ;;  %v2419_v53 = vadd.f32 %v6454_v22, %v2382_v62  ;;  %v1871_v4 = vadd.f32 %v1855_v8, %v1834_v27  ;;  %v10453_v23 = vld [vmem:[#allocation69_spill] sm:$0xff]  ;;  %v10462_v3 = vld [vmem:[#allocation24_spill] sm:$0xff] }
 0x128   : > { %v1579_v46 = vadd.f32 %v1563_v20, %v1542_v19  ;;  %v880_v54 = vadd.f32 %v864_v26, %v10446_v50  ;;  %10447 = vst [vmem:[#allocation47_spill] sm:$0xff] %v6677_v42  ;;  %v6681_v34 = vmul.f32 %v6677_v42, %v10448_v55  ;;  %v6686_v19 = vld [vmem:[%s9488_s1 + $0xd] ss:$0 sm:$0xff]  ;;  %v10450_v8 = vld [vmem:[#allocation71_spill] sm:$0xff]  ;;  %v1616_v6 = vrot.slane %v6435_v38, 3 }
 0x129   : > { %10449 = vst [vmem:[#allocation72_spill] sm:$0xff] %v6686_v19  ;;  %v6690_v22 = vmul.f32 %v6686_v19, %v10450_v8  ;;  %v10451_v20 = vld [vmem:[#allocation106_spill] sm:$0xff]  ;;  %v2456_v27 = vadd.f32 %v6497_v30, %v2419_v53  ;;  %v1908_v50 = vadd.f32 %v1892_v36, %v1871_v4  ;;  %v6697_v55 = vld [vmem:[%s9488_s1 + $0x15] ss:$0 sm:$0xff]  ;;  %v6707_v8 = vld [vmem:[%s9488_s1 + $0x1d] ss:$0 sm:$0xff] }
 0x12a   : > { %v1687_v26 = vadd.f32 %v10451_v20, %v1579_v46  ;;  %v918_v62 = vadd.f32 %v902_v60, %v880_v54  ;;  %10452 = vst [vmem:[#allocation106_spill] sm:$0xff] %v6697_v55  ;;  %v6701_v43 = vmul.f32 %v6697_v55, %v10453_v23  ;;  %10454 = vst [vmem:[#allocation120_spill] sm:$0xff] %v6707_v8  ;;  %v10455_v60 = vld [vmem:[#allocation78_spill] sm:$0xff]  ;;  %v10456_v4 = vld [vmem:[#allocation109_spill] sm:$0xff]  ;;  %v955_v18 = vrot.slane %v6623_v25, 1 }
 0x12b   : > { %v6711_v30 = vmul.f32 %v6707_v8, %v10455_v60  ;;  %v10457_v53 = vld [vmem:[#allocation26_spill] sm:$0xff]  ;;  %v6717_v46 = vld [vmem:[%s4718_s12 + $0xe0] sm:$0xff]  ;;  %v2493_v55 = vadd.f32 %v6504_v11, %v2456_v27  ;;  %v2016_v7 = vadd.f32 %v2000_v0, %v1908_v50  ;;  %v10459_v19 = vld [vmem:[#allocation112_spill] sm:$0xff]  ;;  %v10464_v11 = vrot.slane %v10349_v21, 5 }
 0x12c   : > { %v1724_v36 = vadd.f32 %v10456_v4, %v1687_v26  ;;  %v1782_v54 = vmul.f32 %v6580_v13, %v10457_v53  ;;  %v10458_v20 = vld [vmem:[#allocation62_spill] sm:$0xff]  ;;  %v10463_v53 = vld [vmem:[#allocation61_spill] sm:$0xff]  ;;  %v10466_v27 = vrot.slane %v10349_v21, 3 }
 0x12d   : > { %v1028_v23 = vadd.f32 %v10458_v20, %v918_v62  ;;  %v10460_v60 = vld [vmem:[#allocation38_spill] sm:$0xff]  ;;  %v1123_v13 = vmul.f32 %v10463_v53, %v10462_v3  ;;  %v2530_v42 = vadd.f32 %v6511_v10, %v2493_v55  ;;  %v2053_v62 = vadd.f32 %v2037_v33, %v2016_v7  ;;  %v10469_v20 = vld [vmem:[#allocation40_spill] sm:$0xff]  ;;  %v10470_v10 = vld [vmem:[#allocation41_spill] sm:$0xff] }
 0x12e   : > { %v1761_v32 = vadd.f32 %v10459_v19, %v1724_v36  ;;  %v1819_v8 = vmul.f32 %v6372_v35, %v10460_v60  ;;  %v10461_v26 = vld [vmem:[#allocation30_spill] sm:$0xff]  ;;  %v6734_v0 = vsel %vm2292_vm4, %v2274_v28, %v10464_v11  ;;  %v6740_v19 = vsel %vm1632_vm2, %v10466_v27, %v1616_v6  ;;  %v10471_v7 = vld [vmem:[#allocation39_spill] sm:$0xff]  ;;  %v6751_v28 = vld [vmem:[%s9488_s1 + $0x25] ss:$0 sm:$0xff] }
 0x12f   : > { %v1065_v4 = vadd.f32 %v10461_v26, %v1028_v23  ;;  %10465 = vst [vmem:[#allocation109_spill] sm:$0xff] %v6734_v0  ;;  %10467 = vst [vmem:[#allocation62_spill] sm:$0xff] %v6740_v19  ;;  %v10468_v23 = vld [vmem:[#allocation43_spill] sm:$0xff]  ;;  %v1160_v33 = vmul.f32 %v10471_v7, %v10470_v10  ;;  %v2567_v55 = vadd.f32 %v6515_v56, %v2530_v42  ;;  %v10473_v11 = vld [vmem:[#allocation77_spill] sm:$0xff] }
 0x130   : > { %v1798_v50 = vadd.f32 %v1782_v54, %v1761_v32  ;;  %v1856_v36 = vmul.f32 %v6381_v31, %v10468_v23  ;;  %v2090_v61 = vadd.f32 %v2074_v16, %v2053_v62  ;;  %10472 = vst [vmem:[#allocation112_spill] sm:$0xff] %v6751_v28  ;;  %v6755_v6 = vmul.f32 %v6751_v28, %v10473_v11  ;;  %v10476_v16 = vld [vmem:[#allocation27_spill] sm:$0xff]  ;;  %v6771_v23 = vld [vmem:[%s9488_s1 + $0x2d] ss:$0 sm:$0xff]  ;;  %v10480_v3 = vld [vmem:[#allocation85_spill] sm:$0xff] }
 0x131   : > { %v1102_v26 = vadd.f32 %v10469_v20, %v1065_v4  ;;  %v10474_v32 = vrot.slane %v6717_v46, 1  ;;  %v1893_v56 = vmul.f32 %v6396_v1, %v6740_v19  ;;  %v1197_v62 = vmul.f32 %v6003_v45, %v10476_v16  ;;  %10477 = vst [vmem:[#allocation61_spill] sm:$0xff] %v6771_v23  ;;  %v10478_v10 = vld [vmem:[#allocation14_spill] sm:$0xff]  ;;  %v6798_v19 = vld [vmem:[%s9488_s1 + $0x6] ss:$0 sm:$0xff]  ;;  %v10483_v60 = vld [vmem:[#allocation83_spill] sm:$0xff] }
 0x132   : > { %v1835_v4 = vadd.f32 %v1819_v8, %v1798_v50  ;;  %v2675_v27 = vadd.f32 %v6520_v63, %v2567_v55  ;;  %v2127_v20 = vadd.f32 %v2111_v51, %v2090_v61  ;;  %v6780_v8 = vld [vmem:[%s9488_s1 + $0x35] ss:$0 sm:$0xff]  ;;  %v2604_v63 = vrot.slane %v6216_v9, 6 }
 0x133   : > { %v6761_v54 = vsel %vm972_vm0, %v955_v18, %v10474_v32  ;;  %v1139_v42 = vadd.f32 %v1123_v13, %v1102_v26  ;;  %v6775_v18 = vmul.f32 %v6771_v23, %v10478_v10  ;;  %v6784_v13 = vmul.f32 %v6780_v8, %v6734_v0  ;;  %v6792_v32 = vld [vmem:[%s4718_s12 + $0xc8] sm:$0xff] }
 0x134   : > { %10475 = vst [vmem:[#allocation30_spill] sm:$0xff] %v6761_v54  ;;  %v1872_v51 = vadd.f32 %v1856_v36, %v1835_v4  ;;  %v1234_v50 = vmul.f32 %v6166_v24, %v6761_v54  ;;  %v2712_v26 = vadd.f32 %v6531_v58, %v2675_v27  ;;  %v2164_v55 = vadd.f32 %v6648_v48, %v2127_v20  ;;  %v10481_v58 = vld [vmem:[#allocation84_spill] sm:$0xff] }
 0x135   : > { %v1176_v61 = vadd.f32 %v1160_v33, %v1139_v42  ;;  %10479 = vst [vmem:[#allocation40_spill] sm:$0xff] %v6792_v32  ;;  %v6802_v36 = vmul.f32 %v6798_v19, %v10480_v3  ;;  %v6807_v33 = vld [vmem:[%s9488_s1 + $0xe] ss:$0 sm:$0xff]  ;;  %v10482_v42 = vld [vmem:[#allocation56_spill] sm:$0xff]  ;;  %v6820_v3 = vld [vmem:[%s9488_s1 + $0x16] ss:$0 sm:$0xff] }
 0x136   : > { %v6811_v48 = vmul.f32 %v6807_v33, %v10481_v58  ;;  %v1909_v4 = vadd.f32 %v1893_v56, %v1872_v51  ;;  %v2038_v27 = vmul.f32 %v10434_v59, %v10482_v42  ;;  %v2749_v16 = vadd.f32 %v6552_v2, %v2712_v26  ;;  %v6829_v56 = vld [vmem:[%s9488_s1 + $0x1e] ss:$0 sm:$0xff]  ;;  %v10484_v51 = vld [vmem:[#allocation89_spill] sm:$0xff] }
 0x137   : > { %v1213_v20 = vadd.f32 %v1197_v62, %v1176_v61  ;;  %v2201_v54 = vadd.f32 %v6659_v39, %v2164_v55  ;;  %v6824_v0 = vmul.f32 %v6820_v3, %v10483_v60  ;;  %v6833_v62 = vmul.f32 %v6829_v56, %v10484_v51  ;;  %v10485_v2 = vld [vmem:[#allocation117_spill] sm:$0xff]  ;;  %v10486_v61 = vld [vmem:[#allocation94_spill] sm:$0xff]  ;;  %v10487_v42 = vld [vmem:[#allocation32_spill] sm:$0xff] }
 0x138   : > { %v2017_v39 = vadd.f32 %v10485_v2, %v1909_v4  ;;  %v2075_v26 = vmul.f32 %v10436_v5, %v10486_v61  ;;  %v10488_v58 = vld [vmem:[#allocation96_spill] sm:$0xff]  ;;  %v2786_v60 = vadd.f32 %v6556_v14, %v2749_v16  ;;  %v10489_v11 = vrot.slane %v6792_v32, 6  ;;  %v10491_v2 = vld [vmem:[#allocation98_spill] sm:$0xff]  ;;  %v10495_v5 = vld [vmem:[#allocation37_spill] sm:$0xff] }
 0x139   : > { %v1250_v55 = vadd.f32 %v1234_v50, %v1213_v20  ;;  %v1379_v9 = vmul.f32 %v10488_v58, %v10487_v42  ;;  %v2238_v10 = vadd.f32 %v6668_v40, %v2201_v54  ;;  %v1946_v51 = vrot.slane %v6435_v38, 4  ;;  %v10492_v50 = vld [vmem:[#allocation16_spill] sm:$0xff]  ;;  %v10493_v58 = vld [vmem:[#allocation99_spill] sm:$0xff] }
 0x13a   : > { %v6846_v24 = vsel %vm2622_vm5, %v2604_v63, %v10489_v11  ;;  %v2054_v4 = vadd.f32 %v2038_v27, %v2017_v39  ;;  %v2112_v61 = vmul.f32 %v10438_v57, %v10491_v2  ;;  %v1416_v42 = vmul.f32 %v10493_v58, %v10388_v49  ;;  %v10494_v63 = vld [vmem:[#allocation103_spill] sm:$0xff]  ;;  %v10496_v2 = vld [vmem:[#allocation102_spill] sm:$0xff]  ;;  %v10502_v58 = vld [vmem:[#allocation45_spill] sm:$0xff] }
 0x13b   : > { %10490 = vst [vmem:[#allocation39_spill] sm:$0xff] %v6846_v24  ;;  %v1358_v20 = vadd.f32 %v10492_v50, %v1250_v55  ;;  %v2823_v14 = vadd.f32 %v6562_v29, %v2786_v60  ;;  %v2346_v40 = vadd.f32 %v6681_v34, %v2238_v10  ;;  %v1287_v54 = vrot.slane %v6623_v25, 2  ;;  %v6867_v34 = vld [vmem:[%s9488_s1 + $0x26] ss:$0 sm:$0xff]  ;;  %v10497_v29 = vld [vmem:[#allocation88_spill] sm:$0xff]  ;;  %v10504_v49 = vld [vmem:[#allocation19_spill] sm:$0xff] }
 0x13c   : > { %v2091_v16 = vadd.f32 %v2075_v26, %v2054_v4  ;;  %v2149_v27 = vmul.f32 %v6644_v41, %v10494_v63  ;;  %v1453_v57 = vmul.f32 %v10496_v2, %v10495_v5  ;;  %v6871_v60 = vmul.f32 %v6867_v34, %v10497_v29  ;;  %v10500_v4 = vld [vmem:[#allocation46_spill] sm:$0xff]  ;;  %v10520_v63 = vld [vmem:[#allocation44_spill] sm:$0xff] }
 0x13d   : > { %v1395_v39 = vadd.f32 %v1379_v9, %v1358_v20  ;;  %v2860_v55 = vadd.f32 %v6596_v12, %v2823_v14  ;;  %v2383_v50 = vadd.f32 %v6690_v22, %v2346_v40  ;;  %v10498_v10 = vrot.slane %v10349_v21, 4  ;;  %v10501_v20 = vld [vmem:[#allocation80_spill] sm:$0xff]  ;;  %v6888_v5 = vld [vmem:[%s9488_s1 + $0x2e] ss:$0 sm:$0xff] }
 0x13e   : > { %v2128_v26 = vadd.f32 %v2112_v61, %v2091_v16  ;;  %v2186_v12 = vmul.f32 %v6655_v17, %v10500_v4  ;;  %v1490_v14 = vmul.f32 %v10502_v58, %v10501_v20  ;;  %10503 = vst [vmem:[#allocation117_spill] sm:$0xff] %v6888_v5  ;;  %v10505_v61 = vrot.slane %v6717_v46, 2  ;;  %v10512_v20 = vld [vmem:[#allocation79_spill] sm:$0xff]  ;;  %v10523_v29 = vld [vmem:[#allocation106_spill] sm:$0xff] }
 0x13f   : > { %v6877_v9 = vsel %vm1962_vm3, %v10498_v10, %v1946_v51  ;;  %v1432_v22 = vadd.f32 %v1416_v42, %v1395_v39  ;;  %v2897_v40 = vadd.f32 %v6600_v37, %v2860_v55  ;;  %v2420_v11 = vadd.f32 %v6701_v43, %v2383_v50  ;;  %v6907_v55 = vld [vmem:[%s9489_s2] ss:$0 sm:$0xff]  ;;  %v10524_v2 = vld [vmem:[#allocation22_spill] sm:$0xff] }
 0x140   : > { %10499 = vst [vmem:[#allocation85_spill] sm:$0xff] %v6877_v9  ;;  %v6892_v51 = vmul.f32 %v6888_v5, %v10504_v49  ;;  %v6898_v42 = vsel %vm1302_vm1, %v1287_v54, %v10505_v61  ;;  %v2165_v16 = vadd.f32 %v2149_v27, %v2128_v26  ;;  %v2223_v37 = vmul.f32 %v6664_v47, %v6877_v9  ;;  %v6916_v27 = vld [vmem:[%s9488_s1 + $0x36] ss:$0 sm:$0xff]  ;;  %v10522_v49 = vld [vmem:[#allocation113_spill] sm:$0xff] }
 0x141   : > { %10506 = vst [vmem:[#allocation96_spill] sm:$0xff] %v6898_v42  ;;  %v1469_v43 = vadd.f32 %v1453_v57, %v1432_v22  ;;  %v1527_v39 = vmul.f32 %v6482_v15, %v6474_v52  ;;  %10507 = vst [vmem:[#allocation16_spill] sm:$0xff] %v6907_v55  ;;  %v6910_v50 = vadd.f32 %v6907_v55, %v2897_v40  ;;  %v2276_v10 = vrot.slane %v6435_v38, 5  ;;  %v10510_v22 = vld [vmem:[#allocation108_spill] sm:$0xff]  ;;  %v10511_v61 = vld [vmem:[#allocation47_spill] sm:$0xff] }
 0x142   : > { %v2457_v54 = vadd.f32 %v6711_v30, %v2420_v11  ;;  %10509 = vst [vmem:[#allocation121_spill] sm:$0xff] %v6916_v27  ;;  %v6920_v57 = vmul.f32 %v6916_v27, %v6846_v24  ;;  %v2202_v26 = vadd.f32 %v2186_v12, %v2165_v16  ;;  %v2331_v52 = vmul.f32 %v10511_v61, %v10510_v22  ;;  %v10513_v11 = vld [vmem:[#allocation70_spill] sm:$0xff]  ;;  %v10518_v22 = vld [vmem:[#allocation111_spill] sm:$0xff]  ;;  %v10521_v24 = vld [vmem:[#allocation13_spill] sm:$0xff] }
 0x143   : > { %10508 = vst [vmem:[#allocation99_spill] sm:$0xff] %v6910_v50  ;;  %v1506_v40 = vadd.f32 %v1490_v14, %v1469_v43  ;;  %v1564_v9 = vmul.f32 %v10512_v20, %v6898_v42  ;;  %2939 = vadd.xlane.f32.xlu1 %v6910_v50  ;;  %v6931_v4 = vmul.f32 %v6003_v45, %v10513_v11  ;;  %v6936_v12 = vld [vmem:[%s9488_s1 + $0x8] ss:$0 sm:$0xff]  ;;  %v6946_v43 = vld [vmem:[%s9488_s1 + $0x10] ss:$0 sm:$0xff]  ;;  %v10519_v50 = vld [vmem:[#allocation72_spill] sm:$0xff] }
 0x144   : > { %v2494_v30 = vadd.f32 %v6755_v6, %v2457_v54  ;;  %10514 = vst [vmem:[#allocation108_spill] sm:$0xff] %v6936_v12  ;;  %v6939_v16 = vld [vmem:[%s4718_s12 + $0x68] sm:$0xff]  ;;  %10516 = vst [vmem:[#allocation123_spill] sm:$0xff] %v6946_v43  ;;  %v6949_v6 = vld [vmem:[%s4718_s12 + $0x80] sm:$0xff]  ;;  %v2239_v54 = vadd.f32 %v2223_v37, %v2202_v26  ;;  %v2368_v11 = vmul.f32 %v10519_v50, %v10518_v22  ;;  %v10527_v26 = vrot.slane %v10349_v21, 5 }
 0x145   : > { %10515 = vst [vmem:[#allocation122_spill] sm:$0xff] %v6939_v16  ;;  %v713_v14 = vmul.f32 %v6939_v16, %v6936_v12  ;;  %10517 = vst [vmem:[#allocation124_spill] sm:$0xff] %v6949_v6  ;;  %v751_v45 = vmul.f32 %v6949_v6, %v6946_v43  ;;  %v1543_v42 = vadd.f32 %v1527_v39, %v1506_v40  ;;  %v6964_v6 = vld [vmem:[%s9488_s1 + $0x18] ss:$0 sm:$0xff]  ;;  %v6988_v21 = vld [vmem:[%s4718_s12 + $0xb0] sm:$0xff] }
 0x146   : > { %v1672_v20 = vmul.f32 %v10521_v24, %v10520_v63  ;;  %v2531_v16 = vadd.f32 %v6775_v18, %v2494_v30  ;;  %v2405_v58 = vmul.f32 %v10523_v29, %v10522_v49  ;;  %10525 = vst [vmem:[#allocation22_spill] sm:$0xff] %v6964_v6  ;;  %v6967_v37 = vld [vmem:[%s4718_s12 + $0x98] sm:$0xff]  ;;  %v6975_v18 = vsel %vm2292_vm4, %v10527_v26, %v2276_v10 }
 0x147   : > { %v729_v12 = vadd.f32 %v713_v14, %v10524_v2  ;;  %10526 = vst [vmem:[#allocation125_spill] sm:$0xff] %v6967_v37  ;;  %v789_v39 = vmul.f32 %v6967_v37, %v6964_v6  ;;  %10528 = vst [vmem:[#allocation126_spill] sm:$0xff] %v6975_v18  ;;  %v2347_v40 = vadd.f32 %v2331_v52, %v2239_v54  ;;  %v10529_v63 = vld [vmem:[#allocation48_spill] sm:$0xff]  ;;  %v10530_v2 = vld [vmem:[#allocation75_spill] sm:$0xff] }
 0x148   : > { %v1580_v30 = vadd.f32 %v1564_v9, %v1543_v42  ;;  %v1709_v14 = vmul.f32 %v10530_v2, %v10529_v63  ;;  %v2568_v24 = vadd.f32 %v6784_v13, %v2531_v16  ;;  %v10531_v49 = vld [vmem:[#allocation114_spill] sm:$0xff]  ;;  %v10532_v22 = vld [vmem:[#allocation120_spill] sm:$0xff]  ;;  %v6985_v37 = vld [vmem:[%s9488_s1 + $0x20] ss:$0 sm:$0xff]  ;;  %10534 = vst [vmem:[#allocation128_spill] sm:$0xff] %v6988_v21  ;;  %v1617_v42 = vrot.slane %v6623_v25, 3 }
 0x149   : > { %v2442_v43 = vmul.f32 %v10532_v22, %v10531_v49  ;;  %v767_v29 = vadd.f32 %v751_v45, %v729_v12  ;;  %10533 = vst [vmem:[#allocation127_spill] sm:$0xff] %v6985_v37  ;;  %v827_v52 = vmul.f32 %v6988_v21, %v6985_v37  ;;  %v2384_v9 = vadd.f32 %v2368_v11, %v2347_v40  ;;  %v10535_v54 = vld [vmem:[#allocation50_spill] sm:$0xff]  ;;  %v10536_v13 = vld [vmem:[#allocation76_spill] sm:$0xff]  ;;  %v10537_v2 = vld [vmem:[#allocation21_spill] sm:$0xff] }
 0x14a   : > { %v1688_v10 = vadd.f32 %v1672_v20, %v1580_v30  ;;  %v1746_v16 = vmul.f32 %v10536_v13, %v10535_v54  ;;  %v2676_v26 = vadd.f32 %v6802_v36, %v2568_v24  ;;  %v865_v63 = vmul.f32 %v6792_v32, %v10537_v2  ;;  %v10538_v6 = vld [vmem:[#allocation115_spill] sm:$0xff]  ;;  %v10539_v11 = vld [vmem:[#allocation53_spill] sm:$0xff]  ;;  %v10541_v30 = vld [vmem:[#allocation60_spill] sm:$0xff] }
 0x14b   : > { %v805_v45 = vadd.f32 %v789_v39, %v767_v29  ;;  %v2421_v49 = vadd.f32 %v2405_v58, %v2384_v9  ;;  %v2479_v22 = vmul.f32 %v6751_v28, %v10538_v6  ;;  %v10540_v40 = vld [vmem:[#allocation59_spill] sm:$0xff]  ;;  %v7006_v54 = vmul.f32 %v6482_v15, %v10541_v30  ;;  %v10542_v36 = vld [vmem:[#allocation116_spill] sm:$0xff] }
 0x14c   : > { %v1725_v21 = vadd.f32 %v1709_v14, %v1688_v10  ;;  %v1783_v37 = vmul.f32 %v10540_v40, %v10539_v11  ;;  %v2713_v20 = vadd.f32 %v6811_v48, %v2676_v26  ;;  %v903_v29 = vmul.f32 %v10542_v36, %v6717_v46  ;;  %v10543_v58 = vld [vmem:[#allocation68_spill] sm:$0xff]  ;;  %v10544_v14 = vld [vmem:[#allocation90_spill] sm:$0xff] }
 0x14d   : > { %v843_v24 = vadd.f32 %v827_v52, %v805_v45  ;;  %v2458_v39 = vadd.f32 %v2442_v43, %v2421_v49  ;;  %v2516_v2 = vmul.f32 %v6771_v23, %v10543_v58  ;;  %v1820_v10 = vmul.f32 %v6372_v35, %v10544_v14  ;;  %v10549_v11 = vld [vmem:[#allocation82_spill] sm:$0xff] }
 0x14e   : > { %v1762_v9 = vadd.f32 %v1746_v16, %v1725_v21  ;;  %v2750_v12 = vadd.f32 %v6824_v0, %v2713_v20  ;;  %v2553_v48 = vmul.f32 %v6780_v8, %v6975_v18  ;;  %v10545_v26 = vrot.slane %v6717_v46, 3  ;;  %v10547_v21 = vld [vmem:[#allocation42_spill] sm:$0xff]  ;;  %v10548_v0 = vld [vmem:[#allocation81_spill] sm:$0xff] }
 0x14f   : > { %v881_v45 = vadd.f32 %v865_v63, %v843_v24  ;;  %v2495_v49 = vadd.f32 %v2479_v22, %v2458_v39  ;;  %v2606_v43 = vrot.slane %v6435_v38, 6  ;;  %v1857_v16 = vmul.f32 %v6381_v31, %v10547_v21  ;;  %v7032_v58 = vld [vmem:[%s4718_s12 + $0xe8] sm:$0xff]  ;;  %v10550_v63 = vld [vmem:[#allocation11_spill] sm:$0xff] }
 0x150   : > { %v7021_v52 = vsel %vm1632_vm2, %v1617_v42, %v10545_v26  ;;  %v1799_v30 = vadd.f32 %v1783_v37, %v1762_v9  ;;  %v2787_v14 = vadd.f32 %v6833_v62, %v2750_v12  ;;  %v2661_v20 = vmul.f32 %v6798_v19, %v10548_v0  ;;  %v10551_v62 = vld [vmem:[#allocation86_spill] sm:$0xff]  ;;  %v10552_v9 = vld [vmem:[#allocation49_spill] sm:$0xff] }
 0x151   : > { %10546 = vst [vmem:[#allocation76_spill] sm:$0xff] %v7021_v52  ;;  %v2698_v18 = vmul.f32 %v6807_v33, %v10549_v11  ;;  %v919_v42 = vadd.f32 %v903_v29, %v881_v45  ;;  %v2532_v26 = vadd.f32 %v2516_v2, %v2495_v49  ;;  %v2735_v22 = vmul.f32 %v6820_v3, %v10550_v63  ;;  %v10553_v29 = vld [vmem:[#allocation57_spill] sm:$0xff]  ;;  %v10554_v2 = vld [vmem:[#allocation100_spill] sm:$0xff] }
 0x152   : > { %v1836_v38 = vadd.f32 %v1820_v10, %v1799_v30  ;;  %v1894_v37 = vmul.f32 %v6396_v1, %v7021_v52  ;;  %v2824_v24 = vadd.f32 %v6871_v60, %v2787_v14  ;;  %v2772_v12 = vmul.f32 %v6829_v56, %v10551_v62  ;;  %v10555_v52 = vld [vmem:[#allocation31_spill] sm:$0xff] }
 0x153   : > { %v1947_v39 = vrot.slane %v6623_v25, 4  ;;  %v1029_v0 = vadd.f32 %v10552_v9, %v919_v42  ;;  %v2569_v21 = vadd.f32 %v2553_v48, %v2532_v26  ;;  %v2002_v45 = vmul.f32 %v10554_v2, %v10553_v29  ;;  %v10556_v14 = vld [vmem:[#allocation67_spill] sm:$0xff] }
 0x154   : > { %v1873_v11 = vadd.f32 %v1857_v16, %v1836_v38  ;;  %v957_v49 = vrot.slane %v7032_v58, 1  ;;  %v2861_v30 = vadd.f32 %v6892_v51, %v2824_v24  ;;  %v1124_v62 = vmul.f32 %v10463_v53, %v10556_v14  ;;  %v10559_v26 = vld [vmem:[#allocation63_spill] sm:$0xff]  ;;  %v10560_v24 = vld [vmem:[#allocation33_spill] sm:$0xff] }
 0x155   : > { %v1066_v60 = vadd.f32 %v10555_v52, %v1029_v0  ;;  %v10557_v63 = vrot.slane %v6792_v32, 6  ;;  %v2677_v16 = vadd.f32 %v2661_v20, %v2569_v21  ;;  %v2039_v38 = vmul.f32 %v10434_v59, %v10559_v26  ;;  %v10561_v52 = vld [vmem:[#allocation55_spill] sm:$0xff]  ;;  %v10563_v32 = vld [vmem:[#allocation65_spill] sm:$0xff]  ;;  %v10581_v26 = vld [vmem:[#allocation106_spill] sm:$0xff] }
 0x156   : > { %v1910_v42 = vadd.f32 %v1894_v37, %v1873_v11  ;;  %v2898_v51 = vadd.f32 %v6920_v57, %v2861_v30  ;;  %v2809_v9 = vmul.f32 %v6867_v34, %v10560_v24  ;;  %v10562_v29 = vld [vmem:[#allocation35_spill] sm:$0xff]  ;;  %v10565_v11 = vrot.slane %v6717_v46, 1 }
 0x157   : > { %v7055_v48 = vsel %vm2622_vm5, %v10557_v63, %v2606_v43  ;;  %v1103_v0 = vadd.f32 %v10561_v52, %v1066_v60  ;;  %v1161_v53 = vmul.f32 %v10471_v7, %v10562_v29  ;;  %v2714_v10 = vadd.f32 %v2698_v18, %v2677_v16  ;;  %v10564_v43 = vld [vmem:[#allocation9_spill] sm:$0xff]  ;;  %v10570_v7 = vld [vmem:[#allocation64_spill] sm:$0xff] }
 0x158   : > { %10558 = vst [vmem:[#allocation21_spill] sm:$0xff] %v7055_v48  ;;  %v2018_v14 = vadd.f32 %v2002_v45, %v1910_v42  ;;  %v2076_v63 = vmul.f32 %v10564_v43, %v10563_v32  ;;  %v7071_v21 = vsel %vm972_vm0, %v10565_v11, %v957_v49  ;;  %v7074_v57 = vadd.f32 %v6907_v55, %v2898_v51  ;;  %v10571_v18 = vld [vmem:[#allocation12_spill] sm:$0xff]  ;;  %v10572_v51 = vld [vmem:[#allocation93_spill] sm:$0xff] }
 0x159   : > { %10566 = vst [vmem:[#allocation59_spill] sm:$0xff] %v7071_v21  ;;  %v10568_v20 = vrot.slane %v6717_v46, 4  ;;  %v2113_v45 = vmul.f32 %v10571_v18, %v10570_v7  ;;  %v1140_v30 = vadd.f32 %v1124_v62, %v1103_v0  ;;  %v2751_v60 = vadd.f32 %v2735_v22, %v2714_v10  ;;  %v10574_v10 = vld [vmem:[#allocation92_spill] sm:$0xff] }
 0x15a   : > { %10567 = vst [vmem:[#allocation116_spill] sm:$0xff] %v7074_v57  ;;  %v2055_v16 = vadd.f32 %v2039_v38, %v2018_v14  ;;  %v2277_v42 = vrot.slane %v6623_v25, 5  ;;  %2941 = vadd.xlane.f32.xlu0 %v7074_v57  ;;  %v2846_v52 = vmul.f32 %v6888_v5, %v10572_v51  ;;  %v2883_v11 = vmul.f32 %v6916_v27, %v7055_v48  ;;  %v10575_v38 = vld [vmem:[#allocation58_spill] sm:$0xff]  ;;  %v10576_v57 = vld [vmem:[#allocation71_spill] sm:$0xff] }
 0x15b   : > { %v7080_v37 = vsel %vm1962_vm3, %v1947_v39, %v10568_v20  ;;  %v1177_v39 = vadd.f32 %v1161_v53, %v1140_v30  ;;  %v10573_v20 = vld [vmem:[#allocation36_spill] sm:$0xff]  ;;  %v2788_v62 = vadd.f32 %v2772_v12, %v2751_v60  ;;  %v2150_v14 = vmul.f32 %v6644_v41, %v10574_v10  ;;  %v10577_v30 = vld [vmem:[#allocation69_spill] sm:$0xff]  ;;  %v10589_v51 = vld [vmem:[#allocation14_spill] sm:$0xff] }
 0x15c   : > { %10569 = vst [vmem:[#allocation81_spill] sm:$0xff] %v7080_v37  ;;  %v1235_v7 = vmul.f32 %v10573_v20, %v7071_v21  ;;  %v2092_v22 = vadd.f32 %v2076_v63, %v2055_v16  ;;  %v2187_v0 = vmul.f32 %v6655_v17, %v10575_v38  ;;  %v2224_v49 = vmul.f32 %v6664_v47, %v7080_v37  ;;  %v10580_v38 = vld [vmem:[#allocation78_spill] sm:$0xff] }
 0x15d   : > { %v2332_v53 = vmul.f32 %v10511_v61, %v10576_v57  ;;  %v2369_v32 = vmul.f32 %v10519_v50, %v10577_v30  ;;  %v1214_v12 = vadd.f32 %v6931_v4, %v1177_v39  ;;  %v2825_v60 = vadd.f32 %v2809_v9, %v2788_v62  ;;  %v7115_v57 = vld [vmem:[%s9488_s1] ss:$0 sm:$0xff]  ;;  %v7120_v9 = vld [vmem:[%s4718_s12 + $0x78] sm:$0xff]  ;;  %v10586_v62 = vld [vmem:[#allocation123_spill] sm:$0xff] }
 0x15e   : > { %v2129_v63 = vadd.f32 %v2113_v45, %v2092_v22  ;;  %v10578_v16 = vrot.slane %v6717_v46, 5  ;;  %v2406_v29 = vmul.f32 %v10581_v26, %v10580_v38  ;;  %10582 = vst [vmem:[#allocation57_spill] sm:$0xff] %v7115_v57  ;;  %v4273_v30 = vld [vmem:[%s4718_s12 + $0x60] sm:$0xff]  ;;  %10583 = vst [vmem:[#allocation31_spill] sm:$0xff] %v7120_v9  ;;  %v10584_v45 = vld [vmem:[#allocation108_spill] sm:$0xff]  ;;  %v2480_v24 = vmul.f32 %v6751_v28, %v10589_v51 }
 0x15f   : > { %v1251_v37 = vadd.f32 %v1235_v7, %v1214_v12  ;;  %v676_v4 = vmul.f32 %v4273_v30, %v7115_v57  ;;  %v714_v39 = vmul.f32 %v7120_v9, %v10584_v45  ;;  %v10587_v12 = vld [vmem:[#allocation77_spill] sm:$0xff]  ;;  %v10588_v38 = vld [vmem:[#allocation120_spill] sm:$0xff]  ;;  %v2607_v30 = vrot.slane %v6623_v25, 6  ;;  %v10590_v57 = vld [vmem:[#allocation95_spill] sm:$0xff] }
 0x160   : > { %v7108_v10 = vsel %vm2292_vm4, %v2277_v42, %v10578_v16  ;;  %v7125_v42 = vld [vmem:[%s4718_s12 + $0x90] sm:$0xff]  ;;  %v2862_v16 = vadd.f32 %v2846_v52, %v2825_v60  ;;  %v2166_v7 = vadd.f32 %v2150_v14, %v2129_v63  ;;  %v2443_v48 = vmul.f32 %v10588_v38, %v10587_v12  ;;  %v7136_v9 = vld [vmem:[%s4718_s12 + $0xa8] sm:$0xff] }
 0x161   : > { %10579 = vst [vmem:[#allocation49_spill] sm:$0xff] %v7108_v10  ;;  %10585 = vst [vmem:[#allocation55_spill] sm:$0xff] %v7125_v42  ;;  %v752_v22 = vmul.f32 %v7125_v42, %v10586_v62  ;;  %v1359_v6 = vadd.f32 %v10590_v57, %v1251_v37  ;;  %v730_v26 = vadd.f32 %v714_v39, %v676_v4  ;;  %v10592_v45 = vld [vmem:[#allocation22_spill] sm:$0xff]  ;;  %v1289_v60 = vrot.slane %v7032_v58, 2  ;;  %v10593_v63 = vld [vmem:[#allocation97_spill] sm:$0xff] }
 0x162   : > { %10591 = vst [vmem:[#allocation9_spill] sm:$0xff] %v7136_v9  ;;  %v790_v50 = vmul.f32 %v7136_v9, %v10592_v45  ;;  %v2899_v42 = vadd.f32 %v2883_v11, %v2862_v16  ;;  %v2203_v52 = vadd.f32 %v2187_v0, %v2166_v7  ;;  %v10594_v51 = vld [vmem:[#allocation10_spill] sm:$0xff]  ;;  %v10597_v57 = vld [vmem:[#allocation127_spill] sm:$0xff]  ;;  %v10599_v9 = vld [vmem:[#allocation109_spill] sm:$0xff]  ;;  %v7154_v0 = vmul.f32 %v6780_v8, %v7108_v10 }
 0x163   : > { %v1396_v12 = vadd.f32 %v10593_v63, %v1359_v6  ;;  %v10595_v28 = vld [vmem:[#allocation102_spill] sm:$0xff]  ;;  %v768_v38 = vadd.f32 %v752_v22, %v730_v26  ;;  %v2517_v11 = vmul.f32 %v6771_v23, %v10599_v9  ;;  %v7157_v16 = vld [vmem:[%s4718_s12 + $0xf0] sm:$0xff]  ;;  %v10611_v10 = vld [vmem:[#allocation88_spill] sm:$0xff] }
 0x164   : > { %v1454_v62 = vmul.f32 %v10595_v28, %v10594_v51  ;;  %v10596_v37 = vld [vmem:[#allocation74_spill] sm:$0xff]  ;;  %v7148_v39 = vadd.f32 %v6907_v55, %v2899_v42  ;;  %v2240_v61 = vadd.f32 %v2224_v49, %v2203_v52  ;;  %10600 = vst [vmem:[#allocation36_spill] sm:$0xff] %v7157_v16  ;;  %v10601_v6 = vld [vmem:[#allocation101_spill] sm:$0xff]  ;;  %v10605_v51 = vld [vmem:[#allocation83_spill] sm:$0xff] }
 0x165   : > { %v828_v4 = vmul.f32 %v10597_v57, %v10596_v37  ;;  %v1433_v7 = vadd.f32 %v10601_v6, %v1396_v12  ;;  %v10602_v28 = vld [vmem:[#allocation118_spill] sm:$0xff]  ;;  %v10603_v26 = vld [vmem:[#allocation45_spill] sm:$0xff]  ;;  %v806_v63 = vadd.f32 %v790_v50, %v768_v38  ;;  %v10604_v37 = vld [vmem:[#allocation84_spill] sm:$0xff]  ;;  %v7174_v12 = vmul.f32 %v6807_v33, %v10605_v51 }
 0x166   : > { %10598 = vst [vmem:[#allocation12_spill] sm:$0xff] %v7148_v39  ;;  %v1491_v22 = vmul.f32 %v10603_v26, %v10602_v28  ;;  %v7165_v42 = vld [vmem:[%s9488_s1 + $0x28] ss:$0 sm:$0xff]  ;;  %2943 = vadd.xlane.f32.xlu1 %v7148_v39  ;;  %v2348_v52 = vadd.f32 %v2332_v53, %v2240_v61  ;;  %v2662_v14 = vmul.f32 %v6798_v19, %v10604_v37  ;;  %v10606_v50 = vrot.slane %v6717_v46, 2  ;;  %v10610_v28 = vld [vmem:[#allocation89_spill] sm:$0xff] }
 0x167   : > { %v866_v49 = vmul.f32 %v7165_v42, %v6623_v25  ;;  %v10608_v6 = vrot.slane %v6717_v46, 6  ;;  %v1470_v61 = vadd.f32 %v1454_v62, %v1433_v7  ;;  %v844_v53 = vadd.f32 %v828_v4, %v806_v63  ;;  %v10613_v62 = vld [vmem:[#allocation79_spill] sm:$0xff] }
 0x168   : > { %v7180_v38 = vsel %vm1302_vm1, %v10606_v50, %v1289_v60  ;;  %v904_v37 = vmul.f32 %v10542_v36, %v7157_v16  ;;  %v2385_v39 = vadd.f32 %v2369_v32, %v2348_v52  ;;  %v7192_v51 = vmul.f32 %v6820_v3, %v10610_v28  ;;  %v10612_v50 = vld [vmem:[#allocation19_spill] sm:$0xff]  ;;  %v7207_v32 = vld [vmem:[%s9488_s1 + $0x1] ss:$0 sm:$0xff]  ;;  %v10615_v36 = vld [vmem:[#allocation20_spill] sm:$0xff] }
 0x169   : > { %10607 = vst [vmem:[#allocation71_spill] sm:$0xff] %v7180_v38  ;;  %v7186_v25 = vsel %vm2622_vm5, %v2607_v30, %v10608_v6  ;;  %v7196_v60 = vmul.f32 %v6829_v56, %v10611_v10  ;;  %v7200_v9 = vmul.f32 %v6867_v34, %v10612_v50  ;;  %v1507_v30 = vadd.f32 %v1491_v22, %v1470_v61  ;;  %v10616_v6 = vld [vmem:[#allocation39_spill] sm:$0xff]  ;;  %v7240_v50 = vld [vmem:[%s9488_s1 + $0x29] ss:$0 sm:$0xff] }
 0x16a   : > { %10609 = vst [vmem:[#allocation95_spill] sm:$0xff] %v7186_v25  ;;  %v1565_v4 = vmul.f32 %v10613_v62, %v7180_v38  ;;  %v882_v7 = vadd.f32 %v866_v49, %v844_v53  ;;  %10614 = vst [vmem:[#allocation22_spill] sm:$0xff] %v7207_v32  ;;  %v1014_v63 = vmul.f32 %v7207_v32, %v10615_v36  ;;  %v1619_v49 = vrot.slane %v7032_v58, 3  ;;  %v7223_v61 = vld [vmem:[%s9488_s1 + $0x11] ss:$0 sm:$0xff]  ;;  %v10625_v28 = vld [vmem:[#allocation38_spill] sm:$0xff] }
 0x16b   : > { %v2422_v52 = vadd.f32 %v2406_v29, %v2385_v39  ;;  %v7213_v10 = vmul.f32 %v6888_v5, %v10616_v6  ;;  %v7217_v22 = vmul.f32 %v6916_v27, %v7186_v25  ;;  %10617 = vst [vmem:[#allocation97_spill] sm:$0xff] %v7223_v61  ;;  %v7227_v53 = vmul.f32 %v7223_v61, %v7071_v21  ;;  %v7233_v36 = vld [vmem:[%s9488_s1 + $0x9] ss:$0 sm:$0xff]  ;;  %v10620_v32 = vld [vmem:[#allocation23_spill] sm:$0xff] }
 0x16c   : > { %v1544_v29 = vadd.f32 %v7006_v54, %v1507_v30  ;;  %v920_v39 = vadd.f32 %v904_v37, %v882_v7  ;;  %10619 = vst [vmem:[#allocation74_spill] sm:$0xff] %v7233_v36  ;;  %v1051_v25 = vmul.f32 %v7233_v36, %v10620_v32  ;;  %10621 = vst [vmem:[#allocation127_spill] sm:$0xff] %v7240_v50  ;;  %v10624_v37 = vld [vmem:[#allocation26_spill] sm:$0xff]  ;;  %v10627_v32 = vld [vmem:[#allocation24_spill] sm:$0xff] }
 0x16d   : > { %10618 = vst [vmem:[#allocation102_spill] sm:$0xff] %v7227_v53  ;;  %v2459_v6 = vadd.f32 %v2443_v48, %v2422_v52  ;;  %v7244_v53 = vmul.f32 %v7240_v50, %v7071_v21  ;;  %v7248_v54 = vmul.f32 %v6482_v15, %v7180_v38  ;;  %v1747_v30 = vmul.f32 %v10536_v13, %v10624_v37  ;;  %v7255_v52 = vld [vmem:[%s4718_s12 + $0xf8] sm:$0xff] }
 0x16e   : > { %v1581_v7 = vadd.f32 %v1565_v4, %v1544_v29  ;;  %v1784_v48 = vmul.f32 %v10540_v40, %v10625_v28  ;;  %10626 = vst [vmem:[#allocation84_spill] sm:$0xff] %v7255_v52  ;;  %v1030_v36 = vadd.f32 %v1014_v63, %v920_v39  ;;  %v1088_v27 = vmul.f32 %v7223_v61, %v10627_v32  ;;  %v10630_v29 = vld [vmem:[#allocation107_spill] sm:$0xff]  ;;  %v7272_v63 = vld [vmem:[%s9488_s1 + $0x19] ss:$0 sm:$0xff]  ;;  %v10634_v32 = vld [vmem:[#allocation62_spill] sm:$0xff] }
 0x16f   : > { %10622 = vst [vmem:[#allocation101_spill] sm:$0xff] %v7244_v53  ;;  %10623 = vst [vmem:[#allocation45_spill] sm:$0xff] %v7248_v54  ;;  %v2496_v5 = vadd.f32 %v2480_v24, %v2459_v6  ;;  %v10628_v21 = vrot.slane %v6717_v46, 3  ;;  %v958_v54 = vrot.slane %v7157_v16, 1  ;;  %v1949_v28 = vrot.slane %v7032_v58, 4  ;;  %v10632_v24 = vld [vmem:[#allocation41_spill] sm:$0xff] }
 0x170   : > { %v1689_v37 = vadd.f32 %v10630_v29, %v1581_v7  ;;  %v1067_v53 = vadd.f32 %v1051_v25, %v1030_v36  ;;  %10631 = vst [vmem:[#allocation20_spill] sm:$0xff] %v7272_v63  ;;  %v1125_v6 = vmul.f32 %v7272_v63, %v10632_v24  ;;  %v1858_v4 = vmul.f32 %v6381_v31, %v10634_v32  ;;  %v10636_v25 = vld [vmem:[#allocation110_spill] sm:$0xff]  ;;  %v10639_v24 = vld [vmem:[#allocation56_spill] sm:$0xff] }
 0x171   : > { %v7263_v38 = vsel %vm1632_vm2, %v10628_v21, %v1619_v49  ;;  %v2533_v39 = vadd.f32 %v2517_v11, %v2496_v5  ;;  %v10633_v21 = vld [vmem:[#allocation43_spill] sm:$0xff]  ;;  %v7290_v5 = vld [vmem:[%s9488_s1 + $0x21] ss:$0 sm:$0xff]  ;;  %v2003_v63 = vmul.f32 %v10554_v2, %v10639_v24  ;;  %v10646_v2 = vld [vmem:[#allocation98_spill] sm:$0xff] }
 0x172   : > { %10629 = vst [vmem:[#allocation79_spill] sm:$0xff] %v7263_v38  ;;  %v1821_v49 = vmul.f32 %v6372_v35, %v10633_v21  ;;  %v7282_v7 = vmul.f32 %v6381_v31, %v7263_v38  ;;  %v1726_v36 = vadd.f32 %v10636_v25, %v1689_v37  ;;  %v1895_v29 = vmul.f32 %v6396_v1, %v7263_v38  ;;  %v10638_v11 = vld [vmem:[#allocation27_spill] sm:$0xff] }
 0x173   : > { %v1104_v61 = vadd.f32 %v1088_v27, %v1067_v53  ;;  %10637 = vst [vmem:[#allocation110_spill] sm:$0xff] %v7290_v5  ;;  %v1162_v21 = vmul.f32 %v7290_v5, %v10638_v11  ;;  %v2570_v32 = vadd.f32 %v7154_v0, %v2533_v39  ;;  %v10641_v25 = vrot.slane %v7255_v52, 1  ;;  %v10645_v39 = vld [vmem:[#allocation30_spill] sm:$0xff] }
 0x174   : > { %10635 = vst [vmem:[#allocation107_spill] sm:$0xff] %v7282_v7  ;;  %v10640_v7 = vld [vmem:[#allocation94_spill] sm:$0xff]  ;;  %v1763_v53 = vadd.f32 %v1747_v30, %v1726_v36  ;;  %v10643_v38 = vrot.slane %v6717_v46, 4  ;;  %v1199_v24 = vmul.f32 %v7240_v50, %v10645_v39 }
 0x175   : > { %v2040_v37 = vmul.f32 %v10434_v59, %v10640_v7  ;;  %v7303_v27 = vsel %vm972_vm0, %v958_v54, %v10641_v25  ;;  %v1141_v0 = vadd.f32 %v1125_v6, %v1104_v61  ;;  %v2678_v5 = vadd.f32 %v2662_v14, %v2570_v32  ;;  %v10647_v7 = vld [vmem:[#allocation103_spill] sm:$0xff]  ;;  %v10648_v36 = vld [vmem:[#allocation46_spill] sm:$0xff]  ;;  %v10649_v14 = vld [vmem:[#allocation85_spill] sm:$0xff] }
 0x176   : > { %10642 = vst [vmem:[#allocation56_spill] sm:$0xff] %v7303_v27  ;;  %v7309_v11 = vsel %vm1962_vm3, %v10643_v38, %v1949_v28  ;;  %v2077_v59 = vmul.f32 %v10564_v43, %v10646_v2  ;;  %v2114_v1 = vmul.f32 %v10571_v18, %v10647_v7  ;;  %v2279_v54 = vrot.slane %v7032_v58, 5  ;;  %v10650_v7 = vld [vmem:[#allocation111_spill] sm:$0xff]  ;;  %v10652_v2 = vld [vmem:[#allocation113_spill] sm:$0xff] }
 0x177   : > { %10644 = vst [vmem:[#allocation129_spill] sm:$0xff] %v7309_v11  ;;  %v1800_v30 = vadd.f32 %v1784_v48, %v1763_v53  ;;  %v7320_v25 = vmul.f32 %v6644_v41, %v10648_v36  ;;  %v1178_v28 = vadd.f32 %v1162_v21, %v1141_v0  ;;  %v1236_v38 = vmul.f32 %v10573_v20, %v7303_v27  ;;  %v10651_v48 = vld [vmem:[#allocation47_spill] sm:$0xff]  ;;  %v10653_v21 = vld [vmem:[#allocation72_spill] sm:$0xff] }
 0x178   : > { %v2715_v61 = vadd.f32 %v7174_v12, %v2678_v5  ;;  %v7327_v32 = vmul.f32 %v6655_v17, %v10649_v14  ;;  %v7331_v6 = vmul.f32 %v6664_v47, %v7309_v11  ;;  %v7335_v53 = vmul.f32 %v10651_v48, %v10650_v7  ;;  %v7344_v12 = vld [vmem:[%s9488_s1 + $0x2] ss:$0 sm:$0xff]  ;;  %v10655_v5 = vld [vmem:[#allocation32_spill] sm:$0xff]  ;;  %v10658_v7 = vld [vmem:[#allocation114_spill] sm:$0xff] }
 0x179   : > { %v1837_v36 = vadd.f32 %v1821_v49, %v1800_v30  ;;  %v7339_v0 = vmul.f32 %v10653_v21, %v10652_v2  ;;  %v1215_v20 = vadd.f32 %v1199_v24, %v1178_v28  ;;  %10654 = vst [vmem:[#allocation111_spill] sm:$0xff] %v7344_v12  ;;  %v1344_v14 = vmul.f32 %v7344_v12, %v10655_v5  ;;  %v10659_v30 = vld [vmem:[#allocation106_spill] sm:$0xff]  ;;  %v10661_v24 = vld [vmem:[#allocation115_spill] sm:$0xff]  ;;  %v10662_v28 = vld [vmem:[#allocation120_spill] sm:$0xff] }
 0x17a   : > { %v2752_v11 = vadd.f32 %v7192_v51, %v2715_v61  ;;  %v10656_v27 = vrot.slane %v6717_v46, 5  ;;  %v7357_v2 = vmul.f32 %v10659_v30, %v10658_v7  ;;  %v7361_v39 = vmul.f32 %v10662_v28, %v10661_v24  ;;  %v7367_v51 = vld [vmem:[%s9488_s1 + $0xa] ss:$0 sm:$0xff]  ;;  %v7376_v24 = vld [vmem:[%s9488_s1 + $0x12] ss:$0 sm:$0xff]  ;;  %v10671_v48 = vld [vmem:[#allocation124_spill] sm:$0xff] }
 0x17b   : > { %v1874_v50 = vadd.f32 %v1858_v4, %v1837_v36  ;;  %v1252_v21 = vadd.f32 %v1236_v38, %v1215_v20  ;;  %v1290_v5 = vrot.slane %v7157_v16, 2  ;;  %10664 = vst [vmem:[#allocation132_spill] sm:$0xff] %v7367_v51  ;;  %v10665_v61 = vld [vmem:[#allocation34_spill] sm:$0xff]  ;;  %10666 = vst [vmem:[#allocation133_spill] sm:$0xff] %v7376_v24  ;;  %v10667_v4 = vld [vmem:[#allocation37_spill] sm:$0xff] }
 0x17c   : > { %v7353_v49 = vsel %vm2292_vm4, %v10656_v27, %v2279_v54  ;;  %10660 = vst [vmem:[#allocation130_spill] sm:$0xff] %v7357_v2  ;;  %10663 = vst [vmem:[#allocation131_spill] sm:$0xff] %v7361_v39  ;;  %v1381_v27 = vmul.f32 %v7367_v51, %v10665_v61  ;;  %v2789_v54 = vadd.f32 %v7196_v60, %v2752_v11  ;;  %v10668_v38 = vld [vmem:[#allocation122_spill] sm:$0xff]  ;;  %v10669_v20 = vld [vmem:[#allocation57_spill] sm:$0xff]  ;;  %v2609_v2 = vrot.slane %v7032_v58, 6 }
 0x17d   : > { %10657 = vst [vmem:[#allocation32_spill] sm:$0xff] %v7353_v49  ;;  %v1418_v36 = vmul.f32 %v7376_v24, %v10667_v4  ;;  %v677_v12 = vmul.f32 %v10669_v20, %v10668_v38  ;;  %v1911_v28 = vadd.f32 %v1895_v29, %v1874_v50  ;;  %v1360_v30 = vadd.f32 %v1344_v14, %v1252_v21  ;;  %v10670_v39 = vld [vmem:[#allocation108_spill] sm:$0xff]  ;;  %v10672_v51 = vld [vmem:[#allocation123_spill] sm:$0xff]  ;;  %v10673_v60 = vld [vmem:[#allocation125_spill] sm:$0xff] }
 0x17e   : > { %v715_v61 = vmul.f32 %v10671_v48, %v10670_v39  ;;  %v753_v11 = vmul.f32 %v10673_v60, %v10672_v51  ;;  %v2826_v7 = vadd.f32 %v7200_v9, %v2789_v54  ;;  %v10674_v47 = vld [vmem:[#allocation68_spill] sm:$0xff]  ;;  %v10679_v58 = vrot.slane %v7255_v52, 2  ;;  %v10681_v51 = vld [vmem:[#allocation18_spill] sm:$0xff] }
 0x17f   : > { %v10675_v17 = vld [vmem:[#allocation112_spill] sm:$0xff]  ;;  %v2019_v14 = vadd.f32 %v2003_v63, %v1911_v28  ;;  %v1397_v21 = vadd.f32 %v1381_v27, %v1360_v30  ;;  %v1492_v63 = vmul.f32 %v10603_v26, %v10681_v51  ;;  %v10699_v51 = vld [vmem:[#allocation75_spill] sm:$0xff] }
 0x180   : > { %v7389_v41 = vmul.f32 %v10675_v17, %v10674_v47  ;;  %v7395_v38 = vld [vmem:[%s9488_s1 + $0x1a] ss:$0 sm:$0xff]  ;;  %v731_v48 = vadd.f32 %v715_v61, %v677_v12  ;;  %v2863_v54 = vadd.f32 %v7213_v10, %v2826_v7  ;;  %v10678_v47 = vld [vmem:[#allocation126_spill] sm:$0xff]  ;;  %v7410_v24 = vsel %vm1302_vm1, %v1290_v5, %v10679_v58 }
 0x181   : > { %v10676_v50 = vld [vmem:[#allocation80_spill] sm:$0xff]  ;;  %v7404_v4 = vmul.f32 %v6771_v23, %v10678_v47  ;;  %10680 = vst [vmem:[#allocation122_spill] sm:$0xff] %v7410_v24  ;;  %v2056_v30 = vadd.f32 %v2040_v37, %v2019_v14  ;;  %v1434_v12 = vadd.f32 %v1418_v36, %v1397_v21  ;;  %v7419_v7 = vmul.f32 %v6780_v8, %v7353_v49  ;;  %v10707_v49 = vld [vmem:[#allocation42_spill] sm:$0xff] }
 0x182   : > { %v1455_v29 = vmul.f32 %v7395_v38, %v10676_v50  ;;  %v10677_v60 = vld [vmem:[#allocation128_spill] sm:$0xff]  ;;  %v769_v28 = vadd.f32 %v753_v11, %v731_v48  ;;  %v2900_v10 = vadd.f32 %v7217_v22, %v2863_v54  ;;  %v867_v11 = vmul.f32 %v7165_v42, %v6717_v46 }
 0x183   : > { %v791_v9 = vmul.f32 %v10677_v60, %v10592_v45  ;;  %v10682_v61 = vld [vmem:[#allocation40_spill] sm:$0xff]  ;;  %v10683_v60 = vrot.slane %v6717_v46, 6  ;;  %v2093_v37 = vadd.f32 %v2077_v59, %v2056_v30  ;;  %v1566_v14 = vmul.f32 %v10613_v62, %v7410_v24  ;;  %v10687_v59 = vld [vmem:[#allocation82_spill] sm:$0xff]  ;;  %v10690_v30 = vld [vmem:[#allocation33_spill] sm:$0xff] }
 0x184   : > { %v829_v27 = vmul.f32 %v10597_v57, %v10682_v61  ;;  %v10685_v58 = vld [vmem:[#allocation96_spill] sm:$0xff]  ;;  %v1471_v48 = vadd.f32 %v1455_v29, %v1434_v12  ;;  %v7432_v22 = vadd.f32 %v6907_v55, %v2900_v10  ;;  %v1620_v21 = vrot.slane %v7157_v16, 3  ;;  %v10688_v29 = vld [vmem:[#allocation11_spill] sm:$0xff] }
 0x185   : > { %v7425_v5 = vsel %vm2622_vm5, %v10683_v60, %v2609_v2  ;;  %v1529_v26 = vmul.f32 %v6482_v15, %v10685_v58  ;;  %v807_v36 = vadd.f32 %v791_v9, %v769_v28  ;;  %v2130_v60 = vadd.f32 %v2114_v1, %v2093_v37  ;;  %v7441_v15 = vld [vmem:[%s9488_s1 + $0x30] ss:$0 sm:$0xff]  ;;  %v10689_v9 = vld [vmem:[#allocation86_spill] sm:$0xff]  ;;  %v10691_v10 = vld [vmem:[#allocation48_spill] sm:$0xff] }
 0x186   : > { %10684 = vst [vmem:[#allocation108_spill] sm:$0xff] %v7425_v5  ;;  %10686 = vst [vmem:[#allocation112_spill] sm:$0xff] %v7432_v22  ;;  %v1508_v54 = vadd.f32 %v1492_v63, %v1471_v48  ;;  %v905_v46 = vmul.f32 %v7441_v15, %v7255_v52  ;;  %2945 = vadd.xlane.f32.xlu0 %v7432_v22  ;;  %v7448_v62 = vmul.f32 %v6798_v19, %v10687_v59  ;;  %v10692_v37 = vld [vmem:[#allocation13_spill] sm:$0xff]  ;;  %v10722_v47 = vld [vmem:[#allocation92_spill] sm:$0xff] }
 0x187   : > { %v845_v61 = vadd.f32 %v829_v27, %v807_v36  ;;  %v7452_v1 = vmul.f32 %v6807_v33, %v10688_v29  ;;  %v7456_v63 = vmul.f32 %v6820_v3, %v10689_v9  ;;  %v7460_v12 = vmul.f32 %v6829_v56, %v10690_v30  ;;  %v10693_v59 = vld [vmem:[#allocation93_spill] sm:$0xff]  ;;  %v10698_v30 = vld [vmem:[#allocation50_spill] sm:$0xff] }
 0x188   : > { %v2167_v28 = vadd.f32 %v7320_v25, %v2130_v60  ;;  %v1545_v27 = vadd.f32 %v1529_v26, %v1508_v54  ;;  %v1674_v48 = vmul.f32 %v10692_v37, %v10691_v10  ;;  %v7467_v2 = vmul.f32 %v6867_v34, %v10693_v59  ;;  %v10694_v22 = vld [vmem:[#allocation21_spill] sm:$0xff] }
 0x189   : > { %v883_v36 = vadd.f32 %v867_v11, %v845_v61  ;;  %v10695_v29 = vld [vmem:[#allocation117_spill] sm:$0xff]  ;;  %v1711_v25 = vmul.f32 %v10699_v51, %v10698_v30  ;;  %v10700_v11 = vrot.slane %v7255_v52, 3  ;;  %v1950_v51 = vrot.slane %v7157_v16, 4 }
 0x18a   : > { %v7471_v24 = vmul.f32 %v10695_v29, %v10694_v22  ;;  %v10696_v9 = vld [vmem:[#allocation121_spill] sm:$0xff]  ;;  %v2204_v26 = vadd.f32 %v7327_v32, %v2167_v28  ;;  %v1582_v60 = vadd.f32 %v1566_v14, %v1545_v27  ;;  %v10704_v27 = vld [vmem:[#allocation51_spill] sm:$0xff] }
 0x18b   : > { %v7475_v58 = vmul.f32 %v10696_v9, %v7425_v5  ;;  %v7484_v54 = vsel %vm1632_vm2, %v1620_v21, %v10700_v11  ;;  %v7487_v61 = vld [vmem:[%s4718_s12 + $0x100] sm:$0xff]  ;;  %v921_v37 = vadd.f32 %v905_v46, %v883_v36  ;;  %v10703_v5 = vld [vmem:[#allocation90_spill] sm:$0xff]  ;;  %v1822_v46 = vmul.f32 %v6372_v35, %v10707_v49  ;;  %v10708_v36 = vld [vmem:[#allocation76_spill] sm:$0xff] }
 0x18c   : > { %10701 = vst [vmem:[#allocation82_spill] sm:$0xff] %v7484_v54  ;;  %v10702_v10 = vld [vmem:[#allocation53_spill] sm:$0xff]  ;;  %v1785_v59 = vmul.f32 %v10540_v40, %v10703_v5  ;;  %v2241_v14 = vadd.f32 %v7331_v6, %v2204_v26  ;;  %v1690_v28 = vadd.f32 %v1674_v48, %v1582_v60  ;;  %v10705_v21 = vld [vmem:[#allocation67_spill] sm:$0xff]  ;;  %v10710_v48 = vld [vmem:[#allocation54_spill] sm:$0xff] }
 0x18d   : > { %10697 = vst [vmem:[#allocation40_spill] sm:$0xff] %v7475_v58  ;;  %v1748_v22 = vmul.f32 %v10536_v13, %v10702_v10  ;;  %v1031_v30 = vadd.f32 %v10704_v27, %v921_v37  ;;  %v10706_v11 = vld [vmem:[#allocation97_spill] sm:$0xff]  ;;  %v1859_v13 = vmul.f32 %v6381_v31, %v10708_v36  ;;  %v10709_v40 = vld [vmem:[#allocation91_spill] sm:$0xff]  ;;  %v960_v10 = vrot.slane %v7487_v61, 1  ;;  %v10712_v37 = vld [vmem:[#allocation20_spill] sm:$0xff] }
 0x18e   : > { %v1089_v50 = vmul.f32 %v10706_v11, %v10705_v21  ;;  %v1896_v5 = vmul.f32 %v10709_v40, %v7484_v54  ;;  %v2349_v32 = vadd.f32 %v7335_v53, %v2241_v14  ;;  %v1727_v6 = vadd.f32 %v1711_v25, %v1690_v28  ;;  %v10711_v60 = vld [vmem:[#allocation35_spill] sm:$0xff]  ;;  %v10716_v36 = vld [vmem:[#allocation100_spill] sm:$0xff]  ;;  %v10717_v14 = vld [vmem:[#allocation70_spill] sm:$0xff] }
 0x18f   : > { %v1068_v26 = vadd.f32 %v10710_v48, %v1031_v30  ;;  %v1126_v27 = vmul.f32 %v10712_v37, %v10711_v60  ;;  %v10713_v21 = vrot.slane %v7255_v52, 4  ;;  %v10715_v31 = vld [vmem:[#allocation63_spill] sm:$0xff]  ;;  %v2280_v40 = vrot.slane %v7157_v16, 5  ;;  %v10718_v28 = vld [vmem:[#allocation110_spill] sm:$0xff] }
 0x190   : > { %v2004_v49 = vmul.f32 %v10716_v36, %v10715_v31  ;;  %v2386_v53 = vadd.f32 %v7339_v0, %v2349_v32  ;;  %v1764_v25 = vadd.f32 %v1748_v22, %v1727_v6  ;;  %v1163_v48 = vmul.f32 %v10718_v28, %v10717_v14  ;;  %v7526_v60 = vld [vmem:[%s9488_s1 + $0xc] ss:$0 sm:$0xff]  ;;  %v10721_v36 = vld [vmem:[#allocation64_spill] sm:$0xff]  ;;  %v10726_v14 = vld [vmem:[#allocation105_spill] sm:$0xff] }
 0x191   : > { %v7514_v35 = vsel %vm1962_vm3, %v1950_v51, %v10713_v21  ;;  %v1105_v30 = vadd.f32 %v1089_v50, %v1068_v26  ;;  %10719 = vst [vmem:[#allocation117_spill] sm:$0xff] %v7526_v60  ;;  %v10720_v51 = vld [vmem:[#allocation65_spill] sm:$0xff]  ;;  %v2078_v31 = vmul.f32 %v10564_v43, %v10721_v36  ;;  %v7534_v54 = vmul.f32 %v10571_v18, %v10722_v47  ;;  %v10724_v22 = vld [vmem:[#allocation130_spill] sm:$0xff]  ;;  %v10728_v43 = vld [vmem:[#allocation87_spill] sm:$0xff] }
 0x192   : > { %10714 = vst [vmem:[#allocation13_spill] sm:$0xff] %v7514_v35  ;;  %v2041_v21 = vmul.f32 %v7526_v60, %v10720_v51  ;;  %v10723_v0 = vrot.slane %v7255_v52, 1  ;;  %v2423_v32 = vadd.f32 %v10724_v22, %v2386_v53  ;;  %v1801_v6 = vadd.f32 %v1785_v59, %v1764_v25  ;;  %v10725_v26 = vld [vmem:[#allocation58_spill] sm:$0xff]  ;;  %v10727_v60 = vld [vmem:[#allocation81_spill] sm:$0xff]  ;;  %v10729_v18 = vld [vmem:[#allocation119_spill] sm:$0xff] }
 0x193   : > { %v7545_v55 = vmul.f32 %v10726_v14, %v10725_v26  ;;  %v1142_v51 = vadd.f32 %v1126_v27, %v1105_v30  ;;  %v7549_v36 = vmul.f32 %v10728_v43, %v10727_v60  ;;  %v7553_v47 = vmul.f32 %v10729_v18, %v7514_v35  ;;  %v10732_v59 = vld [vmem:[#allocation69_spill] sm:$0xff]  ;;  %v10733_v53 = vld [vmem:[#allocation47_spill] sm:$0xff]  ;;  %v10737_v18 = vld [vmem:[#allocation78_spill] sm:$0xff] }
 0x194   : > { %v7540_v50 = vsel %vm972_vm0, %v10723_v0, %v960_v10  ;;  %v10730_v58 = vrot.slane %v7255_v52, 5  ;;  %v7563_v25 = vmul.f32 %v10733_v53, %v10732_v59  ;;  %v10735_v14 = vld [vmem:[#allocation131_spill] sm:$0xff]  ;;  %v1838_v30 = vadd.f32 %v1822_v46, %v1801_v6  ;;  %v10738_v35 = vld [vmem:[#allocation72_spill] sm:$0xff]  ;;  %v10741_v60 = vld [vmem:[#allocation106_spill] sm:$0xff] }
 0x195   : > { %v2460_v27 = vadd.f32 %v10735_v14, %v2423_v32  ;;  %v1179_v0 = vadd.f32 %v1163_v48, %v1142_v51  ;;  %v7569_v22 = vld [vmem:[%s9488_s1 + $0x31] ss:$0 sm:$0xff]  ;;  %v10742_v53 = vld [vmem:[#allocation14_spill] sm:$0xff]  ;;  %v10743_v32 = vld [vmem:[#allocation120_spill] sm:$0xff] }
 0x196   : > { %v7559_v10 = vsel %vm2292_vm4, %v2280_v40, %v10730_v58  ;;  %10734 = vst [vmem:[#allocation75_spill] sm:$0xff] %v7563_v25  ;;  %10736 = vst [vmem:[#allocation51_spill] sm:$0xff] %v7569_v22  ;;  %v1237_v43 = vmul.f32 %v7569_v22, %v7540_v50  ;;  %v7575_v58 = vmul.f32 %v10738_v35, %v10737_v18  ;;  %v10740_v40 = vld [vmem:[#allocation77_spill] sm:$0xff]  ;;  %v10746_v25 = vld [vmem:[#allocation15_spill] sm:$0xff] }
 0x197   : > { %10731 = vst [vmem:[#allocation121_spill] sm:$0xff] %v7559_v10  ;;  %v7579_v59 = vmul.f32 %v10741_v60, %v10740_v40  ;;  %v7583_v46 = vmul.f32 %v10743_v32, %v10742_v53  ;;  %v10744_v48 = vld [vmem:[#allocation109_spill] sm:$0xff]  ;;  %v2497_v6 = vadd.f32 %v7389_v41, %v2460_v27  ;;  %v1875_v14 = vadd.f32 %v1859_v13, %v1838_v30  ;;  %v10747_v35 = vld [vmem:[#allocation111_spill] sm:$0xff]  ;;  %v10751_v30 = vld [vmem:[#allocation132_spill] sm:$0xff] }
 0x198   : > { %10739 = vst [vmem:[#allocation91_spill] sm:$0xff] %v7575_v58  ;;  %v7587_v51 = vmul.f32 %v10675_v17, %v10744_v48  ;;  %v10745_v26 = vld [vmem:[#allocation101_spill] sm:$0xff]  ;;  %v1345_v18 = vmul.f32 %v10747_v35, %v10746_v25  ;;  %v7599_v32 = vmul.f32 %v6780_v8, %v7559_v10  ;;  %v2610_v53 = vrot.slane %v7157_v16, 6  ;;  %v10753_v48 = vld [vmem:[#allocation31_spill] sm:$0xff] }
 0x199   : > { %v1216_v22 = vadd.f32 %v10745_v26, %v1179_v0  ;;  %v10748_v58 = vld [vmem:[#allocation49_spill] sm:$0xff]  ;;  %v2534_v41 = vadd.f32 %v7404_v4, %v2497_v6  ;;  %v1912_v13 = vadd.f32 %v1896_v5, %v1875_v14  ;;  %v10752_v0 = vld [vmem:[#allocation83_spill] sm:$0xff]  ;;  %v678_v8 = vmul.f32 %v10753_v48, %v10669_v20 }
 0x19a   : > { %v7595_v60 = vmul.f32 %v6771_v23, %v10748_v58  ;;  %10749 = vst [vmem:[#allocation54_spill] sm:$0xff] %v7599_v32  ;;  %v10750_v27 = vld [vmem:[#allocation17_spill] sm:$0xff]  ;;  %v7608_v58 = vmul.f32 %v6798_v19, %v10752_v0  ;;  %v10754_v10 = vld [vmem:[#allocation55_spill] sm:$0xff]  ;;  %v1292_v0 = vrot.slane %v7487_v61, 2 }
 0x19b   : > { %v1253_v26 = vadd.f32 %v1237_v43, %v1216_v22  ;;  %v1382_v25 = vmul.f32 %v10751_v30, %v10750_v27  ;;  %v716_v40 = vmul.f32 %v10754_v10, %v10670_v39  ;;  %v10755_v23 = vld [vmem:[#allocation123_spill] sm:$0xff]  ;;  %v10756_v17 = vld [vmem:[#allocation9_spill] sm:$0xff]  ;;  %v2571_v4 = vadd.f32 %v7419_v7, %v2534_v41  ;;  %v10757_v43 = vld [vmem:[#allocation10_spill] sm:$0xff] }
 0x19c   : > { %v754_v32 = vmul.f32 %v10756_v17, %v10755_v23  ;;  %v2020_v5 = vadd.f32 %v2004_v49, %v1912_v13  ;;  %v10758_v6 = vld [vmem:[#allocation133_spill] sm:$0xff]  ;;  %v10761_v41 = vld [vmem:[#allocation118_spill] sm:$0xff]  ;;  %v10765_v10 = vld [vmem:[#allocation104_spill] sm:$0xff] }
 0x19d   : > { %v1361_v22 = vadd.f32 %v1345_v18, %v1253_v26  ;;  %v1419_v14 = vmul.f32 %v10758_v6, %v10757_v43  ;;  %v10759_v27 = vld [vmem:[#allocation89_spill] sm:$0xff]  ;;  %v732_v48 = vadd.f32 %v716_v40, %v678_v8  ;;  %v2679_v7 = vadd.f32 %v7448_v62, %v2571_v4  ;;  %v10764_v40 = vld [vmem:[#allocation88_spill] sm:$0xff] }
 0x19e   : > { %v7621_v19 = vmul.f32 %v6807_v33, %v10759_v27  ;;  %v7625_v20 = vld [vmem:[%s4718_s12 + $0xc0] sm:$0xff]  ;;  %v2057_v49 = vadd.f32 %v2041_v21, %v2020_v5  ;;  %v1456_v13 = vmul.f32 %v7395_v38, %v10761_v41  ;;  %v10762_v26 = vrot.slane %v7255_v52, 6  ;;  %v10766_v5 = vld [vmem:[#allocation60_spill] sm:$0xff] }
 0x19f   : > { %10760 = vst [vmem:[#allocation63_spill] sm:$0xff] %v7625_v20  ;;  %v792_v17 = vmul.f32 %v7625_v20, %v10592_v45  ;;  %v1398_v18 = vadd.f32 %v1382_v25, %v1361_v22  ;;  %v7640_v8 = vmul.f32 %v6820_v3, %v10764_v40  ;;  %v770_v27 = vadd.f32 %v754_v32, %v732_v48  ;;  %v7648_v4 = vld [vmem:[%s9488_s1 + $0x22] ss:$0 sm:$0xff]  ;;  %v7653_v22 = vld [vmem:[%s4718_s12 + $0x108] sm:$0xff]  ;;  %v10768_v3 = vld [vmem:[#allocation19_spill] sm:$0xff] }
 0x1a0   : > { %v7636_v33 = vsel %vm2622_vm5, %v2610_v53, %v10762_v26  ;;  %v830_v20 = vmul.f32 %v10597_v57, %v10765_v10  ;;  %v2716_v62 = vadd.f32 %v7452_v1, %v2679_v7  ;;  %v2094_v21 = vadd.f32 %v2078_v31, %v2057_v49  ;;  %10767 = vst [vmem:[#allocation130_spill] sm:$0xff] %v7653_v22  ;;  %v10771_v49 = vld [vmem:[#allocation39_spill] sm:$0xff] }
 0x1a1   : > { %10763 = vst [vmem:[#allocation100_spill] sm:$0xff] %v7636_v33  ;;  %v1435_v25 = vadd.f32 %v1419_v14, %v1398_v18  ;;  %v1493_v53 = vmul.f32 %v7648_v4, %v10766_v5  ;;  %v7657_v32 = vmul.f32 %v6829_v56, %v10768_v3  ;;  %v10769_v10 = vrot.slane %v7255_v52, 2  ;;  %v10772_v26 = vld [vmem:[#allocation95_spill] sm:$0xff] }
 0x1a2   : > { %v808_v31 = vadd.f32 %v792_v17, %v770_v27  ;;  %v868_v14 = vmul.f32 %v7165_v42, %v7157_v16  ;;  %v2753_v48 = vadd.f32 %v7456_v63, %v2716_v62  ;;  %v2131_v7 = vadd.f32 %v7534_v54, %v2094_v21  ;;  %v10817_v40 = vld [vmem:[#allocation103_spill] sm:$0xff] }
 0x1a3   : > { %v7663_v1 = vsel %vm1302_vm1, %v10769_v10, %v1292_v0  ;;  %v7671_v18 = vmul.f32 %v6867_v34, %v10771_v49  ;;  %v1472_v56 = vadd.f32 %v1456_v13, %v1435_v25  ;;  %v7675_v3 = vmul.f32 %v10695_v29, %v10772_v26  ;;  %v7688_v34 = vld [vmem:[%s9488_s1 + $0x32] ss:$0 sm:$0xff]  ;;  %v10777_v10 = vld [vmem:[#allocation45_spill] sm:$0xff] }
 0x1a4   : > { %10770 = vst [vmem:[#allocation105_spill] sm:$0xff] %v7663_v1  ;;  %v7679_v0 = vmul.f32 %v10696_v9, %v7636_v33  ;;  %v846_v17 = vadd.f32 %v830_v20, %v808_v31  ;;  %v906_v27 = vmul.f32 %v7441_v15, %v7653_v22  ;;  %v2790_v63 = vadd.f32 %v7460_v12, %v2753_v48  ;;  %v10775_v13 = vld [vmem:[#allocation23_spill] sm:$0xff]  ;;  %v7708_v48 = vld [vmem:[%s9488_s1 + $0x3] ss:$0 sm:$0xff] }
 0x1a5   : > { %v2168_v54 = vadd.f32 %v7545_v55, %v2131_v7  ;;  %v1509_v62 = vadd.f32 %v1493_v53, %v1472_v56  ;;  %v1567_v29 = vmul.f32 %v7688_v34, %v7663_v1  ;;  %v7694_v9 = vmul.f32 %v10712_v37, %v7540_v50  ;;  %v10776_v55 = vld [vmem:[#allocation22_spill] sm:$0xff]  ;;  %v10778_v7 = vld [vmem:[#allocation52_spill] sm:$0xff]  ;;  %v10788_v33 = vld [vmem:[#allocation75_spill] sm:$0xff] }
 0x1a6   : > { %v7698_v20 = vmul.f32 %v10718_v28, %v7540_v50  ;;  %v884_v12 = vadd.f32 %v868_v14, %v846_v17  ;;  %v1016_v21 = vmul.f32 %v10776_v55, %v10775_v13  ;;  %v2827_v25 = vadd.f32 %v7467_v2, %v2790_v63  ;;  %v10779_v14 = vld [vmem:[#allocation127_spill] sm:$0xff]  ;;  %v10781_v63 = vld [vmem:[#allocation24_spill] sm:$0xff] }
 0x1a7   : > { %10773 = vst [vmem:[#allocation87_spill] sm:$0xff] %v7694_v9  ;;  %v2205_v53 = vadd.f32 %v7549_v36, %v2168_v54  ;;  %v1546_v31 = vadd.f32 %v10777_v10, %v1509_v62  ;;  %v1675_v56 = vmul.f32 %v7708_v48, %v10778_v7  ;;  %v7714_v17 = vmul.f32 %v10779_v14, %v7540_v50  ;;  %v10782_v9 = vld [vmem:[#allocation74_spill] sm:$0xff] }
 0x1a8   : > { %10774 = vst [vmem:[#allocation119_spill] sm:$0xff] %v7698_v20  ;;  %v1622_v13 = vrot.slane %v7487_v61, 3  ;;  %v922_v2 = vadd.f32 %v906_v27, %v884_v12  ;;  %v1053_v36 = vmul.f32 %v10782_v9, %v10781_v63  ;;  %v2864_v54 = vadd.f32 %v7471_v24, %v2827_v25  ;;  %v7724_v20 = vld [vmem:[%s9488_s1 + $0xb] ss:$0 sm:$0xff]  ;;  %v7731_v27 = vld [vmem:[%s9488_s1 + $0x13] ss:$0 sm:$0xff] }
 0x1a9   : > { %10780 = vst [vmem:[#allocation69_spill] sm:$0xff] %v7714_v17  ;;  %v2242_v62 = vadd.f32 %v7553_v47, %v2205_v53  ;;  %v1583_v10 = vadd.f32 %v1567_v29, %v1546_v31  ;;  %v10783_v7 = vld [vmem:[#allocation26_spill] sm:$0xff]  ;;  %10784 = vst [vmem:[#allocation47_spill] sm:$0xff] %v7731_v27  ;;  %v7736_v24 = vld [vmem:[%s4718_s12 + $0x110] sm:$0xff]  ;;  %v961_v47 = vrot.slane %v7653_v22, 1  ;;  %v10789_v16 = vrot.slane %v7255_v52, 3 }
 0x1aa   : > { %v1712_v50 = vmul.f32 %v7724_v20, %v10783_v7  ;;  %v10785_v12 = vld [vmem:[#allocation38_spill] sm:$0xff]  ;;  %v1032_v29 = vadd.f32 %v1016_v21, %v922_v2  ;;  %v10786_v25 = vld [vmem:[#allocation41_spill] sm:$0xff]  ;;  %v10787_v31 = vld [vmem:[#allocation40_spill] sm:$0xff] }
 0x1ab   : > { %v1749_v55 = vmul.f32 %v7731_v27, %v10785_v12  ;;  %v1090_v53 = vmul.f32 %v10706_v11, %v10786_v25  ;;  %v2901_v63 = vadd.f32 %v10787_v31, %v2864_v54  ;;  %v2350_v7 = vadd.f32 %v10788_v33, %v2242_v62  ;;  %v7753_v21 = vld [vmem:[%s9488_s1 + $0x1b] ss:$0 sm:$0xff]  ;;  %v10792_v2 = vld [vmem:[#allocation43_spill] sm:$0xff] }
 0x1ac   : > { %v1691_v26 = vadd.f32 %v1675_v56, %v1583_v10  ;;  %v7748_v12 = vsel %vm1632_vm2, %v10789_v16, %v1622_v13  ;;  %10791 = vst [vmem:[#allocation72_spill] sm:$0xff] %v7753_v21  ;;  %v1786_v25 = vmul.f32 %v7753_v21, %v10792_v2  ;;  %v1069_v54 = vadd.f32 %v1053_v36, %v1032_v29  ;;  %v10793_v31 = vld [vmem:[#allocation27_spill] sm:$0xff]  ;;  %v10794_v56 = vld [vmem:[#allocation16_spill] sm:$0xff]  ;;  %v7771_v2 = vld [vmem:[%s9488_s1 + $0x2a] ss:$0 sm:$0xff] }
 0x1ad   : > { %10790 = vst [vmem:[#allocation131_spill] sm:$0xff] %v7748_v12  ;;  %v1127_v33 = vmul.f32 %v10712_v37, %v10793_v31  ;;  %v7760_v62 = vadd.f32 %v10794_v56, %v2901_v63  ;;  %v10796_v10 = vld [vmem:[#allocation91_spill] sm:$0xff]  ;;  %v1952_v16 = vrot.slane %v7487_v61, 4  ;;  %v7766_v13 = vmul.f32 %v7648_v4, %v7663_v1  ;;  %10798 = vst [vmem:[#allocation101_spill] sm:$0xff] %v7771_v2  ;;  %v10800_v29 = vld [vmem:[#allocation30_spill] sm:$0xff] }
 0x1ae   : > { %v2387_v49 = vadd.f32 %v10796_v10, %v2350_v7  ;;  %v1728_v5 = vadd.f32 %v1712_v50, %v1691_v26  ;;  %v7775_v36 = vmul.f32 %v7771_v2, %v7663_v1  ;;  %v1106_v63 = vadd.f32 %v1090_v53, %v1069_v54  ;;  %v7784_v56 = vld [vmem:[%s9488_s1 + $0x23] ss:$0 sm:$0xff]  ;;  %v10802_v10 = vld [vmem:[#allocation62_spill] sm:$0xff] }
 0x1af   : > { %10795 = vst [vmem:[#allocation106_spill] sm:$0xff] %v7760_v62  ;;  %10797 = vst [vmem:[#allocation120_spill] sm:$0xff] %v7766_v13  ;;  %v1164_v7 = vmul.f32 %v10718_v28, %v10800_v29  ;;  %2947 = vadd.xlane.f32.xlu1 %v7760_v62  ;;  %v1823_v13 = vmul.f32 %v7784_v56, %v10802_v10  ;;  %v10803_v1 = vrot.slane %v7736_v24, 1  ;;  %v7797_v54 = vld [vmem:[%s9488_s1 + $0x2b] ss:$0 sm:$0xff]  ;;  %v10809_v31 = vrot.slane %v7255_v52, 4 }
 0x1b0   : > { %10799 = vst [vmem:[#allocation15_spill] sm:$0xff] %v7775_v36  ;;  %v2424_v26 = vadd.f32 %v7579_v59, %v2387_v49  ;;  %v1765_v50 = vadd.f32 %v1749_v55, %v1728_v5  ;;  %10801 = vst [vmem:[#allocation83_spill] sm:$0xff] %v7784_v56  ;;  %v7801_v59 = vmul.f32 %v7797_v54, %v7748_v12  ;;  %v7806_v5 = vld [vmem:[%s9488_s1 + $0x33] ss:$0 sm:$0xff]  ;;  %v7822_v10 = vld [vmem:[%s9488_s1 + $0x4] ss:$0 sm:$0xff] }
 0x1b1   : > { %v7792_v53 = vsel %vm972_vm0, %v961_v47, %v10803_v1  ;;  %10805 = vst [vmem:[#allocation123_spill] sm:$0xff] %v7797_v54  ;;  %10807 = vst [vmem:[#allocation23_spill] sm:$0xff] %v7806_v5  ;;  %v1897_v49 = vmul.f32 %v7806_v5, %v7748_v12  ;;  %v1143_v55 = vadd.f32 %v1127_v33, %v1106_v63  ;;  %v10808_v1 = vld [vmem:[#allocation56_spill] sm:$0xff]  ;;  %v10812_v36 = vld [vmem:[#allocation94_spill] sm:$0xff] }
 0x1b2   : > { %10804 = vst [vmem:[#allocation31_spill] sm:$0xff] %v7792_v53  ;;  %10806 = vst [vmem:[#allocation104_spill] sm:$0xff] %v7801_v59  ;;  %v1201_v47 = vmul.f32 %v10779_v14, %v10808_v1  ;;  %v2461_v62 = vadd.f32 %v7583_v46, %v2424_v26  ;;  %v1802_v29 = vadd.f32 %v1786_v25, %v1765_v50  ;;  %v10813_v63 = vld [vmem:[#allocation98_spill] sm:$0xff]  ;;  %v10814_v12 = vld [vmem:[#allocation117_spill] sm:$0xff]  ;;  %v2282_v46 = vrot.slane %v7487_v61, 5 }
 0x1b3   : > { %v7817_v59 = vsel %vm1962_vm3, %v10809_v31, %v1952_v16  ;;  %10811 = vst [vmem:[#allocation40_spill] sm:$0xff] %v7822_v10  ;;  %v2005_v33 = vmul.f32 %v7822_v10, %v10812_v36  ;;  %v2042_v1 = vmul.f32 %v10814_v12, %v10813_v63  ;;  %v1180_v25 = vadd.f32 %v1164_v7, %v1143_v55  ;;  %v10815_v26 = vld [vmem:[#allocation51_spill] sm:$0xff]  ;;  %v7842_v63 = vld [vmem:[%s9488_s1 + $0x1c] ss:$0 sm:$0xff]  ;;  %v10819_v7 = vld [vmem:[#allocation46_spill] sm:$0xff] }
 0x1b4   : > { %10810 = vst [vmem:[#allocation45_spill] sm:$0xff] %v7817_v59  ;;  %v1238_v50 = vmul.f32 %v10815_v26, %v7792_v53  ;;  %v2498_v31 = vadd.f32 %v7587_v51, %v2461_v62  ;;  %v1839_v16 = vadd.f32 %v1823_v13, %v1802_v29  ;;  %v7835_v14 = vld [vmem:[%s9488_s1 + $0x14] ss:$0 sm:$0xff]  ;;  %10818 = vst [vmem:[#allocation16_spill] sm:$0xff] %v7842_v63  ;;  %v7849_v51 = vld [vmem:[%s9488_s1 + $0x24] ss:$0 sm:$0xff] }
 0x1b5   : > { %10816 = vst [vmem:[#allocation75_spill] sm:$0xff] %v7835_v14  ;;  %v2079_v36 = vmul.f32 %v7835_v14, %v10817_v40  ;;  %v2116_v55 = vmul.f32 %v7842_v63, %v10819_v7  ;;  %10820 = vst [vmem:[#allocation91_spill] sm:$0xff] %v7849_v51  ;;  %v10821_v62 = vld [vmem:[#allocation85_spill] sm:$0xff]  ;;  %v7858_v29 = vld [vmem:[%s9488_s1 + $0x2c] ss:$0 sm:$0xff]  ;;  %v1217_v41 = vadd.f32 %v1201_v47, %v1180_v25  ;;  %v1293_v12 = vrot.slane %v7653_v22, 2 }
 0x1b6   : > { %v7853_v13 = vmul.f32 %v7849_v51, %v10821_v62  ;;  %10822 = vst [vmem:[#allocation94_spill] sm:$0xff] %v7858_v29  ;;  %v10823_v40 = vld [vmem:[#allocation129_spill] sm:$0xff]  ;;  %v10824_v7 = vld [vmem:[#allocation34_spill] sm:$0xff]  ;;  %v2535_v17 = vadd.f32 %v7595_v60, %v2498_v31  ;;  %v10825_v26 = vld [vmem:[#allocation107_spill] sm:$0xff]  ;;  %v10829_v60 = vrot.slane %v7255_v52, 5 }
 0x1b7   : > { %v7862_v53 = vmul.f32 %v7858_v29, %v10823_v40  ;;  %v1346_v43 = vmul.f32 %v10747_v35, %v10824_v7  ;;  %v1876_v63 = vadd.f32 %v10825_v26, %v1839_v16  ;;  %v7871_v62 = vld [vmem:[%s9488_s1 + $0x34] ss:$0 sm:$0xff]  ;;  %v7880_v47 = vld [vmem:[%s9488_s1 + $0x5] ss:$0 sm:$0xff]  ;;  %v7895_v31 = vld [vmem:[%s9488_s1 + $0xd] ss:$0 sm:$0xff]  ;;  %v1254_v40 = vadd.f32 %v1238_v50, %v1217_v41 }
 0x1b8   : > { %10826 = vst [vmem:[#allocation34_spill] sm:$0xff] %v7871_v62  ;;  %v7875_v51 = vmul.f32 %v7871_v62, %v7817_v59  ;;  %10827 = vst [vmem:[#allocation107_spill] sm:$0xff] %v7880_v47  ;;  %v10828_v25 = vld [vmem:[#allocation113_spill] sm:$0xff]  ;;  %v7890_v26 = vsel %vm2292_vm4, %v10829_v60, %v2282_v46  ;;  %v10832_v16 = vld [vmem:[#allocation114_spill] sm:$0xff] }
 0x1b9   : > { %v7884_v7 = vmul.f32 %v7880_v47, %v10828_v25  ;;  %10830 = vst [vmem:[#allocation113_spill] sm:$0xff] %v7890_v26  ;;  %10831 = vst [vmem:[#allocation134_spill] sm:$0xff] %v7895_v31  ;;  %v7899_v59 = vmul.f32 %v7895_v31, %v10832_v16  ;;  %v10833_v35 = vld [vmem:[#allocation37_spill] sm:$0xff]  ;;  %v10834_v47 = vld [vmem:[#allocation54_spill] sm:$0xff]  ;;  %v1913_v29 = vadd.f32 %v1897_v49, %v1876_v63 }
 0x1ba   : > { %v1383_v25 = vmul.f32 %v10751_v30, %v10833_v35  ;;  %v2572_v62 = vadd.f32 %v10834_v47, %v2535_v17  ;;  %v7907_v46 = vld [vmem:[%s9488_s1 + $0x15] ss:$0 sm:$0xff]  ;;  %v7916_v16 = vld [vmem:[%s9488_s1 + $0x1d] ss:$0 sm:$0xff]  ;;  %v7925_v17 = vld [vmem:[%s9488_s1 + $0x25] ss:$0 sm:$0xff]  ;;  %v1362_v30 = vadd.f32 %v1346_v43, %v1254_v40 }
 0x1bb   : > { %10835 = vst [vmem:[#allocation54_spill] sm:$0xff] %v7907_v46  ;;  %v10836_v60 = vld [vmem:[#allocation115_spill] sm:$0xff]  ;;  %10837 = vst [vmem:[#allocation135_spill] sm:$0xff] %v7916_v16  ;;  %v10838_v41 = vld [vmem:[#allocation68_spill] sm:$0xff] }
 0x1bc   : > { %v7911_v14 = vmul.f32 %v7907_v46, %v10836_v60  ;;  %v7920_v50 = vmul.f32 %v7916_v16, %v10838_v41  ;;  %10840 = vst [vmem:[#allocation137_spill] sm:$0xff] %v7925_v17  ;;  %v10841_v49 = vld [vmem:[#allocation126_spill] sm:$0xff]  ;;  %v10843_v47 = vld [vmem:[#allocation32_spill] sm:$0xff]  ;;  %v10844_v60 = vld [vmem:[#allocation61_spill] sm:$0xff]  ;;  %v2680_v41 = vadd.f32 %v7608_v58, %v2572_v62  ;;  %v2021_v16 = vadd.f32 %v2005_v33, %v1913_v29 }
 0x1bd   : > { %v7929_v63 = vmul.f32 %v7925_v17, %v10841_v49  ;;  %v7933_v35 = vmul.f32 %v10844_v60, %v10843_v47  ;;  %v10845_v46 = vld [vmem:[#allocation80_spill] sm:$0xff]  ;;  %v1399_v28 = vadd.f32 %v1383_v25, %v1362_v30  ;;  %v10846_v10 = vld [vmem:[#allocation18_spill] sm:$0xff]  ;;  %v10849_v43 = vld [vmem:[#allocation125_spill] sm:$0xff] }
 0x1be   : > { %10839 = vst [vmem:[#allocation136_spill] sm:$0xff] %v7920_v50  ;;  %v1420_v31 = vmul.f32 %v10758_v6, %v10845_v46  ;;  %v9945_v50 = vrot.slane %v7736_v24, 2  ;;  %v1457_v49 = vmul.f32 %v7395_v38, %v10846_v10  ;;  %v10847_v17 = vld [vmem:[#allocation124_spill] sm:$0xff]  ;;  %v717_v40 = vmul.f32 %v10849_v43, %v10670_v39  ;;  %v7950_v58 = vld [vmem:[%s9488_s1 + $0x35] ss:$0 sm:$0xff]  ;;  %v10883_v10 = vld [vmem:[#allocation82_spill] sm:$0xff] }
 0x1bf   : > { %10842 = vst [vmem:[#allocation138_spill] sm:$0xff] %v7929_v63  ;;  %v10848_v63 = vld [vmem:[#allocation57_spill] sm:$0xff]  ;;  %v2717_v47 = vadd.f32 %v7621_v19, %v2680_v41  ;;  %v2058_v46 = vadd.f32 %v2042_v1, %v2021_v16  ;;  %10850 = vst [vmem:[#allocation61_spill] sm:$0xff] %v7950_v58  ;;  %v7954_v30 = vmul.f32 %v7950_v58, %v7890_v26  ;;  %v10851_v33 = vld [vmem:[#allocation128_spill] sm:$0xff]  ;;  %v2612_v43 = vrot.slane %v7487_v61, 6 }
 0x1c0   : > { %v679_v60 = vmul.f32 %v10848_v63, %v10847_v17  ;;  %v755_v62 = vmul.f32 %v10851_v33, %v10755_v23  ;;  %v1436_v29 = vadd.f32 %v1420_v31, %v1399_v28  ;;  %v10852_v25 = vld [vmem:[#allocation96_spill] sm:$0xff]  ;;  %v7971_v23 = vsel %vm1302_vm1, %v1293_v12, %v9945_v50  ;;  %v10855_v31 = vld [vmem:[#allocation122_spill] sm:$0xff]  ;;  %v7976_v33 = vld [vmem:[%s4718_s12 + $0xe0] sm:$0xff] }
 0x1c1   : > { %v1494_v39 = vmul.f32 %v7648_v4, %v10852_v25  ;;  %v7961_v19 = vld [vmem:[%s4718_s12 + $0xc8] sm:$0xff]  ;;  %v2754_v16 = vadd.f32 %v7640_v8, %v2717_v47  ;;  %v2095_v41 = vadd.f32 %v2079_v36, %v2058_v46  ;;  %10854 = vst [vmem:[#allocation57_spill] sm:$0xff] %v7971_v23  ;;  %10856 = vst [vmem:[#allocation125_spill] sm:$0xff] %v7976_v33  ;;  %v7984_v61 = vld [vmem:[%s9488_s1 + $0x6] ss:$0 sm:$0xff] }
 0x1c2   : > { %v733_v17 = vadd.f32 %v717_v40, %v679_v60  ;;  %10853 = vst [vmem:[#allocation124_spill] sm:$0xff] %v7961_v19  ;;  %v793_v1 = vmul.f32 %v7961_v19, %v10592_v45  ;;  %v1473_v28 = vadd.f32 %v1457_v49, %v1436_v29  ;;  %v1531_v60 = vmul.f32 %v7771_v2, %v10855_v31  ;;  %v10858_v12 = vld [vmem:[#allocation11_spill] sm:$0xff]  ;;  %v7993_v49 = vld [vmem:[%s9488_s1 + $0xe] ss:$0 sm:$0xff] }
 0x1c3   : > { %v831_v45 = vmul.f32 %v7976_v33, %v10597_v57  ;;  %v2791_v8 = vadd.f32 %v7657_v32, %v2754_v16  ;;  %v2132_v36 = vadd.f32 %v2116_v55, %v2095_v41  ;;  %10857 = vst [vmem:[#allocation128_spill] sm:$0xff] %v7984_v61  ;;  %v7988_v46 = vmul.f32 %v7984_v61, %v10858_v12  ;;  %v10859_v47 = vld [vmem:[#allocation86_spill] sm:$0xff]  ;;  %v10877_v31 = vld [vmem:[#allocation35_spill] sm:$0xff] }
 0x1c4   : > { %v771_v40 = vadd.f32 %v755_v62, %v733_v17  ;;  %v7997_v57 = vmul.f32 %v7993_v49, %v10859_v47  ;;  %v1510_v32 = vadd.f32 %v1494_v39, %v1473_v28  ;;  %v1568_v55 = vmul.f32 %v7688_v34, %v7971_v23  ;;  %v10860_v39 = vld [vmem:[#allocation50_spill] sm:$0xff]  ;;  %v8044_v47 = vld [vmem:[%s9488_s1 + $0x26] ss:$0 sm:$0xff] }
 0x1c5   : > { %v869_v29 = vmul.f32 %v7165_v42, %v7255_v52  ;;  %v2828_v17 = vadd.f32 %v7671_v18, %v2791_v8  ;;  %v2169_v16 = vadd.f32 %v7853_v13, %v2132_v36  ;;  %v907_v41 = vmul.f32 %v7441_v15, %v7736_v24  ;;  %v10864_v8 = vld [vmem:[#allocation33_spill] sm:$0xff]  ;;  %10868 = vst [vmem:[#allocation141_spill] sm:$0xff] %v8044_v47  ;;  %v10875_v23 = vld [vmem:[#allocation42_spill] sm:$0xff] }
 0x1c6   : > { %v809_v62 = vadd.f32 %v793_v1, %v771_v40  ;;  %v1623_v12 = vrot.slane %v7653_v22, 3  ;;  %v1547_v50 = vadd.f32 %v1531_v60, %v1510_v32  ;;  %v1676_v28 = vmul.f32 %v7708_v48, %v10860_v39  ;;  %v8022_v60 = vld [vmem:[%s9488_s1 + $0x16] ss:$0 sm:$0xff]  ;;  %v10867_v32 = vld [vmem:[#allocation53_spill] sm:$0xff] }
 0x1c7   : > { %v2865_v1 = vadd.f32 %v7675_v3, %v2828_v17  ;;  %v2206_v40 = vadd.f32 %v7862_v53, %v2169_v16  ;;  %v10861_v18 = vrot.slane %v7255_v52, 6  ;;  %10863 = vst [vmem:[#allocation139_spill] sm:$0xff] %v8022_v60  ;;  %v8026_v36 = vmul.f32 %v8022_v60, %v10864_v8  ;;  %v8031_v3 = vld [vmem:[%s9488_s1 + $0x1e] ss:$0 sm:$0xff]  ;;  %v10866_v53 = vld [vmem:[#allocation93_spill] sm:$0xff] }
 0x1c8   : > { %v847_v26 = vadd.f32 %v831_v45, %v809_v62  ;;  %10865 = vst [vmem:[#allocation140_spill] sm:$0xff] %v8031_v3  ;;  %v8035_v45 = vmul.f32 %v8031_v3, %v10866_v53  ;;  %v1713_v62 = vmul.f32 %v7724_v20, %v10867_v32  ;;  %v10869_v39 = vld [vmem:[#allocation21_spill] sm:$0xff]  ;;  %v10870_v53 = vld [vmem:[#allocation90_spill] sm:$0xff]  ;;  %v1091_v25 = vmul.f32 %v10706_v11, %v10877_v31  ;;  %v10885_v52 = vld [vmem:[#allocation40_spill] sm:$0xff] }
 0x1c9   : > { %v8017_v13 = vsel %vm2622_vm5, %v10861_v18, %v2612_v43  ;;  %v1584_v43 = vadd.f32 %v1568_v55, %v1547_v50  ;;  %v2902_v16 = vadd.f32 %v7679_v0, %v2865_v1  ;;  %v2243_v18 = vadd.f32 %v7875_v51, %v2206_v40  ;;  %v8059_v51 = vld [vmem:[%s4718_s12 + $0x118] sm:$0xff]  ;;  %v10873_v1 = vld [vmem:[#allocation67_spill] sm:$0xff] }
 0x1ca   : > { %10862 = vst [vmem:[#allocation11_spill] sm:$0xff] %v8017_v13  ;;  %v885_v17 = vadd.f32 %v869_v29, %v847_v26  ;;  %v8048_v8 = vmul.f32 %v8044_v47, %v10869_v39  ;;  %v1750_v50 = vmul.f32 %v7731_v27, %v10870_v53  ;;  %v10871_v55 = vrot.slane %v7736_v24, 3  ;;  %v8066_v39 = vld [vmem:[%s9489_s2] ss:$0 sm:$0xff] }
 0x1cb   : > { %v1692_v0 = vadd.f32 %v1676_v28, %v1584_v43  ;;  %v1054_v40 = vmul.f32 %v10782_v9, %v10873_v1  ;;  %v8069_v53 = vadd.f32 %v8066_v39, %v2902_v16  ;;  %v2351_v32 = vadd.f32 %v7884_v7, %v2243_v18  ;;  %v8084_v7 = vld [vmem:[%s9488_s1 + $0x2e] ss:$0 sm:$0xff]  ;;  %v10879_v18 = vld [vmem:[#allocation108_spill] sm:$0xff] }
 0x1cc   : > { %v8056_v26 = vsel %vm1632_vm2, %v1623_v12, %v10871_v55  ;;  %v923_v29 = vadd.f32 %v907_v41, %v885_v17  ;;  %v1787_v12 = vmul.f32 %v7753_v21, %v10875_v23  ;;  %v1953_v28 = vrot.slane %v7653_v22, 4  ;;  %v10876_v17 = vld [vmem:[#allocation29_spill] sm:$0xff]  ;;  %v10902_v9 = vld [vmem:[#allocation94_spill] sm:$0xff] }
 0x1cd   : > { %10872 = vst [vmem:[#allocation142_spill] sm:$0xff] %v8056_v26  ;;  %10874 = vst [vmem:[#allocation143_spill] sm:$0xff] %v8069_v53  ;;  %v1729_v43 = vadd.f32 %v1713_v62, %v1692_v0  ;;  %2949 = vadd.xlane.f32.xlu0 %v8069_v53  ;;  %v2388_v16 = vadd.f32 %v7899_v59, %v2351_v32  ;;  %v8088_v23 = vmul.f32 %v8084_v7, %v10879_v18  ;;  %v8093_v62 = vld [vmem:[%s9488_s1 + $0x36] ss:$0 sm:$0xff]  ;;  %v10882_v53 = vld [vmem:[#allocation70_spill] sm:$0xff] }
 0x1ce   : > { %v1033_v55 = vadd.f32 %v10876_v17, %v923_v29  ;;  %10878 = vst [vmem:[#allocation29_spill] sm:$0xff] %v8084_v7  ;;  %10880 = vst [vmem:[#allocation144_spill] sm:$0xff] %v8093_v62  ;;  %v8097_v0 = vmul.f32 %v8093_v62, %v8017_v13  ;;  %v963_v59 = vrot.slane %v8059_v51, 1  ;;  %v10881_v29 = vld [vmem:[#allocation76_spill] sm:$0xff]  ;;  %v1128_v18 = vmul.f32 %v10712_v37, %v10882_v53  ;;  %v10884_v13 = vld [vmem:[#allocation65_spill] sm:$0xff] }
 0x1cf   : > { %v1766_v32 = vadd.f32 %v1750_v50, %v1729_v43  ;;  %v1824_v17 = vmul.f32 %v7784_v56, %v10881_v29  ;;  %v2425_v31 = vadd.f32 %v7911_v14, %v2388_v16  ;;  %v1861_v1 = vmul.f32 %v7797_v54, %v10883_v10  ;;  %v10889_v29 = vld [vmem:[#allocation110_spill] sm:$0xff]  ;;  %v10890_v16 = vld [vmem:[#allocation136_spill] sm:$0xff]  ;;  %v10900_v37 = vld [vmem:[#allocation91_spill] sm:$0xff] }
 0x1d0   : > { %v1070_v41 = vadd.f32 %v1054_v40, %v1033_v55  ;;  %v1898_v2 = vmul.f32 %v7806_v5, %v8056_v26  ;;  %v2006_v11 = vmul.f32 %v10885_v52, %v10884_v13  ;;  %v10886_v50 = vrot.slane %v7736_v24, 4  ;;  %v10888_v55 = vld [vmem:[#allocation59_spill] sm:$0xff]  ;;  %v10896_v5 = vld [vmem:[#allocation138_spill] sm:$0xff]  ;;  %v10898_v56 = vld [vmem:[#allocation16_spill] sm:$0xff] }
 0x1d1   : > { %v1803_v21 = vadd.f32 %v1787_v12, %v1766_v32  ;;  %v1165_v14 = vmul.f32 %v10889_v29, %v10888_v55  ;;  %v2462_v53 = vadd.f32 %v10890_v16, %v2425_v31  ;;  %v2283_v10 = vrot.slane %v7653_v22, 5  ;;  %v10892_v32 = vld [vmem:[#allocation64_spill] sm:$0xff]  ;;  %v10897_v16 = vld [vmem:[#allocation58_spill] sm:$0xff]  ;;  %v10899_v26 = vld [vmem:[#allocation81_spill] sm:$0xff] }
 0x1d2   : > { %v8115_v40 = vsel %vm1962_vm3, %v1953_v28, %v10886_v50  ;;  %v1107_v43 = vadd.f32 %v1091_v25, %v1070_v41  ;;  %v10891_v54 = vrot.slane %v7736_v24, 1  ;;  %v10893_v28 = vld [vmem:[#allocation117_spill] sm:$0xff]  ;;  %v10894_v25 = vld [vmem:[#allocation92_spill] sm:$0xff]  ;;  %v10895_v41 = vld [vmem:[#allocation75_spill] sm:$0xff]  ;;  %v2117_v29 = vmul.f32 %v10898_v56, %v10897_v16 }
 0x1d3   : > { %10887 = vst [vmem:[#allocation65_spill] sm:$0xff] %v8115_v40  ;;  %v1840_v12 = vadd.f32 %v1824_v17, %v1803_v21  ;;  %v2043_v50 = vmul.f32 %v10893_v28, %v10892_v32  ;;  %v2080_v52 = vmul.f32 %v10895_v41, %v10894_v25  ;;  %v2499_v31 = vadd.f32 %v10896_v5, %v2462_v53  ;;  %v10901_v62 = vld [vmem:[#allocation13_spill] sm:$0xff]  ;;  %v10907_v16 = vld [vmem:[#allocation78_spill] sm:$0xff]  ;;  %v10915_v56 = vld [vmem:[#allocation111_spill] sm:$0xff] }
 0x1d4   : > { %v8126_v13 = vsel %vm972_vm0, %v10891_v54, %v963_v59  ;;  %v1144_v55 = vadd.f32 %v1128_v18, %v1107_v43  ;;  %v2154_v27 = vmul.f32 %v10900_v37, %v10899_v26  ;;  %v8139_v54 = vmul.f32 %v10902_v9, %v10901_v62  ;;  %v10903_v59 = vld [vmem:[#allocation34_spill] sm:$0xff]  ;;  %v10904_v18 = vld [vmem:[#allocation51_spill] sm:$0xff]  ;;  %v10914_v37 = vld [vmem:[#allocation17_spill] sm:$0xff] }
 0x1d5   : > { %v1877_v21 = vadd.f32 %v1861_v1, %v1840_v12  ;;  %v8143_v17 = vmul.f32 %v10903_v59, %v8115_v40  ;;  %v1239_v43 = vmul.f32 %v10904_v18, %v8126_v13  ;;  %v2536_v5 = vadd.f32 %v7933_v35, %v2499_v31  ;;  %v10908_v62 = vld [vmem:[#allocation107_spill] sm:$0xff]  ;;  %v10909_v1 = vld [vmem:[#allocation77_spill] sm:$0xff]  ;;  %v10910_v12 = vld [vmem:[#allocation134_spill] sm:$0xff] }
 0x1d6   : > { %v1181_v32 = vadd.f32 %v1165_v14, %v1144_v55  ;;  %v10905_v53 = vrot.slane %v7736_v24, 5  ;;  %v8156_v25 = vmul.f32 %v10908_v62, %v10907_v16  ;;  %v8160_v40 = vmul.f32 %v10910_v12, %v10909_v1  ;;  %v10911_v14 = vld [vmem:[#allocation14_spill] sm:$0xff]  ;;  %v10913_v35 = vld [vmem:[#allocation69_spill] sm:$0xff]  ;;  %v10917_v28 = vld [vmem:[#allocation135_spill] sm:$0xff] }
 0x1d7   : > { %v1914_v55 = vadd.f32 %v1898_v2, %v1877_v21  ;;  %v10912_v59 = vld [vmem:[#allocation54_spill] sm:$0xff]  ;;  %v1347_v41 = vmul.f32 %v10915_v56, %v10914_v37  ;;  %v10918_v62 = vld [vmem:[#allocation49_spill] sm:$0xff] }
 0x1d8   : > { %v8152_v26 = vsel %vm2292_vm4, %v2283_v10, %v10905_v53  ;;  %v8164_v9 = vmul.f32 %v10912_v59, %v10911_v14  ;;  %v1218_v31 = vadd.f32 %v10913_v35, %v1181_v32  ;;  %v2573_v10 = vadd.f32 %v7954_v30, %v2536_v5  ;;  %v10916_v53 = vld [vmem:[#allocation109_spill] sm:$0xff]  ;;  %v8181_v2 = vld [vmem:[%s9488_s1 + $0x2d] ss:$0 sm:$0xff] }
 0x1d9   : > { %10906 = vst [vmem:[#allocation136_spill] sm:$0xff] %v8152_v26  ;;  %v8172_v16 = vmul.f32 %v10917_v28, %v10916_v53  ;;  %v10919_v18 = vld [vmem:[#allocation137_spill] sm:$0xff]  ;;  %10920 = vst [vmem:[#allocation138_spill] sm:$0xff] %v8181_v2  ;;  %v2022_v37 = vadd.f32 %v2006_v11, %v1914_v55  ;;  %v8189_v30 = vmul.f32 %v7950_v58, %v8152_v26  ;;  %v10922_v35 = vld [vmem:[#allocation10_spill] sm:$0xff]  ;;  %v1295_v59 = vrot.slane %v8059_v51, 2 }
 0x1da   : > { %v8176_v1 = vmul.f32 %v10919_v18, %v10918_v62  ;;  %v10921_v21 = vld [vmem:[#allocation121_spill] sm:$0xff]  ;;  %v1255_v5 = vadd.f32 %v1239_v43, %v1218_v31  ;;  %v10923_v53 = vld [vmem:[#allocation132_spill] sm:$0xff]  ;;  %v2681_v62 = vadd.f32 %v7988_v46, %v2573_v10  ;;  %v2613_v18 = vrot.slane %v7653_v22, 6  ;;  %v10925_v55 = vld [vmem:[#allocation55_spill] sm:$0xff] }
 0x1db   : > { %v8185_v32 = vmul.f32 %v8181_v2, %v10921_v21  ;;  %v1384_v14 = vmul.f32 %v10923_v53, %v10922_v35  ;;  %v2059_v12 = vadd.f32 %v2043_v50, %v2022_v37  ;;  %v10924_v2 = vld [vmem:[#allocation118_spill] sm:$0xff]  ;;  %v680_v43 = vmul.f32 %v10925_v55, %v10848_v63  ;;  %v10926_v26 = vld [vmem:[#allocation89_spill] sm:$0xff]  ;;  %v8216_v37 = vld [vmem:[%s9488_s1 + $0x10] ss:$0 sm:$0xff] }
 0x1dc   : > { %v1363_v21 = vadd.f32 %v1347_v41, %v1255_v5  ;;  %v1421_v11 = vmul.f32 %v10758_v6, %v10924_v2  ;;  %v2718_v31 = vadd.f32 %v7997_v57, %v2681_v62  ;;  %v8204_v46 = vmul.f32 %v7984_v61, %v10926_v26  ;;  %v8209_v10 = vld [vmem:[%s9488_s1 + $0x8] ss:$0 sm:$0xff]  ;;  %v10928_v50 = vld [vmem:[#allocation9_spill] sm:$0xff]  ;;  %10929 = vst [vmem:[#allocation69_spill] sm:$0xff] %v8216_v37  ;;  %v10930_v5 = vld [vmem:[#allocation63_spill] sm:$0xff] }
 0x1dd   : > { %10927 = vst [vmem:[#allocation78_spill] sm:$0xff] %v8209_v10  ;;  %v718_v41 = vmul.f32 %v8209_v10, %v10928_v50  ;;  %v756_v57 = vmul.f32 %v8216_v37, %v10930_v5  ;;  %v2096_v62 = vadd.f32 %v2080_v52, %v2059_v12  ;;  %v10931_v26 = vld [vmem:[#allocation88_spill] sm:$0xff]  ;;  %v10933_v61 = vrot.slane %v7736_v24, 2 }
 0x1de   : > { %v8222_v55 = vmul.f32 %v7993_v49, %v10931_v26  ;;  %v1400_v28 = vadd.f32 %v1384_v14, %v1363_v21  ;;  %v10932_v2 = vld [vmem:[#allocation60_spill] sm:$0xff]  ;;  %v2755_v50 = vadd.f32 %v8026_v36, %v2718_v31  ;;  %v10937_v31 = vld [vmem:[#allocation71_spill] sm:$0xff] }
 0x1df   : > { %v1458_v35 = vmul.f32 %v7395_v38, %v10932_v2  ;;  %v8231_v58 = vsel %vm1302_vm1, %v10933_v61, %v1295_v59  ;;  %v734_v6 = vadd.f32 %v718_v41, %v680_v43  ;;  %v8236_v52 = vld [vmem:[%s9488_s1 + $0x18] ss:$0 sm:$0xff]  ;;  %v2133_v21 = vadd.f32 %v2117_v29, %v2096_v62  ;;  %v8249_v43 = vld [vmem:[%s4718_s12 + $0xb0] sm:$0xff] }
 0x1e0   : > { %10934 = vst [vmem:[#allocation17_spill] sm:$0xff] %v8231_v58  ;;  %10935 = vst [vmem:[#allocation111_spill] sm:$0xff] %v8236_v52  ;;  %v8239_v12 = vld [vmem:[%s4718_s12 + $0xd8] sm:$0xff]  ;;  %v1437_v36 = vadd.f32 %v1421_v11, %v1400_v28  ;;  %v1495_v26 = vmul.f32 %v7648_v4, %v10937_v31  ;;  %v2792_v59 = vadd.f32 %v8035_v45, %v2755_v50  ;;  %v10941_v62 = vrot.slane %v7736_v24, 6  ;;  %v10943_v45 = vld [vmem:[#allocation19_spill] sm:$0xff] }
 0x1e1   : > { %10936 = vst [vmem:[#allocation132_spill] sm:$0xff] %v8239_v12  ;;  %v794_v14 = vmul.f32 %v8239_v12, %v8236_v52  ;;  %v4329_v5 = vld [vmem:[%s4718_s12 + $0x98] sm:$0xff]  ;;  %10938 = vst [vmem:[#allocation55_spill] sm:$0xff] %v8249_v43  ;;  %v719_v41 = vmul.f32 %v8249_v43, %v8209_v10  ;;  %v772_v2 = vadd.f32 %v756_v57, %v734_v6  ;;  %v8256_v12 = vld [vmem:[%s9488_s1 + $0x20] ss:$0 sm:$0xff] }
 0x1e2   : > { %v681_v61 = vmul.f32 %v4329_v5, %v10848_v63  ;;  %10939 = vst [vmem:[#allocation89_spill] sm:$0xff] %v8256_v12  ;;  %v10940_v29 = vld [vmem:[#allocation36_spill] sm:$0xff]  ;;  %v2170_v11 = vadd.f32 %v2154_v27, %v2133_v21  ;;  %v8264_v63 = vsel %vm2622_vm5, %v2613_v18, %v10941_v62  ;;  %v8268_v5 = vmul.f32 %v8022_v60, %v10943_v45  ;;  %v8271_v57 = vld [vmem:[%s4718_s12 + $0x120] sm:$0xff] }
 0x1e3   : > { %v832_v28 = vmul.f32 %v8256_v12, %v10940_v29  ;;  %10942 = vst [vmem:[#allocation9_spill] sm:$0xff] %v8264_v63  ;;  %v1474_v6 = vadd.f32 %v1458_v35, %v1437_v36  ;;  %v2829_v50 = vadd.f32 %v8048_v8, %v2792_v59  ;;  %v10944_v10 = vld [vmem:[#allocation39_spill] sm:$0xff]  ;;  %v810_v27 = vadd.f32 %v794_v14, %v772_v2 }
 0x1e4   : > { %v8276_v43 = vmul.f32 %v8031_v3, %v10944_v10  ;;  %v870_v21 = vmul.f32 %v7165_v42, %v7653_v22  ;;  %v2207_v18 = vadd.f32 %v8139_v54, %v2170_v11  ;;  %v1569_v62 = vmul.f32 %v7688_v34, %v8231_v58  ;;  %v10945_v14 = vld [vmem:[#allocation95_spill] sm:$0xff]  ;;  %v10947_v11 = vld [vmem:[#allocation26_spill] sm:$0xff]  ;;  %v10948_v22 = vld [vmem:[#allocation100_spill] sm:$0xff] }
 0x1e5   : > { %v1511_v29 = vadd.f32 %v1495_v26, %v1474_v6  ;;  %v757_v35 = vmul.f32 %v8216_v37, %v7961_v19  ;;  %v2866_v36 = vadd.f32 %v8088_v23, %v2829_v50  ;;  %v735_v8 = vadd.f32 %v719_v41, %v681_v61  ;;  %v10946_v54 = vld [vmem:[#allocation15_spill] sm:$0xff]  ;;  %v10949_v41 = vld [vmem:[#allocation24_spill] sm:$0xff]  ;;  %v10963_v37 = vld [vmem:[#allocation30_spill] sm:$0xff] }
 0x1e6   : > { %v848_v59 = vadd.f32 %v832_v28, %v810_v27  ;;  %v908_v10 = vmul.f32 %v7441_v15, %v8271_v57  ;;  %v2244_v2 = vadd.f32 %v8143_v17, %v2207_v18  ;;  %v8291_v42 = vmul.f32 %v8044_v47, %v10945_v14  ;;  %v10950_v28 = vld [vmem:[#allocation22_spill] sm:$0xff]  ;;  %v10996_v31 = vld [vmem:[#allocation91_spill] sm:$0xff] }
 0x1e7   : > { %v1548_v26 = vadd.f32 %v10946_v54, %v1511_v29  ;;  %v1677_v6 = vmul.f32 %v7708_v48, %v10947_v11  ;;  %v2903_v45 = vadd.f32 %v8097_v0, %v2866_v36  ;;  %v8299_v23 = vmul.f32 %v8084_v7, %v10948_v22  ;;  %v10951_v18 = vld [vmem:[#allocation38_spill] sm:$0xff]  ;;  %v10953_v22 = vld [vmem:[#allocation41_spill] sm:$0xff] }
 0x1e8   : > { %v886_v61 = vadd.f32 %v870_v21, %v848_v59  ;;  %v1018_v50 = vmul.f32 %v10950_v28, %v10949_v41  ;;  %v2352_v17 = vadd.f32 %v8156_v25, %v2244_v2  ;;  %v1714_v29 = vmul.f32 %v7724_v20, %v10951_v18  ;;  %v10954_v21 = vld [vmem:[#allocation74_spill] sm:$0xff]  ;;  %v10955_v28 = vld [vmem:[#allocation144_spill] sm:$0xff]  ;;  %v10956_v2 = vld [vmem:[#allocation43_spill] sm:$0xff] }
 0x1e9   : > { %v1585_v27 = vadd.f32 %v1569_v62, %v1548_v26  ;;  %v795_v54 = vmul.f32 %v8236_v52, %v7976_v33  ;;  %v8309_v0 = vadd.f32 %v8066_v39, %v2903_v45  ;;  %v773_v36 = vadd.f32 %v757_v35, %v735_v8  ;;  %v10957_v26 = vld [vmem:[#allocation47_spill] sm:$0xff]  ;;  %v10958_v52 = vld [vmem:[#allocation62_spill] sm:$0xff]  ;;  %v10959_v35 = vld [vmem:[#allocation72_spill] sm:$0xff] }
 0x1ea   : > { %v924_v11 = vadd.f32 %v908_v10, %v886_v61  ;;  %v1055_v59 = vmul.f32 %v10954_v21, %v10953_v22  ;;  %v2389_v41 = vadd.f32 %v8160_v40, %v2352_v17  ;;  %v8316_v25 = vmul.f32 %v10955_v28, %v8264_v63  ;;  %v8325_v8 = vld [vmem:[%s4718_s12 + $0x128] sm:$0xff]  ;;  %v10960_v21 = vld [vmem:[#allocation27_spill] sm:$0xff]  ;;  %v10961_v40 = vld [vmem:[#allocation97_spill] sm:$0xff] }
 0x1eb   : > { %10952 = vst [vmem:[#allocation36_spill] sm:$0xff] %v8309_v0  ;;  %v1693_v62 = vadd.f32 %v1677_v6, %v1585_v27  ;;  %v1751_v14 = vmul.f32 %v10957_v26, %v10956_v2  ;;  %2951 = vadd.xlane.f32.xlu1 %v8309_v0  ;;  %v1625_v45 = vrot.slane %v8059_v51, 3  ;;  %v1788_v10 = vmul.f32 %v10959_v35, %v10958_v52  ;;  %v10962_v0 = vld [vmem:[#allocation84_spill] sm:$0xff]  ;;  %v10969_v27 = vld [vmem:[#allocation127_spill] sm:$0xff] }
 0x1ec   : > { %v1034_v61 = vadd.f32 %v1018_v50, %v924_v11  ;;  %v1092_v17 = vmul.f32 %v10961_v40, %v10960_v21  ;;  %v2426_v63 = vadd.f32 %v8164_v9, %v2389_v41  ;;  %v964_v6 = vrot.slane %v8271_v57, 1  ;;  %v10964_v52 = vld [vmem:[#allocation20_spill] sm:$0xff]  ;;  %v10965_v50 = vld [vmem:[#allocation110_spill] sm:$0xff]  ;;  %v10968_v41 = vld [vmem:[#allocation83_spill] sm:$0xff] }
 0x1ed   : > { %v1730_v22 = vadd.f32 %v1714_v29, %v1693_v62  ;;  %v811_v2 = vadd.f32 %v795_v54, %v773_v36  ;;  %v833_v33 = vmul.f32 %v8256_v12, %v10962_v0  ;;  %v1129_v19 = vmul.f32 %v10964_v52, %v10963_v37  ;;  %v10967_v29 = vld [vmem:[#allocation79_spill] sm:$0xff]  ;;  %v10983_v37 = vld [vmem:[#allocation40_spill] sm:$0xff]  ;;  %v10993_v12 = vld [vmem:[#allocation85_spill] sm:$0xff] }
 0x1ee   : > { %v1071_v18 = vadd.f32 %v1055_v59, %v1034_v61  ;;  %v2463_v11 = vadd.f32 %v8172_v16, %v2426_v63  ;;  %v8339_v40 = vmul.f32 %v10965_v50, %v8126_v13  ;;  %v1825_v62 = vmul.f32 %v10968_v41, %v10967_v29  ;;  %v10972_v16 = vld [vmem:[#allocation56_spill] sm:$0xff]  ;;  %v10988_v21 = vld [vmem:[#allocation103_spill] sm:$0xff] }
 0x1ef   : > { %v1767_v9 = vadd.f32 %v1751_v14, %v1730_v22  ;;  %v8345_v54 = vmul.f32 %v10969_v27, %v8126_v13  ;;  %v10970_v0 = vrot.slane %v7736_v24, 3  ;;  %v1166_v63 = vmul.f32 %v10965_v50, %v10972_v16  ;;  %v10977_v50 = vld [vmem:[#allocation101_spill] sm:$0xff]  ;;  %v10982_v16 = vld [vmem:[#allocation98_spill] sm:$0xff] }
 0x1f0   : > { %10966 = vst [vmem:[#allocation15_spill] sm:$0xff] %v8339_v40  ;;  %v1108_v52 = vadd.f32 %v1092_v17, %v1071_v18  ;;  %v2500_v59 = vadd.f32 %v8176_v1, %v2463_v11  ;;  %v1955_v14 = vrot.slane %v8059_v51, 4  ;;  %v10973_v61 = vrot.slane %v8325_v8, 1  ;;  %v10976_v1 = vld [vmem:[#allocation31_spill] sm:$0xff] }
 0x1f1   : > { %v8351_v36 = vsel %vm1632_vm2, %v10970_v0, %v1625_v45  ;;  %v1804_v22 = vadd.f32 %v1788_v10, %v1767_v9  ;;  %v849_v40 = vadd.f32 %v833_v33, %v811_v2  ;;  %v8366_v45 = vld [vmem:[%s9488_s1 + $0x28] ss:$0 sm:$0xff]  ;;  %v1203_v10 = vmul.f32 %v10969_v27, %v10976_v1  ;;  %v10979_v33 = vld [vmem:[#allocation23_spill] sm:$0xff] }
 0x1f2   : > { %10971 = vst [vmem:[#allocation24_spill] sm:$0xff] %v8351_v36  ;;  %v8361_v13 = vsel %vm972_vm0, %v964_v6, %v10973_v61  ;;  %10975 = vst [vmem:[#allocation74_spill] sm:$0xff] %v8366_v45  ;;  %v871_v18 = vmul.f32 %v8366_v45, %v7736_v24  ;;  %v1145_v17 = vadd.f32 %v1129_v19, %v1108_v52  ;;  %v10980_v0 = vld [vmem:[#allocation123_spill] sm:$0xff] }
 0x1f3   : > { %10974 = vst [vmem:[#allocation22_spill] sm:$0xff] %v8361_v13  ;;  %v2537_v11 = vadd.f32 %v8185_v32, %v2500_v59  ;;  %v8375_v9 = vmul.f32 %v10977_v50, %v8231_v58  ;;  %v1841_v6 = vadd.f32 %v1825_v62, %v1804_v22  ;;  %v1899_v2 = vmul.f32 %v10979_v33, %v8351_v36  ;;  %v10984_v27 = vld [vmem:[#allocation51_spill] sm:$0xff]  ;;  %v10985_v59 = vld [vmem:[#allocation104_spill] sm:$0xff] }
 0x1f4   : > { %v8381_v61 = vmul.f32 %v10980_v0, %v8351_v36  ;;  %v2007_v19 = vmul.f32 %v10983_v37, %v10982_v16  ;;  %v1182_v52 = vadd.f32 %v1166_v63, %v1145_v17  ;;  %v1240_v1 = vmul.f32 %v10984_v27, %v8361_v13  ;;  %v10989_v36 = vld [vmem:[#allocation117_spill] sm:$0xff] }
 0x1f5   : > { %10978 = vst [vmem:[#allocation47_spill] sm:$0xff] %v8375_v9  ;;  %v2574_v32 = vadd.f32 %v8189_v30, %v2537_v11  ;;  %v1878_v58 = vadd.f32 %v10985_v59, %v1841_v6  ;;  %v10986_v62 = vrot.slane %v7736_v24, 4  ;;  %v887_v29 = vadd.f32 %v871_v18, %v849_v40  ;;  %v10990_v17 = vld [vmem:[#allocation37_spill] sm:$0xff]  ;;  %v10991_v6 = vld [vmem:[#allocation46_spill] sm:$0xff]  ;;  %v10992_v59 = vld [vmem:[#allocation75_spill] sm:$0xff] }
 0x1f6   : > { %10981 = vst [vmem:[#allocation72_spill] sm:$0xff] %v8381_v61  ;;  %v2044_v61 = vmul.f32 %v10989_v36, %v10988_v21  ;;  %v909_v16 = vmul.f32 %v7441_v15, %v8325_v8  ;;  %v1219_v63 = vadd.f32 %v1203_v10, %v1182_v52  ;;  %v1348_v13 = vmul.f32 %v10915_v56, %v10990_v17  ;;  %v10995_v9 = vld [vmem:[#allocation129_spill] sm:$0xff]  ;;  %v10998_v18 = vld [vmem:[#allocation94_spill] sm:$0xff]  ;;  %v10999_v10 = vld [vmem:[#allocation80_spill] sm:$0xff] }
 0x1f7   : > { %v8393_v22 = vsel %vm1962_vm3, %v10986_v62, %v1955_v14  ;;  %v2682_v30 = vadd.f32 %v8204_v46, %v2574_v32  ;;  %v1915_v11 = vadd.f32 %v1899_v2, %v1878_v58  ;;  %v2081_v45 = vmul.f32 %v10992_v59, %v10991_v6  ;;  %v10994_v14 = vld [vmem:[#allocation16_spill] sm:$0xff]  ;;  %v10997_v40 = vld [vmem:[#allocation45_spill] sm:$0xff]  ;;  %v11000_v58 = vld [vmem:[#allocation34_spill] sm:$0xff] }
 0x1f8   : > { %10987 = vst [vmem:[#allocation97_spill] sm:$0xff] %v8393_v22  ;;  %v2118_v62 = vmul.f32 %v10994_v14, %v10993_v12  ;;  %v2155_v21 = vmul.f32 %v10996_v31, %v10995_v9  ;;  %v2192_v36 = vmul.f32 %v10998_v18, %v10997_v40  ;;  %v1256_v15 = vadd.f32 %v1240_v1, %v1219_v63  ;;  %v8419_v9 = vld [vmem:[%s9488_s1 + $0x1] ss:$0 sm:$0xff]  ;;  %v11002_v12 = vld [vmem:[#allocation67_spill] sm:$0xff]  ;;  %v11003_v40 = vld [vmem:[#allocation18_spill] sm:$0xff] }
 0x1f9   : > { %v1385_v52 = vmul.f32 %v10923_v53, %v10999_v10  ;;  %v2719_v56 = vadd.f32 %v8222_v55, %v2682_v30  ;;  %v2023_v46 = vadd.f32 %v2007_v19, %v1915_v11  ;;  %v2229_v2 = vmul.f32 %v11000_v58, %v8393_v22  ;;  %11001 = vst [vmem:[#allocation84_spill] sm:$0xff] %v8419_v9  ;;  %v11004_v53 = vld [vmem:[#allocation133_spill] sm:$0xff]  ;;  %v11005_v11 = vld [vmem:[#allocation96_spill] sm:$0xff] }
 0x1fa   : > { %v2285_v32 = vrot.slane %v8059_v51, 5  ;;  %v925_v17 = vadd.f32 %v909_v16, %v887_v29  ;;  %v1019_v1 = vmul.f32 %v8419_v9, %v11002_v12  ;;  %v1364_v63 = vadd.f32 %v1348_v13, %v1256_v15  ;;  %v11010_v29 = vld [vmem:[#allocation122_spill] sm:$0xff] }
 0x1fb   : > { %v1422_v10 = vmul.f32 %v11004_v53, %v11003_v40  ;;  %v2756_v55 = vadd.f32 %v8268_v5, %v2719_v56  ;;  %v2060_v19 = vadd.f32 %v2044_v61, %v2023_v46  ;;  %v1296_v30 = vrot.slane %v8271_v57, 2  ;;  %v11006_v53 = vld [vmem:[#allocation114_spill] sm:$0xff]  ;;  %v11007_v40 = vld [vmem:[#allocation107_spill] sm:$0xff] }
 0x1fc   : > { %v1401_v16 = vadd.f32 %v1385_v52, %v1364_v63  ;;  %v1459_v22 = vmul.f32 %v7395_v38, %v11005_v11  ;;  %v2616_v6 = vrot.slane %v8271_v57, 6  ;;  %v10009_v12 = vrot.slane %v8325_v8, 6  ;;  %v11008_v56 = vld [vmem:[#allocation115_spill] sm:$0xff]  ;;  %v11009_v61 = vld [vmem:[#allocation134_spill] sm:$0xff] }
 0x1fd   : > { %v2793_v13 = vadd.f32 %v8276_v43, %v2756_v55  ;;  %v2097_v15 = vadd.f32 %v2081_v45, %v2060_v19  ;;  %v2337_v5 = vmul.f32 %v11007_v40, %v11006_v53  ;;  %v2374_v46 = vmul.f32 %v11009_v61, %v11008_v56  ;;  %v8446_v63 = vld [vmem:[%s4718_s12 + $0x130] sm:$0xff]  ;;  %v11012_v55 = vld [vmem:[#allocation68_spill] sm:$0xff]  ;;  %v11013_v19 = vld [vmem:[#allocation54_spill] sm:$0xff] }
 0x1fe   : > { %v1035_v9 = vadd.f32 %v1019_v1, %v925_v17  ;;  %v1438_v58 = vadd.f32 %v1422_v10, %v1401_v16  ;;  %v1496_v52 = vmul.f32 %v7648_v4, %v11010_v29  ;;  %v8443_v38 = vsel %vm2622_vm5, %v2616_v6, %v10009_v12  ;;  %v11016_v4 = vld [vmem:[#allocation126_spill] sm:$0xff]  ;;  %v11017_v1 = vld [vmem:[#allocation135_spill] sm:$0xff]  ;;  %v11018_v6 = vld [vmem:[#allocation57_spill] sm:$0xff] }
 0x1ff   : > { %11011 = vst [vmem:[#allocation20_spill] sm:$0xff] %v8443_v38  ;;  %v2830_v43 = vadd.f32 %v8291_v42, %v2793_v13  ;;  %v2134_v45 = vadd.f32 %v2118_v62, %v2097_v15  ;;  %v2411_v53 = vmul.f32 %v11013_v19, %v11012_v55  ;;  %v11014_v17 = vrot.slane %v8325_v8, 2  ;;  %v8464_v42 = vld [vmem:[%s9488_s1 + $0x9] ss:$0 sm:$0xff]  ;;  %v11019_v62 = vld [vmem:[#allocation35_spill] sm:$0xff] }
 0x200   : > { %v2448_v16 = vmul.f32 %v11017_v1, %v11016_v4  ;;  %v1475_v29 = vadd.f32 %v1459_v22, %v1438_v58  ;;  %v1533_v12 = vmul.f32 %v10977_v50, %v11018_v6  ;;  %v1056_v13 = vmul.f32 %v8464_v42, %v11019_v62  ;;  %v8473_v22 = vld [vmem:[%s9488_s1 + $0x11] ss:$0 sm:$0xff]  ;;  %v11021_v58 = vld [vmem:[#allocation70_spill] sm:$0xff] }
 0x201   : > { %v8455_v10 = vsel %vm1302_vm1, %v1296_v30, %v11014_v17  ;;  %v2867_v15 = vadd.f32 %v8299_v23, %v2830_v43  ;;  %v2171_v55 = vadd.f32 %v2155_v21, %v2134_v45  ;;  %v966_v30 = vrot.slane %v8446_v63, 1  ;;  %11020 = vst [vmem:[#allocation83_spill] sm:$0xff] %v8473_v22  ;;  %v8482_v23 = vld [vmem:[%s9488_s1 + $0x19] ss:$0 sm:$0xff]  ;;  %v11022_v21 = vld [vmem:[#allocation59_spill] sm:$0xff]  ;;  %v11028_v56 = vld [vmem:[#allocation138_spill] sm:$0xff] }
 0x202   : > { %11015 = vst [vmem:[#allocation110_spill] sm:$0xff] %v8455_v10  ;;  %v1093_v50 = vmul.f32 %v8473_v22, %v11021_v58  ;;  %v1512_v17 = vadd.f32 %v1496_v52, %v1475_v29  ;;  %v1570_v4 = vmul.f32 %v7688_v34, %v8455_v10  ;;  %v1072_v6 = vadd.f32 %v1056_v13, %v1035_v9  ;;  %v11025_v52 = vld [vmem:[#allocation32_spill] sm:$0xff]  ;;  %v11026_v10 = vld [vmem:[#allocation137_spill] sm:$0xff] }
 0x203   : > { %v1130_v43 = vmul.f32 %v8482_v23, %v11022_v21  ;;  %v2904_v45 = vadd.f32 %v8316_v25, %v2867_v15  ;;  %v2208_v38 = vadd.f32 %v2192_v36, %v2171_v55  ;;  %v11023_v11 = vrot.slane %v7736_v24, 5  ;;  %v11027_v13 = vld [vmem:[#allocation113_spill] sm:$0xff] }
 0x204   : > { %v2485_v9 = vmul.f32 %v11026_v10, %v11025_v52  ;;  %v2522_v58 = vmul.f32 %v11028_v56, %v11027_v13  ;;  %v1549_v62 = vadd.f32 %v1533_v12, %v1512_v17  ;;  %v11029_v22 = vld [vmem:[#allocation53_spill] sm:$0xff]  ;;  %v1109_v21 = vadd.f32 %v1093_v50, %v1072_v6  ;;  %v11034_v17 = vld [vmem:[#allocation90_spill] sm:$0xff] }
 0x205   : > { %v8491_v29 = vsel %vm2292_vm4, %v11023_v11, %v2285_v32  ;;  %v1678_v1 = vmul.f32 %v7708_v48, %v11029_v22  ;;  %v8500_v25 = vadd.f32 %v8066_v39, %v2904_v45  ;;  %v2245_v36 = vadd.f32 %v2229_v2, %v2208_v38  ;;  %v11033_v15 = vld [vmem:[#allocation61_spill] sm:$0xff]  ;;  %v11035_v2 = vld [vmem:[#allocation86_spill] sm:$0xff]  ;;  %v11036_v38 = vld [vmem:[#allocation128_spill] sm:$0xff] }
 0x206   : > { %11024 = vst [vmem:[#allocation127_spill] sm:$0xff] %v8491_v29  ;;  %v2615_v55 = vrot.slane %v8059_v51, 6  ;;  %v11031_v32 = vrot.slane %v8325_v8, 1  ;;  %v2559_v13 = vmul.f32 %v11033_v15, %v8491_v29  ;;  %v1586_v12 = vadd.f32 %v1570_v4, %v1549_v62  ;;  %v11038_v29 = vld [vmem:[#allocation119_spill] sm:$0xff]  ;;  %v11042_v52 = vld [vmem:[#allocation93_spill] sm:$0xff] }
 0x207   : > { %11030 = vst [vmem:[#allocation101_spill] sm:$0xff] %v8500_v25  ;;  %v1715_v22 = vmul.f32 %v7724_v20, %v11034_v17  ;;  %v1146_v6 = vadd.f32 %v1130_v43, %v1109_v21  ;;  %2953 = vadd.xlane.f32.xlu0 %v8500_v25  ;;  %v2353_v50 = vadd.f32 %v2337_v5, %v2245_v36  ;;  %v1626_v45 = vrot.slane %v8271_v57, 3  ;;  %v11041_v36 = vld [vmem:[#allocation33_spill] sm:$0xff]  ;;  %v11043_v25 = vld [vmem:[#allocation76_spill] sm:$0xff]  ;;  %v11052_v17 = vld [vmem:[#allocation142_spill] sm:$0xff] }
 0x208   : > { %v8507_v11 = vsel %vm972_vm0, %v11031_v32, %v966_v30  ;;  %v2667_v51 = vmul.f32 %v11036_v38, %v11035_v2  ;;  %v1694_v30 = vadd.f32 %v1678_v1, %v1586_v12  ;;  %v11037_v32 = vld [vmem:[#allocation42_spill] sm:$0xff]  ;;  %v11039_v21 = vrot.slane %v7736_v24, 6 }
 0x209   : > { %11032 = vst [vmem:[#allocation23_spill] sm:$0xff] %v8507_v11  ;;  %v1752_v56 = vmul.f32 %v10957_v26, %v11037_v32  ;;  %v1183_v4 = vadd.f32 %v11038_v29, %v1146_v6  ;;  %v1241_v62 = vmul.f32 %v10984_v27, %v8507_v11  ;;  %v2390_v43 = vadd.f32 %v2374_v46, %v2353_v50  ;;  %v8541_v46 = vld [vmem:[%s9488_s1 + $0x2] ss:$0 sm:$0xff] }
 0x20a   : > { %v8527_v5 = vsel %vm2622_vm5, %v11039_v21, %v2615_v55  ;;  %v2704_v2 = vmul.f32 %v7993_v49, %v11041_v36  ;;  %v8533_v1 = vmul.f32 %v8022_v60, %v11042_v52  ;;  %v1731_v12 = vadd.f32 %v1715_v22, %v1694_v30  ;;  %v11044_v55 = vld [vmem:[#allocation10_spill] sm:$0xff]  ;;  %v11045_v21 = vld [vmem:[#allocation21_spill] sm:$0xff]  ;;  %v11046_v52 = vld [vmem:[#allocation108_spill] sm:$0xff] }
 0x20b   : > { %11040 = vst [vmem:[#allocation123_spill] sm:$0xff] %v8527_v5  ;;  %v1789_v29 = vmul.f32 %v10959_v35, %v11043_v25  ;;  %v1220_v27 = vadd.f32 %v8345_v54, %v1183_v4  ;;  %v1349_v6 = vmul.f32 %v8541_v46, %v11044_v55  ;;  %v2427_v50 = vadd.f32 %v2411_v53, %v2390_v43  ;;  %v11049_v25 = vld [vmem:[#allocation82_spill] sm:$0xff] }
 0x20c   : > { %v8547_v36 = vmul.f32 %v8031_v3, %v11045_v21  ;;  %v8551_v22 = vmul.f32 %v8044_v47, %v11046_v52  ;;  %v11047_v30 = vrot.slane %v8325_v8, 3  ;;  %v1768_v4 = vadd.f32 %v1752_v56, %v1731_v12  ;;  %v8564_v53 = vld [vmem:[%s9488_s1 + $0xa] ss:$0 sm:$0xff] }
 0x20d   : > { %v1826_v32 = vmul.f32 %v10968_v41, %v11049_v25  ;;  %v1257_v55 = vadd.f32 %v1241_v62, %v1220_v27  ;;  %11050 = vst [vmem:[#allocation40_spill] sm:$0xff] %v8564_v53  ;;  %v11051_v43 = vld [vmem:[#allocation118_spill] sm:$0xff]  ;;  %v2464_v21 = vadd.f32 %v2448_v16, %v2427_v50  ;;  %v1863_v11 = vmul.f32 %v10980_v0, %v11052_v17  ;;  %v8576_v27 = vld [vmem:[%s9488_s1 + $0x12] ss:$0 sm:$0xff]  ;;  %v11054_v25 = vld [vmem:[#allocation60_spill] sm:$0xff] }
 0x20e   : > { %v8557_v54 = vsel %vm1632_vm2, %v1626_v45, %v11047_v30  ;;  %v1386_v52 = vmul.f32 %v8564_v53, %v11051_v43  ;;  %v1956_v45 = vrot.slane %v8271_v57, 4  ;;  %v1805_v12 = vadd.f32 %v1789_v29, %v1768_v4  ;;  %11053 = vst [vmem:[#allocation51_spill] sm:$0xff] %v8576_v27  ;;  %v11055_v50 = vld [vmem:[#allocation11_spill] sm:$0xff]  ;;  %v11056_v4 = vld [vmem:[#allocation64_spill] sm:$0xff]  ;;  %v11080_v47 = vld [vmem:[#allocation38_spill] sm:$0xff] }
 0x20f   : > { %11048 = vst [vmem:[#allocation98_spill] sm:$0xff] %v8557_v54  ;;  %v1298_v30 = vrot.slane %v8446_v63, 2  ;;  %v1365_v62 = vadd.f32 %v1349_v6, %v1257_v55  ;;  %v1423_v43 = vmul.f32 %v8576_v27, %v11054_v25  ;;  %v2501_v16 = vadd.f32 %v2485_v9, %v2464_v21  ;;  %v8595_v9 = vld [vmem:[%s9488_s1 + $0x1a] ss:$0 sm:$0xff]  ;;  %v11058_v21 = vld [vmem:[#allocation71_spill] sm:$0xff] }
 0x210   : > { %v8582_v0 = vmul.f32 %v8084_v7, %v11055_v50  ;;  %v8586_v56 = vmul.f32 %v10955_v28, %v8527_v5  ;;  %v1900_v29 = vmul.f32 %v10979_v33, %v8557_v54  ;;  %v1842_v6 = vadd.f32 %v1826_v32, %v1805_v12  ;;  %11057 = vst [vmem:[#allocation104_spill] sm:$0xff] %v8595_v9  ;;  %v11061_v32 = vld [vmem:[#allocation92_spill] sm:$0xff]  ;;  %v11062_v12 = vld [vmem:[#allocation117_spill] sm:$0xff] }
 0x211   : > { %v2008_v55 = vmul.f32 %v10983_v37, %v11056_v4  ;;  %v1402_v17 = vadd.f32 %v1386_v52, %v1365_v62  ;;  %v1460_v50 = vmul.f32 %v8595_v9, %v11058_v21  ;;  %v2538_v25 = vadd.f32 %v2522_v58, %v2501_v16  ;;  %v11063_v4 = vld [vmem:[#allocation58_spill] sm:$0xff]  ;;  %v11067_v9 = vld [vmem:[#allocation13_spill] sm:$0xff] }
 0x212   : > { %v11059_v5 = vrot.slane %v8325_v8, 4  ;;  %v2045_v54 = vmul.f32 %v11062_v12, %v11061_v32  ;;  %v2082_v52 = vmul.f32 %v10992_v59, %v11063_v4  ;;  %v1879_v62 = vadd.f32 %v1863_v11, %v1842_v6  ;;  %v11068_v32 = vld [vmem:[#allocation65_spill] sm:$0xff]  ;;  %v11069_v4 = vld [vmem:[#allocation34_spill] sm:$0xff] }
 0x213   : > { %v11064_v27 = vrot.slane %v8325_v8, 2  ;;  %v1439_v58 = vadd.f32 %v1423_v43, %v1402_v17  ;;  %v2618_v16 = vrot.slane %v8446_v63, 6  ;;  %v2575_v21 = vadd.f32 %v2559_v13, %v2538_v25 }
 0x214   : > { %v8603_v28 = vsel %vm1962_vm3, %v1956_v45, %v11059_v5  ;;  %v11066_v5 = vld [vmem:[#allocation81_spill] sm:$0xff]  ;;  %v2156_v12 = vmul.f32 %v10996_v31, %v11067_v9  ;;  %v2193_v11 = vmul.f32 %v10998_v18, %v11068_v32  ;;  %v1916_v6 = vadd.f32 %v1900_v29, %v1879_v62  ;;  %v11072_v29 = vld [vmem:[#allocation120_spill] sm:$0xff]  ;;  %v11082_v18 = vld [vmem:[#allocation111_spill] sm:$0xff] }
 0x215   : > { %11060 = vst [vmem:[#allocation37_spill] sm:$0xff] %v8603_v28  ;;  %v8613_v7 = vsel %vm1302_vm1, %v11064_v27, %v1298_v30  ;;  %v2119_v45 = vmul.f32 %v10994_v14, %v11066_v5  ;;  %v2230_v53 = vmul.f32 %v11069_v4, %v8603_v28  ;;  %v1476_v30 = vadd.f32 %v1460_v50, %v1439_v58  ;;  %v4341_v50 = vld [vmem:[%s9488_s1] ss:$0 sm:$0xff]  ;;  %v4342_v58 = vld [vmem:[%s4718_s12 + $0xa8] sm:$0xff] }
 0x216   : > { %11065 = vst [vmem:[#allocation75_spill] sm:$0xff] %v8613_v7  ;;  %v11070_v17 = vrot.slane %v8325_v8, 6  ;;  %v2683_v13 = vadd.f32 %v2667_v51, %v2575_v21  ;;  %v2286_v25 = vrot.slane %v8271_v57, 5  ;;  %v1571_v9 = vmul.f32 %v7688_v34, %v8613_v7  ;;  %v11074_v21 = vld [vmem:[#allocation63_spill] sm:$0xff]  ;;  %v11075_v5 = vld [vmem:[#allocation78_spill] sm:$0xff] }
 0x217   : > { %v2024_v32 = vadd.f32 %v2008_v55, %v1916_v6  ;;  %v1513_v62 = vadd.f32 %v11072_v29, %v1476_v30  ;;  %v682_v28 = vmul.f32 %v4342_v58, %v4341_v50  ;;  %v720_v27 = vmul.f32 %v11075_v5, %v11074_v21  ;;  %v11077_v55 = vld [vmem:[#allocation69_spill] sm:$0xff]  ;;  %v11078_v6 = vld [vmem:[#allocation132_spill] sm:$0xff]  ;;  %v11079_v7 = vld [vmem:[#allocation47_spill] sm:$0xff] }
 0x218   : > { %v8628_v43 = vsel %vm2622_vm5, %v11070_v17, %v2618_v16  ;;  %v11073_v16 = vld [vmem:[#allocation55_spill] sm:$0xff]  ;;  %v2720_v51 = vadd.f32 %v2704_v2, %v2683_v13  ;;  %v758_v30 = vmul.f32 %v11078_v6, %v11077_v55  ;;  %v1679_v3 = vmul.f32 %v7708_v48, %v11080_v47  ;;  %v11081_v58 = vld [vmem:[#allocation125_spill] sm:$0xff] }
 0x219   : > { %11071 = vst [vmem:[#allocation16_spill] sm:$0xff] %v8628_v43  ;;  %v683_v17 = vmul.f32 %v4341_v50, %v11073_v16  ;;  %v11076_v43 = vld [vmem:[#allocation124_spill] sm:$0xff]  ;;  %v2061_v29 = vadd.f32 %v2045_v54, %v2024_v32  ;;  %v1550_v4 = vadd.f32 %v11079_v7, %v1513_v62  ;;  %v759_v50 = vmul.f32 %v11077_v55, %v11081_v58  ;;  %v4343_v21 = vld [vmem:[%s4718_s12 + $0xf0] sm:$0xff]  ;;  %v11084_v58 = vld [vmem:[#allocation130_spill] sm:$0xff] }
 0x21a   : > { %v721_v34 = vmul.f32 %v11075_v5, %v11076_v43  ;;  %v2757_v2 = vadd.f32 %v8533_v1, %v2720_v51  ;;  %v736_v13 = vadd.f32 %v720_v27, %v682_v28  ;;  %v796_v5 = vmul.f32 %v4343_v21, %v11082_v18  ;;  %v11083_v6 = vld [vmem:[#allocation43_spill] sm:$0xff]  ;;  %v4344_v7 = vld [vmem:[%s4718_s12 + $0xf8] sm:$0xff]  ;;  %v11085_v1 = vld [vmem:[#allocation89_spill] sm:$0xff] }
 0x21b   : > { %v2098_v43 = vadd.f32 %v2082_v52, %v2061_v29  ;;  %v1587_v60 = vadd.f32 %v1571_v9, %v1550_v4  ;;  %v1716_v54 = vmul.f32 %v7724_v20, %v11083_v6  ;;  %v797_v32 = vmul.f32 %v4344_v7, %v11082_v18  ;;  %v11087_v52 = vld [vmem:[#allocation62_spill] sm:$0xff]  ;;  %v11125_v47 = vld [vmem:[#allocation97_spill] sm:$0xff] }
 0x21c   : > { %v737_v16 = vadd.f32 %v721_v34, %v683_v17  ;;  %v2794_v48 = vadd.f32 %v8547_v36, %v2757_v2  ;;  %v774_v62 = vadd.f32 %v758_v30, %v736_v13  ;;  %v834_v28 = vmul.f32 %v11085_v1, %v11084_v58  ;;  %v11086_v17 = vld [vmem:[#allocation77_spill] sm:$0xff]  ;;  %v8666_v4 = vld [vmem:[%s4718_s12 + $0x138] sm:$0xff] }
 0x21d   : > { %v2135_v27 = vadd.f32 %v2119_v45, %v2098_v43  ;;  %v2338_v51 = vmul.f32 %v11007_v40, %v11086_v17  ;;  %v1695_v34 = vadd.f32 %v1679_v3, %v1587_v60  ;;  %v1753_v9 = vmul.f32 %v10957_v26, %v11087_v52  ;;  %v11088_v30 = vld [vmem:[#allocation74_spill] sm:$0xff]  ;;  %v11089_v45 = vld [vmem:[#allocation79_spill] sm:$0xff] }
 0x21e   : > { %v775_v55 = vadd.f32 %v759_v50, %v737_v16  ;;  %v2831_v20 = vadd.f32 %v8551_v22, %v2794_v48  ;;  %v1628_v18 = vrot.slane %v8446_v63, 3  ;;  %v812_v36 = vadd.f32 %v796_v5, %v774_v62  ;;  %v4345_v22 = vld [vmem:[%s9488_s1 + $0x30] ss:$0 sm:$0xff]  ;;  %v11093_v48 = vld [vmem:[#allocation41_spill] sm:$0xff]  ;;  %v11094_v62 = vld [vmem:[#allocation84_spill] sm:$0xff] }
 0x21f   : > { %v872_v29 = vmul.f32 %v11088_v30, %v8271_v57  ;;  %v2172_v50 = vadd.f32 %v2156_v12, %v2135_v27  ;;  %v1732_v2 = vadd.f32 %v1716_v54, %v1695_v34  ;;  %v1790_v13 = vmul.f32 %v10959_v35, %v11089_v45  ;;  %v11090_v57 = vld [vmem:[#allocation14_spill] sm:$0xff]  ;;  %v11091_v54 = vld [vmem:[#allocation131_spill] sm:$0xff] }
 0x220   : > { %v835_v60 = vmul.f32 %v11085_v1, %v7736_v24  ;;  %v2868_v3 = vadd.f32 %v8582_v0, %v2831_v20  ;;  %v813_v26 = vadd.f32 %v797_v32, %v775_v55  ;;  %v850_v16 = vadd.f32 %v834_v28, %v812_v36  ;;  %v11098_v34 = vld [vmem:[#allocation27_spill] sm:$0xff] }
 0x221   : > { %v910_v21 = vmul.f32 %v4345_v22, %v8666_v4  ;;  %v2209_v5 = vadd.f32 %v2193_v11, %v2172_v50  ;;  %v2375_v12 = vmul.f32 %v11009_v61, %v11090_v57  ;;  %v1769_v43 = vadd.f32 %v1753_v9, %v1732_v2  ;;  %v11101_v50 = vld [vmem:[#allocation135_spill] sm:$0xff] }
 0x222   : > { %v1827_v35 = vmul.f32 %v10968_v41, %v11091_v54  ;;  %v2905_v24 = vadd.f32 %v8586_v56, %v2868_v3  ;;  %v11092_v0 = vrot.slane %v8325_v8, 3  ;;  %v888_v32 = vadd.f32 %v872_v29, %v850_v16  ;;  %v8712_v29 = vld [vmem:[%s4718_s12 + $0x140] sm:$0xff] }
 0x223   : > { %v1020_v11 = vmul.f32 %v11094_v62, %v11093_v48  ;;  %v2246_v55 = vadd.f32 %v2230_v53, %v2209_v5  ;;  %v11095_v58 = vrot.slane %v8325_v8, 5  ;;  %v1806_v41 = vadd.f32 %v1790_v13, %v1769_v43  ;;  %v11099_v53 = vld [vmem:[#allocation109_spill] sm:$0xff]  ;;  %v11102_v13 = vld [vmem:[#allocation103_spill] sm:$0xff]  ;;  %v11105_v5 = vld [vmem:[#allocation72_spill] sm:$0xff] }
 0x224   : > { %v8690_v7 = vsel %vm1632_vm2, %v11092_v0, %v1628_v18  ;;  %v873_v56 = vmul.f32 %v11088_v30, %v8325_v8  ;;  %v8703_v28 = vadd.f32 %v8066_v39, %v2905_v24  ;;  %v851_v27 = vadd.f32 %v835_v60, %v813_v26  ;;  %v11100_v30 = vld [vmem:[#allocation49_spill] sm:$0xff]  ;;  %v11103_v26 = vld [vmem:[#allocation30_spill] sm:$0xff]  ;;  %v11106_v48 = vld [vmem:[#allocation56_spill] sm:$0xff] }
 0x225   : > { %v8698_v1 = vsel %vm2292_vm4, %v2286_v25, %v11095_v58  ;;  %v926_v17 = vadd.f32 %v910_v21, %v888_v32  ;;  %v1057_v9 = vmul.f32 %v8464_v42, %v11098_v34  ;;  %v2354_v20 = vadd.f32 %v2338_v51, %v2246_v55  ;;  %v11104_v51 = vld [vmem:[#allocation83_spill] sm:$0xff] }
 0x226   : > { %11096 = vst [vmem:[#allocation91_spill] sm:$0xff] %v8698_v1  ;;  %11097 = vst [vmem:[#allocation67_spill] sm:$0xff] %v8703_v28  ;;  %v2412_v18 = vmul.f32 %v11013_v19, %v11099_v53  ;;  %v1843_v36 = vadd.f32 %v1827_v35, %v1806_v41  ;;  %v1901_v25 = vmul.f32 %v10979_v33, %v8690_v7  ;;  %2955 = vadd.xlane.f32.xlu1 %v8703_v28 }
 0x227   : > { %v2449_v2 = vmul.f32 %v11101_v50, %v11100_v30  ;;  %v2009_v60 = vmul.f32 %v10983_v37, %v11102_v13  ;;  %v1036_v3 = vadd.f32 %v1020_v11, %v926_v17  ;;  %v1094_v16 = vmul.f32 %v11104_v51, %v11103_v26  ;;  %v11107_v37 = vld [vmem:[#allocation121_spill] sm:$0xff]  ;;  %v11108_v17 = vld [vmem:[#allocation46_spill] sm:$0xff] }
 0x228   : > { %v2391_v21 = vadd.f32 %v2375_v12, %v2354_v20  ;;  %v1880_v43 = vadd.f32 %v11105_v5, %v1843_v36  ;;  %v967_v35 = vrot.slane %v8666_v4, 1  ;;  %v10039_v33 = vrot.slane %v8712_v29, 1  ;;  %v8732_v12 = vld [vmem:[%s9488_s1 + $0xc] ss:$0 sm:$0xff]  ;;  %v11112_v13 = vld [vmem:[#allocation85_spill] sm:$0xff] }
 0x229   : > { %v889_v24 = vadd.f32 %v873_v56, %v851_v27  ;;  %v911_v0 = vmul.f32 %v4345_v22, %v8712_v29  ;;  %v1073_v32 = vadd.f32 %v1057_v9, %v1036_v3  ;;  %v1131_v55 = vmul.f32 %v8482_v23, %v11106_v48  ;;  %v11109_v56 = vld [vmem:[#allocation136_spill] sm:$0xff]  ;;  %v11110_v27 = vld [vmem:[#allocation138_spill] sm:$0xff]  ;;  %v4347_v23 = vld [vmem:[%s9488_s1 + $0x21] ss:$0 sm:$0xff] }
 0x22a   : > { %v2428_v58 = vadd.f32 %v2412_v18, %v2391_v21  ;;  %v2486_v11 = vmul.f32 %v11026_v10, %v11107_v37  ;;  %v1917_v41 = vadd.f32 %v1901_v25, %v1880_v43  ;;  %v2046_v34 = vmul.f32 %v8732_v12, %v11108_v17  ;;  %v11111_v10 = vld [vmem:[#allocation31_spill] sm:$0xff]  ;;  %v4348_v43 = vld [vmem:[%s9488_s1 + $0x29] ss:$0 sm:$0xff] }
 0x22b   : > { %v2523_v22 = vmul.f32 %v11110_v27, %v11109_v56  ;;  %v1958_v9 = vrot.slane %v8446_v63, 4  ;;  %v1110_v20 = vadd.f32 %v1094_v16, %v1073_v32  ;;  %v1168_v18 = vmul.f32 %v4347_v23, %v11111_v10  ;;  %v11113_v21 = vld [vmem:[#allocation35_spill] sm:$0xff]  ;;  %v11114_v32 = vld [vmem:[#allocation22_spill] sm:$0xff]  ;;  %v11120_v10 = vld [vmem:[#allocation45_spill] sm:$0xff] }
 0x22c   : > { %v2465_v36 = vadd.f32 %v2449_v2, %v2428_v58  ;;  %v2025_v25 = vadd.f32 %v2009_v60, %v1917_v41  ;;  %v2083_v3 = vmul.f32 %v10992_v59, %v11112_v13  ;;  %v974_v26 = vsel %vm972_vm0, %v967_v35, %v10039_v33  ;;  %v11115_v58 = vld [vmem:[#allocation129_spill] sm:$0xff]  ;;  %v11116_v35 = vld [vmem:[#allocation88_spill] sm:$0xff]  ;;  %v11138_v56 = vld [vmem:[#allocation51_spill] sm:$0xff] }
 0x22d   : > { %v927_v51 = vadd.f32 %v911_v0, %v889_v24  ;;  %v1021_v16 = vmul.f32 %v11094_v62, %v11113_v21  ;;  %v1147_v5 = vadd.f32 %v1131_v55, %v1110_v20  ;;  %v1205_v2 = vmul.f32 %v4348_v43, %v11114_v32  ;;  %v11117_v0 = vld [vmem:[#allocation19_spill] sm:$0xff] }
 0x22e   : > { %v2502_v60 = vadd.f32 %v2486_v11, %v2465_v36  ;;  %v2560_v59 = vmul.f32 %v11033_v15, %v8698_v1  ;;  %v2062_v48 = vadd.f32 %v2046_v34, %v2025_v25  ;;  %v2120_v41 = vmul.f32 %v10994_v14, %v11115_v58  ;;  %v8766_v20 = vld [vmem:[%s9488_s1 + $0x31] ss:$0 sm:$0xff] }
 0x22f   : > { %v2668_v24 = vmul.f32 %v11036_v38, %v11116_v35  ;;  %v2705_v62 = vmul.f32 %v7993_v49, %v11117_v0  ;;  %v1184_v55 = vadd.f32 %v1168_v18, %v1147_v5  ;;  %v1242_v11 = vmul.f32 %v8766_v20, %v974_v26  ;;  %v11121_v18 = vld [vmem:[#allocation70_spill] sm:$0xff]  ;;  %v11122_v5 = vld [vmem:[#allocation80_spill] sm:$0xff] }
 0x230   : > { %v2539_v23 = vadd.f32 %v2523_v22, %v2502_v60  ;;  %v11118_v15 = vrot.slane %v8325_v8, 4  ;;  %v2099_v34 = vadd.f32 %v2083_v3, %v2062_v48  ;;  %v2157_v36 = vmul.f32 %v10996_v31, %v11120_v10  ;;  %v11123_v22 = vld [vmem:[#allocation39_spill] sm:$0xff]  ;;  %v11128_v48 = vld [vmem:[#allocation140_spill] sm:$0xff] }
 0x231   : > { %v1037_v49 = vadd.f32 %v1021_v16, %v927_v51  ;;  %v1058_v25 = vmul.f32 %v8464_v42, %v11121_v18  ;;  %v1221_v21 = vadd.f32 %v1205_v2, %v1184_v55  ;;  %v1350_v32 = vmul.f32 %v8541_v46, %v11122_v5  ;;  %v11124_v60 = vld [vmem:[#allocation139_spill] sm:$0xff]  ;;  %v11129_v31 = vld [vmem:[#allocation100_spill] sm:$0xff]  ;;  %v11130_v51 = vld [vmem:[#allocation141_spill] sm:$0xff] }
 0x232   : > { %v8773_v14 = vsel %vm1962_vm3, %v11118_v15, %v1958_v9  ;;  %v2576_v26 = vadd.f32 %v2560_v59, %v2539_v23  ;;  %v2742_v35 = vmul.f32 %v11124_v60, %v11123_v22  ;;  %v2136_v33 = vadd.f32 %v2120_v41, %v2099_v34  ;;  %v11126_v9 = vld [vmem:[#allocation94_spill] sm:$0xff]  ;;  %v11127_v3 = vld [vmem:[#allocation95_spill] sm:$0xff]  ;;  %v11132_v2 = vld [vmem:[#allocation40_spill] sm:$0xff] }
 0x233   : > { %11119 = vst [vmem:[#allocation133_spill] sm:$0xff] %v8773_v14  ;;  %v2194_v15 = vmul.f32 %v11126_v9, %v11125_v47  ;;  %v2779_v28 = vmul.f32 %v11128_v48, %v11127_v3  ;;  %v2816_v16 = vmul.f32 %v11130_v51, %v11129_v31  ;;  %v1258_v0 = vadd.f32 %v1242_v11, %v1221_v21  ;;  %v11131_v42 = vld [vmem:[#allocation18_spill] sm:$0xff]  ;;  %v11133_v5 = vld [vmem:[#allocation9_spill] sm:$0xff]  ;;  %v11136_v22 = vld [vmem:[#allocation115_spill] sm:$0xff] }
 0x234   : > { %v1387_v55 = vmul.f32 %v11132_v2, %v11131_v42  ;;  %v2684_v18 = vadd.f32 %v2668_v24, %v2576_v26  ;;  %v11134_v59 = vld [vmem:[#allocation29_spill] sm:$0xff]  ;;  %v2173_v1 = vadd.f32 %v2157_v36, %v2136_v33  ;;  %v11135_v41 = vld [vmem:[#allocation34_spill] sm:$0xff]  ;;  %v2339_v9 = vmul.f32 %v11007_v40, %v11136_v22  ;;  %v11137_v10 = vld [vmem:[#allocation96_spill] sm:$0xff] }
 0x235   : > { %v2853_v23 = vmul.f32 %v11134_v59, %v11133_v5  ;;  %v2231_v34 = vmul.f32 %v11135_v41, %v8773_v14  ;;  %v1074_v47 = vadd.f32 %v1058_v25, %v1037_v49  ;;  %v1366_v3 = vadd.f32 %v1350_v32, %v1258_v0  ;;  %v11139_v42 = vld [vmem:[#allocation20_spill] sm:$0xff]  ;;  %v11141_v14 = vld [vmem:[#allocation122_spill] sm:$0xff] }
 0x236   : > { %v1424_v31 = vmul.f32 %v11138_v56, %v11137_v10  ;;  %v2721_v11 = vadd.f32 %v2705_v62, %v2684_v18  ;;  %v2210_v21 = vadd.f32 %v2194_v15, %v2173_v1  ;;  %v1299_v24 = vrot.slane %v8666_v4, 2  ;;  %v11140_v33 = vld [vmem:[#allocation144_spill] sm:$0xff]  ;;  %v11144_v10 = vld [vmem:[#allocation102_spill] sm:$0xff]  ;;  %v8813_v18 = vld [vmem:[%s9488_s1 + $0x22] ss:$0 sm:$0xff] }
 0x237   : > { %v10044_v26 = vrot.slane %v8712_v29, 2  ;;  %v2890_v36 = vmul.f32 %v11140_v33, %v11139_v42  ;;  %v2288_v41 = vrot.slane %v8446_v63, 5  ;;  %v1403_v5 = vadd.f32 %v1387_v55, %v1366_v3  ;;  %v11142_v40 = vld [vmem:[#allocation104_spill] sm:$0xff]  ;;  %v11145_v63 = vld [vmem:[#allocation57_spill] sm:$0xff] }
 0x238   : > { %v1461_v49 = vmul.f32 %v11142_v40, %v11141_v14  ;;  %v2758_v0 = vadd.f32 %v2742_v35, %v2721_v11  ;;  %v2247_v25 = vadd.f32 %v2231_v34, %v2210_v21  ;;  %v11143_v32 = vld [vmem:[#allocation68_spill] sm:$0xff]  ;;  %v2619_v1 = vrot.slane %v8666_v4, 6 }
 0x239   : > { %v2376_v62 = vmul.f32 %v11009_v61, %v11143_v32  ;;  %v1111_v22 = vadd.f32 %v11144_v10, %v1074_v47  ;;  %v1440_v15 = vadd.f32 %v1424_v31, %v1403_v5  ;;  %v1498_v3 = vmul.f32 %v8813_v18, %v11145_v63  ;;  %v8819_v35 = vld [vmem:[%s4718_s12 + $0x148] sm:$0xff]  ;;  %v11147_v31 = vld [vmem:[#allocation23_spill] sm:$0xff] }
 0x23a   : > { %v10043_v14 = vrot.slane %v8712_v29, 6  ;;  %v2795_v55 = vadd.f32 %v2779_v28, %v2758_v0  ;;  %v2355_v34 = vadd.f32 %v2339_v9, %v2247_v25  ;;  %v11146_v61 = vld [vmem:[#allocation126_spill] sm:$0xff]  ;;  %v1304_v47 = vsel %vm1302_vm1, %v1299_v24, %v10044_v26  ;;  %v11150_v24 = vld [vmem:[#allocation32_spill] sm:$0xff]  ;;  %v11157_v26 = vld [vmem:[#allocation127_spill] sm:$0xff] }
 0x23b   : > { %v2413_v11 = vmul.f32 %v11013_v19, %v11146_v61  ;;  %v1206_v5 = vmul.f32 %v4348_v43, %v11147_v31  ;;  %v1477_v21 = vadd.f32 %v1461_v49, %v1440_v15  ;;  %v8831_v10 = vld [vmem:[%s9488_s1 + $0x2a] ss:$0 sm:$0xff]  ;;  %v2450_v43 = vmul.f32 %v11101_v50, %v11150_v24 }
 0x23c   : > { %v11148_v63 = vld [vmem:[#allocation110_spill] sm:$0xff]  ;;  %v8839_v19 = vsel %vm2622_vm5, %v2619_v1, %v10043_v14  ;;  %v2832_v9 = vadd.f32 %v2816_v16, %v2795_v55  ;;  %v2392_v0 = vadd.f32 %v2376_v62, %v2355_v34  ;;  %v969_v49 = vrot.slane %v8819_v35, 1  ;;  %v11152_v62 = vld [vmem:[#allocation87_spill] sm:$0xff]  ;;  %v11153_v34 = vld [vmem:[#allocation113_spill] sm:$0xff] }
 0x23d   : > { %v1535_v28 = vmul.f32 %v8831_v10, %v11148_v63  ;;  %11149 = vst [vmem:[#allocation114_spill] sm:$0xff] %v8839_v19  ;;  %v11151_v25 = vrot.slane %v8325_v8, 5  ;;  %v1514_v31 = vadd.f32 %v1498_v3, %v1477_v21  ;;  %v8853_v63 = vld [vmem:[%s9488_s1 + $0x32] ss:$0 sm:$0xff]  ;;  %v1148_v1 = vadd.f32 %v11152_v62, %v1111_v22  ;;  %v8860_v8 = vld [vmem:[%s9488_s1 + $0x25] ss:$0 sm:$0xff] }
 0x23e   : > { %v1572_v16 = vmul.f32 %v8853_v63, %v1304_v47  ;;  %v2869_v55 = vadd.f32 %v2853_v23, %v2832_v9  ;;  %v2429_v50 = vadd.f32 %v2413_v11, %v2392_v0  ;;  %v11154_v3 = vrot.slane %v8712_v29, 1  ;;  %v8871_v22 = vld [vmem:[%s9488_s1 + $0x3] ss:$0 sm:$0xff]  ;;  %v11155_v23 = vld [vmem:[#allocation90_spill] sm:$0xff]  ;;  %v11156_v47 = vld [vmem:[#allocation15_spill] sm:$0xff] }
 0x23f   : > { %v8848_v15 = vsel %vm2292_vm4, %v11151_v25, %v2288_v41  ;;  %v2487_v41 = vmul.f32 %v8860_v8, %v11153_v34  ;;  %v1551_v25 = vadd.f32 %v1535_v28, %v1514_v31  ;;  %v1680_v11 = vmul.f32 %v8871_v22, %v11155_v23  ;;  %v8882_v28 = vld [vmem:[%s9488_s1 + $0xb] ss:$0 sm:$0xff] }
 0x240   : > { %v973_v21 = vsel %vm972_vm0, %v11154_v3, %v969_v49  ;;  %v1185_v9 = vadd.f32 %v11156_v47, %v1148_v1  ;;  %v2906_v62 = vadd.f32 %v2890_v36, %v2869_v55  ;;  %v2466_v14 = vadd.f32 %v2450_v43, %v2429_v50  ;;  %v11158_v49 = vld [vmem:[#allocation42_spill] sm:$0xff]  ;;  %v11161_v55 = vld [vmem:[#allocation76_spill] sm:$0xff] }
 0x241   : > { %v1243_v0 = vmul.f32 %v8766_v20, %v973_v21  ;;  %v2524_v19 = vmul.f32 %v11110_v27, %v11157_v26  ;;  %v1588_v42 = vadd.f32 %v1572_v16, %v1551_v25  ;;  %v1717_v31 = vmul.f32 %v8882_v28, %v11158_v49  ;;  %v11159_v23 = vld [vmem:[#allocation118_spill] sm:$0xff]  ;;  %v8894_v27 = vld [vmem:[%s9488_s1 + $0x35] ss:$0 sm:$0xff]  ;;  %v11162_v50 = vld [vmem:[#allocation60_spill] sm:$0xff] }
 0x242   : > { %v1222_v3 = vadd.f32 %v1206_v5, %v1185_v9  ;;  %v1351_v1 = vmul.f32 %v8541_v46, %v11159_v23  ;;  %v8889_v20 = vadd.f32 %v8066_v39, %v2906_v62  ;;  %v2503_v36 = vadd.f32 %v2487_v41, %v2466_v14  ;;  %v8901_v5 = vld [vmem:[%s9488_s1 + $0x13] ss:$0 sm:$0xff]  ;;  %v11163_v21 = vld [vmem:[#allocation33_spill] sm:$0xff]  ;;  %v4358_v47 = vld [vmem:[%s9488_s1 + $0x1b] ss:$0 sm:$0xff] }
 0x243   : > { %v2561_v43 = vmul.f32 %v8894_v27, %v8848_v15  ;;  %v1696_v16 = vadd.f32 %v1680_v11, %v1588_v42  ;;  %v1754_v46 = vmul.f32 %v8901_v5, %v11161_v55  ;;  %v1388_v14 = vmul.f32 %v11132_v2, %v11162_v50  ;;  %v11164_v9 = vld [vmem:[#allocation82_spill] sm:$0xff] }
 0x244   : > { %11160 = vst [vmem:[#allocation107_spill] sm:$0xff] %v8889_v20  ;;  %v1259_v39 = vadd.f32 %v1243_v0, %v1222_v3  ;;  %2957 = vadd.xlane.f32.xlu0 %v8889_v20  ;;  %v2540_v41 = vadd.f32 %v2524_v19, %v2503_v36  ;;  %v2669_v25 = vmul.f32 %v11036_v38, %v11163_v21  ;;  %v1629_v42 = vrot.slane %v8666_v4, 3  ;;  %v11165_v3 = vld [vmem:[#allocation71_spill] sm:$0xff]  ;;  %v8921_v38 = vld [vmem:[%s9488_s1 + $0xe] ss:$0 sm:$0xff]  ;;  %v11166_v19 = vld [vmem:[#allocation93_spill] sm:$0xff] }
 0x245   : > { %v1733_v11 = vadd.f32 %v1717_v31, %v1696_v16  ;;  %v1791_v0 = vmul.f32 %v4358_v47, %v11164_v9  ;;  %v1425_v2 = vmul.f32 %v11138_v56, %v11165_v3  ;;  %v2706_v36 = vmul.f32 %v8921_v38, %v11166_v19  ;;  %v11167_v16 = vld [vmem:[#allocation105_spill] sm:$0xff]  ;;  %v11168_v56 = vld [vmem:[#allocation142_spill] sm:$0xff] }
 0x246   : > { %v1367_v62 = vadd.f32 %v1351_v1, %v1259_v39  ;;  %v2577_v50 = vadd.f32 %v2561_v43, %v2540_v41  ;;  %v1301_v31 = vrot.slane %v8819_v35, 2  ;;  %v1462_v21 = vmul.f32 %v11142_v40, %v11167_v16  ;;  %v4360_v1 = vld [vmem:[%s9488_s1 + $0x23] ss:$0 sm:$0xff]  ;;  %v11172_v16 = vld [vmem:[#allocation98_spill] sm:$0xff] }
 0x247   : > { %v1770_v23 = vadd.f32 %v1754_v46, %v1733_v11  ;;  %v1828_v43 = vmul.f32 %v4360_v1, %v11168_v56  ;;  %v11169_v3 = vld [vmem:[#allocation21_spill] sm:$0xff]  ;;  %v11170_v9 = vrot.slane %v8712_v29, 3  ;;  %v4361_v11 = vld [vmem:[%s9488_s1 + $0x2b] ss:$0 sm:$0xff] }
 0x248   : > { %v1404_v39 = vadd.f32 %v1388_v14, %v1367_v62  ;;  %v2685_v41 = vadd.f32 %v2669_v25, %v2577_v50  ;;  %v2743_v55 = vmul.f32 %v11124_v60, %v11169_v3  ;;  %v11171_v20 = vld [vmem:[#allocation17_spill] sm:$0xff]  ;;  %v1865_v56 = vmul.f32 %v4361_v11, %v11172_v16  ;;  %v11173_v62 = vld [vmem:[#allocation108_spill] sm:$0xff] }
 0x249   : > { %v1634_v49 = vsel %vm1632_vm2, %v1629_v42, %v11170_v9  ;;  %v1499_v40 = vmul.f32 %v8813_v18, %v11171_v20  ;;  %v1807_v46 = vadd.f32 %v1791_v0, %v1770_v23  ;;  %v2780_v60 = vmul.f32 %v11128_v48, %v11173_v62  ;;  %v11175_v18 = vld [vmem:[#allocation75_spill] sm:$0xff] }
 0x24a   : > { %v1441_v14 = vadd.f32 %v1425_v2, %v1404_v39  ;;  %v2722_v25 = vadd.f32 %v2706_v36, %v2685_v41  ;;  %v11174_v50 = vrot.slane %v8712_v29, 2  ;;  %v2621_v9 = vrot.slane %v8819_v35, 6  ;;  %v4362_v0 = vld [vmem:[%s9488_s1 + $0x33] ss:$0 sm:$0xff] }
 0x24b   : > { %v1536_v20 = vmul.f32 %v8831_v10, %v11175_v18  ;;  %v1844_v23 = vadd.f32 %v1828_v43, %v1807_v46  ;;  %v1902_v2 = vmul.f32 %v4362_v0, %v1634_v49  ;;  %v11176_v41 = vld [vmem:[#allocation11_spill] sm:$0xff]  ;;  %v11177_v16 = vrot.slane %v8712_v29, 6  ;;  %v4363_v10 = vld [vmem:[%s9488_s1 + $0x4] ss:$0 sm:$0xff]  ;;  %v11179_v43 = vld [vmem:[#allocation92_spill] sm:$0xff] }
 0x24c   : > { %v1303_v42 = vsel %vm1302_vm1, %v11174_v50, %v1301_v31  ;;  %v1478_v36 = vadd.f32 %v1462_v21, %v1441_v14  ;;  %v2759_v39 = vadd.f32 %v2743_v55, %v2722_v25  ;;  %v2817_v48 = vmul.f32 %v11130_v51, %v11176_v41  ;;  %v11180_v21 = vld [vmem:[#allocation123_spill] sm:$0xff]  ;;  %v11181_v25 = vld [vmem:[#allocation58_spill] sm:$0xff] }
 0x24d   : > { %v8962_v31 = vsel %vm2622_vm5, %v11177_v16, %v2621_v9  ;;  %v1881_v50 = vadd.f32 %v1865_v56, %v1844_v23  ;;  %v2010_v46 = vmul.f32 %v4363_v10, %v11179_v43  ;;  %v1573_v49 = vmul.f32 %v8853_v63, %v1303_v42  ;;  %v11182_v16 = vld [vmem:[#allocation16_spill] sm:$0xff]  ;;  %v4364_v63 = vld [vmem:[%s9488_s1 + $0x14] ss:$0 sm:$0xff] }
 0x24e   : > { %11178 = vst [vmem:[#allocation134_spill] sm:$0xff] %v8962_v31  ;;  %v1515_v18 = vadd.f32 %v1499_v40, %v1478_v36  ;;  %v2796_v55 = vadd.f32 %v2780_v60, %v2759_v39  ;;  %v2854_v51 = vmul.f32 %v11134_v59, %v11180_v21  ;;  %v2047_v41 = vmul.f32 %v8732_v12, %v11181_v25  ;;  %v11183_v40 = vld [vmem:[#allocation81_spill] sm:$0xff] }
 0x24f   : > { %v1918_v14 = vadd.f32 %v1902_v2, %v1881_v50  ;;  %v1681_v56 = vmul.f32 %v8871_v22, %v11083_v6  ;;  %v2891_v31 = vmul.f32 %v11140_v33, %v11182_v16  ;;  %v2084_v60 = vmul.f32 %v4364_v63, %v11183_v40  ;;  %v4365_v33 = vld [vmem:[%s9488_s1 + $0x1c] ss:$0 sm:$0xff]  ;;  %v11184_v39 = vld [vmem:[#allocation13_spill] sm:$0xff] }
 0x250   : > { %v1552_v9 = vadd.f32 %v1536_v20, %v1515_v18  ;;  %v2833_v23 = vadd.f32 %v2817_v48, %v2796_v55  ;;  %v1718_v42 = vmul.f32 %v8882_v28, %v11087_v52  ;;  %v1959_v20 = vrot.slane %v8666_v4, 4  ;;  %v11187_v40 = vld [vmem:[#allocation37_spill] sm:$0xff] }
 0x251   : > { %v2026_v43 = vadd.f32 %v2010_v46, %v1918_v14  ;;  %v1960_v22 = vrot.slane %v8712_v29, 4  ;;  %v2121_v48 = vmul.f32 %v4365_v33, %v11184_v39  ;;  %v1755_v46 = vmul.f32 %v8901_v5, %v11089_v45 }
 0x252   : > { %v1589_v59 = vadd.f32 %v1573_v49, %v1552_v9  ;;  %v2870_v2 = vadd.f32 %v2854_v51, %v2833_v23  ;;  %v1631_v49 = vrot.slane %v8819_v35, 3  ;;  %v1792_v28 = vmul.f32 %v4358_v47, %v11091_v54  ;;  %v11185_v51 = vld [vmem:[#allocation65_spill] sm:$0xff]  ;;  %v11186_v47 = vld [vmem:[#allocation24_spill] sm:$0xff] }
 0x253   : > { %v2063_v36 = vadd.f32 %v2047_v41, %v2026_v43  ;;  %v4366_v41 = vld [vmem:[%s9488_s1 + $0x24] ss:$0 sm:$0xff]  ;;  %v9000_v9 = vld [vmem:[%s9489_s2] ss:$0 sm:$0xff]  ;;  %v4368_v43 = vld [vmem:[%s9488_s1 + $0x2c] ss:$0 sm:$0xff] }
 0x254   : > { %v1697_v50 = vadd.f32 %v1681_v56, %v1589_v59  ;;  %v2907_v18 = vadd.f32 %v2891_v31, %v2870_v2  ;;  %v2158_v14 = vmul.f32 %v4366_v41, %v11185_v51  ;;  %v1964_v31 = vsel %vm1962_vm3, %v1959_v20, %v1960_v22 }
 0x255   : > { %v2100_v55 = vadd.f32 %v2084_v60, %v2063_v36  ;;  %v1829_v56 = vmul.f32 %v4360_v1, %v11186_v47  ;;  %v2195_v60 = vmul.f32 %v4368_v43, %v11187_v40  ;;  %v1866_v36 = vmul.f32 %v4361_v11, %v8690_v7  ;;  %v4369_v1 = vld [vmem:[%s9488_s1 + $0x34] ss:$0 sm:$0xff]  ;;  %v4371_v7 = vld [vmem:[%s9488_s1 + $0xd] ss:$0 sm:$0xff] }
 0x256   : > { %v1734_v25 = vadd.f32 %v1718_v42, %v1697_v50  ;;  %v9003_v5 = vadd.f32 %v9000_v9, %v2907_v18  ;;  %v11188_v42 = vrot.slane %v8712_v29, 3  ;;  %v2232_v39 = vmul.f32 %v4369_v1, %v1964_v31  ;;  %v4372_v31 = vld [vmem:[%s9488_s1 + $0x15] ss:$0 sm:$0xff] }
 0x257   : > { %v2137_v23 = vadd.f32 %v2121_v48, %v2100_v55  ;;  %v2377_v11 = vmul.f32 %v4371_v7, %v11099_v53  ;;  %v2414_v47 = vmul.f32 %v4372_v31, %v11100_v30  ;;  %v4373_v53 = vld [vmem:[%s9488_s1 + $0x1d] ss:$0 sm:$0xff]  ;;  %v1961_v30 = vrot.slane %v8819_v35, 4 }
 0x258   : > { %v1771_v59 = vadd.f32 %v1755_v46, %v1734_v25  ;;  %2959 = vadd.xlane.f32.xlu1 %v9003_v5  ;;  %v1633_v2 = vsel %vm1632_vm2, %v11188_v42, %v1631_v49  ;;  %v4370_v46 = vld [vmem:[%s9488_s1 + $0x5] ss:$0 sm:$0xff]  ;;  %v11189_v42 = vld [vmem:[#allocation136_spill] sm:$0xff] }
 0x259   : > { %v2174_v20 = vadd.f32 %v2158_v14, %v2137_v23  ;;  %v2340_v18 = vmul.f32 %v4370_v46, %v11090_v57  ;;  %v1903_v51 = vmul.f32 %v4362_v0, %v1633_v2  ;;  %v2011_v14 = vmul.f32 %v4363_v10, %v11108_v17 }
 0x25a   : > { %v1808_v48 = vadd.f32 %v1792_v28, %v1771_v59  ;;  %v2048_v0 = vmul.f32 %v8732_v12, %v11112_v13  ;;  %v2290_v23 = vrot.slane %v8712_v29, 5  ;;  %v2451_v17 = vmul.f32 %v4373_v53, %v11107_v37  ;;  %v4374_v37 = vld [vmem:[%s9488_s1 + $0x2d] ss:$0 sm:$0xff] }
 0x25b   : > { %v2211_v50 = vadd.f32 %v2195_v60, %v2174_v20  ;;  %v2085_v60 = vmul.f32 %v4364_v63, %v11115_v58  ;;  %v2488_v12 = vmul.f32 %v8860_v8, %v11189_v42  ;;  %v11192_v58 = vld [vmem:[#allocation91_spill] sm:$0xff]  ;;  %v2378_v42 = vmul.f32 %v4371_v7, %v11146_v61 }
 0x25c   : > { %v1845_v55 = vadd.f32 %v1829_v56, %v1808_v48  ;;  %v2289_v56 = vrot.slane %v8666_v4, 5  ;;  %v11190_v4 = vld [vmem:[#allocation45_spill] sm:$0xff]  ;;  %v2525_v63 = vmul.f32 %v4374_v37, %v11192_v58  ;;  %v2452_v58 = vmul.f32 %v4373_v53, %v11153_v34 }
 0x25d   : > { %v2248_v25 = vadd.f32 %v2232_v39, %v2211_v50  ;;  %v2122_v2 = vmul.f32 %v4365_v33, %v11190_v4  ;;  %v1963_v50 = vsel %vm1962_vm3, %v1960_v22, %v1961_v30 }
 0x25e   : > { %v1882_v49 = vadd.f32 %v1866_v36, %v1845_v55  ;;  %v2294_v29 = vsel %vm2292_vm4, %v2289_v56, %v2290_v23  ;;  %v11191_v36 = vld [vmem:[#allocation97_spill] sm:$0xff]  ;;  %v11195_v56 = vld [vmem:[#allocation39_spill] sm:$0xff] }
 0x25f   : > { %v2356_v28 = vadd.f32 %v2340_v18, %v2248_v25  ;;  %v2159_v20 = vmul.f32 %v4366_v41, %v11191_v36  ;;  %v11193_v18 = vld [vmem:[#allocation133_spill] sm:$0xff]  ;;  %v2562_v33 = vmul.f32 %v8894_v27, %v2294_v29  ;;  %v2707_v22 = vmul.f32 %v8921_v38, %v11195_v56 }
 0x260   : > { %v1919_v57 = vadd.f32 %v1903_v51, %v1882_v49  ;;  %v2196_v55 = vmul.f32 %v4368_v43, %v11193_v18  ;;  %v4375_v41 = vld [vmem:[%s9488_s1 + $0x6] ss:$0 sm:$0xff]  ;;  %v11194_v49 = vld [vmem:[#allocation19_spill] sm:$0xff]  ;;  %v2341_v43 = vmul.f32 %v4370_v46, %v11143_v32  ;;  %v2415_v32 = vmul.f32 %v4372_v31, %v11150_v24 }
 0x261   : > { %v2393_v40 = vadd.f32 %v2377_v11, %v2356_v28  ;;  %v2291_v46 = vrot.slane %v8819_v35, 5  ;;  %v2489_v35 = vmul.f32 %v8860_v8, %v11157_v26  ;;  %v4380_v18 = vld [vmem:[%s9488_s1 + $0x36] ss:$0 sm:$0xff]  ;;  %v2938_v8 = vpop.xlane.xlu1 %2937  ;;  %v2671_v56 = vmul.f32 %v4375_v41, %v11166_v19 }
 0x262   : > { %v2027_v10 = vadd.f32 %v2011_v14, %v1919_v57  ;;  %v2670_v14 = vmul.f32 %v4375_v41, %v11194_v49  ;;  %v2934_v57 = vpop.xlane.xlu0 %2933 }
 0x263   : > { %v2430_v59 = vadd.f32 %v2414_v47, %v2393_v40  ;;  %v2233_v47 = vmul.f32 %v4369_v1, %v1963_v50  ;;  %v4377_v1 = vld [vmem:[%s9488_s1 + $0x1e] ss:$0 sm:$0xff]  ;;  %v2293_v34 = vsel %vm2292_vm4, %v2290_v23, %v2291_v46 }
 0x264   : > { %v2064_v13 = vadd.f32 %v2048_v0, %v2027_v10  ;;  %v4376_v10 = vld [vmem:[%s9488_s1 + $0x16] ss:$0 sm:$0xff]  ;;  %v11199_v50 = vld [vmem:[#allocation20_spill] sm:$0xff]  ;;  %v2563_v26 = vmul.f32 %v8894_v27, %v2293_v34 }
 0x265   : > { %v2467_v39 = vadd.f32 %v2451_v17, %v2430_v59  ;;  %v2745_v27 = vmul.f32 %v4376_v10, %v11173_v62  ;;  %v11209_v34 = vld [vmem:[#allocation99_spill] sm:$0xff] }
 0x266   : > { %v2101_v48 = vadd.f32 %v2085_v60, %v2064_v13  ;;  %v11196_v60 = vld [vmem:[#allocation95_spill] sm:$0xff]  ;;  %v11197_v13 = vld [vmem:[#allocation100_spill] sm:$0xff]  ;;  %v2936_v29 = vpop.xlane.xlu0 %2935 }
 0x267   : > { %v2504_v51 = vadd.f32 %v2488_v12, %v2467_v39  ;;  %v2744_v30 = vmul.f32 %v4376_v10, %v11196_v60  ;;  %v2781_v4 = vmul.f32 %v4377_v1, %v11197_v13  ;;  %v11198_v39 = vld [vmem:[#allocation9_spill] sm:$0xff] }
 0x268   : > { %v2138_v25 = vadd.f32 %v2122_v2, %v2101_v48  ;;  %v4379_v48 = vld [vmem:[%s9488_s1 + $0x2e] ss:$0 sm:$0xff] }
 0x269   : > { %v2541_v11 = vadd.f32 %v2525_v63, %v2504_v51  ;;  %v2855_v24 = vmul.f32 %v4379_v48, %v11199_v50  ;;  %v2856_v46 = vmul.f32 %v4379_v48, %v11182_v16  ;;  %v11207_v16 = vld [vmem:[#allocation73_spill] sm:$0xff] }
 0x26a   : > { %v2175_v28 = vadd.f32 %v2159_v20, %v2138_v25  ;;  %v4378_v20 = vld [vmem:[%s9488_s1 + $0x26] ss:$0 sm:$0xff]  ;;  %v2526_v25 = vmul.f32 %v4374_v37, %v8848_v15  ;;  %v2942_v49 = vpop.xlane.xlu0 %2941  ;;  %v2708_v37 = vmul.f32 %v8921_v38, %v11169_v3 }
 0x26b   : > { %v2578_v0 = vadd.f32 %v2562_v33, %v2541_v11  ;;  %v2818_v61 = vmul.f32 %v4378_v20, %v11198_v39  ;;  %v9094_v11 = vmul.f32 0.125, %v2934_v57  ;;  %v9107_v57 = vmul.f32 0.125, %v2938_v8 }
 0x26c   : > { %v2212_v40 = vadd.f32 %v2196_v55, %v2175_v28  ;;  %v11200_v55 = vld [vmem:[#allocation114_spill] sm:$0xff]  ;;  %v9113_v41 = vmul.f32 0.125, %v2942_v49  ;;  %v2819_v3 = vmul.f32 %v4378_v20, %v11180_v21  ;;  %v9131_v39 = vmul.f32 0.125, %v2936_v29 }
 0x26d   : > { %v2686_v17 = vadd.f32 %v2670_v14, %v2578_v0  ;;  %v2892_v51 = vmul.f32 %v4380_v18, %v11200_v55 }
 0x26e   : > { %v2249_v59 = vadd.f32 %v2233_v47, %v2212_v40  ;;  %v2946_v40 = vpop.xlane.xlu0 %2945  ;;  %v9143_v48 = vsub.f32 %v11207_v16, %v9131_v39 }
 0x26f   : > { %v2723_v12 = vadd.f32 %v2707_v22, %v2686_v17  ;;  %v11201_v22 = vld [vmem:[#allocation66_spill] sm:$0xff]  ;;  %v11202_v17 = vld [vmem:[#allocation28_spill] sm:$0xff]  ;;  %v9123_v10 = vmul.f32 0.125, %v2946_v40 }
 0x270   : > { %v2357_v2 = vadd.f32 %v2341_v43, %v2249_v59  ;;  %v9100_v44 = vsub.f32 %v11201_v22, %v9094_v11  ;;  %v9117_v60 = vsub.f32 %v11202_v17, %v9107_v57  ;;  %v11203_v59 = vld [vmem:[#allocation11_spill] sm:$0xff]  ;;  %v11211_v22 = vld [vmem:[#allocation106_spill] sm:$0xff]  ;;  %v11213_v17 = vld [vmem:[#allocation36_spill] sm:$0xff] }
 0x271   : > { %v2760_v36 = vadd.f32 %v2744_v30, %v2723_v12  ;;  %v2782_v38 = vmul.f32 %v4377_v1, %v11203_v59  ;;  %v11204_v12 = vld [vmem:[#allocation116_spill] sm:$0xff] }
 0x272   : > { %v2394_v7 = vadd.f32 %v2378_v42, %v2357_v2  ;;  %v2997_v19 = vmul.f32 %v9100_v44, %v9100_v44  ;;  %v2999_v62 = vmul.f32 %v9117_v60, %v9117_v60  ;;  %v9127_v13 = vsub.f32 %v11204_v12, %v9113_v41  ;;  %v2950_v2 = vpop.xlane.xlu0 %2949 }
 0x273   : > { %v2797_v63 = vadd.f32 %v2781_v4, %v2760_v36  ;;  %v2940_v4 = vpop.xlane.xlu1 %2939  ;;  %v11205_v36 = vld [vmem:[#allocation134_spill] sm:$0xff] }
 0x274   : > { %v2431_v31 = vadd.f32 %v2415_v32, %v2394_v7  ;;  %v2893_v1 = vmul.f32 %v4380_v18, %v11205_v36  ;;  %v3001_v20 = vmul.f32 %v9127_v13, %v9127_v13  ;;  %v11206_v7 = vld [vmem:[#allocation112_spill] sm:$0xff]  ;;  %v9154_v55 = vmul.f32 0.125, %v2940_v4 }
 0x275   : > { %v2834_v53 = vadd.f32 %v2818_v61, %v2797_v63  ;;  %v9135_v61 = vmul.f32 0.125, %v2950_v2  ;;  %v11214_v2 = vld [vmem:[#allocation67_spill] sm:$0xff] }
 0x276   : > { %v2468_v33 = vadd.f32 %v2452_v58, %v2431_v31  ;;  %v9139_v58 = vsub.f32 %v11206_v7, %v9123_v10  ;;  %v11208_v31 = vld [vmem:[#allocation143_spill] sm:$0xff] }
 0x277   : > { %v2871_v14 = vadd.f32 %v2855_v24, %v2834_v53  ;;  %v2944_v50 = vpop.xlane.xlu1 %2943  ;;  %v9161_v53 = vsub.f32 %v11209_v34, %v9154_v55  ;;  %v3045_v34 = vmul.f32 120.0, %v9094_v11 }
 0x278   : > { %v2505_v28 = vadd.f32 %v2489_v35, %v2468_v33  ;;  %v3003_v29 = vmul.f32 %v9139_v58, %v9139_v58  ;;  %v9149_v35 = vsub.f32 %v11208_v31, %v9135_v61  ;;  %v9165_v49 = vmul.f32 0.125, %v2944_v50  ;;  %v4140_v31 = vld [vmem:[%s9492_s5 + $0x10] sm:$0xff]  }
 0x279   : > { %v2908_v47 = vadd.f32 %v2892_v51, %v2871_v14  ;;  %v2998_v51 = vmul.f32 %v9143_v48, %v9143_v48  ;;  %v11210_v14 = vld [vmem:[#allocation12_spill] sm:$0xff] }
 0x27a   : > { %v2542_v0 = vadd.f32 %v2526_v25, %v2505_v28  ;;  %v3005_v33 = vmul.f32 %v9149_v35, %v9149_v35  ;;  %v9171_v28 = vsub.f32 %v11210_v14, %v9165_v49  ;;  %v3047_v14 = vmul.f32 120.0, %v9107_v57 }
 0x27b   : > { %v9103_v23 = vadd.f32 %v9000_v9, %v2908_v47  ;;  %v2948_v25 = vpop.xlane.xlu1 %2947 }
 0x27c   : > { %v2579_v15 = vadd.f32 %v2563_v26, %v2542_v0  ;;  %v9173_v8 = vmul.f32 0.125, %v2948_v25 }
 0x27d   : > { %2961 = vadd.xlane.f32.xlu0 %v9103_v23 }
 0x27e   : > { %v2687_v43 = vadd.f32 %v2671_v56, %v2579_v15  ;;  %v3002_v56 = vmul.f32 %v9171_v28, %v9171_v28  ;;  %v9181_v15 = vsub.f32 %v11211_v22, %v9173_v8 }
 0x27f   : > { %v2952_v0 = vpop.xlane.xlu1 %2951 }
 0x280   : > { %v2724_v30 = vadd.f32 %v2708_v37, %v2687_v43  ;;  %v11212_v37 = vld [vmem:[#allocation101_spill] sm:$0xff]  ;;  %v9187_v40 = vmul.f32 0.125, %v2952_v0 }
 0x281   : > { %3013 = vadd.xlane.f32.xlu0 %v2997_v19  ;;  %v3004_v19 = vmul.f32 %v9181_v15, %v9181_v15 }
 0x282   : > { %v2761_v42 = vadd.f32 %v2745_v27, %v2724_v30  ;;  %v9195_v30 = vsub.f32 %v11213_v17, %v9187_v40 }
 0x284   : > { %v2798_v32 = vadd.f32 %v2782_v38, %v2761_v42  ;;  %v3006_v59 = vmul.f32 %v9195_v30, %v9195_v30  ;;  %v4135_v38 = vld [vmem:[%s9492_s5 + $0x38] sm:$0xff]   ;;  %v4137_v42 = vld [vmem:[%s9492_s5 + $0x28] sm:$0xff]  }
 0x285   : > { %3017 = vadd.xlane.f32.xlu0 %v2999_v62  ;;  %4031 = vmatprep.subr.bf16.mxu0 %v4135_v38  ;;  %v4138_v62 = vld [vmem:[%s9492_s5 + $0x20] sm:$0xff]  }
 0x286   : > { %v2835_v21 = vadd.f32 %v2819_v3, %v2798_v32  ;;  %4032 = vmatpush3.bf16.msra.mxu0 %v4135_v38  ;;  %v4136_v3 = vld [vmem:[%s9492_s5 + $0x30] sm:$0xff]  }
 0x287   : > { %4033 = vmatprep.subr.bf16.mxu0 %v4136_v3 }
 0x288   : > { %v2872_v63 = vadd.f32 %v2856_v46, %v2835_v21  ;;  %v4139_v46 = vld [vmem:[%s9492_s5 + $0x18] sm:$0xff]  }
 0x289   : > { %3021 = vadd.xlane.f32.xlu0 %v3001_v20  ;;  %v11215_v20 = vld [vmem:[#allocation107_spill] sm:$0xff] }
 0x28a   : > { %v2909_v24 = vadd.f32 %v2893_v1, %v2872_v63  ;;  %4034 = vmatpush3.bf16.msra.mxu0 %v4136_v3  ;;  %v3046_v3 = vmul.f32 120.0, %v9131_v39 }
 0x28b   : > { %4035 = vmatprep.subr.bf16.mxu0 %v4137_v42 }
 0x28c   : > { %v9152_v18 = vadd.f32 %v9000_v9, %v2909_v24  ;;  %v3000_v9 = vmul.f32 %v9161_v53, %v9161_v53 }
 0x28d   : > { %3025 = vadd.xlane.f32.xlu0 %v3003_v29 }
 0x28e   : > { %2963 = vadd.xlane.f32.xlu1 %v9152_v18  ;;  %4036 = vmatpush3.bf16.msra.mxu0 %v4137_v42 }
 0x28f   : > { %4037 = vmatprep.subr.bf16.mxu0 %v4138_v62 }
 0x290   : > { %v2954_v26 = vpop.xlane.xlu0 %2953 }
 0x291   : > { %3029 = vadd.xlane.f32.xlu0 %v3005_v33  ;;  %v9175_v47 = vmul.f32 0.125, %v2954_v26 }
 0x292   : > { %3015 = vadd.xlane.f32.xlu1 %v2998_v51  ;;  %4038 = vmatpush3.bf16.msra.mxu0 %v4138_v62 }
 0x293   : > { %v9185_v27 = vsub.f32 %v11212_v37, %v9175_v47  ;;  %4039 = vmatprep.subr.bf16.mxu0 %v4139_v46  ;;  %v3049_v37 = vmul.f32 120.0, %v9113_v41 }
 0x295   : > { %v3007_v43 = vmul.f32 %v9185_v27, %v9185_v27 }
 0x296   : > { %3019 = vadd.xlane.f32.xlu1 %v3000_v9  ;;  %4040 = vmatpush3.bf16.msra.mxu0 %v4139_v46  ;;  %v3053_v46 = vmul.f32 120.0, %v9135_v61 }
 0x297   : > { %3033 = vadd.xlane.f32.xlu0 %v3007_v43  ;;  %4041 = vmatprep.subr.bf16.mxu0 %v4140_v31 }
 0x29a   : > { %3023 = vadd.xlane.f32.xlu1 %v3002_v56  ;;  %4042 = vmatpush3.bf16.msra.mxu0 %v4140_v31  ;;  %v3063_v56 = vmul.f32 %v3047_v14, %v9107_v57  ;;  %v3050_v14 = vmul.f32 120.0, %v9165_v49 }
 0x29e   : > { %3027 = vadd.xlane.f32.xlu1 %v3004_v19 }
 0x2a2   : > { %3031 = vadd.xlane.f32.xlu1 %v3006_v59 }
 0x2af   : > { %v2956_v12 = vpop.xlane.xlu1 %2955 }
 0x2b0   : > { %v9211_v4 = vmul.f32 0.125, %v2956_v12 }
 0x2b2   : > { %v9215_v32 = vsub.f32 %v11214_v2, %v9211_v4 }
 0x2b4   : > { %v3008_v36 = vmul.f32 %v9215_v32, %v9215_v32 }
 0x2b6   : > { %3035 = vadd.xlane.f32.xlu1 %v3008_v36 }
 0x2cd   : > { %v2958_v1 = vpop.xlane.xlu0 %2957 }
 0x2ce   : > { %v9222_v21 = vmul.f32 0.125, %v2958_v1 }
 0x2d0   : > { %v9226_v7 = vsub.f32 %v11215_v20, %v9222_v21 }
 0x2d2   : > { %v3009_v63 = vmul.f32 %v9226_v7, %v9226_v7 }
 0x2d4   : > { %3037 = vadd.xlane.f32.xlu0 %v3009_v63 }
 0x2e1   : > { %v2960_v50 = vpop.xlane.xlu1 %2959 }
 0x2e2   : > { %v9230_v24 = vmul.f32 0.125, %v2960_v50  ;;  %v3048_v50 = vmul.f32 120.0, %v9154_v55 }
 0x2e4   : > { %v9234_v16 = vsub.f32 %v9003_v5, %v9230_v24  ;;  %v3061_v5 = vmul.f32 %v3045_v34, %v9094_v11  ;;  %v3065_v11 = vmul.f32 %v3049_v37, %v9113_v41  ;;  %v3062_v41 = vmul.f32 %v3046_v3, %v9131_v39 }
 0x2e5   : > { %v3064_v39 = vmul.f32 %v3048_v50, %v9154_v55 }
 0x2e6   : > { %v3010_v29 = vmul.f32 %v9234_v16, %v9234_v16 }
 0x2e8   : > { %3039 = vadd.xlane.f32.xlu1 %v3010_v29 }
 0x306   : > { %v2962_v51 = vpop.xlane.xlu0 %2961 }
 0x307   : > { %v9242_v33 = vmul.f32 0.125, %v2962_v51 }
 0x309   : > { %v9246_v25 = vsub.f32 %v9103_v23, %v9242_v33  ;;  %v3051_v23 = vmul.f32 120.0, %v9123_v10 }
 0x30a   : > { %v3014_v9 = vpop.xlane.xlu0 %3013 }
 0x30b   : > { %v3011_v26 = vmul.f32 %v9246_v25, %v9246_v25  ;;  %v3077_v0 = vsub.f32 %v3014_v9, %v3061_v5  ;;  %v3067_v12 = vmul.f32 %v3051_v23, %v9123_v10  ;;  %v3069_v5 = vmul.f32 %v3053_v46, %v9135_v61 }
 0x30c   : > { %v3066_v61 = vmul.f32 %v3050_v14, %v9165_v49  ;;  %v3052_v23 = vmul.f32 120.0, %v9173_v8  ;;  %v3054_v46 = vmul.f32 120.0, %v9187_v40 }
 0x30d   : > { %3041 = vadd.xlane.f32.xlu0 %v3011_v26  ;;  %v3093_v43 = vmul.f32 0.125, %v3077_v0 }
 0x30e   : > { %v3018_v22 = vpop.xlane.xlu0 %3017 }
 0x30f   : > { %v3079_v19 = vsub.f32 %v3018_v22, %v3063_v56  ;;  %v3109_v59 = vmax.f32 %v3093_v43, 0.0 }
 0x311   : > { %v3095_v38 = vmul.f32 0.125, %v3079_v19  ;;  %v3125_v36 = vadd.f32 1e-06, %v3109_v59  ;;  %v4141_v19 = vld [vmem:[%s9492_s5 + $0x8] sm:$0xff]  }
 0x312   : > { %v3022_v17 = vpop.xlane.xlu0 %3021  ;;  %4043 = vmatprep.subr.bf16.mxu0 %v4141_v19 }
 0x313   : > { %v3081_v42 = vsub.f32 %v3022_v17, %v3065_v11  ;;  %v3111_v1 = vmax.f32 %v3095_v38, 0.0  ;;  %4151 = vrsqrt.f32 %v3125_v36  ;;  %4044 = vmatpush3.bf16.msra.mxu0 %v4141_v19 }
 0x315   : > { %v3097_v29 = vmul.f32 0.125, %v3081_v42  ;;  %v3127_v9 = vadd.f32 1e-06, %v3111_v1 }
 0x316   : > { %v3026_v2 = vpop.xlane.xlu0 %3025 }
 0x317   : > { %v2964_v62 = vpop.xlane.xlu1 %2963  ;;  %v3083_v20 = vsub.f32 %v3026_v2, %v3067_v12  ;;  %v3113_v0 = vmax.f32 %v3097_v29, 0.0  ;;  %4153 = vrsqrt.f32 %v3127_v9  ;;  %v3068_v2 = vmul.f32 %v3052_v23, %v9173_v8  ;;  %v4142_v8 = vld [vmem:[%s9492_s5] sm:$0xff]  }
 0x318   : > { %v9258_v57 = vmul.f32 0.125, %v2964_v62  ;;  %4045 = vmatprep.subr.bf16.mxu0 %v4142_v8  ;;  %v9296_v23 = vld [vmem:[%s9491_s4] ss:$0 sm:$0xff] }
 0x319   : > { %v3099_v26 = vmul.f32 0.125, %v3083_v20  ;;  %v3129_v38 = vadd.f32 1e-06, %v3113_v0  ;;  %4046 = vmatpush3.bf16.msra.mxu0 %v4142_v8 }
 0x31a   : > { %v9263_v63 = vsub.f32 %v9152_v18, %v9258_v57  ;;  %v3030_v51 = vpop.xlane.xlu0 %3029 }
 0x31b   : > { %v3016_v31 = vpop.xlane.xlu1 %3015  ;;  %v3085_v56 = vsub.f32 %v3030_v51, %v3069_v5  ;;  %v3115_v17 = vmax.f32 %v3099_v26, 0.0 }
 0x31c   : > { %v3012_v10 = vmul.f32 %v9263_v63, %v9263_v63  ;;  %v3078_v34 = vsub.f32 %v3016_v31, %v3062_v41 }
 0x31d   : > { %v3101_v3 = vmul.f32 0.125, %v3085_v56  ;;  %v3131_v12 = vadd.f32 1e-06, %v3115_v17  ;;  %v3055_v56 = vmul.f32 120.0, %v9175_v47 }
 0x31e   : > { %3043 = vadd.xlane.f32.xlu1 %v3012_v10  ;;  %v3094_v18 = vmul.f32 0.125, %v3078_v34  ;;  %v3070_v34 = vmul.f32 %v3054_v46, %v9187_v40  ;;  %v9288_v40 = vld [vmem:[%s9490_s3] ss:$0 sm:$0xff] }
 0x31f   : > { %v3020_v22 = vpop.xlane.xlu1 %3019  ;;  %v3117_v1 = vmax.f32 %v3101_v3, 0.0 }
 0x320   : > { %v3110_v37 = vmax.f32 %v3094_v18, 0.0  ;;  %v3080_v43 = vsub.f32 %v3020_v22, %v3064_v39  ;;  %v4152_v29 = vpop.eup %4151 }
 0x321   : > { %v3133_v10 = vadd.f32 1e-06, %v3117_v1  ;;  %v3157_v26 = vmul.f32 %v4152_v29, %v9100_v44  ;;  %v3071_v44 = vmul.f32 %v3055_v56, %v9175_v47 }
 0x322   : > { %v3126_v11 = vadd.f32 1e-06, %v3110_v37  ;;  %v3096_v59 = vmul.f32 0.125, %v3080_v43  ;;  %v3034_v43 = vpop.xlane.xlu0 %3033 }
 0x323   : > { %v3024_v55 = vpop.xlane.xlu1 %3023  ;;  %v3180_v19 = vmul.f32 %v9288_v40, %v3157_v26 }
 0x324   : > { %4155 = vrsqrt.f32 %v3126_v11  ;;  %v3112_v42 = vmax.f32 %v3096_v59, 0.0  ;;  %v3082_v62 = vsub.f32 %v3024_v55, %v3066_v61  ;;  %v4154_v18 = vpop.eup %4153 }
 0x325   : > { %4157 = vrsqrt.f32 %v3129_v38  ;;  %v3159_v11 = vmul.f32 %v4154_v18, %v9117_v60  ;;  %v3087_v38 = vsub.f32 %v3034_v43, %v3071_v44 }
 0x326   : > { %v3128_v36 = vadd.f32 1e-06, %v3112_v42  ;;  %v3098_v49 = vmul.f32 0.125, %v3082_v62  ;;  %v3203_v42 = vadd.f32 %v9296_v23, %v3180_v19 }
 0x327   : > { %v3028_v20 = vpop.xlane.xlu1 %3027  ;;  %v3103_v46 = vmul.f32 0.125, %v3087_v38 }
 0x328   : > { %4159 = vrsqrt.f32 %v3128_v36  ;;  %v3114_v41 = vmax.f32 %v3098_v49, 0.0  ;;  %v3084_v50 = vsub.f32 %v3028_v20, %v3068_v2 }
 0x329   : > { %4161 = vrsqrt.f32 %v3131_v12  ;;  %v3182_v12 = vmul.f32 %v9288_v40, %v3159_v11 }
 0x32a   : > { %v3130_v31 = vadd.f32 1e-06, %v3114_v41  ;;  %v3100_v51 = vmul.f32 0.125, %v3084_v50 }
 0x32b   : > { %v3032_v5 = vpop.xlane.xlu1 %3031  ;;  %v3205_v20 = vadd.f32 %v9296_v23, %v3182_v12 }
 0x32c   : > { %4163 = vrsqrt.f32 %v3130_v31  ;;  %v3116_v9 = vmax.f32 %v3100_v51, 0.0  ;;  %v3086_v14 = vsub.f32 %v3032_v5, %v3070_v34  ;;  %v3119_v31 = vmax.f32 %v3103_v46, 0.0 }
 0x32d   : > { %4165 = vrsqrt.f32 %v3133_v10  ;;  %v3057_v46 = vmul.f32 120.0, %v9222_v21 }
 0x32e   : > { %v3132_v39 = vadd.f32 1e-06, %v3116_v9  ;;  %v3102_v0 = vmul.f32 0.125, %v3086_v14  ;;  %v3135_v14 = vadd.f32 1e-06, %v3119_v31 }
 0x330   : > { %4167 = vrsqrt.f32 %v3132_v39  ;;  %v3118_v22 = vmax.f32 %v3102_v0, 0.0 }
 0x331   : > { %v4156_v37 = vpop.eup %4155 }
 0x332   : > { %v3134_v61 = vadd.f32 1e-06, %v3118_v22  ;;  %v3158_v17 = vmul.f32 %v4156_v37, %v9143_v48  ;;  %v4158_v59 = vpop.eup %4157 }
 0x333   : > { %v3161_v2 = vmul.f32 %v4158_v59, %v9127_v13  ;;  %v3056_v13 = vmul.f32 120.0, %v9211_v4 }
 0x334   : > { %4169 = vrsqrt.f32 %v3134_v61  ;;  %v3181_v3 = vmul.f32 %v9288_v40, %v3158_v17 }
 0x335   : > { %v4160_v55 = vpop.eup %4159  ;;  %v3072_v26 = vmul.f32 %v3056_v13, %v9211_v4  ;;  %4171 = vrsqrt.f32 %v3135_v14  ;;  %v3059_v14 = vmul.f32 120.0, %v9242_v33 }
 0x336   : > { %v4162_v62 = vpop.eup %4161  ;;  %v3204_v47 = vadd.f32 %v9296_v23, %v3181_v3  ;;  %v3160_v48 = vmul.f32 %v4160_v55, %v9161_v53  ;;  %v3184_v53 = vmul.f32 %v9288_v40, %v3161_v2 }
 0x337   : > { %v3163_v1 = vmul.f32 %v4162_v62, %v9139_v58 }
 0x338   : > { %v3219_v36 = vpack.c.bf16 %v3204_v47, %v3203_v42  ;;  %v3183_v60 = vmul.f32 %v9288_v40, %v3160_v48  ;;  %v3207_v58 = vadd.f32 %v9296_v23, %v3184_v53 }
 0x339   : > { %v4164_v49 = vpop.eup %4163  ;;  %v3186_v5 = vmul.f32 %v9288_v40, %v3163_v1 }
 0x33a   : > { %4047 = vmatprep.mubr.bf16.mxu0 %v3219_v36  ;;  %v3206_v41 = vadd.f32 %v9296_v23, %v3183_v60  ;;  %v3162_v50 = vmul.f32 %v4164_v49, %v9171_v28  ;;  %v4166_v29 = vpop.eup %4165  ;;  %v3073_v60 = vmul.f32 %v3057_v46, %v9222_v21 }
 0x33b   : > { %v3165_v28 = vmul.f32 %v4166_v29, %v9149_v35  ;;  %v3209_v22 = vadd.f32 %v9296_v23, %v3186_v5 }
 0x33c   : > { %v3220_v51 = vpack.c.bf16 %v3206_v41, %v3205_v20  ;;  %v3185_v10 = vmul.f32 %v9288_v40, %v3162_v50 }
 0x33d   : > { %v4168_v34 = vpop.eup %4167 }
 0x33e   : > { %4048 = vmatmul.mubr.bf16.vlgmr.msra.gmra.mxu0 %v3220_v51  ;;  %v3208_v8 = vadd.f32 %v9296_v23, %v3185_v10  ;;  %v3164_v9 = vmul.f32 %v4168_v34, %v9181_v15  ;;  %v3188_v15 = vmul.f32 %v9288_v40, %v3165_v28  ;;  %v4143_v28 = vld [vmem:[%s9494_s7 + $0x38] sm:$0xff]  }
 0x33f   : > { %v3036_v56 = vpop.xlane.xlu1 %3035  ;;  %4063 = vmatprep.subr.bf16.mxu1 %v4143_v28 }
 0x340   : > { %v3221_v18 = vpack.c.bf16 %v3208_v8, %v3207_v58  ;;  %v3187_v39 = vmul.f32 %v9288_v40, %v3164_v9  ;;  %v3088_v37 = vsub.f32 %v3036_v56, %v3072_v26  ;;  %v3211_v17 = vadd.f32 %v9296_v23, %v3188_v15  ;;  %4064 = vmatpush3.bf16.msra.mxu1 %v4143_v28  ;;  %v4146_v56 = vld [vmem:[%s9494_s7 + $0x20] sm:$0xff]  }
 0x341   : > { %v4170_v0 = vpop.eup %4169  ;;  %v3075_v26 = vmul.f32 %v3059_v14, %v9242_v33 }
 0x342   : > { %4051 = vmatprep.mubr.bf16.mxu0 %v3221_v18  ;;  %v3210_v43 = vadd.f32 %v9296_v23, %v3187_v39  ;;  %v3166_v19 = vmul.f32 %v4170_v0, %v9195_v30  ;;  %v3104_v35 = vmul.f32 0.125, %v3088_v37  ;;  %v4172_v3 = vpop.eup %4171  ;;  %v4145_v39 = vld [vmem:[%s9494_s7 + $0x28] sm:$0xff]   ;;  %v3060_v37 = vmul.f32 120.0, %v9258_v57 }
 0x343   : > { %v3167_v30 = vmul.f32 %v4172_v3, %v9185_v27 }
 0x344   : > { %v3222_v61 = vpack.c.bf16 %v3210_v43, %v3209_v22  ;;  %v3189_v4 = vmul.f32 %v9288_v40, %v3166_v19  ;;  %v3120_v44 = vmax.f32 %v3104_v35, 0.0  ;;  %v3076_v43 = vmul.f32 %v3060_v37, %v9258_v57 }
 0x345   : > { %v3190_v62 = vmul.f32 %v9288_v40, %v3167_v30 }
 0x346   : > { %4052 = vmatmul.mubr.bf16.gmra.mxu0 %v3222_v61  ;;  %v3212_v11 = vadd.f32 %v9296_v23, %v3189_v4  ;;  %v3136_v59 = vadd.f32 1e-06, %v3120_v44  ;;  %v4147_v44 = vld [vmem:[%s9494_s7 + $0x18] sm:$0xff]  }
 0x347   : > { %v3213_v48 = vadd.f32 %v9296_v23, %v3190_v62 }
 0x348   : > { %v3223_v38 = vpack.c.bf16 %v3212_v11, %v3211_v17  ;;  %4173 = vrsqrt.f32 %v3136_v59  ;;  %v4148_v11 = vld [vmem:[%s9494_s7 + $0x10] sm:$0xff]  }
 0x34a   : > { %4055 = vmatprep.mubr.bf16.mxu0 %v3223_v38 }
 0x355   : > { %v4174_v55 = vpop.eup %4173 }
 0x356   : > { %v3168_v42 = vmul.f32 %v4174_v55, %v9215_v32  ;;  %v3058_v32 = vmul.f32 120.0, %v9230_v24 }
 0x358   : > { %v3191_v47 = vmul.f32 %v9288_v40, %v3168_v42  ;;  %v3074_v41 = vmul.f32 %v3058_v32, %v9230_v24 }
 0x35a   : > { %v3214_v12 = vadd.f32 %v9296_v23, %v3191_v47  ;;  %v9374_v47 = vld [vmem:[%s9493_s6] ss:$0 sm:$0xff] }
 0x35c   : > { %v3224_v2 = vpack.c.bf16 %v3214_v12, %v3213_v48 }
 0x35d   : > { %v3038_v36 = vpop.xlane.xlu0 %3037 }
 0x35e   : > { %4056 = vmatmul.mubr.bf16.gmra.mxu0 %v3224_v2  ;;  %v3089_v49 = vsub.f32 %v3038_v36, %v3073_v60 }
 0x360   : > { %v3105_v27 = vmul.f32 0.125, %v3089_v49 }
 0x362   : > { %v3121_v1 = vmax.f32 %v3105_v27, 0.0 }
 0x364   : > { %v3137_v20 = vadd.f32 1e-06, %v3121_v1 }
 0x366   : > { %4175 = vrsqrt.f32 %v3137_v20  ;;  %v4149_v20 = vld [vmem:[%s9494_s7 + $0x8] sm:$0xff]  }
 0x371   : > { %v3040_v50 = vpop.xlane.xlu1 %3039 }
 0x372   : > { %v3090_v53 = vsub.f32 %v3040_v50, %v3074_v41 }
 0x373   : > { %v4176_v51 = vpop.eup %4175 }
 0x374   : > { %v3106_v29 = vmul.f32 0.125, %v3090_v53  ;;  %v3169_v10 = vmul.f32 %v4176_v51, %v9226_v7  ;;  %v4150_v51 = vld [vmem:[%s9494_s7] sm:$0xff]  }
 0x376   : > { %v3122_v31 = vmax.f32 %v3106_v29, 0.0  ;;  %v3192_v5 = vmul.f32 %v9288_v40, %v3169_v10 }
 0x378   : > { %v3138_v13 = vadd.f32 1e-06, %v3122_v31  ;;  %v3215_v8 = vadd.f32 %v9296_v23, %v3192_v5 }
 0x37a   : > { %4177 = vrsqrt.f32 %v3138_v13 }
 0x387   : > { %v4178_v34 = vpop.eup %4177 }
 0x388   : > { %v3170_v21 = vmul.f32 %v4178_v34, %v9234_v16  ;;  %v4144_v16 = vld [vmem:[%s9494_s7 + $0x30] sm:$0xff]  }
 0x389   : > { %4065 = vmatprep.subr.bf16.mxu1 %v4144_v16 }
 0x38a   : > { %v3193_v58 = vmul.f32 %v9288_v40, %v3170_v21  ;;  %4066 = vmatpush3.bf16.msra.mxu1 %v4144_v16 }
 0x38b   : > { %4067 = vmatprep.subr.bf16.mxu1 %v4145_v39 }
 0x38c   : > { %v3216_v24 = vadd.f32 %v9296_v23, %v3193_v58 }
 0x38e   : > { %v3225_v9 = vpack.c.bf16 %v3216_v24, %v3215_v8  ;;  %4068 = vmatpush3.bf16.msra.mxu1 %v4145_v39 }
 0x38f   : > { %4069 = vmatprep.subr.bf16.mxu1 %v4146_v56 }
 0x390   : > { %4059 = vmatprep.mubr.bf16.mxu0 %v3225_v9 }
 0x392   : > { %4070 = vmatpush3.bf16.msra.mxu1 %v4146_v56 }
 0x393   : > { %4071 = vmatprep.subr.bf16.mxu1 %v4147_v44 }
 0x396   : > { %v3042_v7 = vpop.xlane.xlu0 %3041  ;;  %4072 = vmatpush3.bf16.msra.mxu1 %v4147_v44 }
 0x397   : > { %v3091_v18 = vsub.f32 %v3042_v7, %v3075_v26  ;;  %4073 = vmatprep.subr.bf16.mxu1 %v4148_v11 }
 0x399   : > { %v3107_v0 = vmul.f32 0.125, %v3091_v18 }
 0x39a   : > { %4074 = vmatpush3.bf16.msra.mxu1 %v4148_v11 }
 0x39b   : > { %v3123_v22 = vmax.f32 %v3107_v0, 0.0  ;;  %4075 = vmatprep.subr.bf16.mxu1 %v4149_v20 }
 0x39d   : > { %v3139_v33 = vadd.f32 1e-06, %v3123_v22 }
 0x39e   : > { %4076 = vmatpush3.bf16.msra.mxu1 %v4149_v20 }
 0x39f   : > { %4179 = vrsqrt.f32 %v3139_v33  ;;  %4077 = vmatprep.subr.bf16.mxu1 %v4150_v51 }
 0x3a2   : > { %4078 = vmatpush3.bf16.msra.mxu1 %v4150_v51 }
 0x3a7   : > { %v3044_v19 = vpop.xlane.xlu1 %3043 }
 0x3a8   : > { %v3092_v15 = vsub.f32 %v3044_v19, %v3076_v43 }
 0x3aa   : > { %v3108_v35 = vmul.f32 0.125, %v3092_v15 }
 0x3ac   : > { %v3124_v61 = vmax.f32 %v3108_v35, 0.0  ;;  %v4180_v17 = vpop.eup %4179 }
 0x3ad   : > { %v3171_v57 = vmul.f32 %v4180_v17, %v9246_v25 }
 0x3ae   : > { %v3140_v4 = vadd.f32 1e-06, %v3124_v61 }
 0x3af   : > { %v3194_v3 = vmul.f32 %v9288_v40, %v3171_v57 }
 0x3b0   : > { %4181 = vrsqrt.f32 %v3140_v4 }
 0x3b1   : > { %v3217_v55 = vadd.f32 %v9296_v23, %v3194_v3 }
 0x3bd   : > { %v4182_v59 = vpop.eup %4181 }
 0x3be   : > { %v3172_v38 = vmul.f32 %v4182_v59, %v9263_v63 }
 0x3c0   : > { %v3195_v30 = vmul.f32 %v9288_v40, %v3172_v38 }
 0x3c2   : > { %v3218_v42 = vadd.f32 %v9296_v23, %v3195_v30 }
 0x3c4   : > { %v3226_v62 = vpack.c.bf16 %v3218_v42, %v3217_v55 }
 0x3c6   : > { %4060 = vmatmul.mubr.bf16.gmra.mxu0 %v3226_v62 }
 0x3fe   : > { %v4049_v25 = vpop.f32.mrf.mxu0 }
 0x3ff   : > { %v3341_v48 = vadd.f32 %v4049_v25, %v9374_v47 }
 0x400   : > { %v3332_v12 = vpop.f32.mrf.mxu0 }
 0x401   : > { %v3333_v63 = vadd.f32 %v9374_v47, %v3332_v12  ;;  %v3413_v2 = vmul.f32 0.70710677, %v3341_v48  ;;  %v3397_v0 = vmul.f32 0.5, %v3341_v48 }
 0x402   : > { %v4050_v46 = vpop.f32.mrf.mxu0 }
 0x403   : > { %v3411_v40 = vmul.f32 0.70710677, %v3333_v63  ;;  %v3344_v36 = vadd.f32 %v4050_v46, %v9374_v47  ;;  %v3395_v26 = vmul.f32 0.5, %v3333_v63 }
 0x404   : > { %v3335_v60 = vpop.f32.mrf.mxu0 }
 0x405   : > { %4183 = verf.f32 %v3411_v40  ;;  %v3414_v23 = vmul.f32 0.70710677, %v3344_v36  ;;  %v3336_v49 = vadd.f32 %v9374_v47, %v3335_v60  ;;  %v3398_v16 = vmul.f32 0.5, %v3344_v36 }
 0x406   : > { %4185 = verf.f32 %v3413_v2  ;;  %v4053_v27 = vpop.f32.mrf.mxu0 }
 0x407   : > { %4187 = verf.f32 %v3414_v23  ;;  %v3412_v1 = vmul.f32 0.70710677, %v3336_v49  ;;  %v3357_v32 = vadd.f32 %v4053_v27, %v9374_v47  ;;  %v3396_v18 = vmul.f32 0.5, %v3336_v49 }
 0x408   : > { %v3348_v41 = vpop.f32.mrf.mxu0 }
 0x409   : > { %4189 = verf.f32 %v3412_v1  ;;  %v3349_v50 = vadd.f32 %v9374_v47, %v3348_v41  ;;  %v3417_v53 = vmul.f32 0.70710677, %v3357_v32  ;;  %v3401_v30 = vmul.f32 0.5, %v3357_v32 }
 0x40a   : > { %v4054_v29 = vpop.f32.mrf.mxu0 }
 0x40b   : > { %v3415_v31 = vmul.f32 0.70710677, %v3349_v50  ;;  %v3360_v13 = vadd.f32 %v4054_v29, %v9374_v47  ;;  %v3399_v59 = vmul.f32 0.5, %v3349_v50 }
 0x40c   : > { %v3351_v10 = vpop.f32.mrf.mxu0 }
 0x40d   : > { %4191 = verf.f32 %v3415_v31  ;;  %v3418_v34 = vmul.f32 0.70710677, %v3360_v13  ;;  %v3352_v21 = vadd.f32 %v9374_v47, %v3351_v10  ;;  %v3402_v57 = vmul.f32 0.5, %v3360_v13 }
 0x40e   : > { %4193 = verf.f32 %v3417_v53 }
 0x40f   : > { %4195 = verf.f32 %v3418_v34  ;;  %v3416_v5 = vmul.f32 0.70710677, %v3352_v21  ;;  %v3400_v38 = vmul.f32 0.5, %v3352_v21 }
 0x411   : > { %4197 = verf.f32 %v3416_v5 }
 0x412   : > { %v4184_v58 = vpop.eup %4183 }
 0x413   : > { %v4186_v8 = vpop.eup %4185  ;;  %v3443_v28 = vadd.f32 1.0, %v4184_v58 }
 0x414   : > { %v4188_v24 = vpop.eup %4187  ;;  %v3445_v7 = vadd.f32 1.0, %v4186_v8 }
 0x415   : > { %v3446_v9 = vadd.f32 1.0, %v4188_v24  ;;  %v3459_v22 = vmul.f32 %v3443_v28, %v3395_v26 }
 0x416   : > { %v4190_v14 = vpop.eup %4189  ;;  %v3461_v43 = vmul.f32 %v3445_v7, %v3397_v0 }
 0x417   : > { %v3444_v39 = vadd.f32 1.0, %v4190_v14  ;;  %v3462_v56 = vmul.f32 %v3446_v9, %v3398_v16 }
 0x419   : > { %v3460_v37 = vmul.f32 %v3444_v39, %v3396_v18  ;;  %v3476_v61 = vpack.c.bf16 %v3462_v56, %v3461_v43 }
 0x41a   : > { %v4192_v33 = vpop.eup %4191 }
 0x41b   : > { %v4194_v19 = vpop.eup %4193  ;;  %v3475_v15 = vpack.c.bf16 %v3460_v37, %v3459_v22  ;;  %v3447_v4 = vadd.f32 1.0, %v4192_v33 }
 0x41c   : > { %v4196_v35 = vpop.eup %4195  ;;  %v3449_v11 = vadd.f32 1.0, %v4194_v19 }
 0x41d   : > { %v3450_v44 = vadd.f32 1.0, %v4196_v35  ;;  %4079 = vmatprep.mubr.bf16.mxu1 %v3475_v15  ;;  %v3463_v62 = vmul.f32 %v3447_v4, %v3399_v59 }
 0x41e   : > { %v4198_v17 = vpop.eup %4197  ;;  %4080 = vmatmul.mubr.bf16.vlgmr.msra.gmra.mxu1 %v3476_v61  ;;  %v4057_v42 = vpop.f32.mrf.mxu0  ;;  %v3465_v12 = vmul.f32 %v3449_v11, %v3401_v30 }
 0x41f   : > { %v3448_v3 = vadd.f32 1.0, %v4198_v17  ;;  %v3466_v55 = vmul.f32 %v3450_v44, %v3402_v57  ;;  %v3373_v48 = vadd.f32 %v4057_v42, %v9374_v47 }
 0x420   : > { %v3364_v63 = vpop.f32.mrf.mxu0 }
 0x421   : > { %v3464_v25 = vmul.f32 %v3448_v3, %v3400_v38  ;;  %v3365_v2 = vadd.f32 %v9374_v47, %v3364_v63  ;;  %v3421_v40 = vmul.f32 0.70710677, %v3373_v48  ;;  %v3478_v60 = vpack.c.bf16 %v3466_v55, %v3465_v12  ;;  %v9401_v63 = vld [vmem:[%s9495_s8] ss:$0 sm:$0xff] }
 0x422   : > { %v4058_v36 = vpop.f32.mrf.mxu0  ;;  %v3405_v58 = vmul.f32 0.5, %v3373_v48 }
 0x423   : > { %v3477_v46 = vpack.c.bf16 %v3464_v25, %v3463_v62  ;;  %v3419_v23 = vmul.f32 0.70710677, %v3365_v2  ;;  %v3376_v49 = vadd.f32 %v4058_v36, %v9374_v47  ;;  %v3403_v34 = vmul.f32 0.5, %v3365_v2 }
 0x424   : > { %v3367_v27 = vpop.f32.mrf.mxu0 }
 0x425   : > { %4083 = vmatprep.mubr.bf16.mxu1 %v3477_v46  ;;  %4199 = verf.f32 %v3419_v23  ;;  %v3422_v1 = vmul.f32 0.70710677, %v3376_v49  ;;  %v3368_v32 = vadd.f32 %v9374_v47, %v3367_v27  ;;  %v3406_v10 = vmul.f32 0.5, %v3376_v49  ;;  %v9406_v46 = vld [vmem:[%s9496_s9] ss:$0 sm:$0xff]  ;;  %v11216_v27 = vld [vmem:[#allocation48_spill] sm:$0xff] }
 0x426   : > { %4084 = vmatmul.mubr.bf16.gmra.mxu1 %v3478_v60  ;;  %4201 = verf.f32 %v3421_v40 }
 0x427   : > { %4203 = verf.f32 %v3422_v1  ;;  %v3420_v20 = vmul.f32 0.70710677, %v3368_v32  ;;  %v3404_v21 = vmul.f32 0.5, %v3368_v32 }
 0x429   : > { %4205 = verf.f32 %v3420_v20 }
 0x432   : > { %v4200_v41 = vpop.eup %4199 }
 0x433   : > { %v4202_v50 = vpop.eup %4201  ;;  %v3451_v29 = vadd.f32 1.0, %v4200_v41 }
 0x434   : > { %v4204_v53 = vpop.eup %4203  ;;  %v3453_v51 = vadd.f32 1.0, %v4202_v50  ;;  %v11217_v50 = vld [vmem:[#allocation44_spill] sm:$0xff] }
 0x435   : > { %v3454_v31 = vadd.f32 1.0, %v4204_v53  ;;  %v3467_v24 = vmul.f32 %v3451_v29, %v3403_v34 }
 0x436   : > { %v4206_v13 = vpop.eup %4205  ;;  %v3469_v28 = vmul.f32 %v3453_v51, %v3405_v58  ;;  %v11218_v51 = vld [vmem:[#allocation52_spill] sm:$0xff]  ;;  %v11219_v58 = vld [vmem:[#allocation25_spill] sm:$0xff] }
 0x437   : > { %v3452_v5 = vadd.f32 1.0, %v4206_v13  ;;  %v3470_v8 = vmul.f32 %v3454_v31, %v3406_v10 }
 0x439   : > { %v3468_v9 = vmul.f32 %v3452_v5, %v3404_v21  ;;  %v3480_v7 = vpack.c.bf16 %v3470_v8, %v3469_v28 }
 0x43b   : > { %v3479_v14 = vpack.c.bf16 %v3468_v9, %v3467_v24 }
 0x43d   : > { %4087 = vmatprep.mubr.bf16.mxu1 %v3479_v14  ;;  %v11220_v14 = vld [vmem:[#allocation53_spill] sm:$0xff] }
 0x43e   : > { %4088 = vmatmul.mubr.bf16.gmra.mxu1 %v3480_v7 }
 0x486   : > { %v4061_v16 = vpop.f32.mrf.mxu0 }
 0x487   : > { %v3389_v26 = vadd.f32 %v4061_v16, %v9374_v47 }
 0x488   : > { %v3380_v18 = vpop.f32.mrf.mxu0 }
 0x489   : > { %v3381_v39 = vadd.f32 %v9374_v47, %v3380_v18  ;;  %v3425_v0 = vmul.f32 0.70710677, %v3389_v26  ;;  %v3409_v55 = vmul.f32 0.5, %v3389_v26 }
 0x48a   : > { %v4062_v56 = vpop.f32.mrf.mxu0 }
 0x48b   : > { %v3423_v22 = vmul.f32 0.70710677, %v3381_v39  ;;  %v3392_v37 = vadd.f32 %v4062_v56, %v9374_v47  ;;  %v3407_v38 = vmul.f32 0.5, %v3381_v39  ;;  %v11221_v39 = vld [vmem:[#allocation50_spill] sm:$0xff] }
 0x48c   : > { %v3383_v33 = vpop.f32.mrf.mxu0 }
 0x48d   : > { %4207 = verf.f32 %v3423_v22  ;;  %v3426_v43 = vmul.f32 0.70710677, %v3392_v37  ;;  %v3384_v19 = vadd.f32 %v9374_v47, %v3383_v33  ;;  %v3410_v59 = vmul.f32 0.5, %v3392_v37  ;;  %v11222_v37 = vld [vmem:[#allocation38_spill] sm:$0xff] }
 0x48e   : > { %4209 = verf.f32 %v3425_v0 }
 0x48f   : > { %4211 = verf.f32 %v3426_v43  ;;  %v3424_v15 = vmul.f32 0.70710677, %v3384_v19  ;;  %v3408_v3 = vmul.f32 0.5, %v3384_v19  ;;  %v11223_v19 = vld [vmem:[#allocation26_spill] sm:$0xff] }
 0x491   : > { %4213 = verf.f32 %v3424_v15 }
 0x49a   : > { %v4208_v35 = vpop.eup %4207 }
 0x49b   : > { %v4210_v61 = vpop.eup %4209  ;;  %v3455_v44 = vadd.f32 1.0, %v4208_v35 }
 0x49c   : > { %v4212_v4 = vpop.eup %4211  ;;  %v3457_v57 = vadd.f32 1.0, %v4210_v61 }
 0x49d   : > { %v3458_v17 = vadd.f32 1.0, %v4212_v4  ;;  %v3471_v62 = vmul.f32 %v3455_v44, %v3407_v38 }
 0x49e   : > { %v4214_v11 = vpop.eup %4213  ;;  %v3473_v47 = vmul.f32 %v3457_v57, %v3409_v55  ;;  %v11224_v57 = vld [vmem:[#allocation42_spill] sm:$0xff] }
 0x49f   : > { %v3456_v30 = vadd.f32 1.0, %v4214_v11  ;;  %v3474_v42 = vmul.f32 %v3458_v17, %v3410_v59  ;;  %v11225_v55 = vld [vmem:[#allocation90_spill] sm:$0xff] }
 0x4a1   : > { %v3472_v25 = vmul.f32 %v3456_v30, %v3408_v3  ;;  %v3482_v12 = vpack.c.bf16 %v3474_v42, %v3473_v47 }
 0x4a3   : > { %v3481_v48 = vpack.c.bf16 %v3472_v25, %v3471_v62 }
 0x4a5   : > { %4091 = vmatprep.mubr.bf16.mxu1 %v3481_v48 }
 0x4a6   : > { %4092 = vmatmul.mubr.bf16.gmra.mxu1 %v3482_v12 }
 0x4de   : > { %v4081_v2 = vpop.f32.mrf.mxu1 }
 0x4df   : > { %v3597_v40 = vadd.f32 %v4081_v2, %v9401_v63 }
 0x4e0   : > { %v3588_v36 = vpop.f32.mrf.mxu1 }
 0x4e1   : > { %v3660_v60 = vmul.f32 %v9406_v46, %v3597_v40  ;;  %v3589_v23 = vadd.f32 %v9401_v63, %v3588_v36 }
 0x4e2   : > { %v4082_v49 = vpop.f32.mrf.mxu1 }
 0x4e3   : > { %v3676_v1 = vadd.f32 %v3660_v60, %v11216_v27  ;;  %v3658_v32 = vmul.f32 %v9406_v46, %v3589_v23  ;;  %v3600_v20 = vadd.f32 %v4082_v49, %v9401_v63  ;;  %v11226_v27 = vld [vmem:[#allocation82_spill] sm:$0xff] }
 0x4e4   : > { %v3591_v41 = vpop.f32.mrf.mxu1 }
 0x4e5   : > { %3692 = vst [vmem:[%s4521_s29 + $0x10] sm:$0xff] %v3676_v1  ;;  %v3674_v53 = vadd.f32 %v3658_v32, %v11217_v50  ;;  %v3661_v29 = vmul.f32 %v9406_v46, %v3600_v20  ;;  %v3592_v31 = vadd.f32 %v9401_v63, %v3591_v41  ;;  %v11227_v20 = vld [vmem:[#allocation76_spill] sm:$0xff] }
 0x4e6   : > { %v4085_v13 = vpop.f32.mrf.mxu1 }
 0x4e7   : > { %3690 = vst [vmem:[%s4521_s29] sm:$0xff] %v3674_v53  ;;  %v3677_v10 = vadd.f32 %v3661_v29, %v11218_v51  ;;  %v3659_v34 = vmul.f32 %v9406_v46, %v3592_v31  ;;  %v3613_v21 = vadd.f32 %v4085_v13, %v9401_v63 }
 0x4e8   : > { %v3604_v5 = vpop.f32.mrf.mxu1 }
 0x4e9   : > { %3693 = vst [vmem:[%s4521_s29 + $0x18] sm:$0xff] %v3677_v10  ;;  %v3675_v8 = vadd.f32 %v3659_v34, %v11219_v58  ;;  %v3664_v24 = vmul.f32 %v9406_v46, %v3613_v21  ;;  %v3605_v9 = vadd.f32 %v9401_v63, %v3604_v5 }
 0x4ea   : > { %v4086_v28 = vpop.f32.mrf.mxu1 }
 0x4eb   : > { %3691 = vst [vmem:[%s4521_s29 + $0x8] sm:$0xff] %v3675_v8  ;;  %v3680_v7 = vadd.f32 %v3664_v24, %v11220_v14  ;;  %v3662_v16 = vmul.f32 %v9406_v46, %v3605_v9  ;;  %v3616_v26 = vadd.f32 %v4086_v28, %v9401_v63 }
 0x4ec   : > { %v3607_v18 = vpop.f32.mrf.mxu1 }
 0x4ed   : > { %3696 = vst [vmem:[%s4521_s29 + $0x30] sm:$0xff] %v3680_v7  ;;  %v3678_v0 = vadd.f32 %v3662_v16, %v11221_v39  ;;  %v3665_v56 = vmul.f32 %v9406_v46, %v3616_v26  ;;  %v3608_v22 = vadd.f32 %v9401_v63, %v3607_v18 }
 0x4ef   : > { %3694 = vst [vmem:[%s4521_s29 + $0x20] sm:$0xff] %v3678_v0  ;;  %v3681_v33 = vadd.f32 %v3665_v56, %v11222_v37  ;;  %v3663_v43 = vmul.f32 %v9406_v46, %v3608_v22 }
 0x4f1   : > { %3697 = vst [vmem:[%s4521_s29 + $0x38] sm:$0xff] %v3681_v33  ;;  %v3679_v15 = vadd.f32 %v3663_v43, %v11223_v19 }
 0x4f3   : > { %3695 = vst [vmem:[%s4521_s29 + $0x28] sm:$0xff] %v3679_v15 }
 0x4fe   : > { %v4089_v35 = vpop.f32.mrf.mxu1 }
 0x4ff   : > { %v3629_v61 = vadd.f32 %v4089_v35, %v9401_v63 }
 0x500   : > { %v3620_v4 = vpop.f32.mrf.mxu1 }
 0x501   : > { %v3668_v44 = vmul.f32 %v9406_v46, %v3629_v61  ;;  %v3621_v17 = vadd.f32 %v9401_v63, %v3620_v4 }
 0x502   : > { %v4090_v11 = vpop.f32.mrf.mxu1 }
 0x503   : > { %v3684_v59 = vadd.f32 %v3668_v44, %v11224_v57  ;;  %v3666_v38 = vmul.f32 %v9406_v46, %v3621_v17  ;;  %v3632_v3 = vadd.f32 %v4090_v11, %v9401_v63 }
 0x504   : > { %v3623_v30 = vpop.f32.mrf.mxu1 }
 0x505   : > { %3700 = vst [vmem:[%s4521_s29 + $0x50] sm:$0xff] %v3684_v59  ;;  %v3682_v42 = vadd.f32 %v3666_v38, %v11225_v55  ;;  %v3669_v62 = vmul.f32 %v9406_v46, %v3632_v3  ;;  %v3624_v25 = vadd.f32 %v9401_v63, %v3623_v30 }
 0x507   : > { %3698 = vst [vmem:[%s4521_s29 + $0x40] sm:$0xff] %v3682_v42  ;;  %v3685_v47 = vadd.f32 %v3669_v62, %v11087_v52  ;;  %v3667_v48 = vmul.f32 %v9406_v46, %v3624_v25 }
 0x509   : > { %3701 = vst [vmem:[%s4521_s29 + $0x58] sm:$0xff] %v3685_v47  ;;  %v3683_v12 = vadd.f32 %v3667_v48, %v11083_v6 }
 0x50b   : > { %3699 = vst [vmem:[%s4521_s29 + $0x48] sm:$0xff] %v3683_v12 }
 0x566   : > { %v4093_v2 = vpop.f32.mrf.mxu1 }
 0x567   : > { %v3645_v40 = vadd.f32 %v4093_v2, %v9401_v63 }
 0x568   : > { %v3636_v36 = vpop.f32.mrf.mxu1 }
 0x569   : > { %v3672_v60 = vmul.f32 %v9406_v46, %v3645_v40  ;;  %v3637_v23 = vadd.f32 %v9401_v63, %v3636_v36 }
 0x56a   : > { %v4094_v49 = vpop.f32.mrf.mxu1 }
 0x56b   : > { %v3688_v52 = vadd.f32 %v3672_v60, %v11226_v27  ;;  %v3670_v1 = vmul.f32 %v9406_v46, %v3637_v23  ;;  %v3648_v32 = vadd.f32 %v4094_v49, %v9401_v63 }
 0x56c   : > { %v3639_v6 = vpop.f32.mrf.mxu1 }
 0x56d   : > { %3704 = vst [vmem:[%s4521_s29 + $0x70] sm:$0xff] %v3688_v52  ;;  %v3686_v41 = vadd.f32 %v3670_v1, %v11227_v20  ;;  %v3673_v50 = vmul.f32 %v9406_v46, %v3648_v32  ;;  %v3640_v53 = vadd.f32 %v9401_v63, %v3639_v6 }
 0x56f   : > { %3702 = vst [vmem:[%s4521_s29 + $0x60] sm:$0xff] %v3686_v41  ;;  %v3689_v29 = vadd.f32 %v3673_v50, %v11091_v54  ;;  %v3671_v31 = vmul.f32 %v9406_v46, %v3640_v53 }
 0x571   : > { %3705 = vst [vmem:[%s4521_s29 + $0x78] sm:$0xff] %v3689_v29  ;;  %v3687_v13 = vadd.f32 %v3671_v31, %v11089_v45 }
 0x573   : > { %3703 = vst [vmem:[%s4521_s29 + $0x68] sm:$0xff] %v3687_v13 }
 0x574 PF: > { %s20_s17 = sadd.s32 1, %s4421_s17   ;;  %s11228_s18 = sld [smem:[#allocation7_spill]] }
 0x575   : > { %p17_p9 = scmp.ge.s32.totalorder %s20_s17, 6   ;;  %s11229_s27 = sld [smem:[#allocation8_spill]] }
 0x576   : > { %s11230_s13 = smov %s4413_s15  ;;  %s11231_s14 = smov %s4417_s16 }
 0x577   :  { %19 = sbr.rel (!%p17_p9) target bundleno = 3 (0x3), region = 190 }
 0x57a   : > { %s11232_s15 = smov %s11228_s18 }
 0x57b   : > { %s11233_s16 = smov %s11229_s27 }
 0x57c   :  { %3738 = vsyncmov [#allocation3] }
 0x57f   :  { %s3739_s29 = vpop.sfrf %3738 }
 0x580   :  { %p3997_p10 = scmp.ne.s32.totalorder %s3739_s29, 0 }
 0x582   :  { %3743 = shalt.err (%p3997_p10)  }
 0x583   :  { %3745 = vsyncmov [#allocation3 + $0x1] }
 0x586   :  { %s3746_s28 = vpop.sfrf %3745 }
 0x587   :  { %p3998_p11 = scmp.ne.s32.totalorder %s3746_s28, 0 }
 0x589   :  { %3750 = shalt.err (%p3998_p11)  }

</bundles_post_ra>
